<compile_context>
chip_gen: v7x
topology: tpu7x:2x2x1
jax: 0.10.0
libtpu: 0.0.40
codegen_flags: <defaults>
</compile_context>

<pallas_src>
import math
from functools import partial

import numpy as np
import jax
import jax.numpy as jnp
from jax.experimental import pallas as pl
from jax.experimental.pallas import tpu as pltpu


# ----------------------------------------------------------------------------
# In-kernel helpers (plain functions traced inside kernels)
# ----------------------------------------------------------------------------
def _ln(y, g, b, eps):
    mu = jnp.mean(y, axis=-1, keepdims=True)
    var = jnp.mean(jnp.square(y - mu), axis=-1, keepdims=True)
    return (y - mu) * jax.lax.rsqrt(var + eps) * g + b


def _gelu_erf(x):
    # exact (erf-based) GELU; erf via Abramowitz-Stegun 7.1.26 (|error| < 1.5e-7).
    z = x * 0.7071067811865476
    a = jnp.abs(z)
    t = 1.0 / (1.0 + 0.3275911 * a)
    poly = t * (0.254829592 + t * (-0.284496736 + t * (1.421413741
               + t * (-1.453152027 + t * 1.061405429))))
    erf_abs = 1.0 - poly * jnp.exp(-a * a)
    erf = jnp.where(z >= 0, erf_abs, -erf_abs)
    return 0.5 * x * (1.0 + erf)


def _attn_core(q2, kv2, wq, bq, wk, bk, wv, bv, wo, bo, mask_bias, H, dh, scale):
    """q2: [B*Lq, dm], kv2: [B*Lk, dm]; block-diagonal MHA over all batches/heads at once."""
    Q = jnp.dot(q2, wq, preferred_element_type=jnp.float32) + bq
    K = jnp.dot(kv2, wk, preferred_element_type=jnp.float32) + bk
    V = jnp.dot(kv2, wv, preferred_element_type=jnp.float32) + bv
    heads = []
    for h in range(H):
        qh = Q[:, h * dh:(h + 1) * dh]
        kh = K[:, h * dh:(h + 1) * dh]
        vh = V[:, h * dh:(h + 1) * dh]
        s = jax.lax.dot_general(qh, kh, (((1,), (1,)), ((), ())),
                                preferred_element_type=jnp.float32) * scale
        s = s + mask_bias                       # -1e30 off the per-batch diagonal blocks
        s = s - jnp.max(s, axis=-1, keepdims=True)
        p = jnp.exp(s)
        p = p / jnp.sum(p, axis=-1, keepdims=True)
        heads.append(jnp.dot(p, vh, preferred_element_type=jnp.float32))
    attn = jnp.concatenate(heads, axis=-1)      # [B*Lq, dm]
    return jnp.dot(attn, wo, preferred_element_type=jnp.float32) + bo


# ----------------------------------------------------------------------------
# Pallas kernels
# ----------------------------------------------------------------------------
def _attn_kernel(q_ref, kv_ref, wq, bq, wk, bk, wv, bv, wo, bo, mask, o_ref,
                 *, H, dh, scale):
    o_ref[...] = _attn_core(q_ref[...], kv_ref[...], wq[...], bq[...], wk[...], bk[...],
                            wv[...], bv[...], wo[...], bo[...], mask[...], H, dh, scale)


def _attn_ln_kernel(q_ref, kv_ref, wq, bq, wk, bk, wv, bv, wo, bo, mask, g, beta, o_ref,
                    *, H, dh, scale, eps):
    q2 = q_ref[...]
    y = _attn_core(q2, kv_ref[...], wq[...], bq[...], wk[...], bk[...],
                   wv[...], bv[...], wo[...], bo[...], mask[...], H, dh, scale)
    o_ref[...] = _ln(q2 + y, g[...], beta[...], eps)


def _mlp_ln_kernel(x_ref, w1, b1, w2, b2, g, beta, o_ref, *, eps):
    x = x_ref[...]
    h = jnp.dot(x, w1[...], preferred_element_type=jnp.float32) + b1[...]
    h = _gelu_erf(h)
    y = jnp.dot(h, w2[...], preferred_element_type=jnp.float32) + b2[...]
    o_ref[...] = _ln(x + y, g[...], beta[...], eps)


def _ln_linear_kernel(x_ref, g, beta, w, b, o_ref, *, eps):
    y = _ln(x_ref[...], g[...], beta[...], eps)
    o_ref[...] = jnp.dot(y, w[...], preferred_element_type=jnp.float32) + b[...]


def _linear_kernel(x_ref, w, b, o_ref):
    o_ref[...] = jnp.dot(x_ref[...], w[...], preferred_element_type=jnp.float32) + b[...]


def _embed_kernel(x_ref, w, b, pos, g, beta, o_ref, *, eps):
    x = x_ref[0]                                             # [M, seg_len]
    y = jnp.dot(x, w[...], preferred_element_type=jnp.float32) + b[...] + pos[0]
    o_ref[0] = _ln(y, g[...], beta[...], eps)


# ----------------------------------------------------------------------------
# Wrappers (pallas_call plumbing)
# ----------------------------------------------------------------------------
def _call2d(kernel, args, out_rows, out_cols):
    """Single-invocation kernel over full 2-D VMEM blocks (model is tiny; everything fits)."""
    in_specs = [pl.BlockSpec(a.shape, lambda i: (0, 0)) for a in args]
    return pl.pallas_call(
        kernel,
        out_shape=jax.ShapeDtypeStruct((out_rows, out_cols), jnp.float32),
        grid=(1,),
        in_specs=in_specs,
        out_specs=pl.BlockSpec((out_rows, out_cols), lambda i: (0, 0)),
    )(*args)


def _block_diag_bias(B, Lq, Lk):
    rb = np.repeat(np.arange(B), Lq)
    cb = np.repeat(np.arange(B), Lk)
    valid = rb[:, None] == cb[None, :]
    return jnp.asarray(np.where(valid, 0.0, -1e30).astype(np.float32))


def fused_attention(p, q3, kv3, n_heads, ln=None):
    """Full AttentionLayer (+ optional residual-add + LayerNorm) in one Pallas kernel.

    q3: [B, Lq, d_model], kv3: [B, Lk, d_model] -> [B, Lq, d_model]."""
    B, Lq, dm = q3.shape
    Lk = kv3.shape[1]
    dh = dm // n_heads
    scale = 1.0 / math.sqrt(dh)
    q2 = q3.reshape(B * Lq, dm)
    kv2 = kv3.reshape(B * Lk, dm)
    mask = _block_diag_bias(B, Lq, Lk)
    args = [q2, kv2, p["q"]["w"], p["q"]["b"], p["k"]["w"], p["k"]["b"],
            p["v"]["w"], p["v"]["b"], p["o"]["w"], p["o"]["b"], mask]
    if ln is not None:
        args += [ln["g"], ln["b"]]
        kernel = partial(_attn_ln_kernel, H=n_heads, dh=dh, scale=scale, eps=1e-5)
    else:
        kernel = partial(_attn_kernel, H=n_heads, dh=dh, scale=scale)
    out = _call2d(kernel, args, B * Lq, dm)
    return out.reshape(B, Lq, dm)


def mlp_ln(p_mlp, p_ln, x2):
    """LN(x + fc2(GELU(fc1(x)))) fused; x2: [M, d_model]."""
    M, dm = x2.shape
    return _call2d(partial(_mlp_ln_kernel, eps=1e-5),
                   [x2, p_mlp["fc1"]["w"], p_mlp["fc1"]["b"],
                    p_mlp["fc2"]["w"], p_mlp["fc2"]["b"], p_ln["g"], p_ln["b"]],
                   M, dm)


def linear(x, w, b):
    orig = x.shape
    K = orig[-1]
    M = int(math.prod(orig[:-1]))
    N = w.shape[1]
    out = _call2d(_linear_kernel, [x.reshape(M, K), w, b], M, N)
    return out.reshape(orig[:-1] + (N,))


def embed_forward(params, x_seq, cfg):
    """DSW embedding + positional embedding + pre-LayerNorm, gridded over batch."""
    B, _, D = x_seq.shape
    seg_num = cfg["pad_in_len"] // cfg["seg_len"]
    seg_len = cfg["seg_len"]
    d_model = cfg["d_model"]
    # 'b (seg_num seg_len) d -> b d seg_num seg_len'
    x = x_seq.reshape(B, seg_num, seg_len, D).transpose(0, 3, 1, 2)
    M = D * seg_num
    x = x.reshape(B, M, seg_len)
    pos = params["enc_pos"].reshape(1, M, d_model)
    out = pl.pallas_call(
        partial(_embed_kernel, eps=1e-5),
        out_shape=jax.ShapeDtypeStruct((B, M, d_model), jnp.float32),
        grid=(B,),
        in_specs=[pl.BlockSpec((1, M, seg_len), lambda i: (i, 0, 0)),
                  pl.BlockSpec((seg_len, d_model), lambda i: (0, 0)),
                  pl.BlockSpec((1, d_model), lambda i: (0, 0)),
                  pl.BlockSpec((1, M, d_model), lambda i: (0, 0, 0)),   # pos broadcast over batch
                  pl.BlockSpec((1, d_model), lambda i: (0, 0)),
                  pl.BlockSpec((1, d_model), lambda i: (0, 0))],
        out_specs=pl.BlockSpec((1, M, d_model), lambda i: (i, 0, 0)),
        compiler_params=pltpu.CompilerParams(dimension_semantics=("parallel",)),
    )(x, params["emb"]["w"], params["emb"]["b"], pos,
      params["pre_norm"]["g"], params["pre_norm"]["b"])
    return out.reshape(B, D, seg_num, d_model)


# ----------------------------------------------------------------------------
# Parameter construction (deterministic, synthetic)
# ----------------------------------------------------------------------------
class PRNG:
    def __init__(self, seed):
        self._key = jax.random.PRNGKey(seed)

    def take(self):
        self._key, sub = jax.random.split(self._key)
        return sub


def dense_params(rng, d_in, d_out, scale=0.02):
    return {"w": scale * jax.random.normal(rng.take(), (d_in, d_out), jnp.float32),
            "b": scale * jax.random.normal(rng.take(), (1, d_out), jnp.float32)}


def ln_params(d):
    return {"g": jnp.ones((1, d), jnp.float32), "b": jnp.zeros((1, d), jnp.float32)}


def attn_layer_params(rng, d_model, n_heads):
    assert d_model % n_heads == 0
    return {"q": dense_params(rng, d_model, d_model),
            "k": dense_params(rng, d_model, d_model),
            "v": dense_params(rng, d_model, d_model),
            "o": dense_params(rng, d_model, d_model)}


def tsa_params(rng, seg_num, factor, d_model, n_heads, d_ff):
    return {
        "time_attn": attn_layer_params(rng, d_model, n_heads),
        "dim_sender": attn_layer_params(rng, d_model, n_heads),
        "dim_receiver": attn_layer_params(rng, d_model, n_heads),
        "router": jax.random.normal(rng.take(), (seg_num, factor, d_model), jnp.float32),
        "norm1": ln_params(d_model), "norm2": ln_params(d_model),
        "norm3": ln_params(d_model), "norm4": ln_params(d_model),
        "mlp1": {"fc1": dense_params(rng, d_model, d_ff), "fc2": dense_params(rng, d_ff, d_model)},
        "mlp2": {"fc1": dense_params(rng, d_model, d_ff), "fc2": dense_params(rng, d_ff, d_model)},
    }


def seg_merging_params(rng, d_model, win_size):
    return {"norm": ln_params(win_size * d_model),
            "lin": dense_params(rng, win_size * d_model, d_model)}


def scale_block_params(rng, win_size, d_model, n_heads, d_ff, depth, seg_num, factor):
    # NOTE: win_size itself is NOT stored here (it must stay static); it lives in cfg["win_sizes"].
    p = {}
    if win_size > 1:
        p["merge"] = seg_merging_params(rng, d_model, win_size)
    p["layers"] = [tsa_params(rng, seg_num, factor, d_model, n_heads, d_ff) for _ in range(depth)]
    return p


def encoder_params(rng, e_blocks, win_size, d_model, n_heads, d_ff, block_depth, in_seg_num, factor):
    blocks = [scale_block_params(rng, 1, d_model, n_heads, d_ff, block_depth, in_seg_num, factor)]
    for i in range(1, e_blocks):
        blocks.append(scale_block_params(rng, win_size, d_model, n_heads, d_ff, block_depth,
                                         math.ceil(in_seg_num / win_size ** i), factor))
    return blocks


def decoder_layer_params(rng, seg_len, d_model, n_heads, d_ff, out_seg_num, factor):
    return {
        "self_attn": tsa_params(rng, out_seg_num, factor, d_model, n_heads, d_ff),
        "cross_attn": attn_layer_params(rng, d_model, n_heads),
        "norm1": ln_params(d_model), "norm2": ln_params(d_model),
        "mlp1": {"fc1": dense_params(rng, d_model, d_model), "fc2": dense_params(rng, d_model, d_model)},
        "linear_pred": dense_params(rng, d_model, seg_len),
    }


def model_params(rng, cfg):
    d_model = cfg["d_model"]
    in_seg = cfg["pad_in_len"] // cfg["seg_len"]
    out_seg = cfg["pad_out_len"] // cfg["seg_len"]
    return {
        "emb": dense_params(rng, cfg["seg_len"], d_model),
        "enc_pos": jax.random.normal(rng.take(), (1, cfg["data_dim"], in_seg, d_model), jnp.float32),
        "pre_norm": ln_params(d_model),
        "encoder": encoder_params(rng, cfg["e_layers"], cfg["win_size"], d_model, cfg["n_heads"],
                                  cfg["d_ff"], 1, in_seg, cfg["factor"]),
        "dec_pos": jax.random.normal(rng.take(), (1, cfg["data_dim"], out_seg, d_model), jnp.float32),
        "decoder": [decoder_layer_params(rng, cfg["seg_len"], d_model, cfg["n_heads"], cfg["d_ff"],
                                         out_seg, cfg["factor"])
                    for _ in range(cfg["e_layers"] + 1)],
    }


# ----------------------------------------------------------------------------
# Forward pass (JAX glue between fused Pallas kernels)
# ----------------------------------------------------------------------------
def tsa_forward(p, x, n_heads):
    """TwoStageAttentionLayer. x: [b, ts_d, seg_num, d_model]."""
    b, ts_d, seg_num, d_model = x.shape
    # --- cross-time stage: attn + residual + norm1 fused; mlp1 + residual + norm2 fused ---
    time_in = x.reshape(b * ts_d, seg_num, d_model)
    dim_in = fused_attention(p["time_attn"], time_in, time_in, n_heads, ln=p["norm1"])
    dim_in = mlp_ln(p["mlp1"], p["norm2"], dim_in.reshape(b * ts_d * seg_num, d_model))
    dim_in = dim_in.reshape(b, ts_d, seg_num, d_model)
    # --- cross-dimension stage (router attention) ---
    dim_send = dim_in.transpose(0, 2, 1, 3).reshape(b * seg_num, ts_d, d_model)
    router = jnp.broadcast_to(p["router"][None], (b,) + p["router"].shape)
    router = router.reshape(b * seg_num, -1, d_model)
    dim_buffer = fused_attention(p["dim_sender"], router, dim_send, n_heads, ln=None)
    dim_enc = fused_attention(p["dim_receiver"], dim_send, dim_buffer, n_heads, ln=p["norm3"])
    dim_enc = mlp_ln(p["mlp2"], p["norm4"], dim_enc.reshape(b * seg_num * ts_d, d_model))
    dim_enc = dim_enc.reshape(b, seg_num, ts_d, d_model)
    return dim_enc.transpose(0, 2, 1, 3)


def seg_merging_forward(p, x, win_size):
    b, ts_d, seg_num, d_model = x.shape
    pad_num = seg_num % win_size
    if pad_num != 0:
        pad_num = win_size - pad_num
        x = jnp.concatenate([x, x[:, :, -pad_num:, :]], axis=2)
    segs = [x[:, :, i::win_size, :] for i in range(win_size)]
    x = jnp.concatenate(segs, axis=-1)                       # [b, ts_d, seg/win, win*d_model]
    new_seg = x.shape[2]
    M = b * ts_d * new_seg
    out = _call2d(partial(_ln_linear_kernel, eps=1e-5),
                  [x.reshape(M, win_size * d_model),
                   p["norm"]["g"], p["norm"]["b"], p["lin"]["w"], p["lin"]["b"]],
                  M, d_model)
    return out.reshape(b, ts_d, new_seg, d_model)


def scale_block_forward(p, x, n_heads, win_size):
    if win_size > 1:                                          # static Python int (from cfg)
        x = seg_merging_forward(p["merge"], x, win_size)
    for lp in p["layers"]:
        x = tsa_forward(lp, x, n_heads)
    return x


def encoder_forward(blocks, x, n_heads, win_sizes):
    enc = [x]
    for bp, ws in zip(blocks, win_sizes):
        x = scale_block_forward(bp, x, n_heads, ws)
        enc.append(x)
    return enc


def decoder_layer_forward(p, x, cross, n_heads):
    b, ts_d, out_seg_num, d_model = x.shape
    x = tsa_forward(p["self_attn"], x, n_heads)
    x2 = x.reshape(b * ts_d, out_seg_num, d_model)
    cross2 = cross.reshape(b * ts_d, cross.shape[2], d_model)
    # cross-attention + residual + norm1 fused; MLP1 + residual + norm2 fused
    x2 = fused_attention(p["cross_attn"], x2, cross2, n_heads, ln=p["norm1"])
    dec2 = mlp_ln(p["mlp1"], p["norm2"], x2.reshape(b * ts_d * out_seg_num, d_model))
    dec_output = dec2.reshape(b, ts_d, out_seg_num, d_model)
    layer_predict = linear(dec_output, p["linear_pred"]["w"], p["linear_pred"]["b"])
    layer_predict = layer_predict.reshape(b, ts_d * out_seg_num, -1)
    return dec_output, layer_predict


def decoder_forward(layers, x, cross_list, n_heads):
    final_predict = None
    ts_d = x.shape[1]
    for i, lp in enumerate(layers):
        x, layer_predict = decoder_layer_forward(lp, x, cross_list[i], n_heads)
        final_predict = layer_predict if final_predict is None else final_predict + layer_predict
    b, _, seg_len = final_predict.shape
    seg_num = final_predict.shape[1] // ts_d
    out = final_predict.reshape(b, ts_d, seg_num, seg_len).transpose(0, 2, 3, 1)
    return out.reshape(b, seg_num * seg_len, ts_d)


def transformer_tf_attn_forward(params, x_seq, cfg):
    """x_seq: [batch, in_len, data_dim] -> [batch, out_len, data_dim]."""
    B, _, D = x_seq.shape
    n_heads = cfg["n_heads"]
    base = 0.0  # baseline=False
    if cfg["in_len_add"] != 0:
        pad = jnp.broadcast_to(x_seq[:, :1, :], (B, cfg["in_len_add"], D))
        x_seq = jnp.concatenate([pad, x_seq], axis=1)
    x = embed_forward(params, x_seq, cfg)                     # [B, D, in_seg, d_model]
    enc_out = encoder_forward(params["encoder"], x, n_heads, cfg["win_sizes"])
    dec_in = jnp.broadcast_to(params["dec_pos"], (B,) + params["dec_pos"].shape[1:])
    predict_y = decoder_forward(params["decoder"], dec_in, enc_out, n_heads)
    return base + predict_y[:, :cfg["out_len"], :]


# ----------------------------------------------------------------------------
if __name__ == "__main__":
    cfg = dict(data_dim=4, in_len=16, out_len=8, seg_len=4, win_size=2, factor=2,
               d_model=32, d_ff=64, n_heads=4, e_layers=2)
    cfg["pad_in_len"] = math.ceil(1.0 * cfg["in_len"] / cfg["seg_len"]) * cfg["seg_len"]
    cfg["pad_out_len"] = math.ceil(1.0 * cfg["out_len"] / cfg["seg_len"]) * cfg["seg_len"]
    cfg["in_len_add"] = cfg["pad_in_len"] - cfg["in_len"]
    # Static per-encoder-block window sizes (kept OUT of the traced params).
    cfg["win_sizes"] = [1] + [cfg["win_size"]] * (cfg["e_layers"] - 1)

    rng = PRNG(0)
    params = model_params(rng, cfg)

    x_seq = jax.random.normal(jax.random.PRNGKey(0), (2, cfg["in_len"], cfg["data_dim"]), jnp.float32)

    fwd = jax.jit(partial(transformer_tf_attn_forward, cfg=cfg))
    y = fwd(params, x_seq)
    jax.block_until_ready(y)

    assert y.shape == (2, cfg["out_len"], cfg["data_dim"]), y.shape
    assert bool(jnp.all(jnp.isfinite(y)))
    print("KERNEL_OK")
</pallas_src>

<mosaic_0001>
module attributes {stable_mosaic.version = 11 : i64} {
  func.func @_attn_ln_kernel(%arg0: i32, %arg1: memref<16x32xf32, #tpu.memory_space<vmem>>, %arg2: memref<16x32xf32, #tpu.memory_space<vmem>>, %arg3: memref<32x32xf32, #tpu.memory_space<vmem>>, %arg4: memref<1x32xf32, #tpu.memory_space<vmem>>, %arg5: memref<32x32xf32, #tpu.memory_space<vmem>>, %arg6: memref<1x32xf32, #tpu.memory_space<vmem>>, %arg7: memref<32x32xf32, #tpu.memory_space<vmem>>, %arg8: memref<1x32xf32, #tpu.memory_space<vmem>>, %arg9: memref<32x32xf32, #tpu.memory_space<vmem>>, %arg10: memref<1x32xf32, #tpu.memory_space<vmem>>, %arg11: memref<16x16xf32, #tpu.memory_space<vmem>>, %arg12: memref<1x32xf32, #tpu.memory_space<vmem>>, %arg13: memref<1x32xf32, #tpu.memory_space<vmem>>, %arg14: memref<16x32xf32, #tpu.memory_space<vmem>>) attributes {dimension_semantics = [#tpu.dimension_semantics<arbitrary>], iteration_bounds = array<i64: 1>, scalar_prefetch = 0 : i64, scratch_operands = 0 : i64, tpu.core_type = #tpu.core_type<tc>, window_params = [{pipeline_mode = #tpu.pipeline_mode<synchronous>, transform_indices = @transform_0, window_bounds = array<i64: 16, 32>}, {pipeline_mode = #tpu.pipeline_mode<synchronous>, transform_indices = @transform_1, window_bounds = array<i64: 16, 32>}, {pipeline_mode = #tpu.pipeline_mode<synchronous>, transform_indices = @transform_2, window_bounds = array<i64: 32, 32>}, {pipeline_mode = #tpu.pipeline_mode<synchronous>, transform_indices = @transform_3, window_bounds = array<i64: 1, 32>}, {pipeline_mode = #tpu.pipeline_mode<synchronous>, transform_indices = @transform_4, window_bounds = array<i64: 32, 32>}, {pipeline_mode = #tpu.pipeline_mode<synchronous>, transform_indices = @transform_5, window_bounds = array<i64: 1, 32>}, {pipeline_mode = #tpu.pipeline_mode<synchronous>, transform_indices = @transform_6, window_bounds = array<i64: 32, 32>}, {pipeline_mode = #tpu.pipeline_mode<synchronous>, transform_indices = @transform_7, window_bounds = array<i64: 1, 32>}, {pipeline_mode = #tpu.pipeline_mode<synchronous>, transform_indices = @transform_8, window_bounds = array<i64: 32, 32>}, {pipeline_mode = #tpu.pipeline_mode<synchronous>, transform_indices = @transform_9, window_bounds = array<i64: 1, 32>}, {pipeline_mode = #tpu.pipeline_mode<synchronous>, transform_indices = @transform_10, window_bounds = array<i64: 16, 16>}, {pipeline_mode = #tpu.pipeline_mode<synchronous>, transform_indices = @transform_11, window_bounds = array<i64: 1, 32>}, {pipeline_mode = #tpu.pipeline_mode<synchronous>, transform_indices = @transform_12, window_bounds = array<i64: 1, 32>}, {pipeline_mode = #tpu.pipeline_mode<synchronous>, transform_indices = @transform_13, window_bounds = array<i64: 16, 32>}]} {
    %c0 = arith.constant 0 : index
    %c0_0 = arith.constant 0 : index
    %0 = vector.load %arg1[%c0, %c0_0] : memref<16x32xf32, #tpu.memory_space<vmem>>, vector<16x32xf32>
    %c0_1 = arith.constant 0 : index
    %c0_2 = arith.constant 0 : index
    %1 = vector.load %arg2[%c0_1, %c0_2] : memref<16x32xf32, #tpu.memory_space<vmem>>, vector<16x32xf32>
    %c0_3 = arith.constant 0 : index
    %c0_4 = arith.constant 0 : index
    %2 = vector.load %arg3[%c0_3, %c0_4] : memref<32x32xf32, #tpu.memory_space<vmem>>, vector<32x32xf32>
    %c0_5 = arith.constant 0 : index
    %c0_6 = arith.constant 0 : index
    %3 = vector.load %arg4[%c0_5, %c0_6] : memref<1x32xf32, #tpu.memory_space<vmem>>, vector<1x32xf32>
    %c0_7 = arith.constant 0 : index
    %c0_8 = arith.constant 0 : index
    %4 = vector.load %arg5[%c0_7, %c0_8] : memref<32x32xf32, #tpu.memory_space<vmem>>, vector<32x32xf32>
    %c0_9 = arith.constant 0 : index
    %c0_10 = arith.constant 0 : index
    %5 = vector.load %arg6[%c0_9, %c0_10] : memref<1x32xf32, #tpu.memory_space<vmem>>, vector<1x32xf32>
    %c0_11 = arith.constant 0 : index
    %c0_12 = arith.constant 0 : index
    %6 = vector.load %arg7[%c0_11, %c0_12] : memref<32x32xf32, #tpu.memory_space<vmem>>, vector<32x32xf32>
    %c0_13 = arith.constant 0 : index
    %c0_14 = arith.constant 0 : index
    %7 = vector.load %arg8[%c0_13, %c0_14] : memref<1x32xf32, #tpu.memory_space<vmem>>, vector<1x32xf32>
    %c0_15 = arith.constant 0 : index
    %c0_16 = arith.constant 0 : index
    %8 = vector.load %arg9[%c0_15, %c0_16] : memref<32x32xf32, #tpu.memory_space<vmem>>, vector<32x32xf32>
    %c0_17 = arith.constant 0 : index
    %c0_18 = arith.constant 0 : index
    %9 = vector.load %arg10[%c0_17, %c0_18] : memref<1x32xf32, #tpu.memory_space<vmem>>, vector<1x32xf32>
    %c0_19 = arith.constant 0 : index
    %c0_20 = arith.constant 0 : index
    %10 = vector.load %arg11[%c0_19, %c0_20] : memref<16x16xf32, #tpu.memory_space<vmem>>, vector<16x16xf32>
    %cst = arith.constant dense<0.000000e+00> : vector<16x32xf32>
    %11 = tpu.matmul %0, %2, %cst {dimension_numbers = #tpu.dot_dimension_numbers<[1], [0], [0], [1], [0, 0, 1, 1], [], []>} : vector<16x32xf32>, vector<32x32xf32>, vector<16x32xf32> -> vector<16x32xf32>
    %12 = vector.broadcast %3 : vector<1x32xf32> to vector<16x32xf32>
    %13 = arith.addf %11, %12 : vector<16x32xf32>
    %cst_21 = arith.constant dense<0.000000e+00> : vector<16x32xf32>
    %14 = tpu.matmul %1, %4, %cst_21 {dimension_numbers = #tpu.dot_dimension_numbers<[1], [0], [0], [1], [0, 0, 1, 1], [], []>} : vector<16x32xf32>, vector<32x32xf32>, vector<16x32xf32> -> vector<16x32xf32>
    %15 = vector.broadcast %5 : vector<1x32xf32> to vector<16x32xf32>
    %16 = arith.addf %14, %15 : vector<16x32xf32>
    %cst_22 = arith.constant dense<0.000000e+00> : vector<16x32xf32>
    %17 = tpu.matmul %1, %6, %cst_22 {dimension_numbers = #tpu.dot_dimension_numbers<[1], [0], [0], [1], [0, 0, 1, 1], [], []>} : vector<16x32xf32>, vector<32x32xf32>, vector<16x32xf32> -> vector<16x32xf32>
    %18 = vector.broadcast %7 : vector<1x32xf32> to vector<16x32xf32>
    %19 = arith.addf %17, %18 : vector<16x32xf32>
    %20 = vector.extract_strided_slice %13 {offsets = [0, 0], sizes = [16, 8], strides = [1, 1]} : vector<16x32xf32> to vector<16x8xf32>
    %21 = vector.extract_strided_slice %16 {offsets = [0, 0], sizes = [16, 8], strides = [1, 1]} : vector<16x32xf32> to vector<16x8xf32>
    %22 = vector.extract_strided_slice %19 {offsets = [0, 0], sizes = [16, 8], strides = [1, 1]} : vector<16x32xf32> to vector<16x8xf32>
    %cst_23 = arith.constant dense<0.000000e+00> : vector<16x16xf32>
    %23 = tpu.matmul %20, %21, %cst_23 {dimension_numbers = #tpu.dot_dimension_numbers<[1], [1], [0], [0], [0, 0, 1, 0], [], []>} : vector<16x8xf32>, vector<16x8xf32>, vector<16x16xf32> -> vector<16x16xf32>
    %cst_24 = arith.constant 0.353553385 : f32
    %24 = vector.broadcast %cst_24 : f32 to vector<16x16xf32>
    %25 = arith.mulf %23, %24 : vector<16x16xf32>
    %26 = arith.addf %25, %10 : vector<16x16xf32>
    %cst_25 = arith.constant dense<0xFF800000> : vector<16xf32>
    %27 = vector.multi_reduction <maximumf>, %26, %cst_25 [1] : vector<16x16xf32> to vector<16xf32>
    %28 = vector.shape_cast %27 : vector<16xf32> to vector<16x1xf32>
    %29 = vector.broadcast %28 : vector<16x1xf32> to vector<16x16xf32>
    %30 = arith.subf %26, %29 : vector<16x16xf32>
    %31 = math.exp %30 : vector<16x16xf32>
    %cst_26 = arith.constant dense<0.000000e+00> : vector<16xf32>
    %32 = vector.multi_reduction <add>, %31, %cst_26 [1] : vector<16x16xf32> to vector<16xf32>
    %33 = vector.shape_cast %32 : vector<16xf32> to vector<16x1xf32>
    %34 = vector.broadcast %33 : vector<16x1xf32> to vector<16x16xf32>
    %35 = arith.divf %31, %34 : vector<16x16xf32>
    %cst_27 = arith.constant dense<0.000000e+00> : vector<16x8xf32>
    %36 = tpu.matmul %35, %22, %cst_27 {dimension_numbers = #tpu.dot_dimension_numbers<[1], [0], [0], [1], [0, 0, 1, 1], [], []>} : vector<16x16xf32>, vector<16x8xf32>, vector<16x8xf32> -> vector<16x8xf32>
    %37 = vector.extract_strided_slice %13 {offsets = [0, 8], sizes = [16, 8], strides = [1, 1]} : vector<16x32xf32> to vector<16x8xf32>
    %38 = vector.extract_strided_slice %16 {offsets = [0, 8], sizes = [16, 8], strides = [1, 1]} : vector<16x32xf32> to vector<16x8xf32>
    %39 = vector.extract_strided_slice %19 {offsets = [0, 8], sizes = [16, 8], strides = [1, 1]} : vector<16x32xf32> to vector<16x8xf32>
    %cst_28 = arith.constant dense<0.000000e+00> : vector<16x16xf32>
    %40 = tpu.matmul %37, %38, %cst_28 {dimension_numbers = #tpu.dot_dimension_numbers<[1], [1], [0], [0], [0, 0, 1, 0], [], []>} : vector<16x8xf32>, vector<16x8xf32>, vector<16x16xf32> -> vector<16x16xf32>
    %cst_29 = arith.constant 0.353553385 : f32
    %41 = vector.broadcast %cst_29 : f32 to vector<16x16xf32>
    %42 = arith.mulf %40, %41 : vector<16x16xf32>
    %43 = arith.addf %42, %10 : vector<16x16xf32>
    %cst_30 = arith.constant dense<0xFF800000> : vector<16xf32>
    %44 = vector.multi_reduction <maximumf>, %43, %cst_30 [1] : vector<16x16xf32> to vector<16xf32>
    %45 = vector.shape_cast %44 : vector<16xf32> to vector<16x1xf32>
    %46 = vector.broadcast %45 : vector<16x1xf32> to vector<16x16xf32>
    %47 = arith.subf %43, %46 : vector<16x16xf32>
    %48 = math.exp %47 : vector<16x16xf32>
    %cst_31 = arith.constant dense<0.000000e+00> : vector<16xf32>
    %49 = vector.multi_reduction <add>, %48, %cst_31 [1] : vector<16x16xf32> to vector<16xf32>
    %50 = vector.shape_cast %49 : vector<16xf32> to vector<16x1xf32>
    %51 = vector.broadcast %50 : vector<16x1xf32> to vector<16x16xf32>
    %52 = arith.divf %48, %51 : vector<16x16xf32>
    %cst_32 = arith.constant dense<0.000000e+00> : vector<16x8xf32>
    %53 = tpu.matmul %52, %39, %cst_32 {dimension_numbers = #tpu.dot_dimension_numbers<[1], [0], [0], [1], [0, 0, 1, 1], [], []>} : vector<16x16xf32>, vector<16x8xf32>, vector<16x8xf32> -> vector<16x8xf32>
    %54 = vector.extract_strided_slice %13 {offsets = [0, 16], sizes = [16, 8], strides = [1, 1]} : vector<16x32xf32> to vector<16x8xf32>
    %55 = vector.extract_strided_slice %16 {offsets = [0, 16], sizes = [16, 8], strides = [1, 1]} : vector<16x32xf32> to vector<16x8xf32>
    %56 = vector.extract_strided_slice %19 {offsets = [0, 16], sizes = [16, 8], strides = [1, 1]} : vector<16x32xf32> to vector<16x8xf32>
    %cst_33 = arith.constant dense<0.000000e+00> : vector<16x16xf32>
    %57 = tpu.matmul %54, %55, %cst_33 {dimension_numbers = #tpu.dot_dimension_numbers<[1], [1], [0], [0], [0, 0, 1, 0], [], []>} : vector<16x8xf32>, vector<16x8xf32>, vector<16x16xf32> -> vector<16x16xf32>
    %cst_34 = arith.constant 0.353553385 : f32
    %58 = vector.broadcast %cst_34 : f32 to vector<16x16xf32>
    %59 = arith.mulf %57, %58 : vector<16x16xf32>
    %60 = arith.addf %59, %10 : vector<16x16xf32>
    %cst_35 = arith.constant dense<0xFF800000> : vector<16xf32>
    %61 = vector.multi_reduction <maximumf>, %60, %cst_35 [1] : vector<16x16xf32> to vector<16xf32>
    %62 = vector.shape_cast %61 : vector<16xf32> to vector<16x1xf32>
    %63 = vector.broadcast %62 : vector<16x1xf32> to vector<16x16xf32>
    %64 = arith.subf %60, %63 : vector<16x16xf32>
    %65 = math.exp %64 : vector<16x16xf32>
    %cst_36 = arith.constant dense<0.000000e+00> : vector<16xf32>
    %66 = vector.multi_reduction <add>, %65, %cst_36 [1] : vector<16x16xf32> to vector<16xf32>
    %67 = vector.shape_cast %66 : vector<16xf32> to vector<16x1xf32>
    %68 = vector.broadcast %67 : vector<16x1xf32> to vector<16x16xf32>
    %69 = arith.divf %65, %68 : vector<16x16xf32>
    %cst_37 = arith.constant dense<0.000000e+00> : vector<16x8xf32>
    %70 = tpu.matmul %69, %56, %cst_37 {dimension_numbers = #tpu.dot_dimension_numbers<[1], [0], [0], [1], [0, 0, 1, 1], [], []>} : vector<16x16xf32>, vector<16x8xf32>, vector<16x8xf32> -> vector<16x8xf32>
    %71 = vector.extract_strided_slice %13 {offsets = [0, 24], sizes = [16, 8], strides = [1, 1]} : vector<16x32xf32> to vector<16x8xf32>
    %72 = vector.extract_strided_slice %16 {offsets = [0, 24], sizes = [16, 8], strides = [1, 1]} : vector<16x32xf32> to vector<16x8xf32>
    %73 = vector.extract_strided_slice %19 {offsets = [0, 24], sizes = [16, 8], strides = [1, 1]} : vector<16x32xf32> to vector<16x8xf32>
    %cst_38 = arith.constant dense<0.000000e+00> : vector<16x16xf32>
    %74 = tpu.matmul %71, %72, %cst_38 {dimension_numbers = #tpu.dot_dimension_numbers<[1], [1], [0], [0], [0, 0, 1, 0], [], []>} : vector<16x8xf32>, vector<16x8xf32>, vector<16x16xf32> -> vector<16x16xf32>
    %cst_39 = arith.constant 0.353553385 : f32
    %75 = vector.broadcast %cst_39 : f32 to vector<16x16xf32>
    %76 = arith.mulf %74, %75 : vector<16x16xf32>
    %77 = arith.addf %76, %10 : vector<16x16xf32>
    %cst_40 = arith.constant dense<0xFF800000> : vector<16xf32>
    %78 = vector.multi_reduction <maximumf>, %77, %cst_40 [1] : vector<16x16xf32> to vector<16xf32>
    %79 = vector.shape_cast %78 : vector<16xf32> to vector<16x1xf32>
    %80 = vector.broadcast %79 : vector<16x1xf32> to vector<16x16xf32>
    %81 = arith.subf %77, %80 : vector<16x16xf32>
    %82 = math.exp %81 : vector<16x16xf32>
    %cst_41 = arith.constant dense<0.000000e+00> : vector<16xf32>
    %83 = vector.multi_reduction <add>, %82, %cst_41 [1] : vector<16x16xf32> to vector<16xf32>
    %84 = vector.shape_cast %83 : vector<16xf32> to vector<16x1xf32>
    %85 = vector.broadcast %84 : vector<16x1xf32> to vector<16x16xf32>
    %86 = arith.divf %82, %85 : vector<16x16xf32>
    %cst_42 = arith.constant dense<0.000000e+00> : vector<16x8xf32>
    %87 = tpu.matmul %86, %73, %cst_42 {dimension_numbers = #tpu.dot_dimension_numbers<[1], [0], [0], [1], [0, 0, 1, 1], [], []>} : vector<16x16xf32>, vector<16x8xf32>, vector<16x8xf32> -> vector<16x8xf32>
    %88 = tpu.concatenate %36, %53, %70, %87 in 1 : vector<16x8xf32>, vector<16x8xf32>, vector<16x8xf32>, vector<16x8xf32> -> vector<16x32xf32>
    %cst_43 = arith.constant dense<0.000000e+00> : vector<16x32xf32>
    %89 = tpu.matmul %88, %8, %cst_43 {dimension_numbers = #tpu.dot_dimension_numbers<[1], [0], [0], [1], [0, 0, 1, 1], [], []>} : vector<16x32xf32>, vector<32x32xf32>, vector<16x32xf32> -> vector<16x32xf32>
    %90 = vector.broadcast %9 : vector<1x32xf32> to vector<16x32xf32>
    %91 = arith.addf %89, %90 : vector<16x32xf32>
    %92 = arith.addf %0, %91 : vector<16x32xf32>
    %c0_44 = arith.constant 0 : index
    %c0_45 = arith.constant 0 : index
    %93 = vector.load %arg12[%c0_44, %c0_45] : memref<1x32xf32, #tpu.memory_space<vmem>>, vector<1x32xf32>
    %c0_46 = arith.constant 0 : index
    %c0_47 = arith.constant 0 : index
    %94 = vector.load %arg13[%c0_46, %c0_47] : memref<1x32xf32, #tpu.memory_space<vmem>>, vector<1x32xf32>
    %cst_48 = arith.constant dense<0.000000e+00> : vector<16xf32>
    %95 = vector.multi_reduction <add>, %92, %cst_48 [1] : vector<16x32xf32> to vector<16xf32>
    %96 = vector.shape_cast %95 : vector<16xf32> to vector<16x1xf32>
    %cst_49 = arith.constant 3.200000e+01 : f32
    %97 = vector.broadcast %cst_49 : f32 to vector<16x1xf32>
    %98 = arith.divf %96, %97 : vector<16x1xf32>
    %99 = vector.broadcast %98 : vector<16x1xf32> to vector<16x32xf32>
    %100 = arith.subf %92, %99 : vector<16x32xf32>
    %101 = arith.mulf %100, %100 : vector<16x32xf32>
    %cst_50 = arith.constant dense<0.000000e+00> : vector<16xf32>
    %102 = vector.multi_reduction <add>, %101, %cst_50 [1] : vector<16x32xf32> to vector<16xf32>
    %103 = vector.shape_cast %102 : vector<16xf32> to vector<16x1xf32>
    %cst_51 = arith.constant 3.200000e+01 : f32
    %104 = vector.broadcast %cst_51 : f32 to vector<16x1xf32>
    %105 = arith.divf %103, %104 : vector<16x1xf32>
    %106 = vector.broadcast %98 : vector<16x1xf32> to vector<16x32xf32>
    %107 = arith.subf %92, %106 : vector<16x32xf32>
    %cst_52 = arith.constant 9.99999974E-6 : f32
    %108 = vector.broadcast %cst_52 : f32 to vector<16x1xf32>
    %109 = arith.addf %105, %108 : vector<16x1xf32>
    %110 = math.rsqrt %109 : vector<16x1xf32>
    %111 = vector.broadcast %110 : vector<16x1xf32> to vector<16x32xf32>
    %112 = arith.mulf %107, %111 : vector<16x32xf32>
    %113 = vector.broadcast %93 : vector<1x32xf32> to vector<16x32xf32>
    %114 = arith.mulf %112, %113 : vector<16x32xf32>
    %115 = vector.broadcast %94 : vector<1x32xf32> to vector<16x32xf32>
    %116 = arith.addf %114, %115 : vector<16x32xf32>
    %c0_53 = arith.constant 0 : index
    %c0_54 = arith.constant 0 : index
    %117 = vector.load %arg14[%c0_53, %c0_54] : memref<16x32xf32, #tpu.memory_space<vmem>>, vector<16x32xf32>
    tpu.vector_store %arg14[%c0_53, %c0_54], %116 {strides = array<i32>} : memref<16x32xf32, #tpu.memory_space<vmem>>, vector<16x32xf32>,
    return
  }
  func.func @transform_0(%arg0: i32) -> (i32, i32) {
    %c0_i32 = arith.constant 0 : i32
    %c0_i32_0 = arith.constant 0 : i32
    %c0_i32_1 = arith.constant 0 : i32
    return %c0_i32, %c0_i32_0 : i32, i32
  }
  func.func @transform_1(%arg0: i32) -> (i32, i32) {
    %c0_i32 = arith.constant 0 : i32
    %c0_i32_0 = arith.constant 0 : i32
    %c0_i32_1 = arith.constant 0 : i32
    return %c0_i32, %c0_i32_0 : i32, i32
  }
  func.func @transform_2(%arg0: i32) -> (i32, i32) {
    %c0_i32 = arith.constant 0 : i32
    %c0_i32_0 = arith.constant 0 : i32
    %c0_i32_1 = arith.constant 0 : i32
    return %c0_i32, %c0_i32_0 : i32, i32
  }
  func.func @transform_3(%arg0: i32) -> (i32, i32) {
    %c0_i32 = arith.constant 0 : i32
    %c0_i32_0 = arith.constant 0 : i32
    %c0_i32_1 = arith.constant 0 : i32
    return %c0_i32, %c0_i32_0 : i32, i32
  }
  func.func @transform_4(%arg0: i32) -> (i32, i32) {
    %c0_i32 = arith.constant 0 : i32
    %c0_i32_0 = arith.constant 0 : i32
    %c0_i32_1 = arith.constant 0 : i32
    return %c0_i32, %c0_i32_0 : i32, i32
  }
  func.func @transform_5(%arg0: i32) -> (i32, i32) {
    %c0_i32 = arith.constant 0 : i32
    %c0_i32_0 = arith.constant 0 : i32
    %c0_i32_1 = arith.constant 0 : i32
    return %c0_i32, %c0_i32_0 : i32, i32
  }
  func.func @transform_6(%arg0: i32) -> (i32, i32) {
    %c0_i32 = arith.constant 0 : i32
    %c0_i32_0 = arith.constant 0 : i32
    %c0_i32_1 = arith.constant 0 : i32
    return %c0_i32, %c0_i32_0 : i32, i32
  }
  func.func @transform_7(%arg0: i32) -> (i32, i32) {
    %c0_i32 = arith.constant 0 : i32
    %c0_i32_0 = arith.constant 0 : i32
    %c0_i32_1 = arith.constant 0 : i32
    return %c0_i32, %c0_i32_0 : i32, i32
  }
  func.func @transform_8(%arg0: i32) -> (i32, i32) {
    %c0_i32 = arith.constant 0 : i32
    %c0_i32_0 = arith.constant 0 : i32
    %c0_i32_1 = arith.constant 0 : i32
    return %c0_i32, %c0_i32_0 : i32, i32
  }
  func.func @transform_9(%arg0: i32) -> (i32, i32) {
    %c0_i32 = arith.constant 0 : i32
    %c0_i32_0 = arith.constant 0 : i32
    %c0_i32_1 = arith.constant 0 : i32
    return %c0_i32, %c0_i32_0 : i32, i32
  }
  func.func @transform_10(%arg0: i32) -> (i32, i32) {
    %c0_i32 = arith.constant 0 : i32
    %c0_i32_0 = arith.constant 0 : i32
    %c0_i32_1 = arith.constant 0 : i32
    return %c0_i32, %c0_i32_0 : i32, i32
  }
  func.func @transform_11(%arg0: i32) -> (i32, i32) {
    %c0_i32 = arith.constant 0 : i32
    %c0_i32_0 = arith.constant 0 : i32
    %c0_i32_1 = arith.constant 0 : i32
    return %c0_i32, %c0_i32_0 : i32, i32
  }
  func.func @transform_12(%arg0: i32) -> (i32, i32) {
    %c0_i32 = arith.constant 0 : i32
    %c0_i32_0 = arith.constant 0 : i32
    %c0_i32_1 = arith.constant 0 : i32
    return %c0_i32, %c0_i32_0 : i32, i32
  }
  func.func @transform_13(%arg0: i32) -> (i32, i32) {
    %c0_i32 = arith.constant 0 : i32
    %c0_i32_0 = arith.constant 0 : i32
    %c0_i32_1 = arith.constant 0 : i32
    return %c0_i32, %c0_i32_0 : i32, i32
  }
}

module attributes {stable_mosaic.version = 11 : i64} {
  func.func @_mlp_ln_kernel(%arg0: i32, %arg1: memref<16x32xf32, #tpu.memory_space<vmem>>, %arg2: memref<32x64xf32, #tpu.memory_space<vmem>>, %arg3: memref<1x64xf32, #tpu.memory_space<vmem>>, %arg4: memref<64x32xf32, #tpu.memory_space<vmem>>, %arg5: memref<1x32xf32, #tpu.memory_space<vmem>>, %arg6: memref<1x32xf32, #tpu.memory_space<vmem>>, %arg7: memref<1x32xf32, #tpu.memory_space<vmem>>, %arg8: memref<16x32xf32, #tpu.memory_space<vmem>>) attributes {dimension_semantics = [#tpu.dimension_semantics<arbitrary>], iteration_bounds = array<i64: 1>, scalar_prefetch = 0 : i64, scratch_operands = 0 : i64, tpu.core_type = #tpu.core_type<tc>, window_params = [{pipeline_mode = #tpu.pipeline_mode<synchronous>, transform_indices = @transform_0, window_bounds = array<i64: 16, 32>}, {pipeline_mode = #tpu.pipeline_mode<synchronous>, transform_indices = @transform_1, window_bounds = array<i64: 32, 64>}, {pipeline_mode = #tpu.pipeline_mode<synchronous>, transform_indices = @transform_2, window_bounds = array<i64: 1, 64>}, {pipeline_mode = #tpu.pipeline_mode<synchronous>, transform_indices = @transform_3, window_bounds = array<i64: 64, 32>}, {pipeline_mode = #tpu.pipeline_mode<synchronous>, transform_indices = @transform_4, window_bounds = array<i64: 1, 32>}, {pipeline_mode = #tpu.pipeline_mode<synchronous>, transform_indices = @transform_5, window_bounds = array<i64: 1, 32>}, {pipeline_mode = #tpu.pipeline_mode<synchronous>, transform_indices = @transform_6, window_bounds = array<i64: 1, 32>}, {pipeline_mode = #tpu.pipeline_mode<synchronous>, transform_indices = @transform_7, window_bounds = array<i64: 16, 32>}]} {
    %c0 = arith.constant 0 : index
    %c0_0 = arith.constant 0 : index
    %0 = vector.load %arg1[%c0, %c0_0] : memref<16x32xf32, #tpu.memory_space<vmem>>, vector<16x32xf32>
    %c0_1 = arith.constant 0 : index
    %c0_2 = arith.constant 0 : index
    %1 = vector.load %arg2[%c0_1, %c0_2] : memref<32x64xf32, #tpu.memory_space<vmem>>, vector<32x64xf32>
    %cst = arith.constant dense<0.000000e+00> : vector<16x64xf32>
    %2 = tpu.matmul %0, %1, %cst {dimension_numbers = #tpu.dot_dimension_numbers<[1], [0], [0], [1], [0, 0, 1, 1], [], []>} : vector<16x32xf32>, vector<32x64xf32>, vector<16x64xf32> -> vector<16x64xf32>
    %c0_3 = arith.constant 0 : index
    %c0_4 = arith.constant 0 : index
    %3 = vector.load %arg3[%c0_3, %c0_4] : memref<1x64xf32, #tpu.memory_space<vmem>>, vector<1x64xf32>
    %4 = vector.broadcast %3 : vector<1x64xf32> to vector<16x64xf32>
    %5 = arith.addf %2, %4 : vector<16x64xf32>
    %cst_5 = arith.constant 0.707106769 : f32
    %6 = vector.broadcast %cst_5 : f32 to vector<16x64xf32>
    %7 = arith.mulf %5, %6 : vector<16x64xf32>
    %8 = math.absf %7 : vector<16x64xf32>
    %cst_6 = arith.constant 0.327591091 : f32
    %9 = vector.broadcast %cst_6 : f32 to vector<16x64xf32>
    %10 = arith.mulf %9, %8 : vector<16x64xf32>
    %cst_7 = arith.constant 1.000000e+00 : f32
    %11 = vector.broadcast %cst_7 : f32 to vector<16x64xf32>
    %12 = arith.addf %11, %10 : vector<16x64xf32>
    %cst_8 = arith.constant 1.000000e+00 : f32
    %13 = vector.broadcast %cst_8 : f32 to vector<16x64xf32>
    %14 = arith.divf %13, %12 : vector<16x64xf32>
    %cst_9 = arith.constant 1.06140542 : f32
    %15 = vector.broadcast %cst_9 : f32 to vector<16x64xf32>
    %16 = arith.mulf %14, %15 : vector<16x64xf32>
    %cst_10 = arith.constant -1.45315206 : f32
    %17 = vector.broadcast %cst_10 : f32 to vector<16x64xf32>
    %18 = arith.addf %17, %16 : vector<16x64xf32>
    %19 = arith.mulf %14, %18 : vector<16x64xf32>
    %cst_11 = arith.constant 1.42141378 : f32
    %20 = vector.broadcast %cst_11 : f32 to vector<16x64xf32>
    %21 = arith.addf %20, %19 : vector<16x64xf32>
    %22 = arith.mulf %14, %21 : vector<16x64xf32>
    %cst_12 = arith.constant -0.284496725 : f32
    %23 = vector.broadcast %cst_12 : f32 to vector<16x64xf32>
    %24 = arith.addf %23, %22 : vector<16x64xf32>
    %25 = arith.mulf %14, %24 : vector<16x64xf32>
    %cst_13 = arith.constant 0.254829586 : f32
    %26 = vector.broadcast %cst_13 : f32 to vector<16x64xf32>
    %27 = arith.addf %26, %25 : vector<16x64xf32>
    %28 = arith.mulf %14, %27 : vector<16x64xf32>
    %cst_14 = arith.constant 0.000000e+00 : f32
    %29 = vector.broadcast %cst_14 : f32 to vector<16x64xf32>
    %30 = arith.subf %29, %8 : vector<16x64xf32>
    %31 = arith.mulf %30, %8 : vector<16x64xf32>
    %32 = math.exp %31 : vector<16x64xf32>
    %33 = arith.mulf %28, %32 : vector<16x64xf32>
    %cst_15 = arith.constant 1.000000e+00 : f32
    %34 = vector.broadcast %cst_15 : f32 to vector<16x64xf32>
    %35 = arith.subf %34, %33 : vector<16x64xf32>
    %cst_16 = arith.constant 0.000000e+00 : f32
    %36 = vector.broadcast %cst_16 : f32 to vector<16x64xf32>
    %37 = arith.cmpf oge, %7, %36 : vector<16x64xf32>
    %cst_17 = arith.constant 0.000000e+00 : f32
    %38 = vector.broadcast %cst_17 : f32 to vector<16x64xf32>
    %39 = arith.subf %38, %35 : vector<16x64xf32>
    %40 = arith.select %37, %35, %39 : vector<16x64xi1>, vector<16x64xf32>
    %cst_18 = arith.constant 5.000000e-01 : f32
    %41 = vector.broadcast %cst_18 : f32 to vector<16x64xf32>
    %42 = arith.mulf %41, %5 : vector<16x64xf32>
    %cst_19 = arith.constant 1.000000e+00 : f32
    %43 = vector.broadcast %cst_19 : f32 to vector<16x64xf32>
    %44 = arith.addf %43, %40 : vector<16x64xf32>
    %45 = arith.mulf %42, %44 : vector<16x64xf32>
    %c0_20 = arith.constant 0 : index
    %c0_21 = arith.constant 0 : index
    %46 = vector.load %arg4[%c0_20, %c0_21] : memref<64x32xf32, #tpu.memory_space<vmem>>, vector<64x32xf32>
    %cst_22 = arith.constant dense<0.000000e+00> : vector<16x32xf32>
    %47 = tpu.matmul %45, %46, %cst_22 {dimension_numbers = #tpu.dot_dimension_numbers<[1], [0], [0], [1], [0, 0, 1, 1], [], []>} : vector<16x64xf32>, vector<64x32xf32>, vector<16x32xf32> -> vector<16x32xf32>
    %c0_23 = arith.constant 0 : index
    %c0_24 = arith.constant 0 : index
    %48 = vector.load %arg5[%c0_23, %c0_24] : memref<1x32xf32, #tpu.memory_space<vmem>>, vector<1x32xf32>
    %49 = vector.broadcast %48 : vector<1x32xf32> to vector<16x32xf32>
    %50 = arith.addf %47, %49 : vector<16x32xf32>
    %51 = arith.addf %0, %50 : vector<16x32xf32>
    %c0_25 = arith.constant 0 : index
    %c0_26 = arith.constant 0 : index
    %52 = vector.load %arg6[%c0_25, %c0_26] : memref<1x32xf32, #tpu.memory_space<vmem>>, vector<1x32xf32>
    %c0_27 = arith.constant 0 : index
    %c0_28 = arith.constant 0 : index
    %53 = vector.load %arg7[%c0_27, %c0_28] : memref<1x32xf32, #tpu.memory_space<vmem>>, vector<1x32xf32>
    %cst_29 = arith.constant dense<0.000000e+00> : vector<16xf32>
    %54 = vector.multi_reduction <add>, %51, %cst_29 [1] : vector<16x32xf32> to vector<16xf32>
    %55 = vector.shape_cast %54 : vector<16xf32> to vector<16x1xf32>
    %cst_30 = arith.constant 3.200000e+01 : f32
    %56 = vector.broadcast %cst_30 : f32 to vector<16x1xf32>
    %57 = arith.divf %55, %56 : vector<16x1xf32>
    %58 = vector.broadcast %57 : vector<16x1xf32> to vector<16x32xf32>
    %59 = arith.subf %51, %58 : vector<16x32xf32>
    %60 = arith.mulf %59, %59 : vector<16x32xf32>
    %cst_31 = arith.constant dense<0.000000e+00> : vector<16xf32>
    %61 = vector.multi_reduction <add>, %60, %cst_31 [1] : vector<16x32xf32> to vector<16xf32>
    %62 = vector.shape_cast %61 : vector<16xf32> to vector<16x1xf32>
    %cst_32 = arith.constant 3.200000e+01 : f32
    %63 = vector.broadcast %cst_32 : f32 to vector<16x1xf32>
    %64 = arith.divf %62, %63 : vector<16x1xf32>
    %65 = vector.broadcast %57 : vector<16x1xf32> to vector<16x32xf32>
    %66 = arith.subf %51, %65 : vector<16x32xf32>
    %cst_33 = arith.constant 9.99999974E-6 : f32
    %67 = vector.broadcast %cst_33 : f32 to vector<16x1xf32>
    %68 = arith.addf %64, %67 : vector<16x1xf32>
    %69 = math.rsqrt %68 : vector<16x1xf32>
    %70 = vector.broadcast %69 : vector<16x1xf32> to vector<16x32xf32>
    %71 = arith.mulf %66, %70 : vector<16x32xf32>
    %72 = vector.broadcast %52 : vector<1x32xf32> to vector<16x32xf32>
    %73 = arith.mulf %71, %72 : vector<16x32xf32>
    %74 = vector.broadcast %53 : vector<1x32xf32> to vector<16x32xf32>
    %75 = arith.addf %73, %74 : vector<16x32xf32>
    %c0_34 = arith.constant 0 : index
    %c0_35 = arith.constant 0 : index
    %76 = vector.load %arg8[%c0_34, %c0_35] : memref<16x32xf32, #tpu.memory_space<vmem>>, vector<16x32xf32>
    tpu.vector_store %arg8[%c0_34, %c0_35], %75 {strides = array<i32>} : memref<16x32xf32, #tpu.memory_space<vmem>>, vector<16x32xf32>,
    return
  }
  func.func @transform_0(%arg0: i32) -> (i32, i32) {
    %c0_i32 = arith.constant 0 : i32
    %c0_i32_0 = arith.constant 0 : i32
    %c0_i32_1 = arith.constant 0 : i32
    return %c0_i32, %c0_i32_0 : i32, i32
  }
  func.func @transform_1(%arg0: i32) -> (i32, i32) {
    %c0_i32 = arith.constant 0 : i32
    %c0_i32_0 = arith.constant 0 : i32
    %c0_i32_1 = arith.constant 0 : i32
    return %c0_i32, %c0_i32_0 : i32, i32
  }
  func.func @transform_2(%arg0: i32) -> (i32, i32) {
    %c0_i32 = arith.constant 0 : i32
    %c0_i32_0 = arith.constant 0 : i32
    %c0_i32_1 = arith.constant 0 : i32
    return %c0_i32, %c0_i32_0 : i32, i32
  }
  func.func @transform_3(%arg0: i32) -> (i32, i32) {
    %c0_i32 = arith.constant 0 : i32
    %c0_i32_0 = arith.constant 0 : i32
    %c0_i32_1 = arith.constant 0 : i32
    return %c0_i32, %c0_i32_0 : i32, i32
  }
  func.func @transform_4(%arg0: i32) -> (i32, i32) {
    %c0_i32 = arith.constant 0 : i32
    %c0_i32_0 = arith.constant 0 : i32
    %c0_i32_1 = arith.constant 0 : i32
    return %c0_i32, %c0_i32_0 : i32, i32
  }
  func.func @transform_5(%arg0: i32) -> (i32, i32) {
    %c0_i32 = arith.constant 0 : i32
    %c0_i32_0 = arith.constant 0 : i32
    %c0_i32_1 = arith.constant 0 : i32
    return %c0_i32, %c0_i32_0 : i32, i32
  }
  func.func @transform_6(%arg0: i32) -> (i32, i32) {
    %c0_i32 = arith.constant 0 : i32
    %c0_i32_0 = arith.constant 0 : i32
    %c0_i32_1 = arith.constant 0 : i32
    return %c0_i32, %c0_i32_0 : i32, i32
  }
  func.func @transform_7(%arg0: i32) -> (i32, i32) {
    %c0_i32 = arith.constant 0 : i32
    %c0_i32_0 = arith.constant 0 : i32
    %c0_i32_1 = arith.constant 0 : i32
    return %c0_i32, %c0_i32_0 : i32, i32
  }
}

module attributes {stable_mosaic.version = 11 : i64} {
  func.func @_attn_ln_kernel(%arg0: i32, %arg1: memref<16x32xf32, #tpu.memory_space<vmem>>, %arg2: memref<8x32xf32, #tpu.memory_space<vmem>>, %arg3: memref<32x32xf32, #tpu.memory_space<vmem>>, %arg4: memref<1x32xf32, #tpu.memory_space<vmem>>, %arg5: memref<32x32xf32, #tpu.memory_space<vmem>>, %arg6: memref<1x32xf32, #tpu.memory_space<vmem>>, %arg7: memref<32x32xf32, #tpu.memory_space<vmem>>, %arg8: memref<1x32xf32, #tpu.memory_space<vmem>>, %arg9: memref<32x32xf32, #tpu.memory_space<vmem>>, %arg10: memref<1x32xf32, #tpu.memory_space<vmem>>, %arg11: memref<16x8xf32, #tpu.memory_space<vmem>>, %arg12: memref<1x32xf32, #tpu.memory_space<vmem>>, %arg13: memref<1x32xf32, #tpu.memory_space<vmem>>, %arg14: memref<16x32xf32, #tpu.memory_space<vmem>>) attributes {dimension_semantics = [#tpu.dimension_semantics<arbitrary>], iteration_bounds = array<i64: 1>, scalar_prefetch = 0 : i64, scratch_operands = 0 : i64, tpu.core_type = #tpu.core_type<tc>, window_params = [{pipeline_mode = #tpu.pipeline_mode<synchronous>, transform_indices = @transform_0, window_bounds = array<i64: 16, 32>}, {pipeline_mode = #tpu.pipeline_mode<synchronous>, transform_indices = @transform_1, window_bounds = array<i64: 8, 32>}, {pipeline_mode = #tpu.pipeline_mode<synchronous>, transform_indices = @transform_2, window_bounds = array<i64: 32, 32>}, {pipeline_mode = #tpu.pipeline_mode<synchronous>, transform_indices = @transform_3, window_bounds = array<i64: 1, 32>}, {pipeline_mode = #tpu.pipeline_mode<synchronous>, transform_indices = @transform_4, window_bounds = array<i64: 32, 32>}, {pipeline_mode = #tpu.pipeline_mode<synchronous>, transform_indices = @transform_5, window_bounds = array<i64: 1, 32>}, {pipeline_mode = #tpu.pipeline_mode<synchronous>, transform_indices = @transform_6, window_bounds = array<i64: 32, 32>}, {pipeline_mode = #tpu.pipeline_mode<synchronous>, transform_indices = @transform_7, window_bounds = array<i64: 1, 32>}, {pipeline_mode = #tpu.pipeline_mode<synchronous>, transform_indices = @transform_8, window_bounds = array<i64: 32, 32>}, {pipeline_mode = #tpu.pipeline_mode<synchronous>, transform_indices = @transform_9, window_bounds = array<i64: 1, 32>}, {pipeline_mode = #tpu.pipeline_mode<synchronous>, transform_indices = @transform_10, window_bounds = array<i64: 16, 8>}, {pipeline_mode = #tpu.pipeline_mode<synchronous>, transform_indices = @transform_11, window_bounds = array<i64: 1, 32>}, {pipeline_mode = #tpu.pipeline_mode<synchronous>, transform_indices = @transform_12, window_bounds = array<i64: 1, 32>}, {pipeline_mode = #tpu.pipeline_mode<synchronous>, transform_indices = @transform_13, window_bounds = array<i64: 16, 32>}]} {
    %c0 = arith.constant 0 : index
    %c0_0 = arith.constant 0 : index
    %0 = vector.load %arg1[%c0, %c0_0] : memref<16x32xf32, #tpu.memory_space<vmem>>, vector<16x32xf32>
    %c0_1 = arith.constant 0 : index
    %c0_2 = arith.constant 0 : index
    %1 = vector.load %arg2[%c0_1, %c0_2] : memref<8x32xf32, #tpu.memory_space<vmem>>, vector<8x32xf32>
    %c0_3 = arith.constant 0 : index
    %c0_4 = arith.constant 0 : index
    %2 = vector.load %arg3[%c0_3, %c0_4] : memref<32x32xf32, #tpu.memory_space<vmem>>, vector<32x32xf32>
    %c0_5 = arith.constant 0 : index
    %c0_6 = arith.constant 0 : index
    %3 = vector.load %arg4[%c0_5, %c0_6] : memref<1x32xf32, #tpu.memory_space<vmem>>, vector<1x32xf32>
    %c0_7 = arith.constant 0 : index
    %c0_8 = arith.constant 0 : index
    %4 = vector.load %arg5[%c0_7, %c0_8] : memref<32x32xf32, #tpu.memory_space<vmem>>, vector<32x32xf32>
    %c0_9 = arith.constant 0 : index
    %c0_10 = arith.constant 0 : index
    %5 = vector.load %arg6[%c0_9, %c0_10] : memref<1x32xf32, #tpu.memory_space<vmem>>, vector<1x32xf32>
    %c0_11 = arith.constant 0 : index
    %c0_12 = arith.constant 0 : index
    %6 = vector.load %arg7[%c0_11, %c0_12] : memref<32x32xf32, #tpu.memory_space<vmem>>, vector<32x32xf32>
    %c0_13 = arith.constant 0 : index
    %c0_14 = arith.constant 0 : index
    %7 = vector.load %arg8[%c0_13, %c0_14] : memref<1x32xf32, #tpu.memory_space<vmem>>, vector<1x32xf32>
    %c0_15 = arith.constant 0 : index
    %c0_16 = arith.constant 0 : index
    %8 = vector.load %arg9[%c0_15, %c0_16] : memref<32x32xf32, #tpu.memory_space<vmem>>, vector<32x32xf32>
    %c0_17 = arith.constant 0 : index
    %c0_18 = arith.constant 0 : index
    %9 = vector.load %arg10[%c0_17, %c0_18] : memref<1x32xf32, #tpu.memory_space<vmem>>, vector<1x32xf32>
    %c0_19 = arith.constant 0 : index
    %c0_20 = arith.constant 0 : index
    %10 = vector.load %arg11[%c0_19, %c0_20] : memref<16x8xf32, #tpu.memory_space<vmem>>, vector<16x8xf32>
    %cst = arith.constant dense<0.000000e+00> : vector<16x32xf32>
    %11 = tpu.matmul %0, %2, %cst {dimension_numbers = #tpu.dot_dimension_numbers<[1], [0], [0], [1], [0, 0, 1, 1], [], []>} : vector<16x32xf32>, vector<32x32xf32>, vector<16x32xf32> -> vector<16x32xf32>
    %12 = vector.broadcast %3 : vector<1x32xf32> to vector<16x32xf32>
    %13 = arith.addf %11, %12 : vector<16x32xf32>
    %cst_21 = arith.constant dense<0.000000e+00> : vector<8x32xf32>
    %14 = tpu.matmul %1, %4, %cst_21 {dimension_numbers = #tpu.dot_dimension_numbers<[1], [0], [0], [1], [0, 0, 1, 1], [], []>} : vector<8x32xf32>, vector<32x32xf32>, vector<8x32xf32> -> vector<8x32xf32>
    %15 = vector.broadcast %5 : vector<1x32xf32> to vector<8x32xf32>
    %16 = arith.addf %14, %15 : vector<8x32xf32>
    %cst_22 = arith.constant dense<0.000000e+00> : vector<8x32xf32>
    %17 = tpu.matmul %1, %6, %cst_22 {dimension_numbers = #tpu.dot_dimension_numbers<[1], [0], [0], [1], [0, 0, 1, 1], [], []>} : vector<8x32xf32>, vector<32x32xf32>, vector<8x32xf32> -> vector<8x32xf32>
    %18 = vector.broadcast %7 : vector<1x32xf32> to vector<8x32xf32>
    %19 = arith.addf %17, %18 : vector<8x32xf32>
    %20 = vector.extract_strided_slice %13 {offsets = [0, 0], sizes = [16, 8], strides = [1, 1]} : vector<16x32xf32> to vector<16x8xf32>
    %21 = vector.extract_strided_slice %16 {offsets = [0, 0], sizes = [8, 8], strides = [1, 1]} : vector<8x32xf32> to vector<8x8xf32>
    %22 = vector.extract_strided_slice %19 {offsets = [0, 0], sizes = [8, 8], strides = [1, 1]} : vector<8x32xf32> to vector<8x8xf32>
    %cst_23 = arith.constant dense<0.000000e+00> : vector<16x8xf32>
    %23 = tpu.matmul %20, %21, %cst_23 {dimension_numbers = #tpu.dot_dimension_numbers<[1], [1], [0], [0], [0, 0, 1, 0], [], []>} : vector<16x8xf32>, vector<8x8xf32>, vector<16x8xf32> -> vector<16x8xf32>
    %cst_24 = arith.constant 0.353553385 : f32
    %24 = vector.broadcast %cst_24 : f32 to vector<16x8xf32>
    %25 = arith.mulf %23, %24 : vector<16x8xf32>
    %26 = arith.addf %25, %10 : vector<16x8xf32>
    %cst_25 = arith.constant dense<0xFF800000> : vector<16xf32>
    %27 = vector.multi_reduction <maximumf>, %26, %cst_25 [1] : vector<16x8xf32> to vector<16xf32>
    %28 = vector.shape_cast %27 : vector<16xf32> to vector<16x1xf32>
    %29 = vector.broadcast %28 : vector<16x1xf32> to vector<16x8xf32>
    %30 = arith.subf %26, %29 : vector<16x8xf32>
    %31 = math.exp %30 : vector<16x8xf32>
    %cst_26 = arith.constant dense<0.000000e+00> : vector<16xf32>
    %32 = vector.multi_reduction <add>, %31, %cst_26 [1] : vector<16x8xf32> to vector<16xf32>
    %33 = vector.shape_cast %32 : vector<16xf32> to vector<16x1xf32>
    %34 = vector.broadcast %33 : vector<16x1xf32> to vector<16x8xf32>
    %35 = arith.divf %31, %34 : vector<16x8xf32>
    %cst_27 = arith.constant dense<0.000000e+00> : vector<16x8xf32>
    %36 = tpu.matmul %35, %22, %cst_27 {dimension_numbers = #tpu.dot_dimension_numbers<[1], [0], [0], [1], [0, 0, 1, 1], [], []>} : vector<16x8xf32>, vector<8x8xf32>, vector<16x8xf32> -> vector<16x8xf32>
    %37 = vector.extract_strided_slice %13 {offsets = [0, 8], sizes = [16, 8], strides = [1, 1]} : vector<16x32xf32> to vector<16x8xf32>
    %38 = vector.extract_strided_slice %16 {offsets = [0, 8], sizes = [8, 8], strides = [1, 1]} : vector<8x32xf32> to vector<8x8xf32>
    %39 = vector.extract_strided_slice %19 {offsets = [0, 8], sizes = [8, 8], strides = [1, 1]} : vector<8x32xf32> to vector<8x8xf32>
    %cst_28 = arith.constant dense<0.000000e+00> : vector<16x8xf32>
    %40 = tpu.matmul %37, %38, %cst_28 {dimension_numbers = #tpu.dot_dimension_numbers<[1], [1], [0], [0], [0, 0, 1, 0], [], []>} : vector<16x8xf32>, vector<8x8xf32>, vector<16x8xf32> -> vector<16x8xf32>
    %cst_29 = arith.constant 0.353553385 : f32
    %41 = vector.broadcast %cst_29 : f32 to vector<16x8xf32>
    %42 = arith.mulf %40, %41 : vector<16x8xf32>
    %43 = arith.addf %42, %10 : vector<16x8xf32>
    %cst_30 = arith.constant dense<0xFF800000> : vector<16xf32>
    %44 = vector.multi_reduction <maximumf>, %43, %cst_30 [1] : vector<16x8xf32> to vector<16xf32>
    %45 = vector.shape_cast %44 : vector<16xf32> to vector<16x1xf32>
    %46 = vector.broadcast %45 : vector<16x1xf32> to vector<16x8xf32>
    %47 = arith.subf %43, %46 : vector<16x8xf32>
    %48 = math.exp %47 : vector<16x8xf32>
    %cst_31 = arith.constant dense<0.000000e+00> : vector<16xf32>
    %49 = vector.multi_reduction <add>, %48, %cst_31 [1] : vector<16x8xf32> to vector<16xf32>
    %50 = vector.shape_cast %49 : vector<16xf32> to vector<16x1xf32>
    %51 = vector.broadcast %50 : vector<16x1xf32> to vector<16x8xf32>
    %52 = arith.divf %48, %51 : vector<16x8xf32>
    %cst_32 = arith.constant dense<0.000000e+00> : vector<16x8xf32>
    %53 = tpu.matmul %52, %39, %cst_32 {dimension_numbers = #tpu.dot_dimension_numbers<[1], [0], [0], [1], [0, 0, 1, 1], [], []>} : vector<16x8xf32>, vector<8x8xf32>, vector<16x8xf32> -> vector<16x8xf32>
    %54 = vector.extract_strided_slice %13 {offsets = [0, 16], sizes = [16, 8], strides = [1, 1]} : vector<16x32xf32> to vector<16x8xf32>
    %55 = vector.extract_strided_slice %16 {offsets = [0, 16], sizes = [8, 8], strides = [1, 1]} : vector<8x32xf32> to vector<8x8xf32>
    %56 = vector.extract_strided_slice %19 {offsets = [0, 16], sizes = [8, 8], strides = [1, 1]} : vector<8x32xf32> to vector<8x8xf32>
    %cst_33 = arith.constant dense<0.000000e+00> : vector<16x8xf32>
    %57 = tpu.matmul %54, %55, %cst_33 {dimension_numbers = #tpu.dot_dimension_numbers<[1], [1], [0], [0], [0, 0, 1, 0], [], []>} : vector<16x8xf32>, vector<8x8xf32>, vector<16x8xf32> -> vector<16x8xf32>
    %cst_34 = arith.constant 0.353553385 : f32
    %58 = vector.broadcast %cst_34 : f32 to vector<16x8xf32>
    %59 = arith.mulf %57, %58 : vector<16x8xf32>
    %60 = arith.addf %59, %10 : vector<16x8xf32>
    %cst_35 = arith.constant dense<0xFF800000> : vector<16xf32>
    %61 = vector.multi_reduction <maximumf>, %60, %cst_35 [1] : vector<16x8xf32> to vector<16xf32>
    %62 = vector.shape_cast %61 : vector<16xf32> to vector<16x1xf32>
    %63 = vector.broadcast %62 : vector<16x1xf32> to vector<16x8xf32>
    %64 = arith.subf %60, %63 : vector<16x8xf32>
    %65 = math.exp %64 : vector<16x8xf32>
    %cst_36 = arith.constant dense<0.000000e+00> : vector<16xf32>
    %66 = vector.multi_reduction <add>, %65, %cst_36 [1] : vector<16x8xf32> to vector<16xf32>
    %67 = vector.shape_cast %66 : vector<16xf32> to vector<16x1xf32>
    %68 = vector.broadcast %67 : vector<16x1xf32> to vector<16x8xf32>
    %69 = arith.divf %65, %68 : vector<16x8xf32>
    %cst_37 = arith.constant dense<0.000000e+00> : vector<16x8xf32>
    %70 = tpu.matmul %69, %56, %cst_37 {dimension_numbers = #tpu.dot_dimension_numbers<[1], [0], [0], [1], [0, 0, 1, 1], [], []>} : vector<16x8xf32>, vector<8x8xf32>, vector<16x8xf32> -> vector<16x8xf32>
    %71 = vector.extract_strided_slice %13 {offsets = [0, 24], sizes = [16, 8], strides = [1, 1]} : vector<16x32xf32> to vector<16x8xf32>
    %72 = vector.extract_strided_slice %16 {offsets = [0, 24], sizes = [8, 8], strides = [1, 1]} : vector<8x32xf32> to vector<8x8xf32>
    %73 = vector.extract_strided_slice %19 {offsets = [0, 24], sizes = [8, 8], strides = [1, 1]} : vector<8x32xf32> to vector<8x8xf32>
    %cst_38 = arith.constant dense<0.000000e+00> : vector<16x8xf32>
    %74 = tpu.matmul %71, %72, %cst_38 {dimension_numbers = #tpu.dot_dimension_numbers<[1], [1], [0], [0], [0, 0, 1, 0], [], []>} : vector<16x8xf32>, vector<8x8xf32>, vector<16x8xf32> -> vector<16x8xf32>
    %cst_39 = arith.constant 0.353553385 : f32
    %75 = vector.broadcast %cst_39 : f32 to vector<16x8xf32>
    %76 = arith.mulf %74, %75 : vector<16x8xf32>
    %77 = arith.addf %76, %10 : vector<16x8xf32>
    %cst_40 = arith.constant dense<0xFF800000> : vector<16xf32>
    %78 = vector.multi_reduction <maximumf>, %77, %cst_40 [1] : vector<16x8xf32> to vector<16xf32>
    %79 = vector.shape_cast %78 : vector<16xf32> to vector<16x1xf32>
    %80 = vector.broadcast %79 : vector<16x1xf32> to vector<16x8xf32>
    %81 = arith.subf %77, %80 : vector<16x8xf32>
    %82 = math.exp %81 : vector<16x8xf32>
    %cst_41 = arith.constant dense<0.000000e+00> : vector<16xf32>
    %83 = vector.multi_reduction <add>, %82, %cst_41 [1] : vector<16x8xf32> to vector<16xf32>
    %84 = vector.shape_cast %83 : vector<16xf32> to vector<16x1xf32>
    %85 = vector.broadcast %84 : vector<16x1xf32> to vector<16x8xf32>
    %86 = arith.divf %82, %85 : vector<16x8xf32>
    %cst_42 = arith.constant dense<0.000000e+00> : vector<16x8xf32>
    %87 = tpu.matmul %86, %73, %cst_42 {dimension_numbers = #tpu.dot_dimension_numbers<[1], [0], [0], [1], [0, 0, 1, 1], [], []>} : vector<16x8xf32>, vector<8x8xf32>, vector<16x8xf32> -> vector<16x8xf32>
    %88 = tpu.concatenate %36, %53, %70, %87 in 1 : vector<16x8xf32>, vector<16x8xf32>, vector<16x8xf32>, vector<16x8xf32> -> vector<16x32xf32>
    %cst_43 = arith.constant dense<0.000000e+00> : vector<16x32xf32>
    %89 = tpu.matmul %88, %8, %cst_43 {dimension_numbers = #tpu.dot_dimension_numbers<[1], [0], [0], [1], [0, 0, 1, 1], [], []>} : vector<16x32xf32>, vector<32x32xf32>, vector<16x32xf32> -> vector<16x32xf32>
    %90 = vector.broadcast %9 : vector<1x32xf32> to vector<16x32xf32>
    %91 = arith.addf %89, %90 : vector<16x32xf32>
    %92 = arith.addf %0, %91 : vector<16x32xf32>
    %c0_44 = arith.constant 0 : index
    %c0_45 = arith.constant 0 : index
    %93 = vector.load %arg12[%c0_44, %c0_45] : memref<1x32xf32, #tpu.memory_space<vmem>>, vector<1x32xf32>
    %c0_46 = arith.constant 0 : index
    %c0_47 = arith.constant 0 : index
    %94 = vector.load %arg13[%c0_46, %c0_47] : memref<1x32xf32, #tpu.memory_space<vmem>>, vector<1x32xf32>
    %cst_48 = arith.constant dense<0.000000e+00> : vector<16xf32>
    %95 = vector.multi_reduction <add>, %92, %cst_48 [1] : vector<16x32xf32> to vector<16xf32>
    %96 = vector.shape_cast %95 : vector<16xf32> to vector<16x1xf32>
    %cst_49 = arith.constant 3.200000e+01 : f32
    %97 = vector.broadcast %cst_49 : f32 to vector<16x1xf32>
    %98 = arith.divf %96, %97 : vector<16x1xf32>
    %99 = vector.broadcast %98 : vector<16x1xf32> to vector<16x32xf32>
    %100 = arith.subf %92, %99 : vector<16x32xf32>
    %101 = arith.mulf %100, %100 : vector<16x32xf32>
    %cst_50 = arith.constant dense<0.000000e+00> : vector<16xf32>
    %102 = vector.multi_reduction <add>, %101, %cst_50 [1] : vector<16x32xf32> to vector<16xf32>
    %103 = vector.shape_cast %102 : vector<16xf32> to vector<16x1xf32>
    %cst_51 = arith.constant 3.200000e+01 : f32
    %104 = vector.broadcast %cst_51 : f32 to vector<16x1xf32>
    %105 = arith.divf %103, %104 : vector<16x1xf32>
    %106 = vector.broadcast %98 : vector<16x1xf32> to vector<16x32xf32>
    %107 = arith.subf %92, %106 : vector<16x32xf32>
    %cst_52 = arith.constant 9.99999974E-6 : f32
    %108 = vector.broadcast %cst_52 : f32 to vector<16x1xf32>
    %109 = arith.addf %105, %108 : vector<16x1xf32>
    %110 = math.rsqrt %109 : vector<16x1xf32>
    %111 = vector.broadcast %110 : vector<16x1xf32> to vector<16x32xf32>
    %112 = arith.mulf %107, %111 : vector<16x32xf32>
    %113 = vector.broadcast %93 : vector<1x32xf32> to vector<16x32xf32>
    %114 = arith.mulf %112, %113 : vector<16x32xf32>
    %115 = vector.broadcast %94 : vector<1x32xf32> to vector<16x32xf32>
    %116 = arith.addf %114, %115 : vector<16x32xf32>
    %c0_53 = arith.constant 0 : index
    %c0_54 = arith.constant 0 : index
    %117 = vector.load %arg14[%c0_53, %c0_54] : memref<16x32xf32, #tpu.memory_space<vmem>>, vector<16x32xf32>
    tpu.vector_store %arg14[%c0_53, %c0_54], %116 {strides = array<i32>} : memref<16x32xf32, #tpu.memory_space<vmem>>, vector<16x32xf32>,
    return
  }
  func.func @transform_0(%arg0: i32) -> (i32, i32) {
    %c0_i32 = arith.constant 0 : i32
    %c0_i32_0 = arith.constant 0 : i32
    %c0_i32_1 = arith.constant 0 : i32
    return %c0_i32, %c0_i32_0 : i32, i32
  }
  func.func @transform_1(%arg0: i32) -> (i32, i32) {
    %c0_i32 = arith.constant 0 : i32
    %c0_i32_0 = arith.constant 0 : i32
    %c0_i32_1 = arith.constant 0 : i32
    return %c0_i32, %c0_i32_0 : i32, i32
  }
  func.func @transform_2(%arg0: i32) -> (i32, i32) {
    %c0_i32 = arith.constant 0 : i32
    %c0_i32_0 = arith.constant 0 : i32
    %c0_i32_1 = arith.constant 0 : i32
    return %c0_i32, %c0_i32_0 : i32, i32
  }
  func.func @transform_3(%arg0: i32) -> (i32, i32) {
    %c0_i32 = arith.constant 0 : i32
    %c0_i32_0 = arith.constant 0 : i32
    %c0_i32_1 = arith.constant 0 : i32
    return %c0_i32, %c0_i32_0 : i32, i32
  }
  func.func @transform_4(%arg0: i32) -> (i32, i32) {
    %c0_i32 = arith.constant 0 : i32
    %c0_i32_0 = arith.constant 0 : i32
    %c0_i32_1 = arith.constant 0 : i32
    return %c0_i32, %c0_i32_0 : i32, i32
  }
  func.func @transform_5(%arg0: i32) -> (i32, i32) {
    %c0_i32 = arith.constant 0 : i32
    %c0_i32_0 = arith.constant 0 : i32
    %c0_i32_1 = arith.constant 0 : i32
    return %c0_i32, %c0_i32_0 : i32, i32
  }
  func.func @transform_6(%arg0: i32) -> (i32, i32) {
    %c0_i32 = arith.constant 0 : i32
    %c0_i32_0 = arith.constant 0 : i32
    %c0_i32_1 = arith.constant 0 : i32
    return %c0_i32, %c0_i32_0 : i32, i32
  }
  func.func @transform_7(%arg0: i32) -> (i32, i32) {
    %c0_i32 = arith.constant 0 : i32
    %c0_i32_0 = arith.constant 0 : i32
    %c0_i32_1 = arith.constant 0 : i32
    return %c0_i32, %c0_i32_0 : i32, i32
  }
  func.func @transform_8(%arg0: i32) -> (i32, i32) {
    %c0_i32 = arith.constant 0 : i32
    %c0_i32_0 = arith.constant 0 : i32
    %c0_i32_1 = arith.constant 0 : i32
    return %c0_i32, %c0_i32_0 : i32, i32
  }
  func.func @transform_9(%arg0: i32) -> (i32, i32) {
    %c0_i32 = arith.constant 0 : i32
    %c0_i32_0 = arith.constant 0 : i32
    %c0_i32_1 = arith.constant 0 : i32
    return %c0_i32, %c0_i32_0 : i32, i32
  }
  func.func @transform_10(%arg0: i32) -> (i32, i32) {
    %c0_i32 = arith.constant 0 : i32
    %c0_i32_0 = arith.constant 0 : i32
    %c0_i32_1 = arith.constant 0 : i32
    return %c0_i32, %c0_i32_0 : i32, i32
  }
  func.func @transform_11(%arg0: i32) -> (i32, i32) {
    %c0_i32 = arith.constant 0 : i32
    %c0_i32_0 = arith.constant 0 : i32
    %c0_i32_1 = arith.constant 0 : i32
    return %c0_i32, %c0_i32_0 : i32, i32
  }
  func.func @transform_12(%arg0: i32) -> (i32, i32) {
    %c0_i32 = arith.constant 0 : i32
    %c0_i32_0 = arith.constant 0 : i32
    %c0_i32_1 = arith.constant 0 : i32
    return %c0_i32, %c0_i32_0 : i32, i32
  }
  func.func @transform_13(%arg0: i32) -> (i32, i32) {
    %c0_i32 = arith.constant 0 : i32
    %c0_i32_0 = arith.constant 0 : i32
    %c0_i32_1 = arith.constant 0 : i32
    return %c0_i32, %c0_i32_0 : i32, i32
  }
}

module attributes {stable_mosaic.version = 11 : i64} {
  func.func @_attn_kernel(%arg0: i32, %arg1: memref<8x32xf32, #tpu.memory_space<vmem>>, %arg2: memref<16x32xf32, #tpu.memory_space<vmem>>, %arg3: memref<32x32xf32, #tpu.memory_space<vmem>>, %arg4: memref<1x32xf32, #tpu.memory_space<vmem>>, %arg5: memref<32x32xf32, #tpu.memory_space<vmem>>, %arg6: memref<1x32xf32, #tpu.memory_space<vmem>>, %arg7: memref<32x32xf32, #tpu.memory_space<vmem>>, %arg8: memref<1x32xf32, #tpu.memory_space<vmem>>, %arg9: memref<32x32xf32, #tpu.memory_space<vmem>>, %arg10: memref<1x32xf32, #tpu.memory_space<vmem>>, %arg11: memref<8x16xf32, #tpu.memory_space<vmem>>, %arg12: memref<8x32xf32, #tpu.memory_space<vmem>>) attributes {dimension_semantics = [#tpu.dimension_semantics<arbitrary>], iteration_bounds = array<i64: 1>, scalar_prefetch = 0 : i64, scratch_operands = 0 : i64, tpu.core_type = #tpu.core_type<tc>, window_params = [{pipeline_mode = #tpu.pipeline_mode<synchronous>, transform_indices = @transform_0, window_bounds = array<i64: 8, 32>}, {pipeline_mode = #tpu.pipeline_mode<synchronous>, transform_indices = @transform_1, window_bounds = array<i64: 16, 32>}, {pipeline_mode = #tpu.pipeline_mode<synchronous>, transform_indices = @transform_2, window_bounds = array<i64: 32, 32>}, {pipeline_mode = #tpu.pipeline_mode<synchronous>, transform_indices = @transform_3, window_bounds = array<i64: 1, 32>}, {pipeline_mode = #tpu.pipeline_mode<synchronous>, transform_indices = @transform_4, window_bounds = array<i64: 32, 32>}, {pipeline_mode = #tpu.pipeline_mode<synchronous>, transform_indices = @transform_5, window_bounds = array<i64: 1, 32>}, {pipeline_mode = #tpu.pipeline_mode<synchronous>, transform_indices = @transform_6, window_bounds = array<i64: 32, 32>}, {pipeline_mode = #tpu.pipeline_mode<synchronous>, transform_indices = @transform_7, window_bounds = array<i64: 1, 32>}, {pipeline_mode = #tpu.pipeline_mode<synchronous>, transform_indices = @transform_8, window_bounds = array<i64: 32, 32>}, {pipeline_mode = #tpu.pipeline_mode<synchronous>, transform_indices = @transform_9, window_bounds = array<i64: 1, 32>}, {pipeline_mode = #tpu.pipeline_mode<synchronous>, transform_indices = @transform_10, window_bounds = array<i64: 8, 16>}, {pipeline_mode = #tpu.pipeline_mode<synchronous>, transform_indices = @transform_11, window_bounds = array<i64: 8, 32>}]} {
    %c0 = arith.constant 0 : index
    %c0_0 = arith.constant 0 : index
    %0 = vector.load %arg1[%c0, %c0_0] : memref<8x32xf32, #tpu.memory_space<vmem>>, vector<8x32xf32>
    %c0_1 = arith.constant 0 : index
    %c0_2 = arith.constant 0 : index
    %1 = vector.load %arg2[%c0_1, %c0_2] : memref<16x32xf32, #tpu.memory_space<vmem>>, vector<16x32xf32>
    %c0_3 = arith.constant 0 : index
    %c0_4 = arith.constant 0 : index
    %2 = vector.load %arg3[%c0_3, %c0_4] : memref<32x32xf32, #tpu.memory_space<vmem>>, vector<32x32xf32>
    %c0_5 = arith.constant 0 : index
    %c0_6 = arith.constant 0 : index
    %3 = vector.load %arg4[%c0_5, %c0_6] : memref<1x32xf32, #tpu.memory_space<vmem>>, vector<1x32xf32>
    %c0_7 = arith.constant 0 : index
    %c0_8 = arith.constant 0 : index
    %4 = vector.load %arg5[%c0_7, %c0_8] : memref<32x32xf32, #tpu.memory_space<vmem>>, vector<32x32xf32>
    %c0_9 = arith.constant 0 : index
    %c0_10 = arith.constant 0 : index
    %5 = vector.load %arg6[%c0_9, %c0_10] : memref<1x32xf32, #tpu.memory_space<vmem>>, vector<1x32xf32>
    %c0_11 = arith.constant 0 : index
    %c0_12 = arith.constant 0 : index
    %6 = vector.load %arg7[%c0_11, %c0_12] : memref<32x32xf32, #tpu.memory_space<vmem>>, vector<32x32xf32>
    %c0_13 = arith.constant 0 : index
    %c0_14 = arith.constant 0 : index
    %7 = vector.load %arg8[%c0_13, %c0_14] : memref<1x32xf32, #tpu.memory_space<vmem>>, vector<1x32xf32>
    %c0_15 = arith.constant 0 : index
    %c0_16 = arith.constant 0 : index
    %8 = vector.load %arg9[%c0_15, %c0_16] : memref<32x32xf32, #tpu.memory_space<vmem>>, vector<32x32xf32>
    %c0_17 = arith.constant 0 : index
    %c0_18 = arith.constant 0 : index
    %9 = vector.load %arg10[%c0_17, %c0_18] : memref<1x32xf32, #tpu.memory_space<vmem>>, vector<1x32xf32>
    %c0_19 = arith.constant 0 : index
    %c0_20 = arith.constant 0 : index
    %10 = vector.load %arg11[%c0_19, %c0_20] : memref<8x16xf32, #tpu.memory_space<vmem>>, vector<8x16xf32>
    %cst = arith.constant dense<0.000000e+00> : vector<8x32xf32>
    %11 = tpu.matmul %0, %2, %cst {dimension_numbers = #tpu.dot_dimension_numbers<[1], [0], [0], [1], [0, 0, 1, 1], [], []>} : vector<8x32xf32>, vector<32x32xf32>, vector<8x32xf32> -> vector<8x32xf32>
    %12 = vector.broadcast %3 : vector<1x32xf32> to vector<8x32xf32>
    %13 = arith.addf %11, %12 : vector<8x32xf32>
    %cst_21 = arith.constant dense<0.000000e+00> : vector<16x32xf32>
    %14 = tpu.matmul %1, %4, %cst_21 {dimension_numbers = #tpu.dot_dimension_numbers<[1], [0], [0], [1], [0, 0, 1, 1], [], []>} : vector<16x32xf32>, vector<32x32xf32>, vector<16x32xf32> -> vector<16x32xf32>
    %15 = vector.broadcast %5 : vector<1x32xf32> to vector<16x32xf32>
    %16 = arith.addf %14, %15 : vector<16x32xf32>
    %cst_22 = arith.constant dense<0.000000e+00> : vector<16x32xf32>
    %17 = tpu.matmul %1, %6, %cst_22 {dimension_numbers = #tpu.dot_dimension_numbers<[1], [0], [0], [1], [0, 0, 1, 1], [], []>} : vector<16x32xf32>, vector<32x32xf32>, vector<16x32xf32> -> vector<16x32xf32>
    %18 = vector.broadcast %7 : vector<1x32xf32> to vector<16x32xf32>
    %19 = arith.addf %17, %18 : vector<16x32xf32>
    %20 = vector.extract_strided_slice %13 {offsets = [0, 0], sizes = [8, 8], strides = [1, 1]} : vector<8x32xf32> to vector<8x8xf32>
    %21 = vector.extract_strided_slice %16 {offsets = [0, 0], sizes = [16, 8], strides = [1, 1]} : vector<16x32xf32> to vector<16x8xf32>
    %22 = vector.extract_strided_slice %19 {offsets = [0, 0], sizes = [16, 8], strides = [1, 1]} : vector<16x32xf32> to vector<16x8xf32>
    %cst_23 = arith.constant dense<0.000000e+00> : vector<8x16xf32>
    %23 = tpu.matmul %20, %21, %cst_23 {dimension_numbers = #tpu.dot_dimension_numbers<[1], [1], [0], [0], [0, 0, 1, 0], [], []>} : vector<8x8xf32>, vector<16x8xf32>, vector<8x16xf32> -> vector<8x16xf32>
    %cst_24 = arith.constant 0.353553385 : f32
    %24 = vector.broadcast %cst_24 : f32 to vector<8x16xf32>
    %25 = arith.mulf %23, %24 : vector<8x16xf32>
    %26 = arith.addf %25, %10 : vector<8x16xf32>
    %cst_25 = arith.constant dense<0xFF800000> : vector<8xf32>
    %27 = vector.multi_reduction <maximumf>, %26, %cst_25 [1] : vector<8x16xf32> to vector<8xf32>
    %28 = vector.shape_cast %27 : vector<8xf32> to vector<8x1xf32>
    %29 = vector.broadcast %28 : vector<8x1xf32> to vector<8x16xf32>
    %30 = arith.subf %26, %29 : vector<8x16xf32>
    %31 = math.exp %30 : vector<8x16xf32>
    %cst_26 = arith.constant dense<0.000000e+00> : vector<8xf32>
    %32 = vector.multi_reduction <add>, %31, %cst_26 [1] : vector<8x16xf32> to vector<8xf32>
    %33 = vector.shape_cast %32 : vector<8xf32> to vector<8x1xf32>
    %34 = vector.broadcast %33 : vector<8x1xf32> to vector<8x16xf32>
    %35 = arith.divf %31, %34 : vector<8x16xf32>
    %cst_27 = arith.constant dense<0.000000e+00> : vector<8x8xf32>
    %36 = tpu.matmul %35, %22, %cst_27 {dimension_numbers = #tpu.dot_dimension_numbers<[1], [0], [0], [1], [0, 0, 1, 1], [], []>} : vector<8x16xf32>, vector<16x8xf32>, vector<8x8xf32> -> vector<8x8xf32>
    %37 = vector.extract_strided_slice %13 {offsets = [0, 8], sizes = [8, 8], strides = [1, 1]} : vector<8x32xf32> to vector<8x8xf32>
    %38 = vector.extract_strided_slice %16 {offsets = [0, 8], sizes = [16, 8], strides = [1, 1]} : vector<16x32xf32> to vector<16x8xf32>
    %39 = vector.extract_strided_slice %19 {offsets = [0, 8], sizes = [16, 8], strides = [1, 1]} : vector<16x32xf32> to vector<16x8xf32>
    %cst_28 = arith.constant dense<0.000000e+00> : vector<8x16xf32>
    %40 = tpu.matmul %37, %38, %cst_28 {dimension_numbers = #tpu.dot_dimension_numbers<[1], [1], [0], [0], [0, 0, 1, 0], [], []>} : vector<8x8xf32>, vector<16x8xf32>, vector<8x16xf32> -> vector<8x16xf32>
    %cst_29 = arith.constant 0.353553385 : f32
    %41 = vector.broadcast %cst_29 : f32 to vector<8x16xf32>
    %42 = arith.mulf %40, %41 : vector<8x16xf32>
    %43 = arith.addf %42, %10 : vector<8x16xf32>
    %cst_30 = arith.constant dense<0xFF800000> : vector<8xf32>
    %44 = vector.multi_reduction <maximumf>, %43, %cst_30 [1] : vector<8x16xf32> to vector<8xf32>
    %45 = vector.shape_cast %44 : vector<8xf32> to vector<8x1xf32>
    %46 = vector.broadcast %45 : vector<8x1xf32> to vector<8x16xf32>
    %47 = arith.subf %43, %46 : vector<8x16xf32>
    %48 = math.exp %47 : vector<8x16xf32>
    %cst_31 = arith.constant dense<0.000000e+00> : vector<8xf32>
    %49 = vector.multi_reduction <add>, %48, %cst_31 [1] : vector<8x16xf32> to vector<8xf32>
    %50 = vector.shape_cast %49 : vector<8xf32> to vector<8x1xf32>
    %51 = vector.broadcast %50 : vector<8x1xf32> to vector<8x16xf32>
    %52 = arith.divf %48, %51 : vector<8x16xf32>
    %cst_32 = arith.constant dense<0.000000e+00> : vector<8x8xf32>
    %53 = tpu.matmul %52, %39, %cst_32 {dimension_numbers = #tpu.dot_dimension_numbers<[1], [0], [0], [1], [0, 0, 1, 1], [], []>} : vector<8x16xf32>, vector<16x8xf32>, vector<8x8xf32> -> vector<8x8xf32>
    %54 = vector.extract_strided_slice %13 {offsets = [0, 16], sizes = [8, 8], strides = [1, 1]} : vector<8x32xf32> to vector<8x8xf32>
    %55 = vector.extract_strided_slice %16 {offsets = [0, 16], sizes = [16, 8], strides = [1, 1]} : vector<16x32xf32> to vector<16x8xf32>
    %56 = vector.extract_strided_slice %19 {offsets = [0, 16], sizes = [16, 8], strides = [1, 1]} : vector<16x32xf32> to vector<16x8xf32>
    %cst_33 = arith.constant dense<0.000000e+00> : vector<8x16xf32>
    %57 = tpu.matmul %54, %55, %cst_33 {dimension_numbers = #tpu.dot_dimension_numbers<[1], [1], [0], [0], [0, 0, 1, 0], [], []>} : vector<8x8xf32>, vector<16x8xf32>, vector<8x16xf32> -> vector<8x16xf32>
    %cst_34 = arith.constant 0.353553385 : f32
    %58 = vector.broadcast %cst_34 : f32 to vector<8x16xf32>
    %59 = arith.mulf %57, %58 : vector<8x16xf32>
    %60 = arith.addf %59, %10 : vector<8x16xf32>
    %cst_35 = arith.constant dense<0xFF800000> : vector<8xf32>
    %61 = vector.multi_reduction <maximumf>, %60, %cst_35 [1] : vector<8x16xf32> to vector<8xf32>
    %62 = vector.shape_cast %61 : vector<8xf32> to vector<8x1xf32>
    %63 = vector.broadcast %62 : vector<8x1xf32> to vector<8x16xf32>
    %64 = arith.subf %60, %63 : vector<8x16xf32>
    %65 = math.exp %64 : vector<8x16xf32>
    %cst_36 = arith.constant dense<0.000000e+00> : vector<8xf32>
    %66 = vector.multi_reduction <add>, %65, %cst_36 [1] : vector<8x16xf32> to vector<8xf32>
    %67 = vector.shape_cast %66 : vector<8xf32> to vector<8x1xf32>
    %68 = vector.broadcast %67 : vector<8x1xf32> to vector<8x16xf32>
    %69 = arith.divf %65, %68 : vector<8x16xf32>
    %cst_37 = arith.constant dense<0.000000e+00> : vector<8x8xf32>
    %70 = tpu.matmul %69, %56, %cst_37 {dimension_numbers = #tpu.dot_dimension_numbers<[1], [0], [0], [1], [0, 0, 1, 1], [], []>} : vector<8x16xf32>, vector<16x8xf32>, vector<8x8xf32> -> vector<8x8xf32>
    %71 = vector.extract_strided_slice %13 {offsets = [0, 24], sizes = [8, 8], strides = [1, 1]} : vector<8x32xf32> to vector<8x8xf32>
    %72 = vector.extract_strided_slice %16 {offsets = [0, 24], sizes = [16, 8], strides = [1, 1]} : vector<16x32xf32> to vector<16x8xf32>
    %73 = vector.extract_strided_slice %19 {offsets = [0, 24], sizes = [16, 8], strides = [1, 1]} : vector<16x32xf32> to vector<16x8xf32>
    %cst_38 = arith.constant dense<0.000000e+00> : vector<8x16xf32>
    %74 = tpu.matmul %71, %72, %cst_38 {dimension_numbers = #tpu.dot_dimension_numbers<[1], [1], [0], [0], [0, 0, 1, 0], [], []>} : vector<8x8xf32>, vector<16x8xf32>, vector<8x16xf32> -> vector<8x16xf32>
    %cst_39 = arith.constant 0.353553385 : f32
    %75 = vector.broadcast %cst_39 : f32 to vector<8x16xf32>
    %76 = arith.mulf %74, %75 : vector<8x16xf32>
    %77 = arith.addf %76, %10 : vector<8x16xf32>
    %cst_40 = arith.constant dense<0xFF800000> : vector<8xf32>
    %78 = vector.multi_reduction <maximumf>, %77, %cst_40 [1] : vector<8x16xf32> to vector<8xf32>
    %79 = vector.shape_cast %78 : vector<8xf32> to vector<8x1xf32>
    %80 = vector.broadcast %79 : vector<8x1xf32> to vector<8x16xf32>
    %81 = arith.subf %77, %80 : vector<8x16xf32>
    %82 = math.exp %81 : vector<8x16xf32>
    %cst_41 = arith.constant dense<0.000000e+00> : vector<8xf32>
    %83 = vector.multi_reduction <add>, %82, %cst_41 [1] : vector<8x16xf32> to vector<8xf32>
    %84 = vector.shape_cast %83 : vector<8xf32> to vector<8x1xf32>
    %85 = vector.broadcast %84 : vector<8x1xf32> to vector<8x16xf32>
    %86 = arith.divf %82, %85 : vector<8x16xf32>
    %cst_42 = arith.constant dense<0.000000e+00> : vector<8x8xf32>
    %87 = tpu.matmul %86, %73, %cst_42 {dimension_numbers = #tpu.dot_dimension_numbers<[1], [0], [0], [1], [0, 0, 1, 1], [], []>} : vector<8x16xf32>, vector<16x8xf32>, vector<8x8xf32> -> vector<8x8xf32>
    %88 = tpu.concatenate %36, %53, %70, %87 in 1 : vector<8x8xf32>, vector<8x8xf32>, vector<8x8xf32>, vector<8x8xf32> -> vector<8x32xf32>
    %cst_43 = arith.constant dense<0.000000e+00> : vector<8x32xf32>
    %89 = tpu.matmul %88, %8, %cst_43 {dimension_numbers = #tpu.dot_dimension_numbers<[1], [0], [0], [1], [0, 0, 1, 1], [], []>} : vector<8x32xf32>, vector<32x32xf32>, vector<8x32xf32> -> vector<8x32xf32>
    %90 = vector.broadcast %9 : vector<1x32xf32> to vector<8x32xf32>
    %91 = arith.addf %89, %90 : vector<8x32xf32>
    %c0_44 = arith.constant 0 : index
    %c0_45 = arith.constant 0 : index
    %92 = vector.load %arg12[%c0_44, %c0_45] : memref<8x32xf32, #tpu.memory_space<vmem>>, vector<8x32xf32>
    tpu.vector_store %arg12[%c0_44, %c0_45], %91 {strides = array<i32>} : memref<8x32xf32, #tpu.memory_space<vmem>>, vector<8x32xf32>,
    return
  }
  func.func @transform_0(%arg0: i32) -> (i32, i32) {
    %c0_i32 = arith.constant 0 : i32
    %c0_i32_0 = arith.constant 0 : i32
    %c0_i32_1 = arith.constant 0 : i32
    return %c0_i32, %c0_i32_0 : i32, i32
  }
  func.func @transform_1(%arg0: i32) -> (i32, i32) {
    %c0_i32 = arith.constant 0 : i32
    %c0_i32_0 = arith.constant 0 : i32
    %c0_i32_1 = arith.constant 0 : i32
    return %c0_i32, %c0_i32_0 : i32, i32
  }
  func.func @transform_2(%arg0: i32) -> (i32, i32) {
    %c0_i32 = arith.constant 0 : i32
    %c0_i32_0 = arith.constant 0 : i32
    %c0_i32_1 = arith.constant 0 : i32
    return %c0_i32, %c0_i32_0 : i32, i32
  }
  func.func @transform_3(%arg0: i32) -> (i32, i32) {
    %c0_i32 = arith.constant 0 : i32
    %c0_i32_0 = arith.constant 0 : i32
    %c0_i32_1 = arith.constant 0 : i32
    return %c0_i32, %c0_i32_0 : i32, i32
  }
  func.func @transform_4(%arg0: i32) -> (i32, i32) {
    %c0_i32 = arith.constant 0 : i32
    %c0_i32_0 = arith.constant 0 : i32
    %c0_i32_1 = arith.constant 0 : i32
    return %c0_i32, %c0_i32_0 : i32, i32
  }
  func.func @transform_5(%arg0: i32) -> (i32, i32) {
    %c0_i32 = arith.constant 0 : i32
    %c0_i32_0 = arith.constant 0 : i32
    %c0_i32_1 = arith.constant 0 : i32
    return %c0_i32, %c0_i32_0 : i32, i32
  }
  func.func @transform_6(%arg0: i32) -> (i32, i32) {
    %c0_i32 = arith.constant 0 : i32
    %c0_i32_0 = arith.constant 0 : i32
    %c0_i32_1 = arith.constant 0 : i32
    return %c0_i32, %c0_i32_0 : i32, i32
  }
  func.func @transform_7(%arg0: i32) -> (i32, i32) {
    %c0_i32 = arith.constant 0 : i32
    %c0_i32_0 = arith.constant 0 : i32
    %c0_i32_1 = arith.constant 0 : i32
    return %c0_i32, %c0_i32_0 : i32, i32
  }
  func.func @transform_8(%arg0: i32) -> (i32, i32) {
    %c0_i32 = arith.constant 0 : i32
    %c0_i32_0 = arith.constant 0 : i32
    %c0_i32_1 = arith.constant 0 : i32
    return %c0_i32, %c0_i32_0 : i32, i32
  }
  func.func @transform_9(%arg0: i32) -> (i32, i32) {
    %c0_i32 = arith.constant 0 : i32
    %c0_i32_0 = arith.constant 0 : i32
    %c0_i32_1 = arith.constant 0 : i32
    return %c0_i32, %c0_i32_0 : i32, i32
  }
  func.func @transform_10(%arg0: i32) -> (i32, i32) {
    %c0_i32 = arith.constant 0 : i32
    %c0_i32_0 = arith.constant 0 : i32
    %c0_i32_1 = arith.constant 0 : i32
    return %c0_i32, %c0_i32_0 : i32, i32
  }
  func.func @transform_11(%arg0: i32) -> (i32, i32) {
    %c0_i32 = arith.constant 0 : i32
    %c0_i32_0 = arith.constant 0 : i32
    %c0_i32_1 = arith.constant 0 : i32
    return %c0_i32, %c0_i32_0 : i32, i32
  }
}

module attributes {stable_mosaic.version = 11 : i64} {
  func.func @_embed_kernel(%arg0: i32, %arg1: memref<1x16x4xf32, #tpu.memory_space<vmem>>, %arg2: memref<4x32xf32, #tpu.memory_space<vmem>>, %arg3: memref<1x32xf32, #tpu.memory_space<vmem>>, %arg4: memref<1x16x32xf32, #tpu.memory_space<vmem>>, %arg5: memref<1x32xf32, #tpu.memory_space<vmem>>, %arg6: memref<1x32xf32, #tpu.memory_space<vmem>>, %arg7: memref<1x16x32xf32, #tpu.memory_space<vmem>>) attributes {dimension_semantics = [#tpu.dimension_semantics<parallel>], iteration_bounds = array<i64: 2>, scalar_prefetch = 0 : i64, scratch_operands = 0 : i64, tpu.core_type = #tpu.core_type<tc>, window_params = [{transform_indices = @transform_0, window_bounds = array<i64: 1, 16, 4>}, {pipeline_mode = #tpu.pipeline_mode<synchronous>, transform_indices = @transform_1, window_bounds = array<i64: 4, 32>}, {pipeline_mode = #tpu.pipeline_mode<synchronous>, transform_indices = @transform_2, window_bounds = array<i64: 1, 32>}, {pipeline_mode = #tpu.pipeline_mode<synchronous>, transform_indices = @transform_3, window_bounds = array<i64: 1, 16, 32>}, {pipeline_mode = #tpu.pipeline_mode<synchronous>, transform_indices = @transform_4, window_bounds = array<i64: 1, 32>}, {pipeline_mode = #tpu.pipeline_mode<synchronous>, transform_indices = @transform_5, window_bounds = array<i64: 1, 32>}, {transform_indices = @transform_6, window_bounds = array<i64: 1, 16, 32>}]} {
    %c0 = arith.constant 0 : index
    %c0_0 = arith.constant 0 : index
    %c0_1 = arith.constant 0 : index
    %0 = vector.load %arg1[%c0, %c0_0, %c0_1] : memref<1x16x4xf32, #tpu.memory_space<vmem>>, vector<1x16x4xf32>
    %1 = vector.shape_cast %0 : vector<1x16x4xf32> to vector<16x4xf32>
    %c0_2 = arith.constant 0 : index
    %c0_3 = arith.constant 0 : index
    %2 = vector.load %arg2[%c0_2, %c0_3] : memref<4x32xf32, #tpu.memory_space<vmem>>, vector<4x32xf32>
    %cst = arith.constant dense<0.000000e+00> : vector<16x32xf32>
    %3 = tpu.matmul %1, %2, %cst {dimension_numbers = #tpu.dot_dimension_numbers<[1], [0], [0], [1], [0, 0, 1, 1], [], []>} : vector<16x4xf32>, vector<4x32xf32>, vector<16x32xf32> -> vector<16x32xf32>
    %c0_4 = arith.constant 0 : index
    %c0_5 = arith.constant 0 : index
    %4 = vector.load %arg3[%c0_4, %c0_5] : memref<1x32xf32, #tpu.memory_space<vmem>>, vector<1x32xf32>
    %5 = vector.broadcast %4 : vector<1x32xf32> to vector<16x32xf32>
    %6 = arith.addf %3, %5 : vector<16x32xf32>
    %c0_6 = arith.constant 0 : index
    %c0_7 = arith.constant 0 : index
    %c0_8 = arith.constant 0 : index
    %7 = vector.load %arg4[%c0_6, %c0_7, %c0_8] : memref<1x16x32xf32, #tpu.memory_space<vmem>>, vector<1x16x32xf32>
    %8 = vector.shape_cast %7 : vector<1x16x32xf32> to vector<16x32xf32>
    %9 = arith.addf %6, %8 : vector<16x32xf32>
    %c0_9 = arith.constant 0 : index
    %c0_10 = arith.constant 0 : index
    %10 = vector.load %arg5[%c0_9, %c0_10] : memref<1x32xf32, #tpu.memory_space<vmem>>, vector<1x32xf32>
    %c0_11 = arith.constant 0 : index
    %c0_12 = arith.constant 0 : index
    %11 = vector.load %arg6[%c0_11, %c0_12] : memref<1x32xf32, #tpu.memory_space<vmem>>, vector<1x32xf32>
    %cst_13 = arith.constant dense<0.000000e+00> : vector<16xf32>
    %12 = vector.multi_reduction <add>, %9, %cst_13 [1] : vector<16x32xf32> to vector<16xf32>
    %13 = vector.shape_cast %12 : vector<16xf32> to vector<16x1xf32>
    %cst_14 = arith.constant 3.200000e+01 : f32
    %14 = vector.broadcast %cst_14 : f32 to vector<16x1xf32>
    %15 = arith.divf %13, %14 : vector<16x1xf32>
    %16 = vector.broadcast %15 : vector<16x1xf32> to vector<16x32xf32>
    %17 = arith.subf %9, %16 : vector<16x32xf32>
    %18 = arith.mulf %17, %17 : vector<16x32xf32>
    %cst_15 = arith.constant dense<0.000000e+00> : vector<16xf32>
    %19 = vector.multi_reduction <add>, %18, %cst_15 [1] : vector<16x32xf32> to vector<16xf32>
    %20 = vector.shape_cast %19 : vector<16xf32> to vector<16x1xf32>
    %cst_16 = arith.constant 3.200000e+01 : f32
    %21 = vector.broadcast %cst_16 : f32 to vector<16x1xf32>
    %22 = arith.divf %20, %21 : vector<16x1xf32>
    %23 = vector.broadcast %15 : vector<16x1xf32> to vector<16x32xf32>
    %24 = arith.subf %9, %23 : vector<16x32xf32>
    %cst_17 = arith.constant 9.99999974E-6 : f32
    %25 = vector.broadcast %cst_17 : f32 to vector<16x1xf32>
    %26 = arith.addf %22, %25 : vector<16x1xf32>
    %27 = math.rsqrt %26 : vector<16x1xf32>
    %28 = vector.broadcast %27 : vector<16x1xf32> to vector<16x32xf32>
    %29 = arith.mulf %24, %28 : vector<16x32xf32>
    %30 = vector.broadcast %10 : vector<1x32xf32> to vector<16x32xf32>
    %31 = arith.mulf %29, %30 : vector<16x32xf32>
    %32 = vector.broadcast %11 : vector<1x32xf32> to vector<16x32xf32>
    %33 = arith.addf %31, %32 : vector<16x32xf32>
    %c0_18 = arith.constant 0 : index
    %c0_19 = arith.constant 0 : index
    %c0_20 = arith.constant 0 : index
    %34 = vector.load %arg7[%c0_18, %c0_19, %c0_20] : memref<1x16x32xf32, #tpu.memory_space<vmem>>, vector<1x16x32xf32>
    %35 = vector.shape_cast %34 : vector<1x16x32xf32> to vector<16x32xf32>
    %36 = vector.shape_cast %33 : vector<16x32xf32> to vector<1x16x32xf32>
    tpu.vector_store %arg7[%c0_18, %c0_19, %c0_20], %36 {strides = array<i32>} : memref<1x16x32xf32, #tpu.memory_space<vmem>>, vector<1x16x32xf32>,
    return
  }
  func.func @transform_0(%arg0: i32) -> (i32, i32, i32) {
    %c0_i32 = arith.constant 0 : i32
    %c0_i32_0 = arith.constant 0 : i32
    %c0_i32_1 = arith.constant 0 : i32
    return %arg0, %c0_i32, %c0_i32_0 : i32, i32, i32
  }
  func.func @transform_1(%arg0: i32) -> (i32, i32) {
    %c0_i32 = arith.constant 0 : i32
    %c0_i32_0 = arith.constant 0 : i32
    %c0_i32_1 = arith.constant 0 : i32
    return %c0_i32, %c0_i32_0 : i32, i32
  }
  func.func @transform_2(%arg0: i32) -> (i32, i32) {
    %c0_i32 = arith.constant 0 : i32
    %c0_i32_0 = arith.constant 0 : i32
    %c0_i32_1 = arith.constant 0 : i32
    return %c0_i32, %c0_i32_0 : i32, i32
  }
  func.func @transform_3(%arg0: i32) -> (i32, i32, i32) {
    %c0_i32 = arith.constant 0 : i32
    %c0_i32_0 = arith.constant 0 : i32
    %c0_i32_1 = arith.constant 0 : i32
    %c0_i32_2 = arith.constant 0 : i32
    return %c0_i32, %c0_i32_0, %c0_i32_1 : i32, i32, i32
  }
  func.func @transform_4(%arg0: i32) -> (i32, i32) {
    %c0_i32 = arith.constant 0 : i32
    %c0_i32_0 = arith.constant 0 : i32
    %c0_i32_1 = arith.constant 0 : i32
    return %c0_i32, %c0_i32_0 : i32, i32
  }
  func.func @transform_5(%arg0: i32) -> (i32, i32) {
    %c0_i32 = arith.constant 0 : i32
    %c0_i32_0 = arith.constant 0 : i32
    %c0_i32_1 = arith.constant 0 : i32
    return %c0_i32, %c0_i32_0 : i32, i32
  }
  func.func @transform_6(%arg0: i32) -> (i32, i32, i32) {
    %c0_i32 = arith.constant 0 : i32
    %c0_i32_0 = arith.constant 0 : i32
    %c0_i32_1 = arith.constant 0 : i32
    return %arg0, %c0_i32, %c0_i32_0 : i32, i32, i32
  }
}

module attributes {stable_mosaic.version = 11 : i64} {
  func.func @_attn_ln_kernel(%arg0: i32, %arg1: memref<16x32xf32, #tpu.memory_space<vmem>>, %arg2: memref<32x32xf32, #tpu.memory_space<vmem>>, %arg3: memref<32x32xf32, #tpu.memory_space<vmem>>, %arg4: memref<1x32xf32, #tpu.memory_space<vmem>>, %arg5: memref<32x32xf32, #tpu.memory_space<vmem>>, %arg6: memref<1x32xf32, #tpu.memory_space<vmem>>, %arg7: memref<32x32xf32, #tpu.memory_space<vmem>>, %arg8: memref<1x32xf32, #tpu.memory_space<vmem>>, %arg9: memref<32x32xf32, #tpu.memory_space<vmem>>, %arg10: memref<1x32xf32, #tpu.memory_space<vmem>>, %arg11: memref<16x32xf32, #tpu.memory_space<vmem>>, %arg12: memref<1x32xf32, #tpu.memory_space<vmem>>, %arg13: memref<1x32xf32, #tpu.memory_space<vmem>>, %arg14: memref<16x32xf32, #tpu.memory_space<vmem>>) attributes {dimension_semantics = [#tpu.dimension_semantics<arbitrary>], iteration_bounds = array<i64: 1>, scalar_prefetch = 0 : i64, scratch_operands = 0 : i64, tpu.core_type = #tpu.core_type<tc>, window_params = [{pipeline_mode = #tpu.pipeline_mode<synchronous>, transform_indices = @transform_0, window_bounds = array<i64: 16, 32>}, {pipeline_mode = #tpu.pipeline_mode<synchronous>, transform_indices = @transform_1, window_bounds = array<i64: 32, 32>}, {pipeline_mode = #tpu.pipeline_mode<synchronous>, transform_indices = @transform_2, window_bounds = array<i64: 32, 32>}, {pipeline_mode = #tpu.pipeline_mode<synchronous>, transform_indices = @transform_3, window_bounds = array<i64: 1, 32>}, {pipeline_mode = #tpu.pipeline_mode<synchronous>, transform_indices = @transform_4, window_bounds = array<i64: 32, 32>}, {pipeline_mode = #tpu.pipeline_mode<synchronous>, transform_indices = @transform_5, window_bounds = array<i64: 1, 32>}, {pipeline_mode = #tpu.pipeline_mode<synchronous>, transform_indices = @transform_6, window_bounds = array<i64: 32, 32>}, {pipeline_mode = #tpu.pipeline_mode<synchronous>, transform_indices = @transform_7, window_bounds = array<i64: 1, 32>}, {pipeline_mode = #tpu.pipeline_mode<synchronous>, transform_indices = @transform_8, window_bounds = array<i64: 32, 32>}, {pipeline_mode = #tpu.pipeline_mode<synchronous>, transform_indices = @transform_9, window_bounds = array<i64: 1, 32>}, {pipeline_mode = #tpu.pipeline_mode<synchronous>, transform_indices = @transform_10, window_bounds = array<i64: 16, 32>}, {pipeline_mode = #tpu.pipeline_mode<synchronous>, transform_indices = @transform_11, window_bounds = array<i64: 1, 32>}, {pipeline_mode = #tpu.pipeline_mode<synchronous>, transform_indices = @transform_12, window_bounds = array<i64: 1, 32>}, {pipeline_mode = #tpu.pipeline_mode<synchronous>, transform_indices = @transform_13, window_bounds = array<i64: 16, 32>}]} {
    %c0 = arith.constant 0 : index
    %c0_0 = arith.constant 0 : index
    %0 = vector.load %arg1[%c0, %c0_0] : memref<16x32xf32, #tpu.memory_space<vmem>>, vector<16x32xf32>
    %c0_1 = arith.constant 0 : index
    %c0_2 = arith.constant 0 : index
    %1 = vector.load %arg2[%c0_1, %c0_2] : memref<32x32xf32, #tpu.memory_space<vmem>>, vector<32x32xf32>
    %c0_3 = arith.constant 0 : index
    %c0_4 = arith.constant 0 : index
    %2 = vector.load %arg3[%c0_3, %c0_4] : memref<32x32xf32, #tpu.memory_space<vmem>>, vector<32x32xf32>
    %c0_5 = arith.constant 0 : index
    %c0_6 = arith.constant 0 : index
    %3 = vector.load %arg4[%c0_5, %c0_6] : memref<1x32xf32, #tpu.memory_space<vmem>>, vector<1x32xf32>
    %c0_7 = arith.constant 0 : index
    %c0_8 = arith.constant 0 : index
    %4 = vector.load %arg5[%c0_7, %c0_8] : memref<32x32xf32, #tpu.memory_space<vmem>>, vector<32x32xf32>
    %c0_9 = arith.constant 0 : index
    %c0_10 = arith.constant 0 : index
    %5 = vector.load %arg6[%c0_9, %c0_10] : memref<1x32xf32, #tpu.memory_space<vmem>>, vector<1x32xf32>
    %c0_11 = arith.constant 0 : index
    %c0_12 = arith.constant 0 : index
    %6 = vector.load %arg7[%c0_11, %c0_12] : memref<32x32xf32, #tpu.memory_space<vmem>>, vector<32x32xf32>
    %c0_13 = arith.constant 0 : index
    %c0_14 = arith.constant 0 : index
    %7 = vector.load %arg8[%c0_13, %c0_14] : memref<1x32xf32, #tpu.memory_space<vmem>>, vector<1x32xf32>
    %c0_15 = arith.constant 0 : index
    %c0_16 = arith.constant 0 : index
    %8 = vector.load %arg9[%c0_15, %c0_16] : memref<32x32xf32, #tpu.memory_space<vmem>>, vector<32x32xf32>
    %c0_17 = arith.constant 0 : index
    %c0_18 = arith.constant 0 : index
    %9 = vector.load %arg10[%c0_17, %c0_18] : memref<1x32xf32, #tpu.memory_space<vmem>>, vector<1x32xf32>
    %c0_19 = arith.constant 0 : index
    %c0_20 = arith.constant 0 : index
    %10 = vector.load %arg11[%c0_19, %c0_20] : memref<16x32xf32, #tpu.memory_space<vmem>>, vector<16x32xf32>
    %cst = arith.constant dense<0.000000e+00> : vector<16x32xf32>
    %11 = tpu.matmul %0, %2, %cst {dimension_numbers = #tpu.dot_dimension_numbers<[1], [0], [0], [1], [0, 0, 1, 1], [], []>} : vector<16x32xf32>, vector<32x32xf32>, vector<16x32xf32> -> vector<16x32xf32>
    %12 = vector.broadcast %3 : vector<1x32xf32> to vector<16x32xf32>
    %13 = arith.addf %11, %12 : vector<16x32xf32>
    %cst_21 = arith.constant dense<0.000000e+00> : vector<32x32xf32>
    %14 = tpu.matmul %1, %4, %cst_21 {dimension_numbers = #tpu.dot_dimension_numbers<[1], [0], [0], [1], [0, 0, 1, 1], [], []>} : vector<32x32xf32>, vector<32x32xf32>, vector<32x32xf32> -> vector<32x32xf32>
    %15 = vector.broadcast %5 : vector<1x32xf32> to vector<32x32xf32>
    %16 = arith.addf %14, %15 : vector<32x32xf32>
    %cst_22 = arith.constant dense<0.000000e+00> : vector<32x32xf32>
    %17 = tpu.matmul %1, %6, %cst_22 {dimension_numbers = #tpu.dot_dimension_numbers<[1], [0], [0], [1], [0, 0, 1, 1], [], []>} : vector<32x32xf32>, vector<32x32xf32>, vector<32x32xf32> -> vector<32x32xf32>
    %18 = vector.broadcast %7 : vector<1x32xf32> to vector<32x32xf32>
    %19 = arith.addf %17, %18 : vector<32x32xf32>
    %20 = vector.extract_strided_slice %13 {offsets = [0, 0], sizes = [16, 8], strides = [1, 1]} : vector<16x32xf32> to vector<16x8xf32>
    %21 = vector.extract_strided_slice %16 {offsets = [0, 0], sizes = [32, 8], strides = [1, 1]} : vector<32x32xf32> to vector<32x8xf32>
    %22 = vector.extract_strided_slice %19 {offsets = [0, 0], sizes = [32, 8], strides = [1, 1]} : vector<32x32xf32> to vector<32x8xf32>
    %cst_23 = arith.constant dense<0.000000e+00> : vector<16x32xf32>
    %23 = tpu.matmul %20, %21, %cst_23 {dimension_numbers = #tpu.dot_dimension_numbers<[1], [1], [0], [0], [0, 0, 1, 0], [], []>} : vector<16x8xf32>, vector<32x8xf32>, vector<16x32xf32> -> vector<16x32xf32>
    %cst_24 = arith.constant 0.353553385 : f32
    %24 = vector.broadcast %cst_24 : f32 to vector<16x32xf32>
    %25 = arith.mulf %23, %24 : vector<16x32xf32>
    %26 = arith.addf %25, %10 : vector<16x32xf32>
    %cst_25 = arith.constant dense<0xFF800000> : vector<16xf32>
    %27 = vector.multi_reduction <maximumf>, %26, %cst_25 [1] : vector<16x32xf32> to vector<16xf32>
    %28 = vector.shape_cast %27 : vector<16xf32> to vector<16x1xf32>
    %29 = vector.broadcast %28 : vector<16x1xf32> to vector<16x32xf32>
    %30 = arith.subf %26, %29 : vector<16x32xf32>
    %31 = math.exp %30 : vector<16x32xf32>
    %cst_26 = arith.constant dense<0.000000e+00> : vector<16xf32>
    %32 = vector.multi_reduction <add>, %31, %cst_26 [1] : vector<16x32xf32> to vector<16xf32>
    %33 = vector.shape_cast %32 : vector<16xf32> to vector<16x1xf32>
    %34 = vector.broadcast %33 : vector<16x1xf32> to vector<16x32xf32>
    %35 = arith.divf %31, %34 : vector<16x32xf32>
    %cst_27 = arith.constant dense<0.000000e+00> : vector<16x8xf32>
    %36 = tpu.matmul %35, %22, %cst_27 {dimension_numbers = #tpu.dot_dimension_numbers<[1], [0], [0], [1], [0, 0, 1, 1], [], []>} : vector<16x32xf32>, vector<32x8xf32>, vector<16x8xf32> -> vector<16x8xf32>
    %37 = vector.extract_strided_slice %13 {offsets = [0, 8], sizes = [16, 8], strides = [1, 1]} : vector<16x32xf32> to vector<16x8xf32>
    %38 = vector.extract_strided_slice %16 {offsets = [0, 8], sizes = [32, 8], strides = [1, 1]} : vector<32x32xf32> to vector<32x8xf32>
    %39 = vector.extract_strided_slice %19 {offsets = [0, 8], sizes = [32, 8], strides = [1, 1]} : vector<32x32xf32> to vector<32x8xf32>
    %cst_28 = arith.constant dense<0.000000e+00> : vector<16x32xf32>
    %40 = tpu.matmul %37, %38, %cst_28 {dimension_numbers = #tpu.dot_dimension_numbers<[1], [1], [0], [0], [0, 0, 1, 0], [], []>} : vector<16x8xf32>, vector<32x8xf32>, vector<16x32xf32> -> vector<16x32xf32>
    %cst_29 = arith.constant 0.353553385 : f32
    %41 = vector.broadcast %cst_29 : f32 to vector<16x32xf32>
    %42 = arith.mulf %40, %41 : vector<16x32xf32>
    %43 = arith.addf %42, %10 : vector<16x32xf32>
    %cst_30 = arith.constant dense<0xFF800000> : vector<16xf32>
    %44 = vector.multi_reduction <maximumf>, %43, %cst_30 [1] : vector<16x32xf32> to vector<16xf32>
    %45 = vector.shape_cast %44 : vector<16xf32> to vector<16x1xf32>
    %46 = vector.broadcast %45 : vector<16x1xf32> to vector<16x32xf32>
    %47 = arith.subf %43, %46 : vector<16x32xf32>
    %48 = math.exp %47 : vector<16x32xf32>
    %cst_31 = arith.constant dense<0.000000e+00> : vector<16xf32>
    %49 = vector.multi_reduction <add>, %48, %cst_31 [1] : vector<16x32xf32> to vector<16xf32>
    %50 = vector.shape_cast %49 : vector<16xf32> to vector<16x1xf32>
    %51 = vector.broadcast %50 : vector<16x1xf32> to vector<16x32xf32>
    %52 = arith.divf %48, %51 : vector<16x32xf32>
    %cst_32 = arith.constant dense<0.000000e+00> : vector<16x8xf32>
    %53 = tpu.matmul %52, %39, %cst_32 {dimension_numbers = #tpu.dot_dimension_numbers<[1], [0], [0], [1], [0, 0, 1, 1], [], []>} : vector<16x32xf32>, vector<32x8xf32>, vector<16x8xf32> -> vector<16x8xf32>
    %54 = vector.extract_strided_slice %13 {offsets = [0, 16], sizes = [16, 8], strides = [1, 1]} : vector<16x32xf32> to vector<16x8xf32>
    %55 = vector.extract_strided_slice %16 {offsets = [0, 16], sizes = [32, 8], strides = [1, 1]} : vector<32x32xf32> to vector<32x8xf32>
    %56 = vector.extract_strided_slice %19 {offsets = [0, 16], sizes = [32, 8], strides = [1, 1]} : vector<32x32xf32> to vector<32x8xf32>
    %cst_33 = arith.constant dense<0.000000e+00> : vector<16x32xf32>
    %57 = tpu.matmul %54, %55, %cst_33 {dimension_numbers = #tpu.dot_dimension_numbers<[1], [1], [0], [0], [0, 0, 1, 0], [], []>} : vector<16x8xf32>, vector<32x8xf32>, vector<16x32xf32> -> vector<16x32xf32>
    %cst_34 = arith.constant 0.353553385 : f32
    %58 = vector.broadcast %cst_34 : f32 to vector<16x32xf32>
    %59 = arith.mulf %57, %58 : vector<16x32xf32>
    %60 = arith.addf %59, %10 : vector<16x32xf32>
    %cst_35 = arith.constant dense<0xFF800000> : vector<16xf32>
    %61 = vector.multi_reduction <maximumf>, %60, %cst_35 [1] : vector<16x32xf32> to vector<16xf32>
    %62 = vector.shape_cast %61 : vector<16xf32> to vector<16x1xf32>
    %63 = vector.broadcast %62 : vector<16x1xf32> to vector<16x32xf32>
    %64 = arith.subf %60, %63 : vector<16x32xf32>
    %65 = math.exp %64 : vector<16x32xf32>
    %cst_36 = arith.constant dense<0.000000e+00> : vector<16xf32>
    %66 = vector.multi_reduction <add>, %65, %cst_36 [1] : vector<16x32xf32> to vector<16xf32>
    %67 = vector.shape_cast %66 : vector<16xf32> to vector<16x1xf32>
    %68 = vector.broadcast %67 : vector<16x1xf32> to vector<16x32xf32>
    %69 = arith.divf %65, %68 : vector<16x32xf32>
    %cst_37 = arith.constant dense<0.000000e+00> : vector<16x8xf32>
    %70 = tpu.matmul %69, %56, %cst_37 {dimension_numbers = #tpu.dot_dimension_numbers<[1], [0], [0], [1], [0, 0, 1, 1], [], []>} : vector<16x32xf32>, vector<32x8xf32>, vector<16x8xf32> -> vector<16x8xf32>
    %71 = vector.extract_strided_slice %13 {offsets = [0, 24], sizes = [16, 8], strides = [1, 1]} : vector<16x32xf32> to vector<16x8xf32>
    %72 = vector.extract_strided_slice %16 {offsets = [0, 24], sizes = [32, 8], strides = [1, 1]} : vector<32x32xf32> to vector<32x8xf32>
    %73 = vector.extract_strided_slice %19 {offsets = [0, 24], sizes = [32, 8], strides = [1, 1]} : vector<32x32xf32> to vector<32x8xf32>
    %cst_38 = arith.constant dense<0.000000e+00> : vector<16x32xf32>
    %74 = tpu.matmul %71, %72, %cst_38 {dimension_numbers = #tpu.dot_dimension_numbers<[1], [1], [0], [0], [0, 0, 1, 0], [], []>} : vector<16x8xf32>, vector<32x8xf32>, vector<16x32xf32> -> vector<16x32xf32>
    %cst_39 = arith.constant 0.353553385 : f32
    %75 = vector.broadcast %cst_39 : f32 to vector<16x32xf32>
    %76 = arith.mulf %74, %75 : vector<16x32xf32>
    %77 = arith.addf %76, %10 : vector<16x32xf32>
    %cst_40 = arith.constant dense<0xFF800000> : vector<16xf32>
    %78 = vector.multi_reduction <maximumf>, %77, %cst_40 [1] : vector<16x32xf32> to vector<16xf32>
    %79 = vector.shape_cast %78 : vector<16xf32> to vector<16x1xf32>
    %80 = vector.broadcast %79 : vector<16x1xf32> to vector<16x32xf32>
    %81 = arith.subf %77, %80 : vector<16x32xf32>
    %82 = math.exp %81 : vector<16x32xf32>
    %cst_41 = arith.constant dense<0.000000e+00> : vector<16xf32>
    %83 = vector.multi_reduction <add>, %82, %cst_41 [1] : vector<16x32xf32> to vector<16xf32>
    %84 = vector.shape_cast %83 : vector<16xf32> to vector<16x1xf32>
    %85 = vector.broadcast %84 : vector<16x1xf32> to vector<16x32xf32>
    %86 = arith.divf %82, %85 : vector<16x32xf32>
    %cst_42 = arith.constant dense<0.000000e+00> : vector<16x8xf32>
    %87 = tpu.matmul %86, %73, %cst_42 {dimension_numbers = #tpu.dot_dimension_numbers<[1], [0], [0], [1], [0, 0, 1, 1], [], []>} : vector<16x32xf32>, vector<32x8xf32>, vector<16x8xf32> -> vector<16x8xf32>
    %88 = tpu.concatenate %36, %53, %70, %87 in 1 : vector<16x8xf32>, vector<16x8xf32>, vector<16x8xf32>, vector<16x8xf32> -> vector<16x32xf32>
    %cst_43 = arith.constant dense<0.000000e+00> : vector<16x32xf32>
    %89 = tpu.matmul %88, %8, %cst_43 {dimension_numbers = #tpu.dot_dimension_numbers<[1], [0], [0], [1], [0, 0, 1, 1], [], []>} : vector<16x32xf32>, vector<32x32xf32>, vector<16x32xf32> -> vector<16x32xf32>
    %90 = vector.broadcast %9 : vector<1x32xf32> to vector<16x32xf32>
    %91 = arith.addf %89, %90 : vector<16x32xf32>
    %92 = arith.addf %0, %91 : vector<16x32xf32>
    %c0_44 = arith.constant 0 : index
    %c0_45 = arith.constant 0 : index
    %93 = vector.load %arg12[%c0_44, %c0_45] : memref<1x32xf32, #tpu.memory_space<vmem>>, vector<1x32xf32>
    %c0_46 = arith.constant 0 : index
    %c0_47 = arith.constant 0 : index
    %94 = vector.load %arg13[%c0_46, %c0_47] : memref<1x32xf32, #tpu.memory_space<vmem>>, vector<1x32xf32>
    %cst_48 = arith.constant dense<0.000000e+00> : vector<16xf32>
    %95 = vector.multi_reduction <add>, %92, %cst_48 [1] : vector<16x32xf32> to vector<16xf32>
    %96 = vector.shape_cast %95 : vector<16xf32> to vector<16x1xf32>
    %cst_49 = arith.constant 3.200000e+01 : f32
    %97 = vector.broadcast %cst_49 : f32 to vector<16x1xf32>
    %98 = arith.divf %96, %97 : vector<16x1xf32>
    %99 = vector.broadcast %98 : vector<16x1xf32> to vector<16x32xf32>
    %100 = arith.subf %92, %99 : vector<16x32xf32>
    %101 = arith.mulf %100, %100 : vector<16x32xf32>
    %cst_50 = arith.constant dense<0.000000e+00> : vector<16xf32>
    %102 = vector.multi_reduction <add>, %101, %cst_50 [1] : vector<16x32xf32> to vector<16xf32>
    %103 = vector.shape_cast %102 : vector<16xf32> to vector<16x1xf32>
    %cst_51 = arith.constant 3.200000e+01 : f32
    %104 = vector.broadcast %cst_51 : f32 to vector<16x1xf32>
    %105 = arith.divf %103, %104 : vector<16x1xf32>
    %106 = vector.broadcast %98 : vector<16x1xf32> to vector<16x32xf32>
    %107 = arith.subf %92, %106 : vector<16x32xf32>
    %cst_52 = arith.constant 9.99999974E-6 : f32
    %108 = vector.broadcast %cst_52 : f32 to vector<16x1xf32>
    %109 = arith.addf %105, %108 : vector<16x1xf32>
    %110 = math.rsqrt %109 : vector<16x1xf32>
    %111 = vector.broadcast %110 : vector<16x1xf32> to vector<16x32xf32>
    %112 = arith.mulf %107, %111 : vector<16x32xf32>
    %113 = vector.broadcast %93 : vector<1x32xf32> to vector<16x32xf32>
    %114 = arith.mulf %112, %113 : vector<16x32xf32>
    %115 = vector.broadcast %94 : vector<1x32xf32> to vector<16x32xf32>
    %116 = arith.addf %114, %115 : vector<16x32xf32>
    %c0_53 = arith.constant 0 : index
    %c0_54 = arith.constant 0 : index
    %117 = vector.load %arg14[%c0_53, %c0_54] : memref<16x32xf32, #tpu.memory_space<vmem>>, vector<16x32xf32>
    tpu.vector_store %arg14[%c0_53, %c0_54], %116 {strides = array<i32>} : memref<16x32xf32, #tpu.memory_space<vmem>>, vector<16x32xf32>,
    return
  }
  func.func @transform_0(%arg0: i32) -> (i32, i32) {
    %c0_i32 = arith.constant 0 : i32
    %c0_i32_0 = arith.constant 0 : i32
    %c0_i32_1 = arith.constant 0 : i32
    return %c0_i32, %c0_i32_0 : i32, i32
  }
  func.func @transform_1(%arg0: i32) -> (i32, i32) {
    %c0_i32 = arith.constant 0 : i32
    %c0_i32_0 = arith.constant 0 : i32
    %c0_i32_1 = arith.constant 0 : i32
    return %c0_i32, %c0_i32_0 : i32, i32
  }
  func.func @transform_2(%arg0: i32) -> (i32, i32) {
    %c0_i32 = arith.constant 0 : i32
    %c0_i32_0 = arith.constant 0 : i32
    %c0_i32_1 = arith.constant 0 : i32
    return %c0_i32, %c0_i32_0 : i32, i32
  }
  func.func @transform_3(%arg0: i32) -> (i32, i32) {
    %c0_i32 = arith.constant 0 : i32
    %c0_i32_0 = arith.constant 0 : i32
    %c0_i32_1 = arith.constant 0 : i32
    return %c0_i32, %c0_i32_0 : i32, i32
  }
  func.func @transform_4(%arg0: i32) -> (i32, i32) {
    %c0_i32 = arith.constant 0 : i32
    %c0_i32_0 = arith.constant 0 : i32
    %c0_i32_1 = arith.constant 0 : i32
    return %c0_i32, %c0_i32_0 : i32, i32
  }
  func.func @transform_5(%arg0: i32) -> (i32, i32) {
    %c0_i32 = arith.constant 0 : i32
    %c0_i32_0 = arith.constant 0 : i32
    %c0_i32_1 = arith.constant 0 : i32
    return %c0_i32, %c0_i32_0 : i32, i32
  }
  func.func @transform_6(%arg0: i32) -> (i32, i32) {
    %c0_i32 = arith.constant 0 : i32
    %c0_i32_0 = arith.constant 0 : i32
    %c0_i32_1 = arith.constant 0 : i32
    return %c0_i32, %c0_i32_0 : i32, i32
  }
  func.func @transform_7(%arg0: i32) -> (i32, i32) {
    %c0_i32 = arith.constant 0 : i32
    %c0_i32_0 = arith.constant 0 : i32
    %c0_i32_1 = arith.constant 0 : i32
    return %c0_i32, %c0_i32_0 : i32, i32
  }
  func.func @transform_8(%arg0: i32) -> (i32, i32) {
    %c0_i32 = arith.constant 0 : i32
    %c0_i32_0 = arith.constant 0 : i32
    %c0_i32_1 = arith.constant 0 : i32
    return %c0_i32, %c0_i32_0 : i32, i32
  }
  func.func @transform_9(%arg0: i32) -> (i32, i32) {
    %c0_i32 = arith.constant 0 : i32
    %c0_i32_0 = arith.constant 0 : i32
    %c0_i32_1 = arith.constant 0 : i32
    return %c0_i32, %c0_i32_0 : i32, i32
  }
  func.func @transform_10(%arg0: i32) -> (i32, i32) {
    %c0_i32 = arith.constant 0 : i32
    %c0_i32_0 = arith.constant 0 : i32
    %c0_i32_1 = arith.constant 0 : i32
    return %c0_i32, %c0_i32_0 : i32, i32
  }
  func.func @transform_11(%arg0: i32) -> (i32, i32) {
    %c0_i32 = arith.constant 0 : i32
    %c0_i32_0 = arith.constant 0 : i32
    %c0_i32_1 = arith.constant 0 : i32
    return %c0_i32, %c0_i32_0 : i32, i32
  }
  func.func @transform_12(%arg0: i32) -> (i32, i32) {
    %c0_i32 = arith.constant 0 : i32
    %c0_i32_0 = arith.constant 0 : i32
    %c0_i32_1 = arith.constant 0 : i32
    return %c0_i32, %c0_i32_0 : i32, i32
  }
  func.func @transform_13(%arg0: i32) -> (i32, i32) {
    %c0_i32 = arith.constant 0 : i32
    %c0_i32_0 = arith.constant 0 : i32
    %c0_i32_1 = arith.constant 0 : i32
    return %c0_i32, %c0_i32_0 : i32, i32
  }
}

module attributes {stable_mosaic.version = 11 : i64} {
  func.func @_mlp_ln_kernel(%arg0: i32, %arg1: memref<16x32xf32, #tpu.memory_space<vmem>>, %arg2: memref<32x32xf32, #tpu.memory_space<vmem>>, %arg3: memref<1x32xf32, #tpu.memory_space<vmem>>, %arg4: memref<32x32xf32, #tpu.memory_space<vmem>>, %arg5: memref<1x32xf32, #tpu.memory_space<vmem>>, %arg6: memref<1x32xf32, #tpu.memory_space<vmem>>, %arg7: memref<1x32xf32, #tpu.memory_space<vmem>>, %arg8: memref<16x32xf32, #tpu.memory_space<vmem>>) attributes {dimension_semantics = [#tpu.dimension_semantics<arbitrary>], iteration_bounds = array<i64: 1>, scalar_prefetch = 0 : i64, scratch_operands = 0 : i64, tpu.core_type = #tpu.core_type<tc>, window_params = [{pipeline_mode = #tpu.pipeline_mode<synchronous>, transform_indices = @transform_0, window_bounds = array<i64: 16, 32>}, {pipeline_mode = #tpu.pipeline_mode<synchronous>, transform_indices = @transform_1, window_bounds = array<i64: 32, 32>}, {pipeline_mode = #tpu.pipeline_mode<synchronous>, transform_indices = @transform_2, window_bounds = array<i64: 1, 32>}, {pipeline_mode = #tpu.pipeline_mode<synchronous>, transform_indices = @transform_3, window_bounds = array<i64: 32, 32>}, {pipeline_mode = #tpu.pipeline_mode<synchronous>, transform_indices = @transform_4, window_bounds = array<i64: 1, 32>}, {pipeline_mode = #tpu.pipeline_mode<synchronous>, transform_indices = @transform_5, window_bounds = array<i64: 1, 32>}, {pipeline_mode = #tpu.pipeline_mode<synchronous>, transform_indices = @transform_6, window_bounds = array<i64: 1, 32>}, {pipeline_mode = #tpu.pipeline_mode<synchronous>, transform_indices = @transform_7, window_bounds = array<i64: 16, 32>}]} {
    %c0 = arith.constant 0 : index
    %c0_0 = arith.constant 0 : index
    %0 = vector.load %arg1[%c0, %c0_0] : memref<16x32xf32, #tpu.memory_space<vmem>>, vector<16x32xf32>
    %c0_1 = arith.constant 0 : index
    %c0_2 = arith.constant 0 : index
    %1 = vector.load %arg2[%c0_1, %c0_2] : memref<32x32xf32, #tpu.memory_space<vmem>>, vector<32x32xf32>
    %cst = arith.constant dense<0.000000e+00> : vector<16x32xf32>
    %2 = tpu.matmul %0, %1, %cst {dimension_numbers = #tpu.dot_dimension_numbers<[1], [0], [0], [1], [0, 0, 1, 1], [], []>} : vector<16x32xf32>, vector<32x32xf32>, vector<16x32xf32> -> vector<16x32xf32>
    %c0_3 = arith.constant 0 : index
    %c0_4 = arith.constant 0 : index
    %3 = vector.load %arg3[%c0_3, %c0_4] : memref<1x32xf32, #tpu.memory_space<vmem>>, vector<1x32xf32>
    %4 = vector.broadcast %3 : vector<1x32xf32> to vector<16x32xf32>
    %5 = arith.addf %2, %4 : vector<16x32xf32>
    %cst_5 = arith.constant 0.707106769 : f32
    %6 = vector.broadcast %cst_5 : f32 to vector<16x32xf32>
    %7 = arith.mulf %5, %6 : vector<16x32xf32>
    %8 = math.absf %7 : vector<16x32xf32>
    %cst_6 = arith.constant 0.327591091 : f32
    %9 = vector.broadcast %cst_6 : f32 to vector<16x32xf32>
    %10 = arith.mulf %9, %8 : vector<16x32xf32>
    %cst_7 = arith.constant 1.000000e+00 : f32
    %11 = vector.broadcast %cst_7 : f32 to vector<16x32xf32>
    %12 = arith.addf %11, %10 : vector<16x32xf32>
    %cst_8 = arith.constant 1.000000e+00 : f32
    %13 = vector.broadcast %cst_8 : f32 to vector<16x32xf32>
    %14 = arith.divf %13, %12 : vector<16x32xf32>
    %cst_9 = arith.constant 1.06140542 : f32
    %15 = vector.broadcast %cst_9 : f32 to vector<16x32xf32>
    %16 = arith.mulf %14, %15 : vector<16x32xf32>
    %cst_10 = arith.constant -1.45315206 : f32
    %17 = vector.broadcast %cst_10 : f32 to vector<16x32xf32>
    %18 = arith.addf %17, %16 : vector<16x32xf32>
    %19 = arith.mulf %14, %18 : vector<16x32xf32>
    %cst_11 = arith.constant 1.42141378 : f32
    %20 = vector.broadcast %cst_11 : f32 to vector<16x32xf32>
    %21 = arith.addf %20, %19 : vector<16x32xf32>
    %22 = arith.mulf %14, %21 : vector<16x32xf32>
    %cst_12 = arith.constant -0.284496725 : f32
    %23 = vector.broadcast %cst_12 : f32 to vector<16x32xf32>
    %24 = arith.addf %23, %22 : vector<16x32xf32>
    %25 = arith.mulf %14, %24 : vector<16x32xf32>
    %cst_13 = arith.constant 0.254829586 : f32
    %26 = vector.broadcast %cst_13 : f32 to vector<16x32xf32>
    %27 = arith.addf %26, %25 : vector<16x32xf32>
    %28 = arith.mulf %14, %27 : vector<16x32xf32>
    %cst_14 = arith.constant 0.000000e+00 : f32
    %29 = vector.broadcast %cst_14 : f32 to vector<16x32xf32>
    %30 = arith.subf %29, %8 : vector<16x32xf32>
    %31 = arith.mulf %30, %8 : vector<16x32xf32>
    %32 = math.exp %31 : vector<16x32xf32>
    %33 = arith.mulf %28, %32 : vector<16x32xf32>
    %cst_15 = arith.constant 1.000000e+00 : f32
    %34 = vector.broadcast %cst_15 : f32 to vector<16x32xf32>
    %35 = arith.subf %34, %33 : vector<16x32xf32>
    %cst_16 = arith.constant 0.000000e+00 : f32
    %36 = vector.broadcast %cst_16 : f32 to vector<16x32xf32>
    %37 = arith.cmpf oge, %7, %36 : vector<16x32xf32>
    %cst_17 = arith.constant 0.000000e+00 : f32
    %38 = vector.broadcast %cst_17 : f32 to vector<16x32xf32>
    %39 = arith.subf %38, %35 : vector<16x32xf32>
    %40 = arith.select %37, %35, %39 : vector<16x32xi1>, vector<16x32xf32>
    %cst_18 = arith.constant 5.000000e-01 : f32
    %41 = vector.broadcast %cst_18 : f32 to vector<16x32xf32>
    %42 = arith.mulf %41, %5 : vector<16x32xf32>
    %cst_19 = arith.constant 1.000000e+00 : f32
    %43 = vector.broadcast %cst_19 : f32 to vector<16x32xf32>
    %44 = arith.addf %43, %40 : vector<16x32xf32>
    %45 = arith.mulf %42, %44 : vector<16x32xf32>
    %c0_20 = arith.constant 0 : index
    %c0_21 = arith.constant 0 : index
    %46 = vector.load %arg4[%c0_20, %c0_21] : memref<32x32xf32, #tpu.memory_space<vmem>>, vector<32x32xf32>
    %cst_22 = arith.constant dense<0.000000e+00> : vector<16x32xf32>
    %47 = tpu.matmul %45, %46, %cst_22 {dimension_numbers = #tpu.dot_dimension_numbers<[1], [0], [0], [1], [0, 0, 1, 1], [], []>} : vector<16x32xf32>, vector<32x32xf32>, vector<16x32xf32> -> vector<16x32xf32>
    %c0_23 = arith.constant 0 : index
    %c0_24 = arith.constant 0 : index
    %48 = vector.load %arg5[%c0_23, %c0_24] : memref<1x32xf32, #tpu.memory_space<vmem>>, vector<1x32xf32>
    %49 = vector.broadcast %48 : vector<1x32xf32> to vector<16x32xf32>
    %50 = arith.addf %47, %49 : vector<16x32xf32>
    %51 = arith.addf %0, %50 : vector<16x32xf32>
    %c0_25 = arith.constant 0 : index
    %c0_26 = arith.constant 0 : index
    %52 = vector.load %arg6[%c0_25, %c0_26] : memref<1x32xf32, #tpu.memory_space<vmem>>, vector<1x32xf32>
    %c0_27 = arith.constant 0 : index
    %c0_28 = arith.constant 0 : index
    %53 = vector.load %arg7[%c0_27, %c0_28] : memref<1x32xf32, #tpu.memory_space<vmem>>, vector<1x32xf32>
    %cst_29 = arith.constant dense<0.000000e+00> : vector<16xf32>
    %54 = vector.multi_reduction <add>, %51, %cst_29 [1] : vector<16x32xf32> to vector<16xf32>
    %55 = vector.shape_cast %54 : vector<16xf32> to vector<16x1xf32>
    %cst_30 = arith.constant 3.200000e+01 : f32
    %56 = vector.broadcast %cst_30 : f32 to vector<16x1xf32>
    %57 = arith.divf %55, %56 : vector<16x1xf32>
    %58 = vector.broadcast %57 : vector<16x1xf32> to vector<16x32xf32>
    %59 = arith.subf %51, %58 : vector<16x32xf32>
    %60 = arith.mulf %59, %59 : vector<16x32xf32>
    %cst_31 = arith.constant dense<0.000000e+00> : vector<16xf32>
    %61 = vector.multi_reduction <add>, %60, %cst_31 [1] : vector<16x32xf32> to vector<16xf32>
    %62 = vector.shape_cast %61 : vector<16xf32> to vector<16x1xf32>
    %cst_32 = arith.constant 3.200000e+01 : f32
    %63 = vector.broadcast %cst_32 : f32 to vector<16x1xf32>
    %64 = arith.divf %62, %63 : vector<16x1xf32>
    %65 = vector.broadcast %57 : vector<16x1xf32> to vector<16x32xf32>
    %66 = arith.subf %51, %65 : vector<16x32xf32>
    %cst_33 = arith.constant 9.99999974E-6 : f32
    %67 = vector.broadcast %cst_33 : f32 to vector<16x1xf32>
    %68 = arith.addf %64, %67 : vector<16x1xf32>
    %69 = math.rsqrt %68 : vector<16x1xf32>
    %70 = vector.broadcast %69 : vector<16x1xf32> to vector<16x32xf32>
    %71 = arith.mulf %66, %70 : vector<16x32xf32>
    %72 = vector.broadcast %52 : vector<1x32xf32> to vector<16x32xf32>
    %73 = arith.mulf %71, %72 : vector<16x32xf32>
    %74 = vector.broadcast %53 : vector<1x32xf32> to vector<16x32xf32>
    %75 = arith.addf %73, %74 : vector<16x32xf32>
    %c0_34 = arith.constant 0 : index
    %c0_35 = arith.constant 0 : index
    %76 = vector.load %arg8[%c0_34, %c0_35] : memref<16x32xf32, #tpu.memory_space<vmem>>, vector<16x32xf32>
    tpu.vector_store %arg8[%c0_34, %c0_35], %75 {strides = array<i32>} : memref<16x32xf32, #tpu.memory_space<vmem>>, vector<16x32xf32>,
    return
  }
  func.func @transform_0(%arg0: i32) -> (i32, i32) {
    %c0_i32 = arith.constant 0 : i32
    %c0_i32_0 = arith.constant 0 : i32
    %c0_i32_1 = arith.constant 0 : i32
    return %c0_i32, %c0_i32_0 : i32, i32
  }
  func.func @transform_1(%arg0: i32) -> (i32, i32) {
    %c0_i32 = arith.constant 0 : i32
    %c0_i32_0 = arith.constant 0 : i32
    %c0_i32_1 = arith.constant 0 : i32
    return %c0_i32, %c0_i32_0 : i32, i32
  }
  func.func @transform_2(%arg0: i32) -> (i32, i32) {
    %c0_i32 = arith.constant 0 : i32
    %c0_i32_0 = arith.constant 0 : i32
    %c0_i32_1 = arith.constant 0 : i32
    return %c0_i32, %c0_i32_0 : i32, i32
  }
  func.func @transform_3(%arg0: i32) -> (i32, i32) {
    %c0_i32 = arith.constant 0 : i32
    %c0_i32_0 = arith.constant 0 : i32
    %c0_i32_1 = arith.constant 0 : i32
    return %c0_i32, %c0_i32_0 : i32, i32
  }
  func.func @transform_4(%arg0: i32) -> (i32, i32) {
    %c0_i32 = arith.constant 0 : i32
    %c0_i32_0 = arith.constant 0 : i32
    %c0_i32_1 = arith.constant 0 : i32
    return %c0_i32, %c0_i32_0 : i32, i32
  }
  func.func @transform_5(%arg0: i32) -> (i32, i32) {
    %c0_i32 = arith.constant 0 : i32
    %c0_i32_0 = arith.constant 0 : i32
    %c0_i32_1 = arith.constant 0 : i32
    return %c0_i32, %c0_i32_0 : i32, i32
  }
  func.func @transform_6(%arg0: i32) -> (i32, i32) {
    %c0_i32 = arith.constant 0 : i32
    %c0_i32_0 = arith.constant 0 : i32
    %c0_i32_1 = arith.constant 0 : i32
    return %c0_i32, %c0_i32_0 : i32, i32
  }
  func.func @transform_7(%arg0: i32) -> (i32, i32) {
    %c0_i32 = arith.constant 0 : i32
    %c0_i32_0 = arith.constant 0 : i32
    %c0_i32_1 = arith.constant 0 : i32
    return %c0_i32, %c0_i32_0 : i32, i32
  }
}

module attributes {stable_mosaic.version = 11 : i64} {
  func.func @_attn_ln_kernel(%arg0: i32, %arg1: memref<32x32xf32, #tpu.memory_space<vmem>>, %arg2: memref<32x32xf32, #tpu.memory_space<vmem>>, %arg3: memref<32x32xf32, #tpu.memory_space<vmem>>, %arg4: memref<1x32xf32, #tpu.memory_space<vmem>>, %arg5: memref<32x32xf32, #tpu.memory_space<vmem>>, %arg6: memref<1x32xf32, #tpu.memory_space<vmem>>, %arg7: memref<32x32xf32, #tpu.memory_space<vmem>>, %arg8: memref<1x32xf32, #tpu.memory_space<vmem>>, %arg9: memref<32x32xf32, #tpu.memory_space<vmem>>, %arg10: memref<1x32xf32, #tpu.memory_space<vmem>>, %arg11: memref<32x32xf32, #tpu.memory_space<vmem>>, %arg12: memref<1x32xf32, #tpu.memory_space<vmem>>, %arg13: memref<1x32xf32, #tpu.memory_space<vmem>>, %arg14: memref<32x32xf32, #tpu.memory_space<vmem>>) attributes {dimension_semantics = [#tpu.dimension_semantics<arbitrary>], iteration_bounds = array<i64: 1>, scalar_prefetch = 0 : i64, scratch_operands = 0 : i64, tpu.core_type = #tpu.core_type<tc>, window_params = [{pipeline_mode = #tpu.pipeline_mode<synchronous>, transform_indices = @transform_0, window_bounds = array<i64: 32, 32>}, {pipeline_mode = #tpu.pipeline_mode<synchronous>, transform_indices = @transform_1, window_bounds = array<i64: 32, 32>}, {pipeline_mode = #tpu.pipeline_mode<synchronous>, transform_indices = @transform_2, window_bounds = array<i64: 32, 32>}, {pipeline_mode = #tpu.pipeline_mode<synchronous>, transform_indices = @transform_3, window_bounds = array<i64: 1, 32>}, {pipeline_mode = #tpu.pipeline_mode<synchronous>, transform_indices = @transform_4, window_bounds = array<i64: 32, 32>}, {pipeline_mode = #tpu.pipeline_mode<synchronous>, transform_indices = @transform_5, window_bounds = array<i64: 1, 32>}, {pipeline_mode = #tpu.pipeline_mode<synchronous>, transform_indices = @transform_6, window_bounds = array<i64: 32, 32>}, {pipeline_mode = #tpu.pipeline_mode<synchronous>, transform_indices = @transform_7, window_bounds = array<i64: 1, 32>}, {pipeline_mode = #tpu.pipeline_mode<synchronous>, transform_indices = @transform_8, window_bounds = array<i64: 32, 32>}, {pipeline_mode = #tpu.pipeline_mode<synchronous>, transform_indices = @transform_9, window_bounds = array<i64: 1, 32>}, {pipeline_mode = #tpu.pipeline_mode<synchronous>, transform_indices = @transform_10, window_bounds = array<i64: 32, 32>}, {pipeline_mode = #tpu.pipeline_mode<synchronous>, transform_indices = @transform_11, window_bounds = array<i64: 1, 32>}, {pipeline_mode = #tpu.pipeline_mode<synchronous>, transform_indices = @transform_12, window_bounds = array<i64: 1, 32>}, {pipeline_mode = #tpu.pipeline_mode<synchronous>, transform_indices = @transform_13, window_bounds = array<i64: 32, 32>}]} {
    %c0 = arith.constant 0 : index
    %c0_0 = arith.constant 0 : index
    %0 = vector.load %arg1[%c0, %c0_0] : memref<32x32xf32, #tpu.memory_space<vmem>>, vector<32x32xf32>
    %c0_1 = arith.constant 0 : index
    %c0_2 = arith.constant 0 : index
    %1 = vector.load %arg2[%c0_1, %c0_2] : memref<32x32xf32, #tpu.memory_space<vmem>>, vector<32x32xf32>
    %c0_3 = arith.constant 0 : index
    %c0_4 = arith.constant 0 : index
    %2 = vector.load %arg3[%c0_3, %c0_4] : memref<32x32xf32, #tpu.memory_space<vmem>>, vector<32x32xf32>
    %c0_5 = arith.constant 0 : index
    %c0_6 = arith.constant 0 : index
    %3 = vector.load %arg4[%c0_5, %c0_6] : memref<1x32xf32, #tpu.memory_space<vmem>>, vector<1x32xf32>
    %c0_7 = arith.constant 0 : index
    %c0_8 = arith.constant 0 : index
    %4 = vector.load %arg5[%c0_7, %c0_8] : memref<32x32xf32, #tpu.memory_space<vmem>>, vector<32x32xf32>
    %c0_9 = arith.constant 0 : index
    %c0_10 = arith.constant 0 : index
    %5 = vector.load %arg6[%c0_9, %c0_10] : memref<1x32xf32, #tpu.memory_space<vmem>>, vector<1x32xf32>
    %c0_11 = arith.constant 0 : index
    %c0_12 = arith.constant 0 : index
    %6 = vector.load %arg7[%c0_11, %c0_12] : memref<32x32xf32, #tpu.memory_space<vmem>>, vector<32x32xf32>
    %c0_13 = arith.constant 0 : index
    %c0_14 = arith.constant 0 : index
    %7 = vector.load %arg8[%c0_13, %c0_14] : memref<1x32xf32, #tpu.memory_space<vmem>>, vector<1x32xf32>
    %c0_15 = arith.constant 0 : index
    %c0_16 = arith.constant 0 : index
    %8 = vector.load %arg9[%c0_15, %c0_16] : memref<32x32xf32, #tpu.memory_space<vmem>>, vector<32x32xf32>
    %c0_17 = arith.constant 0 : index
    %c0_18 = arith.constant 0 : index
    %9 = vector.load %arg10[%c0_17, %c0_18] : memref<1x32xf32, #tpu.memory_space<vmem>>, vector<1x32xf32>
    %c0_19 = arith.constant 0 : index
    %c0_20 = arith.constant 0 : index
    %10 = vector.load %arg11[%c0_19, %c0_20] : memref<32x32xf32, #tpu.memory_space<vmem>>, vector<32x32xf32>
    %cst = arith.constant dense<0.000000e+00> : vector<32x32xf32>
    %11 = tpu.matmul %0, %2, %cst {dimension_numbers = #tpu.dot_dimension_numbers<[1], [0], [0], [1], [0, 0, 1, 1], [], []>} : vector<32x32xf32>, vector<32x32xf32>, vector<32x32xf32> -> vector<32x32xf32>
    %12 = vector.broadcast %3 : vector<1x32xf32> to vector<32x32xf32>
    %13 = arith.addf %11, %12 : vector<32x32xf32>
    %cst_21 = arith.constant dense<0.000000e+00> : vector<32x32xf32>
    %14 = tpu.matmul %1, %4, %cst_21 {dimension_numbers = #tpu.dot_dimension_numbers<[1], [0], [0], [1], [0, 0, 1, 1], [], []>} : vector<32x32xf32>, vector<32x32xf32>, vector<32x32xf32> -> vector<32x32xf32>
    %15 = vector.broadcast %5 : vector<1x32xf32> to vector<32x32xf32>
    %16 = arith.addf %14, %15 : vector<32x32xf32>
    %cst_22 = arith.constant dense<0.000000e+00> : vector<32x32xf32>
    %17 = tpu.matmul %1, %6, %cst_22 {dimension_numbers = #tpu.dot_dimension_numbers<[1], [0], [0], [1], [0, 0, 1, 1], [], []>} : vector<32x32xf32>, vector<32x32xf32>, vector<32x32xf32> -> vector<32x32xf32>
    %18 = vector.broadcast %7 : vector<1x32xf32> to vector<32x32xf32>
    %19 = arith.addf %17, %18 : vector<32x32xf32>
    %20 = vector.extract_strided_slice %13 {offsets = [0, 0], sizes = [32, 8], strides = [1, 1]} : vector<32x32xf32> to vector<32x8xf32>
    %21 = vector.extract_strided_slice %16 {offsets = [0, 0], sizes = [32, 8], strides = [1, 1]} : vector<32x32xf32> to vector<32x8xf32>
    %22 = vector.extract_strided_slice %19 {offsets = [0, 0], sizes = [32, 8], strides = [1, 1]} : vector<32x32xf32> to vector<32x8xf32>
    %cst_23 = arith.constant dense<0.000000e+00> : vector<32x32xf32>
    %23 = tpu.matmul %20, %21, %cst_23 {dimension_numbers = #tpu.dot_dimension_numbers<[1], [1], [0], [0], [0, 0, 1, 0], [], []>} : vector<32x8xf32>, vector<32x8xf32>, vector<32x32xf32> -> vector<32x32xf32>
    %cst_24 = arith.constant 0.353553385 : f32
    %24 = vector.broadcast %cst_24 : f32 to vector<32x32xf32>
    %25 = arith.mulf %23, %24 : vector<32x32xf32>
    %26 = arith.addf %25, %10 : vector<32x32xf32>
    %cst_25 = arith.constant dense<0xFF800000> : vector<32xf32>
    %27 = vector.multi_reduction <maximumf>, %26, %cst_25 [1] : vector<32x32xf32> to vector<32xf32>
    %28 = vector.shape_cast %27 : vector<32xf32> to vector<32x1xf32>
    %29 = vector.broadcast %28 : vector<32x1xf32> to vector<32x32xf32>
    %30 = arith.subf %26, %29 : vector<32x32xf32>
    %31 = math.exp %30 : vector<32x32xf32>
    %cst_26 = arith.constant dense<0.000000e+00> : vector<32xf32>
    %32 = vector.multi_reduction <add>, %31, %cst_26 [1] : vector<32x32xf32> to vector<32xf32>
    %33 = vector.shape_cast %32 : vector<32xf32> to vector<32x1xf32>
    %34 = vector.broadcast %33 : vector<32x1xf32> to vector<32x32xf32>
    %35 = arith.divf %31, %34 : vector<32x32xf32>
    %cst_27 = arith.constant dense<0.000000e+00> : vector<32x8xf32>
    %36 = tpu.matmul %35, %22, %cst_27 {dimension_numbers = #tpu.dot_dimension_numbers<[1], [0], [0], [1], [0, 0, 1, 1], [], []>} : vector<32x32xf32>, vector<32x8xf32>, vector<32x8xf32> -> vector<32x8xf32>
    %37 = vector.extract_strided_slice %13 {offsets = [0, 8], sizes = [32, 8], strides = [1, 1]} : vector<32x32xf32> to vector<32x8xf32>
    %38 = vector.extract_strided_slice %16 {offsets = [0, 8], sizes = [32, 8], strides = [1, 1]} : vector<32x32xf32> to vector<32x8xf32>
    %39 = vector.extract_strided_slice %19 {offsets = [0, 8], sizes = [32, 8], strides = [1, 1]} : vector<32x32xf32> to vector<32x8xf32>
    %cst_28 = arith.constant dense<0.000000e+00> : vector<32x32xf32>
    %40 = tpu.matmul %37, %38, %cst_28 {dimension_numbers = #tpu.dot_dimension_numbers<[1], [1], [0], [0], [0, 0, 1, 0], [], []>} : vector<32x8xf32>, vector<32x8xf32>, vector<32x32xf32> -> vector<32x32xf32>
    %cst_29 = arith.constant 0.353553385 : f32
    %41 = vector.broadcast %cst_29 : f32 to vector<32x32xf32>
    %42 = arith.mulf %40, %41 : vector<32x32xf32>
    %43 = arith.addf %42, %10 : vector<32x32xf32>
    %cst_30 = arith.constant dense<0xFF800000> : vector<32xf32>
    %44 = vector.multi_reduction <maximumf>, %43, %cst_30 [1] : vector<32x32xf32> to vector<32xf32>
    %45 = vector.shape_cast %44 : vector<32xf32> to vector<32x1xf32>
    %46 = vector.broadcast %45 : vector<32x1xf32> to vector<32x32xf32>
    %47 = arith.subf %43, %46 : vector<32x32xf32>
    %48 = math.exp %47 : vector<32x32xf32>
    %cst_31 = arith.constant dense<0.000000e+00> : vector<32xf32>
    %49 = vector.multi_reduction <add>, %48, %cst_31 [1] : vector<32x32xf32> to vector<32xf32>
    %50 = vector.shape_cast %49 : vector<32xf32> to vector<32x1xf32>
    %51 = vector.broadcast %50 : vector<32x1xf32> to vector<32x32xf32>
    %52 = arith.divf %48, %51 : vector<32x32xf32>
    %cst_32 = arith.constant dense<0.000000e+00> : vector<32x8xf32>
    %53 = tpu.matmul %52, %39, %cst_32 {dimension_numbers = #tpu.dot_dimension_numbers<[1], [0], [0], [1], [0, 0, 1, 1], [], []>} : vector<32x32xf32>, vector<32x8xf32>, vector<32x8xf32> -> vector<32x8xf32>
    %54 = vector.extract_strided_slice %13 {offsets = [0, 16], sizes = [32, 8], strides = [1, 1]} : vector<32x32xf32> to vector<32x8xf32>
    %55 = vector.extract_strided_slice %16 {offsets = [0, 16], sizes = [32, 8], strides = [1, 1]} : vector<32x32xf32> to vector<32x8xf32>
    %56 = vector.extract_strided_slice %19 {offsets = [0, 16], sizes = [32, 8], strides = [1, 1]} : vector<32x32xf32> to vector<32x8xf32>
    %cst_33 = arith.constant dense<0.000000e+00> : vector<32x32xf32>
    %57 = tpu.matmul %54, %55, %cst_33 {dimension_numbers = #tpu.dot_dimension_numbers<[1], [1], [0], [0], [0, 0, 1, 0], [], []>} : vector<32x8xf32>, vector<32x8xf32>, vector<32x32xf32> -> vector<32x32xf32>
    %cst_34 = arith.constant 0.353553385 : f32
    %58 = vector.broadcast %cst_34 : f32 to vector<32x32xf32>
    %59 = arith.mulf %57, %58 : vector<32x32xf32>
    %60 = arith.addf %59, %10 : vector<32x32xf32>
    %cst_35 = arith.constant dense<0xFF800000> : vector<32xf32>
    %61 = vector.multi_reduction <maximumf>, %60, %cst_35 [1] : vector<32x32xf32> to vector<32xf32>
    %62 = vector.shape_cast %61 : vector<32xf32> to vector<32x1xf32>
    %63 = vector.broadcast %62 : vector<32x1xf32> to vector<32x32xf32>
    %64 = arith.subf %60, %63 : vector<32x32xf32>
    %65 = math.exp %64 : vector<32x32xf32>
    %cst_36 = arith.constant dense<0.000000e+00> : vector<32xf32>
    %66 = vector.multi_reduction <add>, %65, %cst_36 [1] : vector<32x32xf32> to vector<32xf32>
    %67 = vector.shape_cast %66 : vector<32xf32> to vector<32x1xf32>
    %68 = vector.broadcast %67 : vector<32x1xf32> to vector<32x32xf32>
    %69 = arith.divf %65, %68 : vector<32x32xf32>
    %cst_37 = arith.constant dense<0.000000e+00> : vector<32x8xf32>
    %70 = tpu.matmul %69, %56, %cst_37 {dimension_numbers = #tpu.dot_dimension_numbers<[1], [0], [0], [1], [0, 0, 1, 1], [], []>} : vector<32x32xf32>, vector<32x8xf32>, vector<32x8xf32> -> vector<32x8xf32>
    %71 = vector.extract_strided_slice %13 {offsets = [0, 24], sizes = [32, 8], strides = [1, 1]} : vector<32x32xf32> to vector<32x8xf32>
    %72 = vector.extract_strided_slice %16 {offsets = [0, 24], sizes = [32, 8], strides = [1, 1]} : vector<32x32xf32> to vector<32x8xf32>
    %73 = vector.extract_strided_slice %19 {offsets = [0, 24], sizes = [32, 8], strides = [1, 1]} : vector<32x32xf32> to vector<32x8xf32>
    %cst_38 = arith.constant dense<0.000000e+00> : vector<32x32xf32>
    %74 = tpu.matmul %71, %72, %cst_38 {dimension_numbers = #tpu.dot_dimension_numbers<[1], [1], [0], [0], [0, 0, 1, 0], [], []>} : vector<32x8xf32>, vector<32x8xf32>, vector<32x32xf32> -> vector<32x32xf32>
    %cst_39 = arith.constant 0.353553385 : f32
    %75 = vector.broadcast %cst_39 : f32 to vector<32x32xf32>
    %76 = arith.mulf %74, %75 : vector<32x32xf32>
    %77 = arith.addf %76, %10 : vector<32x32xf32>
    %cst_40 = arith.constant dense<0xFF800000> : vector<32xf32>
    %78 = vector.multi_reduction <maximumf>, %77, %cst_40 [1] : vector<32x32xf32> to vector<32xf32>
    %79 = vector.shape_cast %78 : vector<32xf32> to vector<32x1xf32>
    %80 = vector.broadcast %79 : vector<32x1xf32> to vector<32x32xf32>
    %81 = arith.subf %77, %80 : vector<32x32xf32>
    %82 = math.exp %81 : vector<32x32xf32>
    %cst_41 = arith.constant dense<0.000000e+00> : vector<32xf32>
    %83 = vector.multi_reduction <add>, %82, %cst_41 [1] : vector<32x32xf32> to vector<32xf32>
    %84 = vector.shape_cast %83 : vector<32xf32> to vector<32x1xf32>
    %85 = vector.broadcast %84 : vector<32x1xf32> to vector<32x32xf32>
    %86 = arith.divf %82, %85 : vector<32x32xf32>
    %cst_42 = arith.constant dense<0.000000e+00> : vector<32x8xf32>
    %87 = tpu.matmul %86, %73, %cst_42 {dimension_numbers = #tpu.dot_dimension_numbers<[1], [0], [0], [1], [0, 0, 1, 1], [], []>} : vector<32x32xf32>, vector<32x8xf32>, vector<32x8xf32> -> vector<32x8xf32>
    %88 = tpu.concatenate %36, %53, %70, %87 in 1 : vector<32x8xf32>, vector<32x8xf32>, vector<32x8xf32>, vector<32x8xf32> -> vector<32x32xf32>
    %cst_43 = arith.constant dense<0.000000e+00> : vector<32x32xf32>
    %89 = tpu.matmul %88, %8, %cst_43 {dimension_numbers = #tpu.dot_dimension_numbers<[1], [0], [0], [1], [0, 0, 1, 1], [], []>} : vector<32x32xf32>, vector<32x32xf32>, vector<32x32xf32> -> vector<32x32xf32>
    %90 = vector.broadcast %9 : vector<1x32xf32> to vector<32x32xf32>
    %91 = arith.addf %89, %90 : vector<32x32xf32>
    %92 = arith.addf %0, %91 : vector<32x32xf32>
    %c0_44 = arith.constant 0 : index
    %c0_45 = arith.constant 0 : index
    %93 = vector.load %arg12[%c0_44, %c0_45] : memref<1x32xf32, #tpu.memory_space<vmem>>, vector<1x32xf32>
    %c0_46 = arith.constant 0 : index
    %c0_47 = arith.constant 0 : index
    %94 = vector.load %arg13[%c0_46, %c0_47] : memref<1x32xf32, #tpu.memory_space<vmem>>, vector<1x32xf32>
    %cst_48 = arith.constant dense<0.000000e+00> : vector<32xf32>
    %95 = vector.multi_reduction <add>, %92, %cst_48 [1] : vector<32x32xf32> to vector<32xf32>
    %96 = vector.shape_cast %95 : vector<32xf32> to vector<32x1xf32>
    %cst_49 = arith.constant 3.200000e+01 : f32
    %97 = vector.broadcast %cst_49 : f32 to vector<32x1xf32>
    %98 = arith.divf %96, %97 : vector<32x1xf32>
    %99 = vector.broadcast %98 : vector<32x1xf32> to vector<32x32xf32>
    %100 = arith.subf %92, %99 : vector<32x32xf32>
    %101 = arith.mulf %100, %100 : vector<32x32xf32>
    %cst_50 = arith.constant dense<0.000000e+00> : vector<32xf32>
    %102 = vector.multi_reduction <add>, %101, %cst_50 [1] : vector<32x32xf32> to vector<32xf32>
    %103 = vector.shape_cast %102 : vector<32xf32> to vector<32x1xf32>
    %cst_51 = arith.constant 3.200000e+01 : f32
    %104 = vector.broadcast %cst_51 : f32 to vector<32x1xf32>
    %105 = arith.divf %103, %104 : vector<32x1xf32>
    %106 = vector.broadcast %98 : vector<32x1xf32> to vector<32x32xf32>
    %107 = arith.subf %92, %106 : vector<32x32xf32>
    %cst_52 = arith.constant 9.99999974E-6 : f32
    %108 = vector.broadcast %cst_52 : f32 to vector<32x1xf32>
    %109 = arith.addf %105, %108 : vector<32x1xf32>
    %110 = math.rsqrt %109 : vector<32x1xf32>
    %111 = vector.broadcast %110 : vector<32x1xf32> to vector<32x32xf32>
    %112 = arith.mulf %107, %111 : vector<32x32xf32>
    %113 = vector.broadcast %93 : vector<1x32xf32> to vector<32x32xf32>
    %114 = arith.mulf %112, %113 : vector<32x32xf32>
    %115 = vector.broadcast %94 : vector<1x32xf32> to vector<32x32xf32>
    %116 = arith.addf %114, %115 : vector<32x32xf32>
    %c0_53 = arith.constant 0 : index
    %c0_54 = arith.constant 0 : index
    %117 = vector.load %arg14[%c0_53, %c0_54] : memref<32x32xf32, #tpu.memory_space<vmem>>, vector<32x32xf32>
    tpu.vector_store %arg14[%c0_53, %c0_54], %116 {strides = array<i32>} : memref<32x32xf32, #tpu.memory_space<vmem>>, vector<32x32xf32>,
    return
  }
  func.func @transform_0(%arg0: i32) -> (i32, i32) {
    %c0_i32 = arith.constant 0 : i32
    %c0_i32_0 = arith.constant 0 : i32
    %c0_i32_1 = arith.constant 0 : i32
    return %c0_i32, %c0_i32_0 : i32, i32
  }
  func.func @transform_1(%arg0: i32) -> (i32, i32) {
    %c0_i32 = arith.constant 0 : i32
    %c0_i32_0 = arith.constant 0 : i32
    %c0_i32_1 = arith.constant 0 : i32
    return %c0_i32, %c0_i32_0 : i32, i32
  }
  func.func @transform_2(%arg0: i32) -> (i32, i32) {
    %c0_i32 = arith.constant 0 : i32
    %c0_i32_0 = arith.constant 0 : i32
    %c0_i32_1 = arith.constant 0 : i32
    return %c0_i32, %c0_i32_0 : i32, i32
  }
  func.func @transform_3(%arg0: i32) -> (i32, i32) {
    %c0_i32 = arith.constant 0 : i32
    %c0_i32_0 = arith.constant 0 : i32
    %c0_i32_1 = arith.constant 0 : i32
    return %c0_i32, %c0_i32_0 : i32, i32
  }
  func.func @transform_4(%arg0: i32) -> (i32, i32) {
    %c0_i32 = arith.constant 0 : i32
    %c0_i32_0 = arith.constant 0 : i32
    %c0_i32_1 = arith.constant 0 : i32
    return %c0_i32, %c0_i32_0 : i32, i32
  }
  func.func @transform_5(%arg0: i32) -> (i32, i32) {
    %c0_i32 = arith.constant 0 : i32
    %c0_i32_0 = arith.constant 0 : i32
    %c0_i32_1 = arith.constant 0 : i32
    return %c0_i32, %c0_i32_0 : i32, i32
  }
  func.func @transform_6(%arg0: i32) -> (i32, i32) {
    %c0_i32 = arith.constant 0 : i32
    %c0_i32_0 = arith.constant 0 : i32
    %c0_i32_1 = arith.constant 0 : i32
    return %c0_i32, %c0_i32_0 : i32, i32
  }
  func.func @transform_7(%arg0: i32) -> (i32, i32) {
    %c0_i32 = arith.constant 0 : i32
    %c0_i32_0 = arith.constant 0 : i32
    %c0_i32_1 = arith.constant 0 : i32
    return %c0_i32, %c0_i32_0 : i32, i32
  }
  func.func @transform_8(%arg0: i32) -> (i32, i32) {
    %c0_i32 = arith.constant 0 : i32
    %c0_i32_0 = arith.constant 0 : i32
    %c0_i32_1 = arith.constant 0 : i32
    return %c0_i32, %c0_i32_0 : i32, i32
  }
  func.func @transform_9(%arg0: i32) -> (i32, i32) {
    %c0_i32 = arith.constant 0 : i32
    %c0_i32_0 = arith.constant 0 : i32
    %c0_i32_1 = arith.constant 0 : i32
    return %c0_i32, %c0_i32_0 : i32, i32
  }
  func.func @transform_10(%arg0: i32) -> (i32, i32) {
    %c0_i32 = arith.constant 0 : i32
    %c0_i32_0 = arith.constant 0 : i32
    %c0_i32_1 = arith.constant 0 : i32
    return %c0_i32, %c0_i32_0 : i32, i32
  }
  func.func @transform_11(%arg0: i32) -> (i32, i32) {
    %c0_i32 = arith.constant 0 : i32
    %c0_i32_0 = arith.constant 0 : i32
    %c0_i32_1 = arith.constant 0 : i32
    return %c0_i32, %c0_i32_0 : i32, i32
  }
  func.func @transform_12(%arg0: i32) -> (i32, i32) {
    %c0_i32 = arith.constant 0 : i32
    %c0_i32_0 = arith.constant 0 : i32
    %c0_i32_1 = arith.constant 0 : i32
    return %c0_i32, %c0_i32_0 : i32, i32
  }
  func.func @transform_13(%arg0: i32) -> (i32, i32) {
    %c0_i32 = arith.constant 0 : i32
    %c0_i32_0 = arith.constant 0 : i32
    %c0_i32_1 = arith.constant 0 : i32
    return %c0_i32, %c0_i32_0 : i32, i32
  }
}

module attributes {stable_mosaic.version = 11 : i64} {
  func.func @_mlp_ln_kernel(%arg0: i32, %arg1: memref<32x32xf32, #tpu.memory_space<vmem>>, %arg2: memref<32x64xf32, #tpu.memory_space<vmem>>, %arg3: memref<1x64xf32, #tpu.memory_space<vmem>>, %arg4: memref<64x32xf32, #tpu.memory_space<vmem>>, %arg5: memref<1x32xf32, #tpu.memory_space<vmem>>, %arg6: memref<1x32xf32, #tpu.memory_space<vmem>>, %arg7: memref<1x32xf32, #tpu.memory_space<vmem>>, %arg8: memref<32x32xf32, #tpu.memory_space<vmem>>) attributes {dimension_semantics = [#tpu.dimension_semantics<arbitrary>], iteration_bounds = array<i64: 1>, scalar_prefetch = 0 : i64, scratch_operands = 0 : i64, tpu.core_type = #tpu.core_type<tc>, window_params = [{pipeline_mode = #tpu.pipeline_mode<synchronous>, transform_indices = @transform_0, window_bounds = array<i64: 32, 32>}, {pipeline_mode = #tpu.pipeline_mode<synchronous>, transform_indices = @transform_1, window_bounds = array<i64: 32, 64>}, {pipeline_mode = #tpu.pipeline_mode<synchronous>, transform_indices = @transform_2, window_bounds = array<i64: 1, 64>}, {pipeline_mode = #tpu.pipeline_mode<synchronous>, transform_indices = @transform_3, window_bounds = array<i64: 64, 32>}, {pipeline_mode = #tpu.pipeline_mode<synchronous>, transform_indices = @transform_4, window_bounds = array<i64: 1, 32>}, {pipeline_mode = #tpu.pipeline_mode<synchronous>, transform_indices = @transform_5, window_bounds = array<i64: 1, 32>}, {pipeline_mode = #tpu.pipeline_mode<synchronous>, transform_indices = @transform_6, window_bounds = array<i64: 1, 32>}, {pipeline_mode = #tpu.pipeline_mode<synchronous>, transform_indices = @transform_7, window_bounds = array<i64: 32, 32>}]} {
    %c0 = arith.constant 0 : index
    %c0_0 = arith.constant 0 : index
    %0 = vector.load %arg1[%c0, %c0_0] : memref<32x32xf32, #tpu.memory_space<vmem>>, vector<32x32xf32>
    %c0_1 = arith.constant 0 : index
    %c0_2 = arith.constant 0 : index
    %1 = vector.load %arg2[%c0_1, %c0_2] : memref<32x64xf32, #tpu.memory_space<vmem>>, vector<32x64xf32>
    %cst = arith.constant dense<0.000000e+00> : vector<32x64xf32>
    %2 = tpu.matmul %0, %1, %cst {dimension_numbers = #tpu.dot_dimension_numbers<[1], [0], [0], [1], [0, 0, 1, 1], [], []>} : vector<32x32xf32>, vector<32x64xf32>, vector<32x64xf32> -> vector<32x64xf32>
    %c0_3 = arith.constant 0 : index
    %c0_4 = arith.constant 0 : index
    %3 = vector.load %arg3[%c0_3, %c0_4] : memref<1x64xf32, #tpu.memory_space<vmem>>, vector<1x64xf32>
    %4 = vector.broadcast %3 : vector<1x64xf32> to vector<32x64xf32>
    %5 = arith.addf %2, %4 : vector<32x64xf32>
    %cst_5 = arith.constant 0.707106769 : f32
    %6 = vector.broadcast %cst_5 : f32 to vector<32x64xf32>
    %7 = arith.mulf %5, %6 : vector<32x64xf32>
    %8 = math.absf %7 : vector<32x64xf32>
    %cst_6 = arith.constant 0.327591091 : f32
    %9 = vector.broadcast %cst_6 : f32 to vector<32x64xf32>
    %10 = arith.mulf %9, %8 : vector<32x64xf32>
    %cst_7 = arith.constant 1.000000e+00 : f32
    %11 = vector.broadcast %cst_7 : f32 to vector<32x64xf32>
    %12 = arith.addf %11, %10 : vector<32x64xf32>
    %cst_8 = arith.constant 1.000000e+00 : f32
    %13 = vector.broadcast %cst_8 : f32 to vector<32x64xf32>
    %14 = arith.divf %13, %12 : vector<32x64xf32>
    %cst_9 = arith.constant 1.06140542 : f32
    %15 = vector.broadcast %cst_9 : f32 to vector<32x64xf32>
    %16 = arith.mulf %14, %15 : vector<32x64xf32>
    %cst_10 = arith.constant -1.45315206 : f32
    %17 = vector.broadcast %cst_10 : f32 to vector<32x64xf32>
    %18 = arith.addf %17, %16 : vector<32x64xf32>
    %19 = arith.mulf %14, %18 : vector<32x64xf32>
    %cst_11 = arith.constant 1.42141378 : f32
    %20 = vector.broadcast %cst_11 : f32 to vector<32x64xf32>
    %21 = arith.addf %20, %19 : vector<32x64xf32>
    %22 = arith.mulf %14, %21 : vector<32x64xf32>
    %cst_12 = arith.constant -0.284496725 : f32
    %23 = vector.broadcast %cst_12 : f32 to vector<32x64xf32>
    %24 = arith.addf %23, %22 : vector<32x64xf32>
    %25 = arith.mulf %14, %24 : vector<32x64xf32>
    %cst_13 = arith.constant 0.254829586 : f32
    %26 = vector.broadcast %cst_13 : f32 to vector<32x64xf32>
    %27 = arith.addf %26, %25 : vector<32x64xf32>
    %28 = arith.mulf %14, %27 : vector<32x64xf32>
    %cst_14 = arith.constant 0.000000e+00 : f32
    %29 = vector.broadcast %cst_14 : f32 to vector<32x64xf32>
    %30 = arith.subf %29, %8 : vector<32x64xf32>
    %31 = arith.mulf %30, %8 : vector<32x64xf32>
    %32 = math.exp %31 : vector<32x64xf32>
    %33 = arith.mulf %28, %32 : vector<32x64xf32>
    %cst_15 = arith.constant 1.000000e+00 : f32
    %34 = vector.broadcast %cst_15 : f32 to vector<32x64xf32>
    %35 = arith.subf %34, %33 : vector<32x64xf32>
    %cst_16 = arith.constant 0.000000e+00 : f32
    %36 = vector.broadcast %cst_16 : f32 to vector<32x64xf32>
    %37 = arith.cmpf oge, %7, %36 : vector<32x64xf32>
    %cst_17 = arith.constant 0.000000e+00 : f32
    %38 = vector.broadcast %cst_17 : f32 to vector<32x64xf32>
    %39 = arith.subf %38, %35 : vector<32x64xf32>
    %40 = arith.select %37, %35, %39 : vector<32x64xi1>, vector<32x64xf32>
    %cst_18 = arith.constant 5.000000e-01 : f32
    %41 = vector.broadcast %cst_18 : f32 to vector<32x64xf32>
    %42 = arith.mulf %41, %5 : vector<32x64xf32>
    %cst_19 = arith.constant 1.000000e+00 : f32
    %43 = vector.broadcast %cst_19 : f32 to vector<32x64xf32>
    %44 = arith.addf %43, %40 : vector<32x64xf32>
    %45 = arith.mulf %42, %44 : vector<32x64xf32>
    %c0_20 = arith.constant 0 : index
    %c0_21 = arith.constant 0 : index
    %46 = vector.load %arg4[%c0_20, %c0_21] : memref<64x32xf32, #tpu.memory_space<vmem>>, vector<64x32xf32>
    %cst_22 = arith.constant dense<0.000000e+00> : vector<32x32xf32>
    %47 = tpu.matmul %45, %46, %cst_22 {dimension_numbers = #tpu.dot_dimension_numbers<[1], [0], [0], [1], [0, 0, 1, 1], [], []>} : vector<32x64xf32>, vector<64x32xf32>, vector<32x32xf32> -> vector<32x32xf32>
    %c0_23 = arith.constant 0 : index
    %c0_24 = arith.constant 0 : index
    %48 = vector.load %arg5[%c0_23, %c0_24] : memref<1x32xf32, #tpu.memory_space<vmem>>, vector<1x32xf32>
    %49 = vector.broadcast %48 : vector<1x32xf32> to vector<32x32xf32>
    %50 = arith.addf %47, %49 : vector<32x32xf32>
    %51 = arith.addf %0, %50 : vector<32x32xf32>
    %c0_25 = arith.constant 0 : index
    %c0_26 = arith.constant 0 : index
    %52 = vector.load %arg6[%c0_25, %c0_26] : memref<1x32xf32, #tpu.memory_space<vmem>>, vector<1x32xf32>
    %c0_27 = arith.constant 0 : index
    %c0_28 = arith.constant 0 : index
    %53 = vector.load %arg7[%c0_27, %c0_28] : memref<1x32xf32, #tpu.memory_space<vmem>>, vector<1x32xf32>
    %cst_29 = arith.constant dense<0.000000e+00> : vector<32xf32>
    %54 = vector.multi_reduction <add>, %51, %cst_29 [1] : vector<32x32xf32> to vector<32xf32>
    %55 = vector.shape_cast %54 : vector<32xf32> to vector<32x1xf32>
    %cst_30 = arith.constant 3.200000e+01 : f32
    %56 = vector.broadcast %cst_30 : f32 to vector<32x1xf32>
    %57 = arith.divf %55, %56 : vector<32x1xf32>
    %58 = vector.broadcast %57 : vector<32x1xf32> to vector<32x32xf32>
    %59 = arith.subf %51, %58 : vector<32x32xf32>
    %60 = arith.mulf %59, %59 : vector<32x32xf32>
    %cst_31 = arith.constant dense<0.000000e+00> : vector<32xf32>
    %61 = vector.multi_reduction <add>, %60, %cst_31 [1] : vector<32x32xf32> to vector<32xf32>
    %62 = vector.shape_cast %61 : vector<32xf32> to vector<32x1xf32>
    %cst_32 = arith.constant 3.200000e+01 : f32
    %63 = vector.broadcast %cst_32 : f32 to vector<32x1xf32>
    %64 = arith.divf %62, %63 : vector<32x1xf32>
    %65 = vector.broadcast %57 : vector<32x1xf32> to vector<32x32xf32>
    %66 = arith.subf %51, %65 : vector<32x32xf32>
    %cst_33 = arith.constant 9.99999974E-6 : f32
    %67 = vector.broadcast %cst_33 : f32 to vector<32x1xf32>
    %68 = arith.addf %64, %67 : vector<32x1xf32>
    %69 = math.rsqrt %68 : vector<32x1xf32>
    %70 = vector.broadcast %69 : vector<32x1xf32> to vector<32x32xf32>
    %71 = arith.mulf %66, %70 : vector<32x32xf32>
    %72 = vector.broadcast %52 : vector<1x32xf32> to vector<32x32xf32>
    %73 = arith.mulf %71, %72 : vector<32x32xf32>
    %74 = vector.broadcast %53 : vector<1x32xf32> to vector<32x32xf32>
    %75 = arith.addf %73, %74 : vector<32x32xf32>
    %c0_34 = arith.constant 0 : index
    %c0_35 = arith.constant 0 : index
    %76 = vector.load %arg8[%c0_34, %c0_35] : memref<32x32xf32, #tpu.memory_space<vmem>>, vector<32x32xf32>
    tpu.vector_store %arg8[%c0_34, %c0_35], %75 {strides = array<i32>} : memref<32x32xf32, #tpu.memory_space<vmem>>, vector<32x32xf32>,
    return
  }
  func.func @transform_0(%arg0: i32) -> (i32, i32) {
    %c0_i32 = arith.constant 0 : i32
    %c0_i32_0 = arith.constant 0 : i32
    %c0_i32_1 = arith.constant 0 : i32
    return %c0_i32, %c0_i32_0 : i32, i32
  }
  func.func @transform_1(%arg0: i32) -> (i32, i32) {
    %c0_i32 = arith.constant 0 : i32
    %c0_i32_0 = arith.constant 0 : i32
    %c0_i32_1 = arith.constant 0 : i32
    return %c0_i32, %c0_i32_0 : i32, i32
  }
  func.func @transform_2(%arg0: i32) -> (i32, i32) {
    %c0_i32 = arith.constant 0 : i32
    %c0_i32_0 = arith.constant 0 : i32
    %c0_i32_1 = arith.constant 0 : i32
    return %c0_i32, %c0_i32_0 : i32, i32
  }
  func.func @transform_3(%arg0: i32) -> (i32, i32) {
    %c0_i32 = arith.constant 0 : i32
    %c0_i32_0 = arith.constant 0 : i32
    %c0_i32_1 = arith.constant 0 : i32
    return %c0_i32, %c0_i32_0 : i32, i32
  }
  func.func @transform_4(%arg0: i32) -> (i32, i32) {
    %c0_i32 = arith.constant 0 : i32
    %c0_i32_0 = arith.constant 0 : i32
    %c0_i32_1 = arith.constant 0 : i32
    return %c0_i32, %c0_i32_0 : i32, i32
  }
  func.func @transform_5(%arg0: i32) -> (i32, i32) {
    %c0_i32 = arith.constant 0 : i32
    %c0_i32_0 = arith.constant 0 : i32
    %c0_i32_1 = arith.constant 0 : i32
    return %c0_i32, %c0_i32_0 : i32, i32
  }
  func.func @transform_6(%arg0: i32) -> (i32, i32) {
    %c0_i32 = arith.constant 0 : i32
    %c0_i32_0 = arith.constant 0 : i32
    %c0_i32_1 = arith.constant 0 : i32
    return %c0_i32, %c0_i32_0 : i32, i32
  }
  func.func @transform_7(%arg0: i32) -> (i32, i32) {
    %c0_i32 = arith.constant 0 : i32
    %c0_i32_0 = arith.constant 0 : i32
    %c0_i32_1 = arith.constant 0 : i32
    return %c0_i32, %c0_i32_0 : i32, i32
  }
}

module attributes {stable_mosaic.version = 11 : i64} {
  func.func @_attn_kernel(%arg0: i32, %arg1: memref<16x32xf32, #tpu.memory_space<vmem>>, %arg2: memref<32x32xf32, #tpu.memory_space<vmem>>, %arg3: memref<32x32xf32, #tpu.memory_space<vmem>>, %arg4: memref<1x32xf32, #tpu.memory_space<vmem>>, %arg5: memref<32x32xf32, #tpu.memory_space<vmem>>, %arg6: memref<1x32xf32, #tpu.memory_space<vmem>>, %arg7: memref<32x32xf32, #tpu.memory_space<vmem>>, %arg8: memref<1x32xf32, #tpu.memory_space<vmem>>, %arg9: memref<32x32xf32, #tpu.memory_space<vmem>>, %arg10: memref<1x32xf32, #tpu.memory_space<vmem>>, %arg11: memref<16x32xf32, #tpu.memory_space<vmem>>, %arg12: memref<16x32xf32, #tpu.memory_space<vmem>>) attributes {dimension_semantics = [#tpu.dimension_semantics<arbitrary>], iteration_bounds = array<i64: 1>, scalar_prefetch = 0 : i64, scratch_operands = 0 : i64, tpu.core_type = #tpu.core_type<tc>, window_params = [{pipeline_mode = #tpu.pipeline_mode<synchronous>, transform_indices = @transform_0, window_bounds = array<i64: 16, 32>}, {pipeline_mode = #tpu.pipeline_mode<synchronous>, transform_indices = @transform_1, window_bounds = array<i64: 32, 32>}, {pipeline_mode = #tpu.pipeline_mode<synchronous>, transform_indices = @transform_2, window_bounds = array<i64: 32, 32>}, {pipeline_mode = #tpu.pipeline_mode<synchronous>, transform_indices = @transform_3, window_bounds = array<i64: 1, 32>}, {pipeline_mode = #tpu.pipeline_mode<synchronous>, transform_indices = @transform_4, window_bounds = array<i64: 32, 32>}, {pipeline_mode = #tpu.pipeline_mode<synchronous>, transform_indices = @transform_5, window_bounds = array<i64: 1, 32>}, {pipeline_mode = #tpu.pipeline_mode<synchronous>, transform_indices = @transform_6, window_bounds = array<i64: 32, 32>}, {pipeline_mode = #tpu.pipeline_mode<synchronous>, transform_indices = @transform_7, window_bounds = array<i64: 1, 32>}, {pipeline_mode = #tpu.pipeline_mode<synchronous>, transform_indices = @transform_8, window_bounds = array<i64: 32, 32>}, {pipeline_mode = #tpu.pipeline_mode<synchronous>, transform_indices = @transform_9, window_bounds = array<i64: 1, 32>}, {pipeline_mode = #tpu.pipeline_mode<synchronous>, transform_indices = @transform_10, window_bounds = array<i64: 16, 32>}, {pipeline_mode = #tpu.pipeline_mode<synchronous>, transform_indices = @transform_11, window_bounds = array<i64: 16, 32>}]} {
    %c0 = arith.constant 0 : index
    %c0_0 = arith.constant 0 : index
    %0 = vector.load %arg1[%c0, %c0_0] : memref<16x32xf32, #tpu.memory_space<vmem>>, vector<16x32xf32>
    %c0_1 = arith.constant 0 : index
    %c0_2 = arith.constant 0 : index
    %1 = vector.load %arg2[%c0_1, %c0_2] : memref<32x32xf32, #tpu.memory_space<vmem>>, vector<32x32xf32>
    %c0_3 = arith.constant 0 : index
    %c0_4 = arith.constant 0 : index
    %2 = vector.load %arg3[%c0_3, %c0_4] : memref<32x32xf32, #tpu.memory_space<vmem>>, vector<32x32xf32>
    %c0_5 = arith.constant 0 : index
    %c0_6 = arith.constant 0 : index
    %3 = vector.load %arg4[%c0_5, %c0_6] : memref<1x32xf32, #tpu.memory_space<vmem>>, vector<1x32xf32>
    %c0_7 = arith.constant 0 : index
    %c0_8 = arith.constant 0 : index
    %4 = vector.load %arg5[%c0_7, %c0_8] : memref<32x32xf32, #tpu.memory_space<vmem>>, vector<32x32xf32>
    %c0_9 = arith.constant 0 : index
    %c0_10 = arith.constant 0 : index
    %5 = vector.load %arg6[%c0_9, %c0_10] : memref<1x32xf32, #tpu.memory_space<vmem>>, vector<1x32xf32>
    %c0_11 = arith.constant 0 : index
    %c0_12 = arith.constant 0 : index
    %6 = vector.load %arg7[%c0_11, %c0_12] : memref<32x32xf32, #tpu.memory_space<vmem>>, vector<32x32xf32>
    %c0_13 = arith.constant 0 : index
    %c0_14 = arith.constant 0 : index
    %7 = vector.load %arg8[%c0_13, %c0_14] : memref<1x32xf32, #tpu.memory_space<vmem>>, vector<1x32xf32>
    %c0_15 = arith.constant 0 : index
    %c0_16 = arith.constant 0 : index
    %8 = vector.load %arg9[%c0_15, %c0_16] : memref<32x32xf32, #tpu.memory_space<vmem>>, vector<32x32xf32>
    %c0_17 = arith.constant 0 : index
    %c0_18 = arith.constant 0 : index
    %9 = vector.load %arg10[%c0_17, %c0_18] : memref<1x32xf32, #tpu.memory_space<vmem>>, vector<1x32xf32>
    %c0_19 = arith.constant 0 : index
    %c0_20 = arith.constant 0 : index
    %10 = vector.load %arg11[%c0_19, %c0_20] : memref<16x32xf32, #tpu.memory_space<vmem>>, vector<16x32xf32>
    %cst = arith.constant dense<0.000000e+00> : vector<16x32xf32>
    %11 = tpu.matmul %0, %2, %cst {dimension_numbers = #tpu.dot_dimension_numbers<[1], [0], [0], [1], [0, 0, 1, 1], [], []>} : vector<16x32xf32>, vector<32x32xf32>, vector<16x32xf32> -> vector<16x32xf32>
    %12 = vector.broadcast %3 : vector<1x32xf32> to vector<16x32xf32>
    %13 = arith.addf %11, %12 : vector<16x32xf32>
    %cst_21 = arith.constant dense<0.000000e+00> : vector<32x32xf32>
    %14 = tpu.matmul %1, %4, %cst_21 {dimension_numbers = #tpu.dot_dimension_numbers<[1], [0], [0], [1], [0, 0, 1, 1], [], []>} : vector<32x32xf32>, vector<32x32xf32>, vector<32x32xf32> -> vector<32x32xf32>
    %15 = vector.broadcast %5 : vector<1x32xf32> to vector<32x32xf32>
    %16 = arith.addf %14, %15 : vector<32x32xf32>
    %cst_22 = arith.constant dense<0.000000e+00> : vector<32x32xf32>
    %17 = tpu.matmul %1, %6, %cst_22 {dimension_numbers = #tpu.dot_dimension_numbers<[1], [0], [0], [1], [0, 0, 1, 1], [], []>} : vector<32x32xf32>, vector<32x32xf32>, vector<32x32xf32> -> vector<32x32xf32>
    %18 = vector.broadcast %7 : vector<1x32xf32> to vector<32x32xf32>
    %19 = arith.addf %17, %18 : vector<32x32xf32>
    %20 = vector.extract_strided_slice %13 {offsets = [0, 0], sizes = [16, 8], strides = [1, 1]} : vector<16x32xf32> to vector<16x8xf32>
    %21 = vector.extract_strided_slice %16 {offsets = [0, 0], sizes = [32, 8], strides = [1, 1]} : vector<32x32xf32> to vector<32x8xf32>
    %22 = vector.extract_strided_slice %19 {offsets = [0, 0], sizes = [32, 8], strides = [1, 1]} : vector<32x32xf32> to vector<32x8xf32>
    %cst_23 = arith.constant dense<0.000000e+00> : vector<16x32xf32>
    %23 = tpu.matmul %20, %21, %cst_23 {dimension_numbers = #tpu.dot_dimension_numbers<[1], [1], [0], [0], [0, 0, 1, 0], [], []>} : vector<16x8xf32>, vector<32x8xf32>, vector<16x32xf32> -> vector<16x32xf32>
    %cst_24 = arith.constant 0.353553385 : f32
    %24 = vector.broadcast %cst_24 : f32 to vector<16x32xf32>
    %25 = arith.mulf %23, %24 : vector<16x32xf32>
    %26 = arith.addf %25, %10 : vector<16x32xf32>
    %cst_25 = arith.constant dense<0xFF800000> : vector<16xf32>
    %27 = vector.multi_reduction <maximumf>, %26, %cst_25 [1] : vector<16x32xf32> to vector<16xf32>
    %28 = vector.shape_cast %27 : vector<16xf32> to vector<16x1xf32>
    %29 = vector.broadcast %28 : vector<16x1xf32> to vector<16x32xf32>
    %30 = arith.subf %26, %29 : vector<16x32xf32>
    %31 = math.exp %30 : vector<16x32xf32>
    %cst_26 = arith.constant dense<0.000000e+00> : vector<16xf32>
    %32 = vector.multi_reduction <add>, %31, %cst_26 [1] : vector<16x32xf32> to vector<16xf32>
    %33 = vector.shape_cast %32 : vector<16xf32> to vector<16x1xf32>
    %34 = vector.broadcast %33 : vector<16x1xf32> to vector<16x32xf32>
    %35 = arith.divf %31, %34 : vector<16x32xf32>
    %cst_27 = arith.constant dense<0.000000e+00> : vector<16x8xf32>
    %36 = tpu.matmul %35, %22, %cst_27 {dimension_numbers = #tpu.dot_dimension_numbers<[1], [0], [0], [1], [0, 0, 1, 1], [], []>} : vector<16x32xf32>, vector<32x8xf32>, vector<16x8xf32> -> vector<16x8xf32>
    %37 = vector.extract_strided_slice %13 {offsets = [0, 8], sizes = [16, 8], strides = [1, 1]} : vector<16x32xf32> to vector<16x8xf32>
    %38 = vector.extract_strided_slice %16 {offsets = [0, 8], sizes = [32, 8], strides = [1, 1]} : vector<32x32xf32> to vector<32x8xf32>
    %39 = vector.extract_strided_slice %19 {offsets = [0, 8], sizes = [32, 8], strides = [1, 1]} : vector<32x32xf32> to vector<32x8xf32>
    %cst_28 = arith.constant dense<0.000000e+00> : vector<16x32xf32>
    %40 = tpu.matmul %37, %38, %cst_28 {dimension_numbers = #tpu.dot_dimension_numbers<[1], [1], [0], [0], [0, 0, 1, 0], [], []>} : vector<16x8xf32>, vector<32x8xf32>, vector<16x32xf32> -> vector<16x32xf32>
    %cst_29 = arith.constant 0.353553385 : f32
    %41 = vector.broadcast %cst_29 : f32 to vector<16x32xf32>
    %42 = arith.mulf %40, %41 : vector<16x32xf32>
    %43 = arith.addf %42, %10 : vector<16x32xf32>
    %cst_30 = arith.constant dense<0xFF800000> : vector<16xf32>
    %44 = vector.multi_reduction <maximumf>, %43, %cst_30 [1] : vector<16x32xf32> to vector<16xf32>
    %45 = vector.shape_cast %44 : vector<16xf32> to vector<16x1xf32>
    %46 = vector.broadcast %45 : vector<16x1xf32> to vector<16x32xf32>
    %47 = arith.subf %43, %46 : vector<16x32xf32>
    %48 = math.exp %47 : vector<16x32xf32>
    %cst_31 = arith.constant dense<0.000000e+00> : vector<16xf32>
    %49 = vector.multi_reduction <add>, %48, %cst_31 [1] : vector<16x32xf32> to vector<16xf32>
    %50 = vector.shape_cast %49 : vector<16xf32> to vector<16x1xf32>
    %51 = vector.broadcast %50 : vector<16x1xf32> to vector<16x32xf32>
    %52 = arith.divf %48, %51 : vector<16x32xf32>
    %cst_32 = arith.constant dense<0.000000e+00> : vector<16x8xf32>
    %53 = tpu.matmul %52, %39, %cst_32 {dimension_numbers = #tpu.dot_dimension_numbers<[1], [0], [0], [1], [0, 0, 1, 1], [], []>} : vector<16x32xf32>, vector<32x8xf32>, vector<16x8xf32> -> vector<16x8xf32>
    %54 = vector.extract_strided_slice %13 {offsets = [0, 16], sizes = [16, 8], strides = [1, 1]} : vector<16x32xf32> to vector<16x8xf32>
    %55 = vector.extract_strided_slice %16 {offsets = [0, 16], sizes = [32, 8], strides = [1, 1]} : vector<32x32xf32> to vector<32x8xf32>
    %56 = vector.extract_strided_slice %19 {offsets = [0, 16], sizes = [32, 8], strides = [1, 1]} : vector<32x32xf32> to vector<32x8xf32>
    %cst_33 = arith.constant dense<0.000000e+00> : vector<16x32xf32>
    %57 = tpu.matmul %54, %55, %cst_33 {dimension_numbers = #tpu.dot_dimension_numbers<[1], [1], [0], [0], [0, 0, 1, 0], [], []>} : vector<16x8xf32>, vector<32x8xf32>, vector<16x32xf32> -> vector<16x32xf32>
    %cst_34 = arith.constant 0.353553385 : f32
    %58 = vector.broadcast %cst_34 : f32 to vector<16x32xf32>
    %59 = arith.mulf %57, %58 : vector<16x32xf32>
    %60 = arith.addf %59, %10 : vector<16x32xf32>
    %cst_35 = arith.constant dense<0xFF800000> : vector<16xf32>
    %61 = vector.multi_reduction <maximumf>, %60, %cst_35 [1] : vector<16x32xf32> to vector<16xf32>
    %62 = vector.shape_cast %61 : vector<16xf32> to vector<16x1xf32>
    %63 = vector.broadcast %62 : vector<16x1xf32> to vector<16x32xf32>
    %64 = arith.subf %60, %63 : vector<16x32xf32>
    %65 = math.exp %64 : vector<16x32xf32>
    %cst_36 = arith.constant dense<0.000000e+00> : vector<16xf32>
    %66 = vector.multi_reduction <add>, %65, %cst_36 [1] : vector<16x32xf32> to vector<16xf32>
    %67 = vector.shape_cast %66 : vector<16xf32> to vector<16x1xf32>
    %68 = vector.broadcast %67 : vector<16x1xf32> to vector<16x32xf32>
    %69 = arith.divf %65, %68 : vector<16x32xf32>
    %cst_37 = arith.constant dense<0.000000e+00> : vector<16x8xf32>
    %70 = tpu.matmul %69, %56, %cst_37 {dimension_numbers = #tpu.dot_dimension_numbers<[1], [0], [0], [1], [0, 0, 1, 1], [], []>} : vector<16x32xf32>, vector<32x8xf32>, vector<16x8xf32> -> vector<16x8xf32>
    %71 = vector.extract_strided_slice %13 {offsets = [0, 24], sizes = [16, 8], strides = [1, 1]} : vector<16x32xf32> to vector<16x8xf32>
    %72 = vector.extract_strided_slice %16 {offsets = [0, 24], sizes = [32, 8], strides = [1, 1]} : vector<32x32xf32> to vector<32x8xf32>
    %73 = vector.extract_strided_slice %19 {offsets = [0, 24], sizes = [32, 8], strides = [1, 1]} : vector<32x32xf32> to vector<32x8xf32>
    %cst_38 = arith.constant dense<0.000000e+00> : vector<16x32xf32>
    %74 = tpu.matmul %71, %72, %cst_38 {dimension_numbers = #tpu.dot_dimension_numbers<[1], [1], [0], [0], [0, 0, 1, 0], [], []>} : vector<16x8xf32>, vector<32x8xf32>, vector<16x32xf32> -> vector<16x32xf32>
    %cst_39 = arith.constant 0.353553385 : f32
    %75 = vector.broadcast %cst_39 : f32 to vector<16x32xf32>
    %76 = arith.mulf %74, %75 : vector<16x32xf32>
    %77 = arith.addf %76, %10 : vector<16x32xf32>
    %cst_40 = arith.constant dense<0xFF800000> : vector<16xf32>
    %78 = vector.multi_reduction <maximumf>, %77, %cst_40 [1] : vector<16x32xf32> to vector<16xf32>
    %79 = vector.shape_cast %78 : vector<16xf32> to vector<16x1xf32>
    %80 = vector.broadcast %79 : vector<16x1xf32> to vector<16x32xf32>
    %81 = arith.subf %77, %80 : vector<16x32xf32>
    %82 = math.exp %81 : vector<16x32xf32>
    %cst_41 = arith.constant dense<0.000000e+00> : vector<16xf32>
    %83 = vector.multi_reduction <add>, %82, %cst_41 [1] : vector<16x32xf32> to vector<16xf32>
    %84 = vector.shape_cast %83 : vector<16xf32> to vector<16x1xf32>
    %85 = vector.broadcast %84 : vector<16x1xf32> to vector<16x32xf32>
    %86 = arith.divf %82, %85 : vector<16x32xf32>
    %cst_42 = arith.constant dense<0.000000e+00> : vector<16x8xf32>
    %87 = tpu.matmul %86, %73, %cst_42 {dimension_numbers = #tpu.dot_dimension_numbers<[1], [0], [0], [1], [0, 0, 1, 1], [], []>} : vector<16x32xf32>, vector<32x8xf32>, vector<16x8xf32> -> vector<16x8xf32>
    %88 = tpu.concatenate %36, %53, %70, %87 in 1 : vector<16x8xf32>, vector<16x8xf32>, vector<16x8xf32>, vector<16x8xf32> -> vector<16x32xf32>
    %cst_43 = arith.constant dense<0.000000e+00> : vector<16x32xf32>
    %89 = tpu.matmul %88, %8, %cst_43 {dimension_numbers = #tpu.dot_dimension_numbers<[1], [0], [0], [1], [0, 0, 1, 1], [], []>} : vector<16x32xf32>, vector<32x32xf32>, vector<16x32xf32> -> vector<16x32xf32>
    %90 = vector.broadcast %9 : vector<1x32xf32> to vector<16x32xf32>
    %91 = arith.addf %89, %90 : vector<16x32xf32>
    %c0_44 = arith.constant 0 : index
    %c0_45 = arith.constant 0 : index
    %92 = vector.load %arg12[%c0_44, %c0_45] : memref<16x32xf32, #tpu.memory_space<vmem>>, vector<16x32xf32>
    tpu.vector_store %arg12[%c0_44, %c0_45], %91 {strides = array<i32>} : memref<16x32xf32, #tpu.memory_space<vmem>>, vector<16x32xf32>,
    return
  }
  func.func @transform_0(%arg0: i32) -> (i32, i32) {
    %c0_i32 = arith.constant 0 : i32
    %c0_i32_0 = arith.constant 0 : i32
    %c0_i32_1 = arith.constant 0 : i32
    return %c0_i32, %c0_i32_0 : i32, i32
  }
  func.func @transform_1(%arg0: i32) -> (i32, i32) {
    %c0_i32 = arith.constant 0 : i32
    %c0_i32_0 = arith.constant 0 : i32
    %c0_i32_1 = arith.constant 0 : i32
    return %c0_i32, %c0_i32_0 : i32, i32
  }
  func.func @transform_2(%arg0: i32) -> (i32, i32) {
    %c0_i32 = arith.constant 0 : i32
    %c0_i32_0 = arith.constant 0 : i32
    %c0_i32_1 = arith.constant 0 : i32
    return %c0_i32, %c0_i32_0 : i32, i32
  }
  func.func @transform_3(%arg0: i32) -> (i32, i32) {
    %c0_i32 = arith.constant 0 : i32
    %c0_i32_0 = arith.constant 0 : i32
    %c0_i32_1 = arith.constant 0 : i32
    return %c0_i32, %c0_i32_0 : i32, i32
  }
  func.func @transform_4(%arg0: i32) -> (i32, i32) {
    %c0_i32 = arith.constant 0 : i32
    %c0_i32_0 = arith.constant 0 : i32
    %c0_i32_1 = arith.constant 0 : i32
    return %c0_i32, %c0_i32_0 : i32, i32
  }
  func.func @transform_5(%arg0: i32) -> (i32, i32) {
    %c0_i32 = arith.constant 0 : i32
    %c0_i32_0 = arith.constant 0 : i32
    %c0_i32_1 = arith.constant 0 : i32
    return %c0_i32, %c0_i32_0 : i32, i32
  }
  func.func @transform_6(%arg0: i32) -> (i32, i32) {
    %c0_i32 = arith.constant 0 : i32
    %c0_i32_0 = arith.constant 0 : i32
    %c0_i32_1 = arith.constant 0 : i32
    return %c0_i32, %c0_i32_0 : i32, i32
  }
  func.func @transform_7(%arg0: i32) -> (i32, i32) {
    %c0_i32 = arith.constant 0 : i32
    %c0_i32_0 = arith.constant 0 : i32
    %c0_i32_1 = arith.constant 0 : i32
    return %c0_i32, %c0_i32_0 : i32, i32
  }
  func.func @transform_8(%arg0: i32) -> (i32, i32) {
    %c0_i32 = arith.constant 0 : i32
    %c0_i32_0 = arith.constant 0 : i32
    %c0_i32_1 = arith.constant 0 : i32
    return %c0_i32, %c0_i32_0 : i32, i32
  }
  func.func @transform_9(%arg0: i32) -> (i32, i32) {
    %c0_i32 = arith.constant 0 : i32
    %c0_i32_0 = arith.constant 0 : i32
    %c0_i32_1 = arith.constant 0 : i32
    return %c0_i32, %c0_i32_0 : i32, i32
  }
  func.func @transform_10(%arg0: i32) -> (i32, i32) {
    %c0_i32 = arith.constant 0 : i32
    %c0_i32_0 = arith.constant 0 : i32
    %c0_i32_1 = arith.constant 0 : i32
    return %c0_i32, %c0_i32_0 : i32, i32
  }
  func.func @transform_11(%arg0: i32) -> (i32, i32) {
    %c0_i32 = arith.constant 0 : i32
    %c0_i32_0 = arith.constant 0 : i32
    %c0_i32_1 = arith.constant 0 : i32
    return %c0_i32, %c0_i32_0 : i32, i32
  }
}

module attributes {stable_mosaic.version = 11 : i64} {
  func.func @_attn_ln_kernel(%arg0: i32, %arg1: memref<32x32xf32, #tpu.memory_space<vmem>>, %arg2: memref<16x32xf32, #tpu.memory_space<vmem>>, %arg3: memref<32x32xf32, #tpu.memory_space<vmem>>, %arg4: memref<1x32xf32, #tpu.memory_space<vmem>>, %arg5: memref<32x32xf32, #tpu.memory_space<vmem>>, %arg6: memref<1x32xf32, #tpu.memory_space<vmem>>, %arg7: memref<32x32xf32, #tpu.memory_space<vmem>>, %arg8: memref<1x32xf32, #tpu.memory_space<vmem>>, %arg9: memref<32x32xf32, #tpu.memory_space<vmem>>, %arg10: memref<1x32xf32, #tpu.memory_space<vmem>>, %arg11: memref<32x16xf32, #tpu.memory_space<vmem>>, %arg12: memref<1x32xf32, #tpu.memory_space<vmem>>, %arg13: memref<1x32xf32, #tpu.memory_space<vmem>>, %arg14: memref<32x32xf32, #tpu.memory_space<vmem>>) attributes {dimension_semantics = [#tpu.dimension_semantics<arbitrary>], iteration_bounds = array<i64: 1>, scalar_prefetch = 0 : i64, scratch_operands = 0 : i64, tpu.core_type = #tpu.core_type<tc>, window_params = [{pipeline_mode = #tpu.pipeline_mode<synchronous>, transform_indices = @transform_0, window_bounds = array<i64: 32, 32>}, {pipeline_mode = #tpu.pipeline_mode<synchronous>, transform_indices = @transform_1, window_bounds = array<i64: 16, 32>}, {pipeline_mode = #tpu.pipeline_mode<synchronous>, transform_indices = @transform_2, window_bounds = array<i64: 32, 32>}, {pipeline_mode = #tpu.pipeline_mode<synchronous>, transform_indices = @transform_3, window_bounds = array<i64: 1, 32>}, {pipeline_mode = #tpu.pipeline_mode<synchronous>, transform_indices = @transform_4, window_bounds = array<i64: 32, 32>}, {pipeline_mode = #tpu.pipeline_mode<synchronous>, transform_indices = @transform_5, window_bounds = array<i64: 1, 32>}, {pipeline_mode = #tpu.pipeline_mode<synchronous>, transform_indices = @transform_6, window_bounds = array<i64: 32, 32>}, {pipeline_mode = #tpu.pipeline_mode<synchronous>, transform_indices = @transform_7, window_bounds = array<i64: 1, 32>}, {pipeline_mode = #tpu.pipeline_mode<synchronous>, transform_indices = @transform_8, window_bounds = array<i64: 32, 32>}, {pipeline_mode = #tpu.pipeline_mode<synchronous>, transform_indices = @transform_9, window_bounds = array<i64: 1, 32>}, {pipeline_mode = #tpu.pipeline_mode<synchronous>, transform_indices = @transform_10, window_bounds = array<i64: 32, 16>}, {pipeline_mode = #tpu.pipeline_mode<synchronous>, transform_indices = @transform_11, window_bounds = array<i64: 1, 32>}, {pipeline_mode = #tpu.pipeline_mode<synchronous>, transform_indices = @transform_12, window_bounds = array<i64: 1, 32>}, {pipeline_mode = #tpu.pipeline_mode<synchronous>, transform_indices = @transform_13, window_bounds = array<i64: 32, 32>}]} {
    %c0 = arith.constant 0 : index
    %c0_0 = arith.constant 0 : index
    %0 = vector.load %arg1[%c0, %c0_0] : memref<32x32xf32, #tpu.memory_space<vmem>>, vector<32x32xf32>
    %c0_1 = arith.constant 0 : index
    %c0_2 = arith.constant 0 : index
    %1 = vector.load %arg2[%c0_1, %c0_2] : memref<16x32xf32, #tpu.memory_space<vmem>>, vector<16x32xf32>
    %c0_3 = arith.constant 0 : index
    %c0_4 = arith.constant 0 : index
    %2 = vector.load %arg3[%c0_3, %c0_4] : memref<32x32xf32, #tpu.memory_space<vmem>>, vector<32x32xf32>
    %c0_5 = arith.constant 0 : index
    %c0_6 = arith.constant 0 : index
    %3 = vector.load %arg4[%c0_5, %c0_6] : memref<1x32xf32, #tpu.memory_space<vmem>>, vector<1x32xf32>
    %c0_7 = arith.constant 0 : index
    %c0_8 = arith.constant 0 : index
    %4 = vector.load %arg5[%c0_7, %c0_8] : memref<32x32xf32, #tpu.memory_space<vmem>>, vector<32x32xf32>
    %c0_9 = arith.constant 0 : index
    %c0_10 = arith.constant 0 : index
    %5 = vector.load %arg6[%c0_9, %c0_10] : memref<1x32xf32, #tpu.memory_space<vmem>>, vector<1x32xf32>
    %c0_11 = arith.constant 0 : index
    %c0_12 = arith.constant 0 : index
    %6 = vector.load %arg7[%c0_11, %c0_12] : memref<32x32xf32, #tpu.memory_space<vmem>>, vector<32x32xf32>
    %c0_13 = arith.constant 0 : index
    %c0_14 = arith.constant 0 : index
    %7 = vector.load %arg8[%c0_13, %c0_14] : memref<1x32xf32, #tpu.memory_space<vmem>>, vector<1x32xf32>
    %c0_15 = arith.constant 0 : index
    %c0_16 = arith.constant 0 : index
    %8 = vector.load %arg9[%c0_15, %c0_16] : memref<32x32xf32, #tpu.memory_space<vmem>>, vector<32x32xf32>
    %c0_17 = arith.constant 0 : index
    %c0_18 = arith.constant 0 : index
    %9 = vector.load %arg10[%c0_17, %c0_18] : memref<1x32xf32, #tpu.memory_space<vmem>>, vector<1x32xf32>
    %c0_19 = arith.constant 0 : index
    %c0_20 = arith.constant 0 : index
    %10 = vector.load %arg11[%c0_19, %c0_20] : memref<32x16xf32, #tpu.memory_space<vmem>>, vector<32x16xf32>
    %cst = arith.constant dense<0.000000e+00> : vector<32x32xf32>
    %11 = tpu.matmul %0, %2, %cst {dimension_numbers = #tpu.dot_dimension_numbers<[1], [0], [0], [1], [0, 0, 1, 1], [], []>} : vector<32x32xf32>, vector<32x32xf32>, vector<32x32xf32> -> vector<32x32xf32>
    %12 = vector.broadcast %3 : vector<1x32xf32> to vector<32x32xf32>
    %13 = arith.addf %11, %12 : vector<32x32xf32>
    %cst_21 = arith.constant dense<0.000000e+00> : vector<16x32xf32>
    %14 = tpu.matmul %1, %4, %cst_21 {dimension_numbers = #tpu.dot_dimension_numbers<[1], [0], [0], [1], [0, 0, 1, 1], [], []>} : vector<16x32xf32>, vector<32x32xf32>, vector<16x32xf32> -> vector<16x32xf32>
    %15 = vector.broadcast %5 : vector<1x32xf32> to vector<16x32xf32>
    %16 = arith.addf %14, %15 : vector<16x32xf32>
    %cst_22 = arith.constant dense<0.000000e+00> : vector<16x32xf32>
    %17 = tpu.matmul %1, %6, %cst_22 {dimension_numbers = #tpu.dot_dimension_numbers<[1], [0], [0], [1], [0, 0, 1, 1], [], []>} : vector<16x32xf32>, vector<32x32xf32>, vector<16x32xf32> -> vector<16x32xf32>
    %18 = vector.broadcast %7 : vector<1x32xf32> to vector<16x32xf32>
    %19 = arith.addf %17, %18 : vector<16x32xf32>
    %20 = vector.extract_strided_slice %13 {offsets = [0, 0], sizes = [32, 8], strides = [1, 1]} : vector<32x32xf32> to vector<32x8xf32>
    %21 = vector.extract_strided_slice %16 {offsets = [0, 0], sizes = [16, 8], strides = [1, 1]} : vector<16x32xf32> to vector<16x8xf32>
    %22 = vector.extract_strided_slice %19 {offsets = [0, 0], sizes = [16, 8], strides = [1, 1]} : vector<16x32xf32> to vector<16x8xf32>
    %cst_23 = arith.constant dense<0.000000e+00> : vector<32x16xf32>
    %23 = tpu.matmul %20, %21, %cst_23 {dimension_numbers = #tpu.dot_dimension_numbers<[1], [1], [0], [0], [0, 0, 1, 0], [], []>} : vector<32x8xf32>, vector<16x8xf32>, vector<32x16xf32> -> vector<32x16xf32>
    %cst_24 = arith.constant 0.353553385 : f32
    %24 = vector.broadcast %cst_24 : f32 to vector<32x16xf32>
    %25 = arith.mulf %23, %24 : vector<32x16xf32>
    %26 = arith.addf %25, %10 : vector<32x16xf32>
    %cst_25 = arith.constant dense<0xFF800000> : vector<32xf32>
    %27 = vector.multi_reduction <maximumf>, %26, %cst_25 [1] : vector<32x16xf32> to vector<32xf32>
    %28 = vector.shape_cast %27 : vector<32xf32> to vector<32x1xf32>
    %29 = vector.broadcast %28 : vector<32x1xf32> to vector<32x16xf32>
    %30 = arith.subf %26, %29 : vector<32x16xf32>
    %31 = math.exp %30 : vector<32x16xf32>
    %cst_26 = arith.constant dense<0.000000e+00> : vector<32xf32>
    %32 = vector.multi_reduction <add>, %31, %cst_26 [1] : vector<32x16xf32> to vector<32xf32>
    %33 = vector.shape_cast %32 : vector<32xf32> to vector<32x1xf32>
    %34 = vector.broadcast %33 : vector<32x1xf32> to vector<32x16xf32>
    %35 = arith.divf %31, %34 : vector<32x16xf32>
    %cst_27 = arith.constant dense<0.000000e+00> : vector<32x8xf32>
    %36 = tpu.matmul %35, %22, %cst_27 {dimension_numbers = #tpu.dot_dimension_numbers<[1], [0], [0], [1], [0, 0, 1, 1], [], []>} : vector<32x16xf32>, vector<16x8xf32>, vector<32x8xf32> -> vector<32x8xf32>
    %37 = vector.extract_strided_slice %13 {offsets = [0, 8], sizes = [32, 8], strides = [1, 1]} : vector<32x32xf32> to vector<32x8xf32>
    %38 = vector.extract_strided_slice %16 {offsets = [0, 8], sizes = [16, 8], strides = [1, 1]} : vector<16x32xf32> to vector<16x8xf32>
    %39 = vector.extract_strided_slice %19 {offsets = [0, 8], sizes = [16, 8], strides = [1, 1]} : vector<16x32xf32> to vector<16x8xf32>
    %cst_28 = arith.constant dense<0.000000e+00> : vector<32x16xf32>
    %40 = tpu.matmul %37, %38, %cst_28 {dimension_numbers = #tpu.dot_dimension_numbers<[1], [1], [0], [0], [0, 0, 1, 0], [], []>} : vector<32x8xf32>, vector<16x8xf32>, vector<32x16xf32> -> vector<32x16xf32>
    %cst_29 = arith.constant 0.353553385 : f32
    %41 = vector.broadcast %cst_29 : f32 to vector<32x16xf32>
    %42 = arith.mulf %40, %41 : vector<32x16xf32>
    %43 = arith.addf %42, %10 : vector<32x16xf32>
    %cst_30 = arith.constant dense<0xFF800000> : vector<32xf32>
    %44 = vector.multi_reduction <maximumf>, %43, %cst_30 [1] : vector<32x16xf32> to vector<32xf32>
    %45 = vector.shape_cast %44 : vector<32xf32> to vector<32x1xf32>
    %46 = vector.broadcast %45 : vector<32x1xf32> to vector<32x16xf32>
    %47 = arith.subf %43, %46 : vector<32x16xf32>
    %48 = math.exp %47 : vector<32x16xf32>
    %cst_31 = arith.constant dense<0.000000e+00> : vector<32xf32>
    %49 = vector.multi_reduction <add>, %48, %cst_31 [1] : vector<32x16xf32> to vector<32xf32>
    %50 = vector.shape_cast %49 : vector<32xf32> to vector<32x1xf32>
    %51 = vector.broadcast %50 : vector<32x1xf32> to vector<32x16xf32>
    %52 = arith.divf %48, %51 : vector<32x16xf32>
    %cst_32 = arith.constant dense<0.000000e+00> : vector<32x8xf32>
    %53 = tpu.matmul %52, %39, %cst_32 {dimension_numbers = #tpu.dot_dimension_numbers<[1], [0], [0], [1], [0, 0, 1, 1], [], []>} : vector<32x16xf32>, vector<16x8xf32>, vector<32x8xf32> -> vector<32x8xf32>
    %54 = vector.extract_strided_slice %13 {offsets = [0, 16], sizes = [32, 8], strides = [1, 1]} : vector<32x32xf32> to vector<32x8xf32>
    %55 = vector.extract_strided_slice %16 {offsets = [0, 16], sizes = [16, 8], strides = [1, 1]} : vector<16x32xf32> to vector<16x8xf32>
    %56 = vector.extract_strided_slice %19 {offsets = [0, 16], sizes = [16, 8], strides = [1, 1]} : vector<16x32xf32> to vector<16x8xf32>
    %cst_33 = arith.constant dense<0.000000e+00> : vector<32x16xf32>
    %57 = tpu.matmul %54, %55, %cst_33 {dimension_numbers = #tpu.dot_dimension_numbers<[1], [1], [0], [0], [0, 0, 1, 0], [], []>} : vector<32x8xf32>, vector<16x8xf32>, vector<32x16xf32> -> vector<32x16xf32>
    %cst_34 = arith.constant 0.353553385 : f32
    %58 = vector.broadcast %cst_34 : f32 to vector<32x16xf32>
    %59 = arith.mulf %57, %58 : vector<32x16xf32>
    %60 = arith.addf %59, %10 : vector<32x16xf32>
    %cst_35 = arith.constant dense<0xFF800000> : vector<32xf32>
    %61 = vector.multi_reduction <maximumf>, %60, %cst_35 [1] : vector<32x16xf32> to vector<32xf32>
    %62 = vector.shape_cast %61 : vector<32xf32> to vector<32x1xf32>
    %63 = vector.broadcast %62 : vector<32x1xf32> to vector<32x16xf32>
    %64 = arith.subf %60, %63 : vector<32x16xf32>
    %65 = math.exp %64 : vector<32x16xf32>
    %cst_36 = arith.constant dense<0.000000e+00> : vector<32xf32>
    %66 = vector.multi_reduction <add>, %65, %cst_36 [1] : vector<32x16xf32> to vector<32xf32>
    %67 = vector.shape_cast %66 : vector<32xf32> to vector<32x1xf32>
    %68 = vector.broadcast %67 : vector<32x1xf32> to vector<32x16xf32>
    %69 = arith.divf %65, %68 : vector<32x16xf32>
    %cst_37 = arith.constant dense<0.000000e+00> : vector<32x8xf32>
    %70 = tpu.matmul %69, %56, %cst_37 {dimension_numbers = #tpu.dot_dimension_numbers<[1], [0], [0], [1], [0, 0, 1, 1], [], []>} : vector<32x16xf32>, vector<16x8xf32>, vector<32x8xf32> -> vector<32x8xf32>
    %71 = vector.extract_strided_slice %13 {offsets = [0, 24], sizes = [32, 8], strides = [1, 1]} : vector<32x32xf32> to vector<32x8xf32>
    %72 = vector.extract_strided_slice %16 {offsets = [0, 24], sizes = [16, 8], strides = [1, 1]} : vector<16x32xf32> to vector<16x8xf32>
    %73 = vector.extract_strided_slice %19 {offsets = [0, 24], sizes = [16, 8], strides = [1, 1]} : vector<16x32xf32> to vector<16x8xf32>
    %cst_38 = arith.constant dense<0.000000e+00> : vector<32x16xf32>
    %74 = tpu.matmul %71, %72, %cst_38 {dimension_numbers = #tpu.dot_dimension_numbers<[1], [1], [0], [0], [0, 0, 1, 0], [], []>} : vector<32x8xf32>, vector<16x8xf32>, vector<32x16xf32> -> vector<32x16xf32>
    %cst_39 = arith.constant 0.353553385 : f32
    %75 = vector.broadcast %cst_39 : f32 to vector<32x16xf32>
    %76 = arith.mulf %74, %75 : vector<32x16xf32>
    %77 = arith.addf %76, %10 : vector<32x16xf32>
    %cst_40 = arith.constant dense<0xFF800000> : vector<32xf32>
    %78 = vector.multi_reduction <maximumf>, %77, %cst_40 [1] : vector<32x16xf32> to vector<32xf32>
    %79 = vector.shape_cast %78 : vector<32xf32> to vector<32x1xf32>
    %80 = vector.broadcast %79 : vector<32x1xf32> to vector<32x16xf32>
    %81 = arith.subf %77, %80 : vector<32x16xf32>
    %82 = math.exp %81 : vector<32x16xf32>
    %cst_41 = arith.constant dense<0.000000e+00> : vector<32xf32>
    %83 = vector.multi_reduction <add>, %82, %cst_41 [1] : vector<32x16xf32> to vector<32xf32>
    %84 = vector.shape_cast %83 : vector<32xf32> to vector<32x1xf32>
    %85 = vector.broadcast %84 : vector<32x1xf32> to vector<32x16xf32>
    %86 = arith.divf %82, %85 : vector<32x16xf32>
    %cst_42 = arith.constant dense<0.000000e+00> : vector<32x8xf32>
    %87 = tpu.matmul %86, %73, %cst_42 {dimension_numbers = #tpu.dot_dimension_numbers<[1], [0], [0], [1], [0, 0, 1, 1], [], []>} : vector<32x16xf32>, vector<16x8xf32>, vector<32x8xf32> -> vector<32x8xf32>
    %88 = tpu.concatenate %36, %53, %70, %87 in 1 : vector<32x8xf32>, vector<32x8xf32>, vector<32x8xf32>, vector<32x8xf32> -> vector<32x32xf32>
    %cst_43 = arith.constant dense<0.000000e+00> : vector<32x32xf32>
    %89 = tpu.matmul %88, %8, %cst_43 {dimension_numbers = #tpu.dot_dimension_numbers<[1], [0], [0], [1], [0, 0, 1, 1], [], []>} : vector<32x32xf32>, vector<32x32xf32>, vector<32x32xf32> -> vector<32x32xf32>
    %90 = vector.broadcast %9 : vector<1x32xf32> to vector<32x32xf32>
    %91 = arith.addf %89, %90 : vector<32x32xf32>
    %92 = arith.addf %0, %91 : vector<32x32xf32>
    %c0_44 = arith.constant 0 : index
    %c0_45 = arith.constant 0 : index
    %93 = vector.load %arg12[%c0_44, %c0_45] : memref<1x32xf32, #tpu.memory_space<vmem>>, vector<1x32xf32>
    %c0_46 = arith.constant 0 : index
    %c0_47 = arith.constant 0 : index
    %94 = vector.load %arg13[%c0_46, %c0_47] : memref<1x32xf32, #tpu.memory_space<vmem>>, vector<1x32xf32>
    %cst_48 = arith.constant dense<0.000000e+00> : vector<32xf32>
    %95 = vector.multi_reduction <add>, %92, %cst_48 [1] : vector<32x32xf32> to vector<32xf32>
    %96 = vector.shape_cast %95 : vector<32xf32> to vector<32x1xf32>
    %cst_49 = arith.constant 3.200000e+01 : f32
    %97 = vector.broadcast %cst_49 : f32 to vector<32x1xf32>
    %98 = arith.divf %96, %97 : vector<32x1xf32>
    %99 = vector.broadcast %98 : vector<32x1xf32> to vector<32x32xf32>
    %100 = arith.subf %92, %99 : vector<32x32xf32>
    %101 = arith.mulf %100, %100 : vector<32x32xf32>
    %cst_50 = arith.constant dense<0.000000e+00> : vector<32xf32>
    %102 = vector.multi_reduction <add>, %101, %cst_50 [1] : vector<32x32xf32> to vector<32xf32>
    %103 = vector.shape_cast %102 : vector<32xf32> to vector<32x1xf32>
    %cst_51 = arith.constant 3.200000e+01 : f32
    %104 = vector.broadcast %cst_51 : f32 to vector<32x1xf32>
    %105 = arith.divf %103, %104 : vector<32x1xf32>
    %106 = vector.broadcast %98 : vector<32x1xf32> to vector<32x32xf32>
    %107 = arith.subf %92, %106 : vector<32x32xf32>
    %cst_52 = arith.constant 9.99999974E-6 : f32
    %108 = vector.broadcast %cst_52 : f32 to vector<32x1xf32>
    %109 = arith.addf %105, %108 : vector<32x1xf32>
    %110 = math.rsqrt %109 : vector<32x1xf32>
    %111 = vector.broadcast %110 : vector<32x1xf32> to vector<32x32xf32>
    %112 = arith.mulf %107, %111 : vector<32x32xf32>
    %113 = vector.broadcast %93 : vector<1x32xf32> to vector<32x32xf32>
    %114 = arith.mulf %112, %113 : vector<32x32xf32>
    %115 = vector.broadcast %94 : vector<1x32xf32> to vector<32x32xf32>
    %116 = arith.addf %114, %115 : vector<32x32xf32>
    %c0_53 = arith.constant 0 : index
    %c0_54 = arith.constant 0 : index
    %117 = vector.load %arg14[%c0_53, %c0_54] : memref<32x32xf32, #tpu.memory_space<vmem>>, vector<32x32xf32>
    tpu.vector_store %arg14[%c0_53, %c0_54], %116 {strides = array<i32>} : memref<32x32xf32, #tpu.memory_space<vmem>>, vector<32x32xf32>,
    return
  }
  func.func @transform_0(%arg0: i32) -> (i32, i32) {
    %c0_i32 = arith.constant 0 : i32
    %c0_i32_0 = arith.constant 0 : i32
    %c0_i32_1 = arith.constant 0 : i32
    return %c0_i32, %c0_i32_0 : i32, i32
  }
  func.func @transform_1(%arg0: i32) -> (i32, i32) {
    %c0_i32 = arith.constant 0 : i32
    %c0_i32_0 = arith.constant 0 : i32
    %c0_i32_1 = arith.constant 0 : i32
    return %c0_i32, %c0_i32_0 : i32, i32
  }
  func.func @transform_2(%arg0: i32) -> (i32, i32) {
    %c0_i32 = arith.constant 0 : i32
    %c0_i32_0 = arith.constant 0 : i32
    %c0_i32_1 = arith.constant 0 : i32
    return %c0_i32, %c0_i32_0 : i32, i32
  }
  func.func @transform_3(%arg0: i32) -> (i32, i32) {
    %c0_i32 = arith.constant 0 : i32
    %c0_i32_0 = arith.constant 0 : i32
    %c0_i32_1 = arith.constant 0 : i32
    return %c0_i32, %c0_i32_0 : i32, i32
  }
  func.func @transform_4(%arg0: i32) -> (i32, i32) {
    %c0_i32 = arith.constant 0 : i32
    %c0_i32_0 = arith.constant 0 : i32
    %c0_i32_1 = arith.constant 0 : i32
    return %c0_i32, %c0_i32_0 : i32, i32
  }
  func.func @transform_5(%arg0: i32) -> (i32, i32) {
    %c0_i32 = arith.constant 0 : i32
    %c0_i32_0 = arith.constant 0 : i32
    %c0_i32_1 = arith.constant 0 : i32
    return %c0_i32, %c0_i32_0 : i32, i32
  }
  func.func @transform_6(%arg0: i32) -> (i32, i32) {
    %c0_i32 = arith.constant 0 : i32
    %c0_i32_0 = arith.constant 0 : i32
    %c0_i32_1 = arith.constant 0 : i32
    return %c0_i32, %c0_i32_0 : i32, i32
  }
  func.func @transform_7(%arg0: i32) -> (i32, i32) {
    %c0_i32 = arith.constant 0 : i32
    %c0_i32_0 = arith.constant 0 : i32
    %c0_i32_1 = arith.constant 0 : i32
    return %c0_i32, %c0_i32_0 : i32, i32
  }
  func.func @transform_8(%arg0: i32) -> (i32, i32) {
    %c0_i32 = arith.constant 0 : i32
    %c0_i32_0 = arith.constant 0 : i32
    %c0_i32_1 = arith.constant 0 : i32
    return %c0_i32, %c0_i32_0 : i32, i32
  }
  func.func @transform_9(%arg0: i32) -> (i32, i32) {
    %c0_i32 = arith.constant 0 : i32
    %c0_i32_0 = arith.constant 0 : i32
    %c0_i32_1 = arith.constant 0 : i32
    return %c0_i32, %c0_i32_0 : i32, i32
  }
  func.func @transform_10(%arg0: i32) -> (i32, i32) {
    %c0_i32 = arith.constant 0 : i32
    %c0_i32_0 = arith.constant 0 : i32
    %c0_i32_1 = arith.constant 0 : i32
    return %c0_i32, %c0_i32_0 : i32, i32
  }
  func.func @transform_11(%arg0: i32) -> (i32, i32) {
    %c0_i32 = arith.constant 0 : i32
    %c0_i32_0 = arith.constant 0 : i32
    %c0_i32_1 = arith.constant 0 : i32
    return %c0_i32, %c0_i32_0 : i32, i32
  }
  func.func @transform_12(%arg0: i32) -> (i32, i32) {
    %c0_i32 = arith.constant 0 : i32
    %c0_i32_0 = arith.constant 0 : i32
    %c0_i32_1 = arith.constant 0 : i32
    return %c0_i32, %c0_i32_0 : i32, i32
  }
  func.func @transform_13(%arg0: i32) -> (i32, i32) {
    %c0_i32 = arith.constant 0 : i32
    %c0_i32_0 = arith.constant 0 : i32
    %c0_i32_1 = arith.constant 0 : i32
    return %c0_i32, %c0_i32_0 : i32, i32
  }
}

module attributes {stable_mosaic.version = 11 : i64} {
  func.func @_ln_linear_kernel(%arg0: i32, %arg1: memref<16x64xf32, #tpu.memory_space<vmem>>, %arg2: memref<1x64xf32, #tpu.memory_space<vmem>>, %arg3: memref<1x64xf32, #tpu.memory_space<vmem>>, %arg4: memref<64x32xf32, #tpu.memory_space<vmem>>, %arg5: memref<1x32xf32, #tpu.memory_space<vmem>>, %arg6: memref<16x32xf32, #tpu.memory_space<vmem>>) attributes {dimension_semantics = [#tpu.dimension_semantics<arbitrary>], iteration_bounds = array<i64: 1>, scalar_prefetch = 0 : i64, scratch_operands = 0 : i64, tpu.core_type = #tpu.core_type<tc>, window_params = [{pipeline_mode = #tpu.pipeline_mode<synchronous>, transform_indices = @transform_0, window_bounds = array<i64: 16, 64>}, {pipeline_mode = #tpu.pipeline_mode<synchronous>, transform_indices = @transform_1, window_bounds = array<i64: 1, 64>}, {pipeline_mode = #tpu.pipeline_mode<synchronous>, transform_indices = @transform_2, window_bounds = array<i64: 1, 64>}, {pipeline_mode = #tpu.pipeline_mode<synchronous>, transform_indices = @transform_3, window_bounds = array<i64: 64, 32>}, {pipeline_mode = #tpu.pipeline_mode<synchronous>, transform_indices = @transform_4, window_bounds = array<i64: 1, 32>}, {pipeline_mode = #tpu.pipeline_mode<synchronous>, transform_indices = @transform_5, window_bounds = array<i64: 16, 32>}]} {
    %c0 = arith.constant 0 : index
    %c0_0 = arith.constant 0 : index
    %0 = vector.load %arg1[%c0, %c0_0] : memref<16x64xf32, #tpu.memory_space<vmem>>, vector<16x64xf32>
    %c0_1 = arith.constant 0 : index
    %c0_2 = arith.constant 0 : index
    %1 = vector.load %arg2[%c0_1, %c0_2] : memref<1x64xf32, #tpu.memory_space<vmem>>, vector<1x64xf32>
    %c0_3 = arith.constant 0 : index
    %c0_4 = arith.constant 0 : index
    %2 = vector.load %arg3[%c0_3, %c0_4] : memref<1x64xf32, #tpu.memory_space<vmem>>, vector<1x64xf32>
    %cst = arith.constant dense<0.000000e+00> : vector<16xf32>
    %3 = vector.multi_reduction <add>, %0, %cst [1] : vector<16x64xf32> to vector<16xf32>
    %4 = vector.shape_cast %3 : vector<16xf32> to vector<16x1xf32>
    %cst_5 = arith.constant 6.400000e+01 : f32
    %5 = vector.broadcast %cst_5 : f32 to vector<16x1xf32>
    %6 = arith.divf %4, %5 : vector<16x1xf32>
    %7 = vector.broadcast %6 : vector<16x1xf32> to vector<16x64xf32>
    %8 = arith.subf %0, %7 : vector<16x64xf32>
    %9 = arith.mulf %8, %8 : vector<16x64xf32>
    %cst_6 = arith.constant dense<0.000000e+00> : vector<16xf32>
    %10 = vector.multi_reduction <add>, %9, %cst_6 [1] : vector<16x64xf32> to vector<16xf32>
    %11 = vector.shape_cast %10 : vector<16xf32> to vector<16x1xf32>
    %cst_7 = arith.constant 6.400000e+01 : f32
    %12 = vector.broadcast %cst_7 : f32 to vector<16x1xf32>
    %13 = arith.divf %11, %12 : vector<16x1xf32>
    %14 = vector.broadcast %6 : vector<16x1xf32> to vector<16x64xf32>
    %15 = arith.subf %0, %14 : vector<16x64xf32>
    %cst_8 = arith.constant 9.99999974E-6 : f32
    %16 = vector.broadcast %cst_8 : f32 to vector<16x1xf32>
    %17 = arith.addf %13, %16 : vector<16x1xf32>
    %18 = math.rsqrt %17 : vector<16x1xf32>
    %19 = vector.broadcast %18 : vector<16x1xf32> to vector<16x64xf32>
    %20 = arith.mulf %15, %19 : vector<16x64xf32>
    %21 = vector.broadcast %1 : vector<1x64xf32> to vector<16x64xf32>
    %22 = arith.mulf %20, %21 : vector<16x64xf32>
    %23 = vector.broadcast %2 : vector<1x64xf32> to vector<16x64xf32>
    %24 = arith.addf %22, %23 : vector<16x64xf32>
    %c0_9 = arith.constant 0 : index
    %c0_10 = arith.constant 0 : index
    %25 = vector.load %arg4[%c0_9, %c0_10] : memref<64x32xf32, #tpu.memory_space<vmem>>, vector<64x32xf32>
    %cst_11 = arith.constant dense<0.000000e+00> : vector<16x32xf32>
    %26 = tpu.matmul %24, %25, %cst_11 {dimension_numbers = #tpu.dot_dimension_numbers<[1], [0], [0], [1], [0, 0, 1, 1], [], []>} : vector<16x64xf32>, vector<64x32xf32>, vector<16x32xf32> -> vector<16x32xf32>
    %c0_12 = arith.constant 0 : index
    %c0_13 = arith.constant 0 : index
    %27 = vector.load %arg5[%c0_12, %c0_13] : memref<1x32xf32, #tpu.memory_space<vmem>>, vector<1x32xf32>
    %28 = vector.broadcast %27 : vector<1x32xf32> to vector<16x32xf32>
    %29 = arith.addf %26, %28 : vector<16x32xf32>
    %c0_14 = arith.constant 0 : index
    %c0_15 = arith.constant 0 : index
    %30 = vector.load %arg6[%c0_14, %c0_15] : memref<16x32xf32, #tpu.memory_space<vmem>>, vector<16x32xf32>
    tpu.vector_store %arg6[%c0_14, %c0_15], %29 {strides = array<i32>} : memref<16x32xf32, #tpu.memory_space<vmem>>, vector<16x32xf32>,
    return
  }
  func.func @transform_0(%arg0: i32) -> (i32, i32) {
    %c0_i32 = arith.constant 0 : i32
    %c0_i32_0 = arith.constant 0 : i32
    %c0_i32_1 = arith.constant 0 : i32
    return %c0_i32, %c0_i32_0 : i32, i32
  }
  func.func @transform_1(%arg0: i32) -> (i32, i32) {
    %c0_i32 = arith.constant 0 : i32
    %c0_i32_0 = arith.constant 0 : i32
    %c0_i32_1 = arith.constant 0 : i32
    return %c0_i32, %c0_i32_0 : i32, i32
  }
  func.func @transform_2(%arg0: i32) -> (i32, i32) {
    %c0_i32 = arith.constant 0 : i32
    %c0_i32_0 = arith.constant 0 : i32
    %c0_i32_1 = arith.constant 0 : i32
    return %c0_i32, %c0_i32_0 : i32, i32
  }
  func.func @transform_3(%arg0: i32) -> (i32, i32) {
    %c0_i32 = arith.constant 0 : i32
    %c0_i32_0 = arith.constant 0 : i32
    %c0_i32_1 = arith.constant 0 : i32
    return %c0_i32, %c0_i32_0 : i32, i32
  }
  func.func @transform_4(%arg0: i32) -> (i32, i32) {
    %c0_i32 = arith.constant 0 : i32
    %c0_i32_0 = arith.constant 0 : i32
    %c0_i32_1 = arith.constant 0 : i32
    return %c0_i32, %c0_i32_0 : i32, i32
  }
  func.func @transform_5(%arg0: i32) -> (i32, i32) {
    %c0_i32 = arith.constant 0 : i32
    %c0_i32_0 = arith.constant 0 : i32
    %c0_i32_1 = arith.constant 0 : i32
    return %c0_i32, %c0_i32_0 : i32, i32
  }
}

module attributes {stable_mosaic.version = 11 : i64} {
  func.func @_linear_kernel(%arg0: i32, %arg1: memref<16x32xf32, #tpu.memory_space<vmem>>, %arg2: memref<32x4xf32, #tpu.memory_space<vmem>>, %arg3: memref<1x4xf32, #tpu.memory_space<vmem>>, %arg4: memref<16x4xf32, #tpu.memory_space<vmem>>) attributes {dimension_semantics = [#tpu.dimension_semantics<arbitrary>], iteration_bounds = array<i64: 1>, scalar_prefetch = 0 : i64, scratch_operands = 0 : i64, tpu.core_type = #tpu.core_type<tc>, window_params = [{pipeline_mode = #tpu.pipeline_mode<synchronous>, transform_indices = @transform_0, window_bounds = array<i64: 16, 32>}, {pipeline_mode = #tpu.pipeline_mode<synchronous>, transform_indices = @transform_1, window_bounds = array<i64: 32, 4>}, {pipeline_mode = #tpu.pipeline_mode<synchronous>, transform_indices = @transform_2, window_bounds = array<i64: 1, 4>}, {pipeline_mode = #tpu.pipeline_mode<synchronous>, transform_indices = @transform_3, window_bounds = array<i64: 16, 4>}]} {
    %c0 = arith.constant 0 : index
    %c0_0 = arith.constant 0 : index
    %0 = vector.load %arg1[%c0, %c0_0] : memref<16x32xf32, #tpu.memory_space<vmem>>, vector<16x32xf32>
    %c0_1 = arith.constant 0 : index
    %c0_2 = arith.constant 0 : index
    %1 = vector.load %arg2[%c0_1, %c0_2] : memref<32x4xf32, #tpu.memory_space<vmem>>, vector<32x4xf32>
    %cst = arith.constant dense<0.000000e+00> : vector<16x4xf32>
    %2 = tpu.matmul %0, %1, %cst {dimension_numbers = #tpu.dot_dimension_numbers<[1], [0], [0], [1], [0, 0, 1, 1], [], []>} : vector<16x32xf32>, vector<32x4xf32>, vector<16x4xf32> -> vector<16x4xf32>
    %c0_3 = arith.constant 0 : index
    %c0_4 = arith.constant 0 : index
    %3 = vector.load %arg3[%c0_3, %c0_4] : memref<1x4xf32, #tpu.memory_space<vmem>>, vector<1x4xf32>
    %4 = vector.broadcast %3 : vector<1x4xf32> to vector<16x4xf32>
    %5 = arith.addf %2, %4 : vector<16x4xf32>
    %c0_5 = arith.constant 0 : index
    %c0_6 = arith.constant 0 : index
    %6 = vector.load %arg4[%c0_5, %c0_6] : memref<16x4xf32, #tpu.memory_space<vmem>>, vector<16x4xf32>
    tpu.vector_store %arg4[%c0_5, %c0_6], %5 {strides = array<i32>} : memref<16x4xf32, #tpu.memory_space<vmem>>, vector<16x4xf32>,
    return
  }
  func.func @transform_0(%arg0: i32) -> (i32, i32) {
    %c0_i32 = arith.constant 0 : i32
    %c0_i32_0 = arith.constant 0 : i32
    %c0_i32_1 = arith.constant 0 : i32
    return %c0_i32, %c0_i32_0 : i32, i32
  }
  func.func @transform_1(%arg0: i32) -> (i32, i32) {
    %c0_i32 = arith.constant 0 : i32
    %c0_i32_0 = arith.constant 0 : i32
    %c0_i32_1 = arith.constant 0 : i32
    return %c0_i32, %c0_i32_0 : i32, i32
  }
  func.func @transform_2(%arg0: i32) -> (i32, i32) {
    %c0_i32 = arith.constant 0 : i32
    %c0_i32_0 = arith.constant 0 : i32
    %c0_i32_1 = arith.constant 0 : i32
    return %c0_i32, %c0_i32_0 : i32, i32
  }
  func.func @transform_3(%arg0: i32) -> (i32, i32) {
    %c0_i32 = arith.constant 0 : i32
    %c0_i32_0 = arith.constant 0 : i32
    %c0_i32_1 = arith.constant 0 : i32
    return %c0_i32, %c0_i32_0 : i32, i32
  }
}

</mosaic_0001>

<bundles_post_ra>
// kernel: transformer_tf_attn_forward.49
= control target key start
LH: loop header
LB: loop body
LE: loop exit
PB: predicated region body
PF: predicated region fallthrough
CT: control target
= control target key end

     0   :  { %vm39_vm0 = vcmask 261120   ;;  %vm190_vm3 = vcmask 523264   ;;  %s531_s1 = inlined_call_operand.vmem [shape: f32[32,64], index: 1, kind: input, shape index: {}]   ;;  %s532_s0 = inlined_call_operand.vmem [shape: f32[16,32], index: 0, kind: input, shape index: {}]   ;;  %s533_s3 = inlined_call_operand.vmem [shape: f32[64,32], index: 3, kind: input, shape index: {}]   ;;  %s534_s2 = inlined_call_operand.vmem [shape: f32[1,64], index: 2, kind: input, shape index: {}]   ;;  %s535_s4 = inlined_call_operand.vmem [shape: f32[1,32], index: 4, kind: input, shape index: {}]   ;;  %s536_s5 = inlined_call_operand.vmem [shape: f32[1,32], index: 5, kind: input, shape index: {}]   ;;  %s537_s6 = inlined_call_operand.vmem [shape: f32[1,32], index: 6, kind: input, shape index: {}]   ;;  %s538_s7 = inlined_call_operand.vmem [shape: f32[16,32], index: 7, kind: output, shape index: {}]  }
   0x1   :  { %v28_v0 = vld [vmem:[%s531_s1] sm:$0xff]  ;;  %v29_v1 = vld [vmem:[%s531_s1 + $0x8] sm:$0xff]  ;;  %v30_v2 = vld [vmem:[%s531_s1 + $0x10] sm:$0xff] }
   0x2   :  { %v379_v3 = vpack.c.bf16 %v29_v1, %v28_v0  ;;  %v31_v4 = vld [vmem:[%s531_s1 + $0x18] sm:$0xff]  ;;  %v470_v5 = vld [vmem:[%s532_s0] sm:$0xff]  ;;  %v477_v7 = vld [vmem:[%s532_s0 + $0x8] sm:$0xff] }
   0x3   :  { %v383_v6 = vpack.c.bf16 %v31_v4, %v30_v2  ;;  %357 = vmatprep.mubr.msk.f32.mxu0 %vm39_vm0, %v470_v5  ;;  %v175_v8 = vld [vmem:[%s533_s3] sm:$0xff]  ;;  %v176_v9 = vld [vmem:[%s533_s3 + $0x8] sm:$0xff]  ;;  %v177_v11 = vld [vmem:[%s533_s3 + $0x10] sm:$0xff] }
   0x4   :  { %380 = vmatprep.subr.bf16.mxu0 %v379_v3  ;;  %v387_v10 = vpack.c.bf16 %v176_v9, %v175_v8  ;;  %v178_v12 = vld [vmem:[%s533_s3 + $0x18] sm:$0xff]  ;;  %v179_v14 = vld [vmem:[%s533_s3 + $0x20] sm:$0xff]  ;;  %v180_v15 = vld [vmem:[%s533_s3 + $0x28] sm:$0xff] }
   0x5   :  { %382 = vmatpush3.bf16.msra.mxu0 %v379_v3  ;;  %v391_v13 = vpack.c.bf16 %v178_v12, %v177_v11  ;;  %v395_v16 = vpack.c.bf16 %v180_v15, %v179_v14  ;;  %v181_v17 = vld [vmem:[%s533_s3 + $0x30] sm:$0xff]  ;;  %v182_v18 = vld [vmem:[%s533_s3 + $0x38] sm:$0xff]  ;;  %v325_v20 = vld [vmem:[%s534_s2] ss:$0 sm:$0xff] }
   0x6   :  { %384 = vmatprep.subr.bf16.mxu0 %v383_v6  ;;  %388 = vmatprep.subr.bf16.mxu1 %v387_v10  ;;  %v399_v19 = vpack.c.bf16 %v182_v18, %v181_v17 }
   0x7   :  { %390 = vmatpush3.bf16.msra.mxu1 %v387_v10 }
   0x8   :  { %392 = vmatprep.subr.bf16.mxu1 %v391_v13 }
   0x9   :  { %386 = vmatpush3.bf16.msra.mxu0 %v383_v6 }
   0xb   :  { %394 = vmatpush3.bf16.msra.mxu1 %v391_v13  ;;  %v328_v13 = vld [vmem:[%s535_s4] ss:$0 sm:$0xff] }
   0xc   :  { %358 = vmatmul.mubr.msk.f32.vlgmr.msra.gmra.mrb[0].mxu0 %vm39_vm0, %v477_v7  ;;  %396 = vmatprep.subr.bf16.mxu1 %v395_v16 }
   0xf   :  { %398 = vmatpush3.bf16.msra.mxu1 %v395_v16 }
  0x10   :  { %400 = vmatprep.subr.bf16.mxu1 %v399_v19 }
  0x13   :  { %402 = vmatpush3.bf16.msra.mxu1 %v399_v19 }
  0xdf   :  { %v359_v21 = vpop.f32.mrb[0].mxu0 }
  0xe0   :  { %v118_v22 = vadd.f32 %v359_v21, %v325_v20  ;;  %v112_v23 = vpop.f32.mrb[1].mxu0 }
  0xe1   :  { %v113_v24 = vadd.f32 %v325_v20, %v112_v23 }
  0xe2   :  { %v122_v25 = vmul.f32 0.70710677, %v118_v22  ;;  %v170_v10 = vmul.f32 0.5, %v118_v22 }
  0xe3   :  { %v121_v26 = vmul.f32 0.70710677, %v113_v24  ;;  %v169_v8 = vmul.f32 0.5, %v113_v24 }
  0xe4   :  { %v124_v27 = vand.u32 2147483647, %v122_v25  ;;  %vm164_vm1 = vcmp.ge.f32.partialorder %v122_v25, 0.0 }
  0xe5   :  { %v123_v28 = vand.u32 2147483647, %v121_v26  ;;  %vm163_vm2 = vcmp.ge.f32.partialorder %v121_v26, 0.0 }
  0xe6   :  { %v126_v29 = vmul.f32 0.3275911, %v124_v27  ;;  %v152_v33 = vsub.f32 0.0, %v124_v27 }
  0xe7   :  { %v125_v30 = vmul.f32 0.3275911, %v123_v28  ;;  %v151_v34 = vsub.f32 0.0, %v123_v28 }
  0xe8   :  { %v128_v31 = vadd.f32 1.0, %v126_v29  ;;  %v154_v36 = vmul.f32 %v152_v33, %v124_v27 }
  0xe9   :  { %v127_v32 = vadd.f32 1.0, %v125_v30  ;;  %v153_v39 = vmul.f32 %v151_v34, %v123_v28 }
  0xea   :  { %403 = vrcp.f32 %v128_v31  ;;  %v157_v42 = vmul.f32 1.442695, %v154_v36 }
  0xeb   :  { %405 = vrcp.f32 %v127_v32  ;;  %v155_v45 = vmul.f32 1.442695, %v153_v39  ;;  %v332_v39 = vld [vmem:[%s537_s6] ss:$0 sm:$0xff] }
  0xec   :  { %407 = vpow2.f32 %v157_v42 }
  0xed   :  { %409 = vpow2.f32 %v155_v45 }
  0xf4   :  { %v404_v35 = vpop.eup %403 }
  0xf5   :  { %v406_v37 = vpop.eup %405  ;;  %v134_v38 = vmul.f32 1.0614054, %v404_v35 }
  0xf6   :  { %v133_v40 = vmul.f32 1.0614054, %v406_v37  ;;  %v408_v58 = vpop.eup %407 }
  0xf7   :  { %v136_v41 = vadd.f32 -1.4531521, %v134_v38  ;;  %v410_v60 = vpop.eup %409 }
  0xf8   :  { %v135_v43 = vadd.f32 -1.4531521, %v133_v40 }
  0xf9   :  { %v138_v44 = vmul.f32 %v404_v35, %v136_v41 }
  0xfa   :  { %v137_v46 = vmul.f32 %v406_v37, %v135_v43 }
  0xfb   :  { %v140_v47 = vadd.f32 1.4214138, %v138_v44 }
  0xfc   :  { %v139_v48 = vadd.f32 1.4214138, %v137_v46 }
  0xfd   :  { %v142_v49 = vmul.f32 %v404_v35, %v140_v47 }
  0xfe   :  { %v141_v50 = vmul.f32 %v406_v37, %v139_v48 }
  0xff   :  { %v144_v51 = vadd.f32 -0.28449672, %v142_v49 }
 0x100   :  { %v143_v52 = vadd.f32 -0.28449672, %v141_v50 }
 0x101   :  { %v146_v53 = vmul.f32 %v404_v35, %v144_v51 }
 0x102   :  { %v145_v54 = vmul.f32 %v406_v37, %v143_v52 }
 0x103   :  { %v148_v55 = vadd.f32 0.2548296, %v146_v53 }
 0x104   :  { %v147_v56 = vadd.f32 0.2548296, %v145_v54 }
 0x105   :  { %v150_v57 = vmul.f32 %v404_v35, %v148_v55 }
 0x106   :  { %v149_v59 = vmul.f32 %v406_v37, %v147_v56  ;;  %v331_v37 = vld [vmem:[%s536_s5] ss:$0 sm:$0xff] }
 0x107   :  { %v160_v61 = vmul.f32 %v408_v58, %v150_v57 }
 0x108   :  { %v159_v62 = vmul.f32 %v410_v60, %v149_v59 }
 0x109   :  { %v162_v63 = vsub.f32 1.0, %v160_v61 }
 0x10a   :  { %v161_v0 = vsub.f32 1.0, %v159_v62 }
 0x10b   :  { %v166_v1 = vsub.f32 0.0, %v162_v63 }
 0x10c   :  { %v165_v2 = vsub.f32 0.0, %v161_v0 }
 0x10d   :  { %v168_v3 = vsel %vm164_vm1, %v162_v63, %v166_v1 }
 0x10e   :  { %v172_v4 = vadd.f32 1.0, %v168_v3  ;;  %v167_v6 = vsel %vm163_vm2, %v161_v0, %v165_v2 }
 0x10f   :  { %v171_v9 = vadd.f32 1.0, %v167_v6 }
 0x110   :  { %v174_v12 = vmul.f32 %v172_v4, %v170_v10 }
 0x111   :  { %v173_v11 = vmul.f32 %v171_v9, %v169_v8 }
 0x113   :  { %376 = vmatprep.mubr.msk.f32.mxu1 %vm190_vm3, %v173_v11 }
 0x114   :  { %377 = vmatmul.mubr.msk.f32.vlgmr.msra.gmra.mrb[0].mxu1 %vm190_vm3, %v174_v12 }
 0x1e7   :  { %v378_v14 = vpop.f32.mrb[0].mxu1 }
 0x1e8   :  { %v263_v15 = vpop.f32.mrb[1].mxu1  ;;  %v269_v16 = vadd.f32 %v378_v14, %v328_v13 }
 0x1e9   :  { %v264_v17 = vadd.f32 %v328_v13, %v263_v15 }
 0x1ea   :  { %v273_v20 = vadd.f32 %v269_v16, %v477_v7 }
 0x1eb   :  { %v272_v18 = vadd.f32 %v264_v17, %v470_v5 }
 0x1ec   :  { %v279_v21 = vsel %vm39_vm0, %v273_v20, 0.0 }
 0x1ed   :  { %v276_v19 = vsel %vm39_vm0, %v272_v18, 0.0 }
 0x1ee   :  { %277 = vadd.xlane.f32.xlu0 %v276_v19 }
 0x1f2   :  { %280 = vadd.xlane.f32.xlu0 %v279_v21 }
 0x27b   :  { %v278_v22 = vpop.xlane.xlu0 %277 }
 0x27c   :  { %v283_v23 = vmul.f32 0.03125, %v278_v22 }
 0x27e   :  { %v285_v24 = vsub.f32 %v272_v18, %v283_v23 }
 0x27f   :  { %v281_v25 = vpop.xlane.xlu0 %280 }
 0x280   :  { %v284_v26 = vmul.f32 0.03125, %v281_v25  ;;  %v287_v27 = vmul.f32 %v285_v24, %v285_v24 }
 0x282   :  { %v286_v28 = vsub.f32 %v273_v20, %v284_v26  ;;  %v289_v29 = vsel %vm39_vm0, %v287_v27, 0.0 }
 0x283   :  { %290 = vadd.xlane.f32.xlu1 %v289_v29 }
 0x284   :  { %v288_v30 = vmul.f32 %v286_v28, %v286_v28 }
 0x286   :  { %v292_v5 = vsel %vm39_vm0, %v288_v30, 0.0 }
 0x287   :  { %293 = vadd.xlane.f32.xlu1 %v292_v5 }
 0x310   :  { %v291_v31 = vpop.xlane.xlu1 %290 }
 0x311   :  { %v295_v7 = vmul.f32 0.03125, %v291_v31 }
 0x313   :  { %v297_v32 = vadd.f32 1e-05, %v295_v7 }
 0x314   :  { %v294_v33 = vpop.xlane.xlu1 %293 }
 0x315   :  { %411 = vrsqrt.f32 %v297_v32  ;;  %v296_v34 = vmul.f32 0.03125, %v294_v33 }
 0x317   :  { %v298_v35 = vadd.f32 1e-05, %v296_v34 }
 0x319   :  { %413 = vrsqrt.f32 %v298_v35 }
 0x31f   :  { %v412_v36 = vpop.eup %411 }
 0x320   :  { %v301_v38 = vmul.f32 %v412_v36, %v285_v24 }
 0x322   :  { %v309_v40 = vmul.f32 %v331_v37, %v301_v38 }
 0x323   :  { %v414_v41 = vpop.eup %413 }
 0x324   :  { %v317_v42 = vadd.f32 %v332_v39, %v309_v40  ;;  %v302_v43 = vmul.f32 %v414_v41, %v286_v28 }
 0x326   :  { %319 = vst.msk [vmem:[%s538_s7] sm:$0xff] %vm39_vm0, %v317_v42  ;;  %v310_v44 = vmul.f32 %v331_v37, %v302_v43 }
 0x328   :  { %v318_v45 = vadd.f32 %v332_v39, %v310_v44 }
 0x32a   :  { %320 = vst.msk [vmem:[%s538_s7 + $0x8] sm:$0xff] %vm39_vm0, %v318_v45 }

// kernel: transformer_tf_attn_forward.48
= control target key start
LH: loop header
LB: loop body
LE: loop exit
PB: predicated region body
PF: predicated region fallthrough
CT: control target
= control target key end

     0   :  { %vm76_vm0 = vcmask 261120   ;;  %vm326_vm1 = vcmask 64512   ;;  %vm418_vm3 = vcmask 130048   ;;  %s1648_s26 = smov 8   ;;  %s1649_s27 = smov 16   ;;  %vm1164_vm4 = vcmask 195584   ;;  %s1949_s4 = inlined_call_operand.vmem [shape: f32[32,32], index: 4, kind: input, shape index: {}]   ;;  %s1950_s1 = inlined_call_operand.vmem [shape: f32[16,32], index: 1, kind: input, shape index: {}, may-alias: {0,1}]   ;;  %s1951_s2 = inlined_call_operand.vmem [shape: f32[32,32], index: 2, kind: input, shape index: {}]   ;;  %s1952_s0 = inlined_call_operand.vmem [shape: f32[16,32], index: 0, kind: input, shape index: {}, may-alias: {0,1}]   ;;  %s1953_s6 = inlined_call_operand.vmem [shape: f32[32,32], index: 6, kind: input, shape index: {}]   ;;  %s1954_s5 = inlined_call_operand.vmem [shape: f32[1,32], index: 5, kind: input, shape index: {}]   ;;  %s1955_s3 = inlined_call_operand.vmem [shape: f32[1,32], index: 3, kind: input, shape index: {}]   ;;  %s1956_s10 = inlined_call_operand.vmem [shape: f32[16,16], index: 10, kind: input, shape index: {}]   ;;  %s1957_s7 = inlined_call_operand.vmem [shape: f32[1,32], index: 7, kind: input, shape index: {}]   ;;  %s1958_s8 = inlined_call_operand.vmem [shape: f32[32,32], index: 8, kind: input, shape index: {}]   ;;  %s1959_s9 = inlined_call_operand.vmem [shape: f32[1,32], index: 9, kind: input, shape index: {}]   ;;  %s1960_s11 = inlined_call_operand.vmem [shape: f32[1,32], index: 11, kind: input, shape index: {}]   ;;  %s1961_s12 = inlined_call_operand.vmem [shape: f32[1,32], index: 12, kind: input, shape index: {}]   ;;  %s1962_s13 = inlined_call_operand.vmem [shape: f32[16,32], index: 13, kind: output, shape index: {}]  }
   0x1   :  { %v53_v0 = vld [vmem:[%s1949_s4] sm:$0xff]  ;;  %v54_v1 = vld [vmem:[%s1949_s4 + $0x8] sm:$0xff]  ;;  %v55_v2 = vld [vmem:[%s1949_s4 + $0x10] sm:$0xff]  ;;  %s1650_s17 = smov 24  }
   0x2   :  { %v1509_v3 = vpack.c.bf16 %v54_v1, %v53_v0  ;;  %v56_v4 = vld [vmem:[%s1949_s4 + $0x18] sm:$0xff]  ;;  %v46_v5 = vld [vmem:[%s1950_s1] sm:$0xff]  ;;  %v49_v8 = vld [vmem:[%s1951_s2 + $0x8] sm:$0xff] }
   0x3   :  { %v1513_v6 = vpack.c.bf16 %v56_v4, %v55_v2  ;;  %1420 = vmatprep.mubr.msk.f32.mxu1 %vm76_vm0, %v46_v5  ;;  %v48_v7 = vld [vmem:[%s1951_s2] sm:$0xff]  ;;  %v50_v9 = vld [vmem:[%s1951_s2 + $0x10] sm:$0xff]  ;;  %v51_v11 = vld [vmem:[%s1951_s2 + $0x18] sm:$0xff] }
   0x4   :  { %1510 = vmatprep.subr.bf16.mxu1 %v1509_v3  ;;  %v1501_v10 = vpack.c.bf16 %v49_v8, %v48_v7  ;;  %v1752_v12 = vld [vmem:[%s1952_s0] sm:$0xff]  ;;  %v1505_v13 = vpack.c.bf16 %v51_v11, %v50_v9  ;;  %v47_v14 = vld [vmem:[%s1950_s1 + $0x8] sm:$0xff]  ;;  %v60_v18 = vld [vmem:[%s1953_s6 + $0x10] sm:$0xff] }
   0x5   :  { %1512 = vmatpush3.bf16.msra.mxu1 %v1509_v3  ;;  %1409 = vmatprep.mubr.msk.f32.mxu0 %vm76_vm0, %v1752_v12  ;;  %v1762_v15 = vld [vmem:[%s1952_s0 + $0x8] sm:$0xff]  ;;  %v58_v16 = vld [vmem:[%s1953_s6] sm:$0xff]  ;;  %v61_v20 = vld [vmem:[%s1953_s6 + $0x18] sm:$0xff] }
   0x6   :  { %1514 = vmatprep.subr.bf16.mxu1 %v1513_v6  ;;  %1502 = vmatprep.subr.bf16.mxu0 %v1501_v10  ;;  %v59_v17 = vld [vmem:[%s1953_s6 + $0x8] sm:$0xff]  ;;  %v1521_v21 = vpack.c.bf16 %v61_v20, %v60_v18  ;;  %v1310_v22 = vld [vmem:[%s1954_s5] ss:$0 sm:$0xff]  ;;  %vm1788_vm2 = vmpackc.low %vm326_vm1, %vm326_vm1 }
   0x7   :  { %1504 = vmatpush3.bf16.msra.mxu0 %v1501_v10  ;;  %v1517_v19 = vpack.c.bf16 %v59_v17, %v58_v16  ;;  %v1307_v26 = vld [vmem:[%s1955_s3] ss:$0 sm:$0xff]  ;;  %s1645_s3 = smov 120   ;;  %v1817_v40 = vld [vmem:[%s1956_s10 + $0x8] sm:$0xff] }
   0x8   :  { %1506 = vmatprep.subr.bf16.mxu0 %v1505_v13  ;;  %v1812_v37 = vld [vmem:[%s1956_s10] sm:$0xff]  ;;  %s1647_s10 = smov 104  }
   0x9   :  { %1516 = vmatpush3.bf16.msra.mxu1 %v1513_v6  ;;  %v1313_v46 = vld [vmem:[%s1957_s7] ss:$0 sm:$0xff]  ;;  %s1646_s7 = smov 112  }
   0xb   :  { %1508 = vmatpush3.bf16.msra.mxu0 %v1505_v13 }
   0xc   :  { %1421 = vmatmul.mubr.msk.f32.vlgmr.msra.gmra.mrb[0].mxu1 %vm76_vm0, %v47_v14  ;;  %1518 = vmatprep.subr.bf16.mxu0 %v1517_v19 }
   0xe   :  { %1410 = vmatmul.mubr.msk.f32.vlgmr.msra.gmra.mrb[0].mxu0 %vm76_vm0, %v1762_v15 }
   0xf   :  { %1431 = vmatprep.mubr.msk.f32.mxu0 %vm76_vm0, %v46_v5  ;;  %1520 = vmatpush3.bf16.msra.mxu0 %v1517_v19 }
  0x10   :  { %1522 = vmatprep.subr.bf16.mxu0 %v1521_v21 }
  0x13   :  { %1524 = vmatpush3.bf16.msra.mxu0 %v1521_v21 }
  0x16   :  { %1432 = vmatmul.mubr.msk.f32.vlgmr.msra.gmra.mrb[2].mxu0 %vm76_vm0, %v47_v14 }
  0xdf   :  { %v1422_v23 = vpop.f32.mrb[0].mxu1 }
  0xe0   :  { %v242_v24 = vadd.f32 %v1422_v23, %v1310_v22  ;;  %v236_v25 = vpop.f32.mrb[1].mxu1 }
  0xe1   :  { %v237_v27 = vadd.f32 %v1310_v22, %v236_v25  ;;  %v1411_v28 = vpop.f32.mrb[0].mxu0 }
  0xe2   :  { %v149_v30 = vpop.f32.mrb[1].mxu0  ;;  %v1805_v34 = vadd.f32 %v1411_v28, %v1307_v26 }
  0xe3   :  { %v1525_v31 = vpack.c.bf16 %v242_v24, %v237_v27  ;;  %v1792_v32 = vadd.f32 %v1307_v26, %v149_v30  ;;  %v1795_v33 = vpack.i.bf16 %v242_v24, %v237_v27 }
  0xe5   :  { %1527 = vmatprep.subr.msk.bf16.mxu1 %vm1788_vm2, %v1525_v31  ;;  %522 = vrot.lane.b32.xlu1 %v1792_v32, %s1645_s3 }
  0xe6   :  { %1530 = vmatpush3.bf16.xpose.msk.msra.mxu1 %vm1788_vm2, %v1525_v31  ;;  %1438 = vmatprep.mubr.msk.f32.mxu1 %vm326_vm1, %v1792_v32 }
  0xe9   :  { %v1433_v45 = vpop.f32.mrb[2].mxu0 }
  0xea   :  { %v317_v47 = vpop.f32.mrb[3].mxu0  ;;  %v323_v48 = vadd.f32 %v1433_v45, %v1313_v46 }
  0xeb   :  { %v318_v49 = vadd.f32 %v1313_v46, %v317_v47 }
  0xed   :  { %1439 = vmatmul.mubr.msk.f32.vlgmr.msra.gmra.mrb[2].mxu1 %vm326_vm1, %v1805_v34  ;;  %v1531_v50 = vpack.c.bf16 %v323_v48, %v318_v49  ;;  %v1848_v21 = vpack.i.bf16 %v323_v48, %v318_v49 }
  0xef   :  { %1532 = vmatprep.subr.bf16.mxu1 %v1531_v50 }
  0xf0   :  { %1534 = vmatpush3.bf16.msra.mxu1 %v1531_v50 }
 0x157   :  { %v523_v1 = vpop.permute.xlu1 %522 }
 0x1c0   :  { %v1440_v35 = vpop.f32.mrb[2].mxu1 }
 0x1c1   :  { %v405_v36 = vpop.f32.mrb[3].mxu1  ;;  %v415_v38 = vmul.f32 0.35355338, %v1440_v35 }
 0x1c2   :  { %v414_v39 = vmul.f32 0.35355338, %v405_v36 }
 0x1c3   :  { %v417_v43 = vadd.f32 %v415_v38, %v1817_v40 }
 0x1c4   :  { %v416_v41 = vadd.f32 %v414_v39, %v1812_v37 }
 0x1c5   :  { %v422_v44 = vsel %vm418_vm3, %v417_v43, -inf }
 0x1c6   :  { %v419_v42 = vsel %vm418_vm3, %v416_v41, -inf }
 0x1c7   :  { %420 = vmax.xlane.f32.xlu0 %v419_v42 }
 0x1cb   :  { %423 = vmax.xlane.f32.xlu0 %v422_v44 }
 0x1e1   :  { %1580 = vrot.lane.b32.xlu0 %v1795_v33, %s1645_s3 }
 0x254   :  { %v421_v51 = vpop.xlane.xlu0 %420 }
 0x255   :  { %v425_v52 = vsub.f32 %v416_v41, %v421_v51 }
 0x257   :  { %v427_v55 = vmul.f32 1.442695, %v425_v52 }
 0x258   :  { %v424_v53 = vpop.xlane.xlu0 %423 }
 0x259   :  { %v426_v54 = vsub.f32 %v417_v43, %v424_v53 }
 0x25b   :  { %v429_v56 = vmul.f32 1.442695, %v426_v54 }
 0x25c   :  { %v1581_v57 = vpop.permute.xlu0 %1580 }
 0x25d   :  { %1609 = vpow2.f32 %v429_v56  ;;  %v1583_v58 = vunpack.i.h.bf16 %v1581_v57  ;;  %v1582_v59 = vunpack.i.l.bf16 %v1581_v57 }
 0x25e   :  { %1611 = vpow2.f32 %v427_v55 }
 0x25f   :  { %v1535_v60 = vpack.c.bf16 %v1583_v58, %v1582_v59 }
 0x261   :  { %1537 = vmatprep.subr.msk.bf16.mxu1 %vm1788_vm2, %v1535_v60 }
 0x267   :  { %v1610_v61 = vpop.eup %1609 }
 0x268   :  { %v434_v62 = vsel %vm418_vm3, %v1610_v61, 0.0  ;;  %v1612_v63 = vpop.eup %1611 }
 0x269   :  { %435 = vadd.xlane.f32.xlu1 %v434_v62  ;;  %v431_v0 = vsel %vm418_vm3, %v1612_v63, 0.0 }
 0x26d   :  { %432 = vadd.xlane.f32.xlu1 %v431_v0 }
 0x27e   :  { %524 = vrot.lane.b32.xlu1 %v1805_v34, %s1645_s3 }
 0x2f6   :  { %v436_v2 = vpop.xlane.xlu1 %435 }
 0x2f7   :  { %1613 = vrcp.f32 %v436_v2 }
 0x2fa   :  { %v433_v3 = vpop.xlane.xlu1 %432 }
 0x2fb   :  { %1615 = vrcp.f32 %v433_v3 }
 0x2fe   :  { %v525_v8 = vpop.permute.xlu1 %524 }
 0x301   :  { %v1614_v4 = vpop.eup %1613 }
 0x302   :  { %v440_v7 = vmul.f32 %v1614_v4, %v1610_v61 }
 0x305   :  { %v1616_v5 = vpop.eup %1615 }
 0x306   :  { %v438_v6 = vmul.f32 %v1616_v5, %v1612_v63 }
 0x308   :  { %1445 = vmatprep.mubr.msk.f32.mxu1 %vm418_vm3, %v438_v6 }
 0x309   :  { %1446 = vmatmul.mubr.msk.f32.vlgmr.msra.gmra.mrb[4].mxu1 %vm418_vm3, %v440_v7 }
 0x30a   :  { %1540 = vmatpush3.bf16.xpose.msk.msra.mxu1 %vm1788_vm2, %v1535_v60  ;;  %1452 = vmatprep.mubr.msk.f32.mxu1 %vm326_vm1, %v523_v1 }
 0x311   :  { %1453 = vmatmul.mubr.msk.f32.vlgmr.msra.gmra.mrb[6].mxu1 %vm326_vm1, %v525_v8 }
 0x3dc   :  { %v1840_v9 = vpop.f32.mrb[4].mxu1 }
 0x3dd   :  { %v1842_v10 = vpop.f32.mrb[5].mxu1 }
 0x3e4   :  { %v1454_v11 = vpop.f32.mrb[6].mxu1 }
 0x3e5   :  { %v614_v13 = vmul.f32 0.35355338, %v1454_v11  ;;  %v604_v14 = vpop.f32.mrb[7].mxu1 }
 0x3e6   :  { %v613_v16 = vmul.f32 0.35355338, %v604_v14 }
 0x3e7   :  { %v616_v17 = vadd.f32 %v614_v13, %v1817_v40 }
 0x3e8   :  { %v615_v18 = vadd.f32 %v613_v16, %v1812_v37 }
 0x3e9   :  { %v620_v19 = vsel %vm418_vm3, %v616_v17, -inf }
 0x3ea   :  { %621 = vmax.xlane.f32.xlu0 %v620_v19  ;;  %v617_v20 = vsel %vm418_vm3, %v615_v18, -inf }
 0x3eb   :  { %618 = vmax.xlane.f32.xlu1 %v617_v20 }
 0x3fc   :  { %1585 = vrot.lane.b32.xlu1 %v1848_v21, %s1645_s3 }
 0x400   :  { %728 = vrot.lane.b32.xlu1 %v1792_v32, %s1646_s7 }
 0x404   :  { %730 = vrot.lane.b32.xlu1 %v1805_v34, %s1646_s7 }
 0x477   :  { %v622_v22 = vpop.xlane.xlu0 %621 }
 0x478   :  { %v624_v23 = vsub.f32 %v616_v17, %v622_v22  ;;  %v619_v24 = vpop.xlane.xlu1 %618 }
 0x479   :  { %v623_v25 = vsub.f32 %v615_v18, %v619_v24 }
 0x47a   :  { %v627_v26 = vmul.f32 1.442695, %v624_v23 }
 0x47b   :  { %v625_v27 = vmul.f32 1.442695, %v623_v25 }
 0x47c   :  { %1617 = vpow2.f32 %v627_v26  ;;  %v1586_v28 = vpop.permute.xlu1 %1585 }
 0x47d   :  { %v1588_v30 = vunpack.i.h.bf16 %v1586_v28  ;;  %v1587_v31 = vunpack.i.l.bf16 %v1586_v28  ;;  %1619 = vpow2.f32 %v625_v27 }
 0x47f   :  { %v1541_v35 = vpack.c.bf16 %v1588_v30, %v1587_v31 }
 0x480   :  { %v729_v52 = vpop.permute.xlu1 %728 }
 0x481   :  { %1542 = vmatprep.subr.bf16.mxu0 %v1541_v35 }
 0x482   :  { %1544 = vmatpush3.bf16.msra.mxu0 %v1541_v35 }
 0x484   :  { %v731_v53 = vpop.permute.xlu1 %730 }
 0x486   :  { %v1618_v36 = vpop.eup %1617 }
 0x487   :  { %v632_v38 = vsel %vm418_vm3, %v1618_v36, 0.0  ;;  %v1620_v39 = vpop.eup %1619 }
 0x488   :  { %633 = vadd.xlane.f32.xlu0 %v632_v38  ;;  %v629_v41 = vsel %vm418_vm3, %v1620_v39, 0.0 }
 0x48c   :  { %630 = vadd.xlane.f32.xlu0 %v629_v41 }
 0x4a2   :  { %1590 = vrot.lane.b32.xlu0 %v1795_v33, %s1646_s7 }
 0x515   :  { %v634_v42 = vpop.xlane.xlu0 %633 }
 0x516   :  { %1621 = vrcp.f32 %v634_v42 }
 0x519   :  { %v631_v43 = vpop.xlane.xlu0 %630 }
 0x51a   :  { %1623 = vrcp.f32 %v631_v43 }
 0x51d   :  { %v1591_v44 = vpop.permute.xlu0 %1590 }
 0x51e   :  { %v1593_v45 = vunpack.i.h.bf16 %v1591_v44  ;;  %v1592_v46 = vunpack.i.l.bf16 %v1591_v44 }
 0x520   :  { %v1545_v47 = vpack.c.bf16 %v1593_v45, %v1592_v46  ;;  %v1622_v48 = vpop.eup %1621 }
 0x521   :  { %v638_v51 = vmul.f32 %v1622_v48, %v1618_v36 }
 0x522   :  { %1547 = vmatprep.subr.msk.bf16.mxu0 %vm1788_vm2, %v1545_v47 }
 0x524   :  { %v1624_v49 = vpop.eup %1623 }
 0x525   :  { %v636_v50 = vmul.f32 %v1624_v49, %v1620_v39 }
 0x527   :  { %1459 = vmatprep.mubr.msk.f32.mxu0 %vm418_vm3, %v636_v50 }
 0x528   :  { %1460 = vmatmul.mubr.msk.f32.vlgmr.msra.gmra.mrb[4].mxu0 %vm418_vm3, %v638_v51 }
 0x529   :  { %1550 = vmatpush3.bf16.xpose.msk.msra.mxu0 %vm1788_vm2, %v1545_v47  ;;  %1466 = vmatprep.mubr.msk.f32.mxu0 %vm326_vm1, %v729_v52 }
 0x530   :  { %1467 = vmatmul.mubr.msk.f32.vlgmr.msra.gmra.mrb[6].mxu0 %vm326_vm1, %v731_v53 }
 0x5fb   :  { %v1868_v54 = vpop.f32.mrb[4].mxu0 }
 0x5fc   :  { %v1870_v55 = vpop.f32.mrb[5].mxu0 }
 0x603   :  { %v1468_v56 = vpop.f32.mrb[6].mxu0 }
 0x604   :  { %v820_v57 = vmul.f32 0.35355338, %v1468_v56  ;;  %v810_v58 = vpop.f32.mrb[7].mxu0 }
 0x605   :  { %v819_v59 = vmul.f32 0.35355338, %v810_v58 }
 0x606   :  { %v822_v60 = vadd.f32 %v820_v57, %v1817_v40 }
 0x607   :  { %v821_v61 = vadd.f32 %v819_v59, %v1812_v37 }
 0x608   :  { %v826_v62 = vsel %vm418_vm3, %v822_v60, -inf }
 0x609   :  { %827 = vmax.xlane.f32.xlu0 %v826_v62  ;;  %v823_v63 = vsel %vm418_vm3, %v821_v61, -inf  ;;  %v65_v62 = vld [vmem:[%s1958_s8 + $0x10] sm:$0xff] }
 0x60a   :  { %824 = vmax.xlane.f32.xlu1 %v823_v63 }
 0x61b   :  { %1595 = vrot.lane.b32.xlu1 %v1848_v21, %s1646_s7 }
 0x61f   :  { %932 = vrot.lane.b32.xlu1 %v1792_v32, %s1647_s10 }
 0x623   :  { %934 = vrot.lane.b32.xlu1 %v1805_v34, %s1647_s10 }
 0x696   :  { %v828_v0 = vpop.xlane.xlu0 %827 }
 0x697   :  { %v830_v1 = vsub.f32 %v822_v60, %v828_v0  ;;  %v825_v2 = vpop.xlane.xlu1 %824  ;;  %v66_v0 = vld [vmem:[%s1958_s8 + $0x18] sm:$0xff] }
 0x698   :  { %v829_v3 = vsub.f32 %v821_v61, %v825_v2  ;;  %v63_v61 = vld [vmem:[%s1958_s8] sm:$0xff] }
 0x699   :  { %v833_v4 = vmul.f32 1.442695, %v830_v1  ;;  %v1569_v1 = vpack.c.bf16 %v66_v0, %v65_v62 }
 0x69a   :  { %v831_v5 = vmul.f32 1.442695, %v829_v3 }
 0x69b   :  { %1625 = vpow2.f32 %v833_v4  ;;  %v1596_v6 = vpop.permute.xlu1 %1595 }
 0x69c   :  { %v1598_v7 = vunpack.i.h.bf16 %v1596_v6  ;;  %v1597_v8 = vunpack.i.l.bf16 %v1596_v6  ;;  %1627 = vpow2.f32 %v831_v5 }
 0x69e   :  { %v1551_v11 = vpack.c.bf16 %v1598_v7, %v1597_v8 }
 0x69f   :  { %v933_v27 = vpop.permute.xlu1 %932 }
 0x6a0   :  { %1552 = vmatprep.subr.bf16.mxu1 %v1551_v11 }
 0x6a1   :  { %1554 = vmatpush3.bf16.msra.mxu1 %v1551_v11 }
 0x6a5   :  { %v1626_v13 = vpop.eup %1625 }
 0x6a6   :  { %v838_v32 = vsel %vm418_vm3, %v1626_v13, 0.0  ;;  %v1628_v14 = vpop.eup %1627 }
 0x6a7   :  { %839 = vadd.xlane.f32.xlu0 %v838_v32  ;;  %v835_v34 = vsel %vm418_vm3, %v1628_v14, 0.0 }
 0x6ab   :  { %836 = vadd.xlane.f32.xlu0 %v835_v34 }
 0x6c1   :  { %1600 = vrot.lane.b32.xlu0 %v1795_v33, %s1647_s10  ;;  %v935_v33 = vpop.permute.xlu1 %934 }
 0x734   :  { %v840_v16 = vpop.xlane.xlu0 %839 }
 0x735   :  { %1629 = vrcp.f32 %v840_v16 }
 0x738   :  { %v837_v17 = vpop.xlane.xlu0 %836 }
 0x739   :  { %1631 = vrcp.f32 %v837_v17 }
 0x73c   :  { %v1601_v18 = vpop.permute.xlu0 %1600 }
 0x73d   :  { %v1603_v19 = vunpack.i.h.bf16 %v1601_v18  ;;  %v1602_v20 = vunpack.i.l.bf16 %v1601_v18 }
 0x73f   :  { %v1555_v22 = vpack.c.bf16 %v1603_v19, %v1602_v20  ;;  %v1630_v23 = vpop.eup %1629 }
 0x740   :  { %v844_v26 = vmul.f32 %v1630_v23, %v1626_v13 }
 0x741   :  { %1557 = vmatprep.subr.msk.bf16.mxu1 %vm1788_vm2, %v1555_v22 }
 0x743   :  { %v1632_v24 = vpop.eup %1631 }
 0x744   :  { %v842_v25 = vmul.f32 %v1632_v24, %v1628_v14 }
 0x746   :  { %1473 = vmatprep.mubr.msk.f32.mxu1 %vm418_vm3, %v842_v25 }
 0x747   :  { %1474 = vmatmul.mubr.msk.f32.vlgmr.msra.gmra.mrb[8].mxu1 %vm418_vm3, %v844_v26 }
 0x748   :  { %1560 = vmatpush3.bf16.xpose.msk.msra.mxu1 %vm1788_vm2, %v1555_v22  ;;  %1480 = vmatprep.mubr.msk.f32.mxu1 %vm326_vm1, %v933_v27 }
 0x74f   :  { %1481 = vmatmul.mubr.msk.f32.vlgmr.msra.gmra.mrb[10].mxu1 %vm326_vm1, %v935_v33 }
 0x81a   :  { %v1475_v28 = vpop.f32.mrb[8].mxu1 }
 0x81b   :  { %v923_v30 = vpop.f32.mrb[9].mxu1 }
 0x822   :  { %v1482_v31 = vpop.f32.mrb[10].mxu1 }
 0x823   :  { %v1024_v35 = vmul.f32 0.35355338, %v1482_v31  ;;  %v1014_v36 = vpop.f32.mrb[11].mxu1 }
 0x824   :  { %v1023_v38 = vmul.f32 0.35355338, %v1014_v36 }
 0x825   :  { %v1026_v39 = vadd.f32 %v1024_v35, %v1817_v40 }
 0x826   :  { %v1025_v41 = vadd.f32 %v1023_v38, %v1812_v37 }
 0x827   :  { %v1030_v42 = vsel %vm418_vm3, %v1026_v39, -inf }
 0x828   :  { %1031 = vmax.xlane.f32.xlu0 %v1030_v42  ;;  %v1027_v29 = vsel %vm418_vm3, %v1025_v41, -inf }
 0x829   :  { %1028 = vmax.xlane.f32.xlu1 %v1027_v29 }
 0x83a   :  { %1605 = vrot.lane.b32.xlu1 %v1848_v21, %s1647_s10 }
 0x83e   :  { %1140 = vrot.lane.b32.xlu1 %v1868_v54, %s1648_s26 }
 0x842   :  { %1146 = vrot.lane.b32.xlu1 %v923_v30, %s1649_s27 }
 0x846   :  { %1148 = vrot.lane.b32.xlu1 %v1475_v28, %s1649_s27 }
 0x8b5   :  { %v1032_v43 = vpop.xlane.xlu0 %1031 }
 0x8b6   :  { %v1034_v44 = vsub.f32 %v1026_v39, %v1032_v43  ;;  %v1029_v40 = vpop.xlane.xlu1 %1028 }
 0x8b7   :  { %v1033_v45 = vsub.f32 %v1025_v41, %v1029_v40  ;;  %v1343_v40 = vld [vmem:[%s1960_s11] ss:$0 sm:$0xff] }
 0x8b8   :  { %v1037_v37 = vmul.f32 1.442695, %v1034_v44 }
 0x8b9   :  { %v1035_v46 = vmul.f32 1.442695, %v1033_v45 }
 0x8ba   :  { %v1606_v47 = vpop.permute.xlu1 %1605 }
 0x8bb   :  { %1633 = vpow2.f32 %v1035_v46  ;;  %v1608_v48 = vunpack.i.h.bf16 %v1606_v47  ;;  %v1607_v49 = vunpack.i.l.bf16 %v1606_v47 }
 0x8bc   :  { %1635 = vpow2.f32 %v1037_v37  ;;  %v1344_v37 = vld [vmem:[%s1961_s12] ss:$0 sm:$0xff] }
 0x8bd   :  { %v1561_v50 = vpack.c.bf16 %v1608_v48, %v1607_v49 }
 0x8be   :  { %v1141_v4 = vpop.permute.xlu1 %1140 }
 0x8bf   :  { %1562 = vmatprep.subr.bf16.mxu0 %v1561_v50  ;;  %v1161_v13 = vsel %vm326_vm1, %v1840_v9, %v1141_v4 }
 0x8c0   :  { %1564 = vmatpush3.bf16.msra.mxu0 %v1561_v50 }
 0x8c2   :  { %v1147_v5 = vpop.permute.xlu1 %1146 }
 0x8c5   :  { %v1634_v21 = vpop.eup %1633 }
 0x8c6   :  { %v1039_v51 = vsel %vm418_vm3, %v1634_v21, 0.0  ;;  %v1636_v52 = vpop.eup %1635  ;;  %v1149_v7 = vpop.permute.xlu1 %1148 }
 0x8c7   :  { %1040 = vadd.xlane.f32.xlu0 %v1039_v51  ;;  %v1042_v53 = vsel %vm418_vm3, %v1636_v52, 0.0  ;;  %v1163_v34 = vsel %vm418_vm3, %v1161_v13, %v1149_v7 }
 0x8cb   :  { %1043 = vadd.xlane.f32.xlu0 %v1042_v53 }
 0x8e1   :  { %1138 = vrot.lane.b32.xlu0 %v1870_v55, %s1648_s26  ;;  %v64_v55 = vld [vmem:[%s1958_s8 + $0x8] sm:$0xff] }
 0x8e2   :  { %v1565_v63 = vpack.c.bf16 %v64_v55, %v63_v61 }
 0x8e4   :  { %1566 = vmatprep.subr.bf16.mxu0 %v1565_v63 }
 0x954   :  { %v1041_v54 = vpop.xlane.xlu0 %1040 }
 0x955   :  { %1637 = vrcp.f32 %v1041_v54 }
 0x958   :  { %v1044_v56 = vpop.xlane.xlu0 %1043 }
 0x959   :  { %1639 = vrcp.f32 %v1044_v56 }
 0x95c   :  { %v1139_v6 = vpop.permute.xlu0 %1138 }
 0x95d   :  { %v1160_v8 = vsel %vm326_vm1, %v1842_v10, %v1139_v6  ;;  %v1340_v10 = vld [vmem:[%s1959_s9] ss:$0 sm:$0xff] }
 0x95e   :  { %v1162_v32 = vsel %vm418_vm3, %v1160_v8, %v1147_v5 }
 0x95f   :  { %v1638_v57 = vpop.eup %1637 }
 0x960   :  { %v1046_v58 = vmul.f32 %v1638_v57, %v1634_v21 }
 0x962   :  { %1487 = vmatprep.mubr.msk.f32.mxu0 %vm418_vm3, %v1046_v58 }
 0x963   :  { %v1640_v59 = vpop.eup %1639 }
 0x964   :  { %v1048_v60 = vmul.f32 %v1640_v59, %v1636_v52 }
 0x966   :  { %1488 = vmatmul.mubr.msk.f32.vlgmr.msra.gmra.mrb[8].mxu0 %vm418_vm3, %v1048_v60 }
 0x967   :  { %1568 = vmatpush3.bf16.msra.mxu0 %v1565_v63 }
 0x968   :  { %1570 = vmatprep.subr.bf16.mxu0 %v1569_v1 }
 0x96b   :  { %1572 = vmatpush3.bf16.msra.mxu0 %v1569_v1 }
 0xa39   :  { %v1489_v2 = vpop.f32.mrb[8].mxu0 }
 0xa3a   :  { %1156 = vrot.lane.b32.xlu1 %v1489_v2, %s1650_s17  ;;  %v1127_v3 = vpop.f32.mrb[9].mxu0 }
 0xa3b   :  { %1154 = vrot.lane.b32.xlu0 %v1127_v3, %s1650_s17 }
 0xaac   :  { %v1157_v11 = vpop.permute.xlu1 %1156 }
 0xaad   :  { %v1155_v14 = vpop.permute.xlu0 %1154  ;;  %v1166_v17 = vsel %vm1164_vm4, %v1163_v34, %v1157_v11 }
 0xaae   :  { %v1165_v16 = vsel %vm1164_vm4, %v1162_v32, %v1155_v14 }
 0xaaf   :  { %1498 = vmatprep.mubr.msk.f32.mxu0 %vm76_vm0, %v1165_v16 }
 0xab0   :  { %1499 = vmatmul.mubr.msk.f32.vlgmr.msra.gmra.mrb[10].mxu0 %vm76_vm0, %v1166_v17 }
 0xb83   :  { %v1500_v18 = vpop.f32.mrb[10].mxu0 }
 0xb84   :  { %v1251_v19 = vadd.f32 %v1500_v18, %v1340_v10  ;;  %v1245_v20 = vpop.f32.mrb[11].mxu0 }
 0xb85   :  { %v1246_v22 = vadd.f32 %v1340_v10, %v1245_v20 }
 0xb86   :  { %v1255_v9 = vadd.f32 %v1251_v19, %v1762_v15 }
 0xb87   :  { %v1254_v23 = vadd.f32 %v1246_v22, %v1752_v12 }
 0xb88   :  { %v1261_v24 = vsel %vm76_vm0, %v1255_v9, 0.0 }
 0xb89   :  { %1262 = vadd.xlane.f32.xlu1 %v1261_v24  ;;  %v1258_v25 = vsel %vm76_vm0, %v1254_v23, 0.0 }
 0xb8a   :  { %1259 = vadd.xlane.f32.xlu0 %v1258_v25 }
 0xc16   :  { %v1263_v26 = vpop.xlane.xlu1 %1262 }
 0xc17   :  { %v1266_v27 = vmul.f32 0.03125, %v1263_v26  ;;  %v1260_v33 = vpop.xlane.xlu0 %1259 }
 0xc18   :  { %v1265_v28 = vmul.f32 0.03125, %v1260_v33 }
 0xc19   :  { %v1268_v30 = vsub.f32 %v1255_v9, %v1266_v27 }
 0xc1a   :  { %v1267_v31 = vsub.f32 %v1254_v23, %v1265_v28 }
 0xc1b   :  { %v1270_v38 = vmul.f32 %v1268_v30, %v1268_v30 }
 0xc1c   :  { %v1269_v35 = vmul.f32 %v1267_v31, %v1267_v31 }
 0xc1d   :  { %v1274_v15 = vsel %vm76_vm0, %v1270_v38, 0.0 }
 0xc1e   :  { %v1271_v36 = vsel %vm76_vm0, %v1269_v35, 0.0 }
 0xc1f   :  { %1272 = vadd.xlane.f32.xlu0 %v1271_v36 }
 0xc23   :  { %1275 = vadd.xlane.f32.xlu0 %v1274_v15 }
 0xcac   :  { %v1273_v12 = vpop.xlane.xlu0 %1272 }
 0xcad   :  { %v1277_v39 = vmul.f32 0.03125, %v1273_v12 }
 0xcaf   :  { %v1279_v41 = vadd.f32 1e-05, %v1277_v39 }
 0xcb0   :  { %v1276_v42 = vpop.xlane.xlu0 %1275 }
 0xcb1   :  { %1641 = vrsqrt.f32 %v1279_v41  ;;  %v1278_v29 = vmul.f32 0.03125, %v1276_v42 }
 0xcb3   :  { %v1280_v43 = vadd.f32 1e-05, %v1278_v29 }
 0xcb5   :  { %1643 = vrsqrt.f32 %v1280_v43 }
 0xcbb   :  { %v1642_v44 = vpop.eup %1641 }
 0xcbc   :  { %v1283_v45 = vmul.f32 %v1642_v44, %v1267_v31 }
 0xcbe   :  { %v1291_v46 = vmul.f32 %v1343_v40, %v1283_v45 }
 0xcbf   :  { %v1644_v47 = vpop.eup %1643 }
 0xcc0   :  { %v1299_v48 = vadd.f32 %v1344_v37, %v1291_v46  ;;  %v1284_v49 = vmul.f32 %v1644_v47, %v1268_v30 }
 0xcc2   :  { %1301 = vst.msk [vmem:[%s1962_s13] sm:$0xff] %vm76_vm0, %v1299_v48  ;;  %v1292_v50 = vmul.f32 %v1343_v40, %v1284_v49 }
 0xcc4   :  { %v1300_v21 = vadd.f32 %v1344_v37, %v1292_v50 }
 0xcc6   :  { %1302 = vst.msk [vmem:[%s1962_s13 + $0x8] sm:$0xff] %vm76_vm0, %v1300_v21 }

// kernel: transformer_tf_attn_forward.51
= control target key start
LH: loop header
LB: loop body
LE: loop exit
PB: predicated region body
PF: predicated region fallthrough
CT: control target
= control target key end

     0   :  { %v1503_v0 = vmov 0.0|0.0   ;;  %vm1504_vm0 = vmmov 0   ;;  %v1505_v4 = vmov 0.0   ;;  %vm75_vm1 = vcmask 261120   ;;  %s1509_s14 = smov 8   ;;  %s1776_s2 = inlined_call_operand.vmem [shape: f32[32,32], index: 2, kind: input, shape index: {}]   ;;  %s1777_s4 = inlined_call_operand.vmem [shape: f32[32,32], index: 4, kind: input, shape index: {}]   ;;  %s1778_s0 = inlined_call_operand.vmem [shape: f32[16,32], index: 0, kind: input, shape index: {}]   ;;  %s1779_s1 = inlined_call_operand.vmem [shape: f32[8,32], index: 1, kind: input, shape index: {}]   ;;  %s1780_s6 = inlined_call_operand.vmem [shape: f32[32,32], index: 6, kind: input, shape index: {}]   ;;  %s1781_s5 = inlined_call_operand.vmem [shape: f32[1,32], index: 5, kind: input, shape index: {}]   ;;  %s1782_s3 = inlined_call_operand.vmem [shape: f32[1,32], index: 3, kind: input, shape index: {}]   ;;  %s1783_s10 = inlined_call_operand.vmem [shape: f32[16,8], index: 10, kind: input, shape index: {}]   ;;  %s1784_s7 = inlined_call_operand.vmem [shape: f32[1,32], index: 7, kind: input, shape index: {}]   ;;  %s1785_s8 = inlined_call_operand.vmem [shape: f32[32,32], index: 8, kind: input, shape index: {}]   ;;  %s1786_s9 = inlined_call_operand.vmem [shape: f32[1,32], index: 9, kind: input, shape index: {}]   ;;  %s1787_s11 = inlined_call_operand.vmem [shape: f32[1,32], index: 11, kind: input, shape index: {}]   ;;  %s1788_s12 = inlined_call_operand.vmem [shape: f32[1,32], index: 12, kind: input, shape index: {}]   ;;  %s1789_s13 = inlined_call_operand.vmem [shape: f32[16,32], index: 13, kind: output, shape index: {}]  }
   0x1   :  { %1438 = vmatprep.subr.bf16.mxu1 %v1503_v0  ;;  %v47_v1 = vld [vmem:[%s1776_s2] sm:$0xff]  ;;  %v48_v2 = vld [vmem:[%s1776_s2 + $0x8] sm:$0xff]  ;;  %1365 = vmatprep.mubr.msk.f32.mxu1 %vm1504_vm0, %v1505_v4  ;;  %v49_v7 = vld [vmem:[%s1776_s2 + $0x10] sm:$0xff]  ;;  %vm312_vm2 = vcmask 64512   ;;  %vm1122_vm3 = vcmask 130048   ;;  %vm1125_vm4 = vcmask 195584  }
   0x2   :  { %v52_v3 = vld [vmem:[%s1777_s4] sm:$0xff]  ;;  %v1430_v5 = vpack.c.bf16 %v48_v2, %v47_v1  ;;  %v53_v6 = vld [vmem:[%s1777_s4 + $0x8] sm:$0xff]  ;;  %v50_v8 = vld [vmem:[%s1776_s2 + $0x18] sm:$0xff] }
   0x3   :  { %v1439_v9 = vpack.c.bf16 %v53_v6, %v52_v3  ;;  %v1434_v10 = vpack.c.bf16 %v50_v8, %v49_v7  ;;  %v54_v11 = vld [vmem:[%s1777_s4 + $0x10] sm:$0xff]  ;;  %v55_v12 = vld [vmem:[%s1777_s4 + $0x18] sm:$0xff]  ;;  %v1610_v13 = vld [vmem:[%s1778_s0] sm:$0xff] }
   0x4   :  { %1431 = vmatprep.subr.bf16.mxu0 %v1430_v5  ;;  %1354 = vmatprep.mubr.msk.f32.mxu0 %vm75_vm1, %v1610_v13  ;;  %v1442_v14 = vpack.c.bf16 %v55_v12, %v54_v11  ;;  %v1617_v15 = vld [vmem:[%s1778_s0 + $0x8] sm:$0xff]  ;;  %v46_v16 = vld [vmem:[%s1779_s1] sm:$0xff]  ;;  %v59_v20 = vld [vmem:[%s1780_s6 + $0x10] sm:$0xff]  ;;  %s1510_s0 = smov 16   ;;  %s1511_s1 = smov 24  }
   0x5   :  { %1440 = vmatpush3.bf16.msra.mxu1 %v1439_v9  ;;  %1433 = vmatpush3.bf16.msra.mxu0 %v1430_v5  ;;  %v57_v17 = vld [vmem:[%s1780_s6] sm:$0xff]  ;;  %v58_v18 = vld [vmem:[%s1780_s6 + $0x8] sm:$0xff]  ;;  %v60_v21 = vld [vmem:[%s1780_s6 + $0x18] sm:$0xff]  ;;  %s1506_s6 = smov 120  }
   0x6   :  { %1441 = vmatprep.subr.bf16.mxu1 %v1503_v0  ;;  %1435 = vmatprep.subr.bf16.mxu0 %v1434_v10  ;;  %v1445_v19 = vpack.c.bf16 %v58_v18, %v57_v17  ;;  %v1448_v22 = vpack.c.bf16 %v60_v21, %v59_v20  ;;  %v1271_v23 = vld [vmem:[%s1781_s5] ss:$0 sm:$0xff]  ;;  %v1666_v40 = vld [vmem:[%s1783_s10 + $0x8] sm:$0xff] }
   0x7   :  { %v1268_v24 = vld [vmem:[%s1782_s3] ss:$0 sm:$0xff]  ;;  %s1507_s3 = smov 112  }
   0x8   :  { %v1661_v37 = vld [vmem:[%s1783_s10] sm:$0xff]  ;;  %s1508_s10 = smov 104  }
   0x9   :  { %1443 = vmatpush3.bf16.msra.mxu1 %v1442_v14  ;;  %1437 = vmatpush3.bf16.msra.mxu0 %v1434_v10  ;;  %v1273_v45 = vld [vmem:[%s1784_s7] ss:$0 sm:$0xff] }
   0xa   :  { %1444 = vmatprep.subr.bf16.mxu0 %v1503_v0 }
   0xc   :  { %1366 = vmatmul.mubr.msk.f32.vlgmr.msra.gmra.mrb[0].mxu1 %vm75_vm1, %v46_v16  ;;  %1355 = vmatmul.mubr.msk.f32.vlgmr.msra.gmra.mrb[0].mxu0 %vm75_vm1, %v1617_v15 }
   0xd   :  { %1376 = vmatprep.mubr.msk.f32.mxu0 %vm1504_vm0, %v1505_v4  ;;  %1446 = vmatpush3.bf16.msra.mxu0 %v1445_v19 }
   0xe   :  { %1447 = vmatprep.subr.bf16.mxu0 %v1503_v0 }
  0x11   :  { %1449 = vmatpush3.bf16.msra.mxu0 %v1448_v22 }
  0x14   :  { %1377 = vmatmul.mubr.msk.f32.vlgmr.msra.gmra.mrb[2].mxu0 %vm75_vm1, %v46_v16 }
  0xdf   :  { %v232_v25 = vpop.f32.mrb[0].mxu1  ;;  %v1356_v26 = vpop.f32.mrb[0].mxu0 }
  0xe0   :  { %v233_v27 = vadd.f32 %v1271_v23, %v232_v25  ;;  %v1367_v28 = vpop.f32.mrb[1].mxu1  ;;  %v148_v29 = vpop.f32.mrb[1].mxu0  ;;  %v154_v31 = vadd.f32 %v1356_v26, %v1268_v24 }
  0xe1   :  { %v149_v30 = vadd.f32 %v1268_v24, %v148_v29 }
  0xe2   :  { %1379 = vmatprep.subr.msk.mxu1 %vm312_vm2, %v233_v27 }
  0xe3   :  { %1380 = vmatpush3.xpose.msk.msra.mxu1 %vm312_vm2, %v233_v27  ;;  %504 = vrot.lane.b32.xlu1 %v149_v30, %s1506_s6 }
  0xe4   :  { %1381 = vmatprep.mubr.msk.f32.mxu1 %vm312_vm2, %v149_v30 }
  0xe6   :  { %1382 = vmatmul.mubr.msk.f32.vlgmr.msra.gmra.mrb[2].mxu1 %vm312_vm2, %v154_v31 }
  0xe7   :  { %506 = vrot.lane.b32.xlu1 %v154_v31, %s1506_s6  ;;  %v308_v46 = vpop.f32.mrb[2].mxu0 }
  0xe8   :  { %v1675_v47 = vadd.f32 %v1273_v45, %v308_v46  ;;  %v1378_v48 = vpop.f32.mrb[3].mxu0 }
  0xea   :  { %1384 = vmatprep.subr.mxu1 %v1675_v47 }
  0xeb   :  { %706 = vrot.lane.b32.xlu1 %v233_v27, %s1507_s3  ;;  %1385 = vmatpush3.msra.mxu1 %v1675_v47 }
 0x155   :  { %v1652_v32 = vpop.permute.xlu1 %504 }
 0x159   :  { %v1654_v33 = vpop.permute.xlu1 %506 }
 0x15d   :  { %v707_v34 = vpop.permute.xlu1 %706 }
 0x15e   :  { %1399 = vmatprep.subr.msk.mxu0 %vm312_vm2, %v707_v34 }
 0x15f   :  { %1400 = vmatpush3.xpose.msk.msra.mxu0 %vm312_vm2, %v707_v34 }
 0x1b9   :  { %v1383_v35 = vpop.f32.mrb[2].mxu1 }
 0x1ba   :  { %v388_v36 = vpop.f32.mrb[3].mxu1  ;;  %v398_v38 = vmul.f32 0.35355338, %v1383_v35 }
 0x1bb   :  { %v397_v39 = vmul.f32 0.35355338, %v388_v36 }
 0x1bc   :  { %v400_v43 = vadd.f32 %v398_v38, %v1666_v40 }
 0x1bd   :  { %v399_v41 = vadd.f32 %v397_v39, %v1661_v37 }
 0x1be   :  { %v404_v44 = vsel %vm312_vm2, %v400_v43, -inf }
 0x1bf   :  { %v401_v42 = vsel %vm312_vm2, %v399_v41, -inf }
 0x1c0   :  { %402 = vmax.xlane.f32.xlu0 %v401_v42 }
 0x1c4   :  { %405 = vmax.xlane.f32.xlu0 %v404_v44 }
 0x1da   :  { %508 = vrot.lane.b32.xlu0 %v233_v27, %s1506_s6 }
 0x1de   :  { %702 = vrot.lane.b32.xlu0 %v149_v30, %s1507_s3 }
 0x1e2   :  { %903 = vrot.lane.b32.xlu0 %v233_v27, %s1508_s10 }
 0x1e6   :  { %901 = vrot.lane.b32.xlu0 %v154_v31, %s1508_s10 }
 0x24d   :  { %v403_v49 = vpop.xlane.xlu0 %402 }
 0x24e   :  { %v407_v50 = vsub.f32 %v399_v41, %v403_v49 }
 0x250   :  { %v409_v53 = vmul.f32 1.442695, %v407_v50 }
 0x251   :  { %v406_v51 = vpop.xlane.xlu0 %405 }
 0x252   :  { %v408_v52 = vsub.f32 %v400_v43, %v406_v51 }
 0x254   :  { %v411_v54 = vmul.f32 1.442695, %v408_v52 }
 0x255   :  { %v509_v55 = vpop.permute.xlu0 %508 }
 0x256   :  { %1467 = vpow2.f32 %v411_v54  ;;  %1389 = vmatprep.subr.msk.mxu1 %vm312_vm2, %v509_v55 }
 0x257   :  { %1469 = vpow2.f32 %v409_v53 }
 0x259   :  { %v703_v56 = vpop.permute.xlu0 %702 }
 0x25a   :  { %1401 = vmatprep.mubr.msk.f32.mxu0 %vm312_vm2, %v703_v56 }
 0x25d   :  { %v904_v57 = vpop.permute.xlu0 %903 }
 0x25e   :  { %1409 = vmatprep.subr.msk.mxu0 %vm312_vm2, %v904_v57 }
 0x260   :  { %v1468_v58 = vpop.eup %1467 }
 0x261   :  { %v416_v59 = vsel %vm312_vm2, %v1468_v58, 0.0  ;;  %v1470_v60 = vpop.eup %1469  ;;  %v902_v2 = vpop.permute.xlu0 %901 }
 0x262   :  { %417 = vadd.xlane.f32.xlu1 %v416_v59  ;;  %v413_v61 = vsel %vm312_vm2, %v1470_v60, 0.0 }
 0x266   :  { %414 = vadd.xlane.f32.xlu1 %v413_v61 }
 0x277   :  { %704 = vrot.lane.b32.xlu1 %v154_v31, %s1507_s3 }
 0x27b   :  { %899 = vrot.lane.b32.xlu1 %v149_v30, %s1508_s10 }
 0x2ef   :  { %v418_v62 = vpop.xlane.xlu1 %417 }
 0x2f0   :  { %1471 = vrcp.f32 %v418_v62 }
 0x2f3   :  { %v415_v63 = vpop.xlane.xlu1 %414 }
 0x2f4   :  { %1473 = vrcp.f32 %v415_v63 }
 0x2f7   :  { %v705_v0 = vpop.permute.xlu1 %704 }
 0x2f8   :  { %1402 = vmatmul.mubr.msk.f32.vlgmr.msra.gmra.mrb[4].mxu0 %vm312_vm2, %v705_v0 }
 0x2f9   :  { %1410 = vmatpush3.xpose.msk.msra.mxu0 %vm312_vm2, %v904_v57 }
 0x2fa   :  { %v1472_v3 = vpop.eup %1471 }
 0x2fb   :  { %v900_v1 = vpop.permute.xlu1 %899  ;;  %v422_v6 = vmul.f32 %v1472_v3, %v1468_v58 }
 0x2fc   :  { %1411 = vmatprep.mubr.msk.f32.mxu0 %vm312_vm2, %v900_v1 }
 0x2fd   :  { %1412 = vmatmul.mubr.msk.f32.vlgmr.msra.gmra.mrb[6].mxu0 %vm312_vm2, %v902_v2 }
 0x2fe   :  { %v1474_v4 = vpop.eup %1473 }
 0x2ff   :  { %v420_v5 = vmul.f32 %v1474_v4, %v1470_v60 }
 0x301   :  { %1386 = vmatprep.mubr.msk.f32.mxu1 %vm312_vm2, %v420_v5 }
 0x302   :  { %1387 = vmatmul.mubr.msk.f32.vlgmr.msra.gmra.mrb[4].mxu1 %vm312_vm2, %v422_v6 }
 0x303   :  { %1390 = vmatpush3.xpose.msk.msra.mxu1 %vm312_vm2, %v509_v55  ;;  %1391 = vmatprep.mubr.msk.f32.mxu1 %vm312_vm2, %v1652_v32 }
 0x306   :  { %1392 = vmatmul.mubr.msk.f32.vlgmr.msra.gmra.mrb[6].mxu1 %vm312_vm2, %v1654_v33 }
 0x3cb   :  { %v1403_v7 = vpop.f32.mrb[4].mxu0 }
 0x3cc   :  { %v780_v8 = vpop.f32.mrb[5].mxu0  ;;  %v790_v23 = vmul.f32 0.35355338, %v1403_v7 }
 0x3cd   :  { %v789_v16 = vmul.f32 0.35355338, %v780_v8 }
 0x3ce   :  { %v792_v30 = vadd.f32 %v790_v23, %v1666_v40 }
 0x3cf   :  { %v791_v25 = vadd.f32 %v789_v16, %v1661_v37 }
 0x3d0   :  { %v1413_v9 = vpop.f32.mrb[6].mxu0  ;;  %v796_v32 = vsel %vm312_vm2, %v792_v30, -inf }
 0x3d1   :  { %v977_v10 = vpop.f32.mrb[7].mxu0  ;;  %v987_v28 = vmul.f32 0.35355338, %v1413_v9  ;;  %v793_v29 = vsel %vm312_vm2, %v791_v25, -inf }
 0x3d2   :  { %v986_v19 = vmul.f32 0.35355338, %v977_v10 }
 0x3d3   :  { %v989_v33 = vadd.f32 %v987_v28, %v1666_v40 }
 0x3d4   :  { %v988_v27 = vadd.f32 %v986_v19, %v1661_v37 }
 0x3d5   :  { %v1701_v11 = vpop.f32.mrb[4].mxu1  ;;  %v993_v34 = vsel %vm312_vm2, %v989_v33, -inf }
 0x3d6   :  { %v1703_v12 = vpop.f32.mrb[5].mxu1  ;;  %v990_v31 = vsel %vm312_vm2, %v988_v27, -inf }
 0x3d9   :  { %v1393_v14 = vpop.f32.mrb[6].mxu1 }
 0x3da   :  { %v592_v17 = vmul.f32 0.35355338, %v1393_v14  ;;  %v582_v18 = vpop.f32.mrb[7].mxu1 }
 0x3db   :  { %v591_v20 = vmul.f32 0.35355338, %v582_v18 }
 0x3dc   :  { %v594_v21 = vadd.f32 %v592_v17, %v1666_v40 }
 0x3dd   :  { %v593_v22 = vadd.f32 %v591_v20, %v1661_v37 }
 0x3de   :  { %v598_v24 = vsel %vm312_vm2, %v594_v21, -inf }
 0x3df   :  { %599 = vmax.xlane.f32.xlu0 %v598_v24  ;;  %v595_v26 = vsel %vm312_vm2, %v593_v22, -inf }
 0x3e0   :  { %596 = vmax.xlane.f32.xlu1 %v595_v26  ;;  %v62_v26 = vld [vmem:[%s1785_s8] sm:$0xff] }
 0x3e3   :  { %794 = vmax.xlane.f32.xlu0 %v793_v29  ;;  %v64_v29 = vld [vmem:[%s1785_s8 + $0x10] sm:$0xff] }
 0x3e4   :  { %991 = vmax.xlane.f32.xlu1 %v990_v31 }
 0x3e7   :  { %797 = vmax.xlane.f32.xlu0 %v796_v32 }
 0x3eb   :  { %994 = vmax.xlane.f32.xlu0 %v993_v34 }
 0x46c   :  { %v600_v35 = vpop.xlane.xlu0 %599 }
 0x46d   :  { %v597_v36 = vpop.xlane.xlu1 %596  ;;  %v602_v46 = vsub.f32 %v594_v21, %v600_v35 }
 0x46e   :  { %v601_v62 = vsub.f32 %v593_v22, %v597_v36 }
 0x46f   :  { %v605_v50 = vmul.f32 1.442695, %v602_v46 }
 0x470   :  { %v795_v37 = vpop.xlane.xlu0 %794  ;;  %v603_v63 = vmul.f32 1.442695, %v601_v62 }
 0x471   :  { %v799_v38 = vsub.f32 %v791_v25, %v795_v37  ;;  %v992_v39 = vpop.xlane.xlu1 %991 }
 0x472   :  { %v996_v41 = vsub.f32 %v988_v27, %v992_v39  ;;  %v63_v27 = vld [vmem:[%s1785_s8 + $0x8] sm:$0xff] }
 0x473   :  { %v801_v42 = vmul.f32 1.442695, %v799_v38  ;;  %v1450_v28 = vpack.c.bf16 %v63_v27, %v62_v26 }
 0x474   :  { %v998_v43 = vmul.f32 1.442695, %v996_v41  ;;  %v798_v44 = vpop.xlane.xlu0 %797 }
 0x475   :  { %1475 = vpow2.f32 %v801_v42  ;;  %v800_v45 = vsub.f32 %v792_v30, %v798_v44  ;;  %1451 = vmatprep.subr.bf16.mxu0 %v1450_v28  ;;  %v65_v30 = vld [vmem:[%s1785_s8 + $0x18] sm:$0xff] }
 0x476   :  { %1477 = vpow2.f32 %v998_v43  ;;  %1453 = vmatpush3.bf16.msra.mxu0 %v1450_v28  ;;  %v1454_v31 = vpack.c.bf16 %v65_v30, %v64_v29 }
 0x477   :  { %v803_v48 = vmul.f32 1.442695, %v800_v45 }
 0x478   :  { %v995_v49 = vpop.xlane.xlu0 %994  ;;  %1455 = vmatprep.subr.bf16.mxu0 %v1454_v31 }
 0x479   :  { %1479 = vpow2.f32 %v803_v48  ;;  %v997_v40 = vsub.f32 %v989_v33, %v995_v49 }
 0x47a   :  { %1457 = vmatpush3.bf16.msra.mxu0 %v1454_v31 }
 0x47b   :  { %v1000_v51 = vmul.f32 1.442695, %v997_v40 }
 0x47d   :  { %1481 = vpow2.f32 %v1000_v51 }
 0x47e   :  { %1483 = vpow2.f32 %v605_v50 }
 0x47f   :  { %v1476_v52 = vpop.eup %1475  ;;  %1485 = vpow2.f32 %v603_v63 }
 0x480   :  { %v805_v53 = vsel %vm312_vm2, %v1476_v52, 0.0  ;;  %v1478_v54 = vpop.eup %1477 }
 0x481   :  { %806 = vadd.xlane.f32.xlu1 %v805_v53  ;;  %v1002_v56 = vsel %vm312_vm2, %v1478_v54, 0.0 }
 0x483   :  { %v1480_v55 = vpop.eup %1479 }
 0x484   :  { %v808_v57 = vsel %vm312_vm2, %v1480_v55, 0.0 }
 0x485   :  { %1003 = vadd.xlane.f32.xlu1 %v1002_v56  ;;  %809 = vadd.xlane.f32.xlu0 %v808_v57 }
 0x487   :  { %v1482_v58 = vpop.eup %1481 }
 0x488   :  { %v1005_v59 = vsel %vm312_vm2, %v1482_v58, 0.0  ;;  %v1484_v60 = vpop.eup %1483 }
 0x489   :  { %1006 = vadd.xlane.f32.xlu0 %v1005_v59  ;;  %v610_v61 = vsel %vm312_vm2, %v1484_v60, 0.0  ;;  %v1486_v0 = vpop.eup %1485 }
 0x48a   :  { %v607_v1 = vsel %vm312_vm2, %v1486_v0, 0.0 }
 0x48d   :  { %611 = vadd.xlane.f32.xlu0 %v610_v61 }
 0x496   :  { %618 = vrot.lane.b32.xlu1 %v1675_v47, %s1506_s6 }
 0x4a3   :  { %815 = vrot.lane.b32.xlu0 %v1675_v47, %s1507_s3 }
 0x4ba   :  { %608 = vadd.xlane.f32.xlu1 %v607_v1 }
 0x4cb   :  { %1012 = vrot.lane.b32.xlu1 %v1675_v47, %s1508_s10 }
 0x50e   :  { %v807_v2 = vpop.xlane.xlu1 %806 }
 0x50f   :  { %1487 = vrcp.f32 %v807_v2 }
 0x512   :  { %v1004_v3 = vpop.xlane.xlu1 %1003  ;;  %v810_v4 = vpop.xlane.xlu0 %809 }
 0x516   :  { %v619_v5 = vpop.permute.xlu1 %618  ;;  %v1007_v6 = vpop.xlane.xlu0 %1006 }
 0x517   :  { %1394 = vmatprep.subr.mxu1 %v619_v5 }
 0x518   :  { %1395 = vmatpush3.msra.mxu1 %v619_v5 }
 0x519   :  { %v1488_v10 = vpop.eup %1487 }
 0x51a   :  { %v612_v7 = vpop.xlane.xlu0 %611  ;;  %v812_v19 = vmul.f32 %v1488_v10, %v1476_v52 }
 0x51b   :  { %1489 = vrcp.f32 %v612_v7 }
 0x51e   :  { %v816_v8 = vpop.permute.xlu0 %815 }
 0x51f   :  { %1404 = vmatprep.subr.mxu1 %v816_v8 }
 0x525   :  { %v1490_v14 = vpop.eup %1489 }
 0x526   :  { %v616_v17 = vmul.f32 %v1490_v14, %v1484_v60  ;;  %v1299_v14 = vld [vmem:[%s1788_s12] ss:$0 sm:$0xff] }
 0x547   :  { %v609_v9 = vpop.xlane.xlu1 %608 }
 0x548   :  { %1491 = vrcp.f32 %v609_v9  ;;  %v1298_v9 = vld [vmem:[%s1787_s11] ss:$0 sm:$0xff] }
 0x549   :  { %1493 = vrcp.f32 %v810_v4 }
 0x54a   :  { %1495 = vrcp.f32 %v1004_v3 }
 0x54b   :  { %1497 = vrcp.f32 %v1007_v6  ;;  %v1013_v21 = vpop.permute.xlu1 %1012 }
 0x552   :  { %v1492_v47 = vpop.eup %1491 }
 0x553   :  { %v614_v16 = vmul.f32 %v1492_v47, %v1486_v0  ;;  %v1494_v18 = vpop.eup %1493 }
 0x554   :  { %v1496_v20 = vpop.eup %1495  ;;  %v814_v22 = vmul.f32 %v1494_v18, %v1480_v55 }
 0x555   :  { %1396 = vmatprep.mubr.msk.f32.mxu1 %vm312_vm2, %v614_v16  ;;  %v1498_v23 = vpop.eup %1497  ;;  %v1009_v24 = vmul.f32 %v1496_v20, %v1478_v54 }
 0x556   :  { %1397 = vmatmul.mubr.msk.f32.vlgmr.msra.gmra.mrb[8].mxu1 %vm312_vm2, %v616_v17  ;;  %v1011_v25 = vmul.f32 %v1498_v23, %v1482_v58 }
 0x557   :  { %1405 = vmatpush3.msra.mxu1 %v816_v8  ;;  %1406 = vmatprep.mubr.msk.f32.mxu1 %vm312_vm2, %v812_v19 }
 0x558   :  { %1414 = vmatprep.subr.mxu1 %v1013_v21 }
 0x55a   :  { %1407 = vmatmul.mubr.msk.f32.vlgmr.msra.gmra.mrb[10].mxu1 %vm312_vm2, %v814_v22 }
 0x55b   :  { %1415 = vmatpush3.msra.mxu1 %v1013_v21  ;;  %1416 = vmatprep.mubr.msk.f32.mxu1 %vm312_vm2, %v1009_v24 }
 0x55e   :  { %1417 = vmatmul.mubr.msk.f32.vlgmr.msra.gmra.mrb[12].mxu1 %vm312_vm2, %v1011_v25 }
 0x629   :  { %v1398_v32 = vpop.f32.mrb[8].mxu1 }
 0x62a   :  { %1100 = vrot.lane.b32.xlu1 %v1398_v32, %s1509_s14  ;;  %v693_v33 = vpop.f32.mrb[9].mxu1 }
 0x62d   :  { %v1408_v34 = vpop.f32.mrb[10].mxu1 }
 0x62e   :  { %1098 = vrot.lane.b32.xlu1 %v693_v33, %s1509_s14  ;;  %v890_v35 = vpop.f32.mrb[11].mxu1 }
 0x62f   :  { %1106 = vrot.lane.b32.xlu0 %v890_v35, %s1510_s0 }
 0x631   :  { %v1418_v36 = vpop.f32.mrb[12].mxu1 }
 0x632   :  { %1108 = vrot.lane.b32.xlu1 %v1408_v34, %s1510_s0  ;;  %v1087_v37 = vpop.f32.mrb[13].mxu1 }
 0x633   :  { %1114 = vrot.lane.b32.xlu0 %v1087_v37, %s1511_s1 }
 0x636   :  { %1116 = vrot.lane.b32.xlu1 %v1418_v36, %s1511_s1 }
 0x69c   :  { %v1101_v38 = vpop.permute.xlu1 %1100 }
 0x69d   :  { %v1121_v48 = vsel %vm312_vm2, %v1701_v11, %v1101_v38 }
 0x6a0   :  { %v1099_v39 = vpop.permute.xlu1 %1098 }
 0x6a1   :  { %v1107_v41 = vpop.permute.xlu0 %1106  ;;  %v1120_v42 = vsel %vm312_vm2, %v1703_v12, %v1099_v39  ;;  %v1295_v12 = vld [vmem:[%s1786_s9] ss:$0 sm:$0xff] }
 0x6a2   :  { %v1123_v44 = vsel %vm1122_vm3, %v1120_v42, %v1107_v41 }
 0x6a4   :  { %v1109_v43 = vpop.permute.xlu1 %1108 }
 0x6a5   :  { %v1115_v45 = vpop.permute.xlu0 %1114  ;;  %v1124_v49 = vsel %vm1122_vm3, %v1121_v48, %v1109_v43 }
 0x6a6   :  { %v1126_v46 = vsel %vm1125_vm4, %v1123_v44, %v1115_v45 }
 0x6a7   :  { %1427 = vmatprep.mubr.msk.f32.mxu0 %vm75_vm1, %v1126_v46 }
 0x6a8   :  { %v1117_v40 = vpop.permute.xlu1 %1116 }
 0x6a9   :  { %v1127_v50 = vsel %vm1125_vm4, %v1124_v49, %v1117_v40 }
 0x6aa   :  { %1428 = vmatmul.mubr.msk.f32.vlgmr.msra.gmra.mrb[8].mxu0 %vm75_vm1, %v1127_v50 }
 0x77d   :  { %v1429_v51 = vpop.f32.mrb[8].mxu0 }
 0x77e   :  { %v1212_v52 = vadd.f32 %v1429_v51, %v1295_v12  ;;  %v1206_v53 = vpop.f32.mrb[9].mxu0 }
 0x77f   :  { %v1207_v54 = vadd.f32 %v1295_v12, %v1206_v53 }
 0x780   :  { %v1216_v55 = vadd.f32 %v1212_v52, %v1617_v15 }
 0x781   :  { %v1215_v56 = vadd.f32 %v1207_v54, %v1610_v13 }
 0x782   :  { %v1222_v11 = vsel %vm75_vm1, %v1216_v55, 0.0 }
 0x783   :  { %1223 = vadd.xlane.f32.xlu1 %v1222_v11  ;;  %v1219_v57 = vsel %vm75_vm1, %v1215_v56, 0.0 }
 0x784   :  { %1220 = vadd.xlane.f32.xlu0 %v1219_v57 }
 0x810   :  { %v1224_v58 = vpop.xlane.xlu1 %1223 }
 0x811   :  { %v1227_v59 = vmul.f32 0.03125, %v1224_v58  ;;  %v1221_v60 = vpop.xlane.xlu0 %1220 }
 0x812   :  { %v1226_v61 = vmul.f32 0.03125, %v1221_v60 }
 0x813   :  { %v1229_v62 = vsub.f32 %v1216_v55, %v1227_v59 }
 0x814   :  { %v1228_v63 = vsub.f32 %v1215_v56, %v1226_v61 }
 0x815   :  { %v1231_v2 = vmul.f32 %v1229_v62, %v1229_v62 }
 0x816   :  { %v1230_v0 = vmul.f32 %v1228_v63, %v1228_v63 }
 0x817   :  { %v1235_v15 = vsel %vm75_vm1, %v1231_v2, 0.0 }
 0x818   :  { %v1232_v1 = vsel %vm75_vm1, %v1230_v0, 0.0 }
 0x819   :  { %1233 = vadd.xlane.f32.xlu0 %v1232_v1 }
 0x81d   :  { %1236 = vadd.xlane.f32.xlu0 %v1235_v15 }
 0x8a6   :  { %v1234_v13 = vpop.xlane.xlu0 %1233 }
 0x8a7   :  { %v1238_v3 = vmul.f32 0.03125, %v1234_v13 }
 0x8a9   :  { %v1240_v4 = vadd.f32 1e-05, %v1238_v3 }
 0x8aa   :  { %v1237_v5 = vpop.xlane.xlu0 %1236 }
 0x8ab   :  { %1499 = vrsqrt.f32 %v1240_v4  ;;  %v1239_v6 = vmul.f32 0.03125, %v1237_v5 }
 0x8ad   :  { %v1241_v7 = vadd.f32 1e-05, %v1239_v6 }
 0x8af   :  { %1501 = vrsqrt.f32 %v1241_v7 }
 0x8b5   :  { %v1500_v8 = vpop.eup %1499 }
 0x8b6   :  { %v1244_v10 = vmul.f32 %v1500_v8, %v1228_v63 }
 0x8b8   :  { %v1252_v47 = vmul.f32 %v1298_v9, %v1244_v10 }
 0x8b9   :  { %v1502_v16 = vpop.eup %1501 }
 0x8ba   :  { %v1260_v17 = vadd.f32 %v1299_v14, %v1252_v47  ;;  %v1245_v18 = vmul.f32 %v1502_v16, %v1229_v62 }
 0x8bc   :  { %1262 = vst.msk [vmem:[%s1789_s13] sm:$0xff] %vm75_vm1, %v1260_v17  ;;  %v1253_v19 = vmul.f32 %v1298_v9, %v1245_v18 }
 0x8be   :  { %v1261_v20 = vadd.f32 %v1299_v14, %v1253_v19 }
 0x8c0   :  { %1263 = vst.msk [vmem:[%s1789_s13 + $0x8] sm:$0xff] %vm75_vm1, %v1261_v20 }

// kernel: transformer_tf_attn_forward.50
= control target key start
LH: loop header
LB: loop body
LE: loop exit
PB: predicated region body
PF: predicated region fallthrough
CT: control target
= control target key end

     0   :  { %vm68_vm0 = vcmask 261120   ;;  %v1384_v3 = vmov 0.0|0.0   ;;  %vm1385_vm1 = vmmov 0   ;;  %v1386_v4 = vmov 0.0   ;;  %s1389_s29 = smov 104   ;;  %s1390_s30 = smov 8   ;;  %s1630_s4 = inlined_call_operand.vmem [shape: f32[32,32], index: 4, kind: input, shape index: {}]   ;;  %s1631_s1 = inlined_call_operand.vmem [shape: f32[16,32], index: 1, kind: input, shape index: {}]   ;;  %s1632_s2 = inlined_call_operand.vmem [shape: f32[32,32], index: 2, kind: input, shape index: {}]   ;;  %s1633_s0 = inlined_call_operand.vmem [shape: f32[8,32], index: 0, kind: input, shape index: {}]   ;;  %s1634_s5 = inlined_call_operand.vmem [shape: f32[1,32], index: 5, kind: input, shape index: {}]   ;;  %s1635_s3 = inlined_call_operand.vmem [shape: f32[1,32], index: 3, kind: input, shape index: {}]   ;;  %s1636_s6 = inlined_call_operand.vmem [shape: f32[32,32], index: 6, kind: input, shape index: {}]   ;;  %s1637_s10 = inlined_call_operand.vmem [shape: f32[8,16], index: 10, kind: input, shape index: {}]   ;;  %s1638_s7 = inlined_call_operand.vmem [shape: f32[1,32], index: 7, kind: input, shape index: {}]   ;;  %s1639_s8 = inlined_call_operand.vmem [shape: f32[32,32], index: 8, kind: input, shape index: {}]   ;;  %s1640_s9 = inlined_call_operand.vmem [shape: f32[1,32], index: 9, kind: input, shape index: {}]   ;;  %s1641_s11 = inlined_call_operand.vmem [shape: f32[8,32], index: 11, kind: output, shape index: {}]  }
   0x1   :  { %v46_v0 = vld [vmem:[%s1630_s4] sm:$0xff]  ;;  %v47_v1 = vld [vmem:[%s1630_s4 + $0x8] sm:$0xff]  ;;  %v48_v2 = vld [vmem:[%s1630_s4 + $0x10] sm:$0xff]  ;;  %1273 = vmatprep.subr.bf16.mxu0 %v1384_v3  ;;  %1181 = vmatprep.mubr.msk.f32.mxu0 %vm1385_vm1, %v1386_v4  ;;  %vm310_vm2 = vcmask 64512   ;;  %vm392_vm4 = vcmask 130048   ;;  %s1391_s12 = smov 16  }
   0x2   :  { %v1279_v5 = vpack.c.bf16 %v47_v1, %v46_v0  ;;  %v49_v6 = vld [vmem:[%s1630_s4 + $0x18] sm:$0xff]  ;;  %v39_v7 = vld [vmem:[%s1631_s1] sm:$0xff]  ;;  %v42_v10 = vld [vmem:[%s1632_s2 + $0x8] sm:$0xff]  ;;  %s1392_s19 = smov 24   ;;  %vm1015_vm5 = vcmask 195584  }
   0x3   :  { %v1283_v8 = vpack.c.bf16 %v49_v6, %v48_v2  ;;  %1192 = vmatprep.mubr.msk.f32.mxu1 %vm68_vm0, %v39_v7  ;;  %v41_v9 = vld [vmem:[%s1632_s2] sm:$0xff]  ;;  %v43_v11 = vld [vmem:[%s1632_s2 + $0x10] sm:$0xff]  ;;  %v44_v13 = vld [vmem:[%s1632_s2 + $0x18] sm:$0xff] }
   0x4   :  { %1280 = vmatprep.subr.bf16.mxu1 %v1279_v5  ;;  %v1274_v12 = vpack.c.bf16 %v42_v10, %v41_v9  ;;  %v1277_v14 = vpack.c.bf16 %v44_v13, %v43_v11  ;;  %v40_v15 = vld [vmem:[%s1631_s1 + $0x8] sm:$0xff]  ;;  %v38_v16 = vld [vmem:[%s1633_s0] sm:$0xff]  ;;  %vm1502_vm3 = vmpackc.low %vm310_vm2, %vm310_vm2 }
   0x5   :  { %1282 = vmatpush3.bf16.msra.mxu1 %v1279_v5  ;;  %v1103_v17 = vld [vmem:[%s1634_s5] ss:$0 sm:$0xff]  ;;  %s1387_s5 = smov 120   ;;  %v52_v30 = vld [vmem:[%s1636_s6 + $0x8] sm:$0xff]  ;;  %v53_v31 = vld [vmem:[%s1636_s6 + $0x10] sm:$0xff] }
   0x6   :  { %1284 = vmatprep.subr.bf16.mxu1 %v1283_v8  ;;  %1275 = vmatpush3.bf16.msra.mxu0 %v1274_v12  ;;  %v1101_v25 = vld [vmem:[%s1635_s3] ss:$0 sm:$0xff]  ;;  %v54_v33 = vld [vmem:[%s1636_s6 + $0x18] sm:$0xff] }
   0x7   :  { %1276 = vmatprep.subr.bf16.mxu0 %v1384_v3  ;;  %v51_v29 = vld [vmem:[%s1636_s6] sm:$0xff]  ;;  %v1291_v34 = vpack.c.bf16 %v54_v33, %v53_v31 }
   0x8   :  { %v1287_v32 = vpack.c.bf16 %v52_v30, %v51_v29  ;;  %v1543_v36 = vld [vmem:[%s1637_s10] sm:$0xff] }
   0x9   :  { %1286 = vmatpush3.bf16.msra.mxu1 %v1283_v8  ;;  %v1106_v48 = vld [vmem:[%s1638_s7] ss:$0 sm:$0xff]  ;;  %s1388_s7 = smov 112  }
   0xa   :  { %1278 = vmatpush3.bf16.msra.mxu0 %v1277_v14  ;;  %1295 = vmatprep.subr.bf16.mxu1 %v1384_v3 }
   0xb   :  { %1288 = vmatprep.subr.bf16.mxu0 %v1287_v32 }
   0xc   :  { %1193 = vmatmul.mubr.msk.f32.vlgmr.msra.gmra.mrb[0].mxu1 %vm68_vm0, %v40_v15 }
   0xd   :  { %1182 = vmatmul.mubr.msk.f32.vlgmr.msra.gmra.mrb[0].mxu0 %vm68_vm0, %v38_v16  ;;  %1210 = vmatprep.mubr.msk.f32.mxu1 %vm1385_vm1, %v1386_v4 }
   0xe   :  { %1203 = vmatprep.mubr.msk.f32.mxu0 %vm68_vm0, %v39_v7  ;;  %1290 = vmatpush3.bf16.msra.mxu0 %v1287_v32 }
   0xf   :  { %1292 = vmatprep.subr.bf16.mxu0 %v1291_v34 }
  0x12   :  { %1294 = vmatpush3.bf16.msra.mxu0 %v1291_v34 }
  0x13   :  { %1306 = vmatprep.subr.bf16.mxu0 %v1384_v3 }
  0x15   :  { %1204 = vmatmul.mubr.msk.f32.vlgmr.msra.gmra.mrb[2].mxu0 %vm68_vm0, %v40_v15 }
  0x16   :  { %1231 = vmatprep.mubr.msk.f32.mxu0 %vm1385_vm1, %v1386_v4 }
  0xdf   :  { %v1194_v18 = vpop.f32.mrb[0].mxu1 }
  0xe0   :  { %v226_v19 = vadd.f32 %v1194_v18, %v1103_v17  ;;  %v220_v20 = vpop.f32.mrb[1].mxu1  ;;  %v138_v21 = vpop.f32.mrb[0].mxu0 }
  0xe1   :  { %v221_v22 = vadd.f32 %v1103_v17, %v220_v20  ;;  %v1183_v23 = vpop.f32.mrb[1].mxu0  ;;  %v1515_v28 = vadd.f32 %v1101_v25, %v138_v21 }
  0xe3   :  { %v1296_v26 = vpack.c.bf16 %v226_v19, %v221_v22  ;;  %v1509_v27 = vpack.i.bf16 %v226_v19, %v221_v22 }
  0xe5   :  { %1339 = vrot.lane.b32.xlu1 %v1509_v27, %s1387_s5  ;;  %1298 = vmatpush3.bf16.xpose.msk.msra.mxu1 %vm1502_vm3, %v1296_v26 }
  0xe6   :  { %1299 = vmatprep.subr.bf16.mxu1 %v1384_v3 }
  0xe8   :  { %v1205_v41 = vpop.f32.mrb[2].mxu0 }
  0xe9   :  { %477 = vrot.lane.b32.xlu1 %v1515_v28, %s1387_s5  ;;  %v301_v42 = vpop.f32.mrb[3].mxu0  ;;  %v307_v49 = vadd.f32 %v1205_v41, %v1106_v48 }
  0xea   :  { %v302_v50 = vadd.f32 %v1106_v48, %v301_v42 }
  0xec   :  { %1211 = vmatmul.mubr.msk.f32.vlgmr.msra.gmra.mrb[2].mxu1 %vm310_vm2, %v1515_v28  ;;  %v1300_v51 = vpack.c.bf16 %v307_v49, %v302_v50  ;;  %v1551_v52 = vpack.i.bf16 %v307_v49, %v302_v50 }
  0xed   :  { %1217 = vmatprep.mubr.msk.f32.mxu1 %vm1385_vm1, %v1386_v4 }
  0xee   :  { %1301 = vmatpush3.bf16.msra.mxu1 %v1300_v51 }
  0xef   :  { %1302 = vmatprep.subr.bf16.mxu1 %v1384_v3 }
 0x157   :  { %v1340_v54 = vpop.permute.xlu1 %1339 }
 0x158   :  { %v1342_v55 = vunpack.i.h.bf16 %v1340_v54  ;;  %v1341_v56 = vunpack.i.l.bf16 %v1340_v54 }
 0x15a   :  { %v1303_v59 = vpack.c.bf16 %v1342_v55, %v1341_v56 }
 0x15b   :  { %v478_v60 = vpop.permute.xlu1 %477 }
 0x1bf   :  { %v386_v35 = vpop.f32.mrb[2].mxu1 }
 0x1c0   :  { %v390_v37 = vmul.f32 0.35355338, %v386_v35  ;;  %v1212_v38 = vpop.f32.mrb[3].mxu1 }
 0x1c2   :  { %v391_v39 = vadd.f32 %v390_v37, %v1543_v36 }
 0x1c4   :  { %v393_v40 = vsel %vm392_vm4, %v391_v39, -inf }
 0x1c5   :  { %394 = vmax.xlane.f32.xlu0 %v393_v40 }
 0x252   :  { %v395_v43 = vpop.xlane.xlu0 %394 }
 0x253   :  { %v396_v44 = vsub.f32 %v391_v39, %v395_v43 }
 0x255   :  { %v397_v45 = vmul.f32 1.442695, %v396_v44 }
 0x257   :  { %1368 = vpow2.f32 %v397_v45 }
 0x261   :  { %v1369_v46 = vpop.eup %1368 }
 0x262   :  { %v399_v47 = vsel %vm392_vm4, %v1369_v46, 0.0 }
 0x263   :  { %400 = vadd.xlane.f32.xlu0 %v399_v47 }
 0x2f0   :  { %v401_v53 = vpop.xlane.xlu0 %400 }
 0x2f1   :  { %1370 = vrcp.f32 %v401_v53 }
 0x2fb   :  { %v1371_v57 = vpop.eup %1370 }
 0x2fc   :  { %v403_v58 = vmul.f32 %v1371_v57, %v1369_v46 }
 0x2fe   :  { %1218 = vmatmul.mubr.msk.f32.vlgmr.msra.gmra.mrb[4].mxu1 %vm392_vm4, %v403_v58 }
 0x2ff   :  { %1305 = vmatpush3.bf16.xpose.msk.msra.mxu1 %vm1502_vm3, %v1303_v59  ;;  %1224 = vmatprep.mubr.msk.f32.mxu1 %vm1385_vm1, %v1386_v4 }
 0x300   :  { %1313 = vmatprep.subr.bf16.mxu1 %v1384_v3 }
 0x306   :  { %1225 = vmatmul.mubr.msk.f32.vlgmr.msra.gmra.mrb[6].mxu1 %vm310_vm2, %v478_v60 }
 0x307   :  { %1245 = vmatprep.mubr.msk.f32.mxu1 %vm1385_vm1, %v1386_v4 }
 0x3d1   :  { %v1563_v61 = vpop.f32.mrb[4].mxu1 }
 0x3d2   :  { %v1219_v62 = vpop.f32.mrb[5].mxu1 }
 0x3d9   :  { %v555_v63 = vpop.f32.mrb[6].mxu1 }
 0x3da   :  { %v559_v0 = vmul.f32 0.35355338, %v555_v63  ;;  %v1226_v1 = vpop.f32.mrb[7].mxu1 }
 0x3dc   :  { %v560_v2 = vadd.f32 %v559_v0, %v1543_v36 }
 0x3de   :  { %v561_v5 = vsel %vm392_vm4, %v560_v2, -inf }
 0x3df   :  { %562 = vmax.xlane.f32.xlu0 %v561_v5  ;;  %v56_v5 = vld [vmem:[%s1639_s8] sm:$0xff] }
 0x3f5   :  { %1344 = vrot.lane.b32.xlu0 %v1551_v52, %s1387_s5 }
 0x3f9   :  { %1349 = vrot.lane.b32.xlu0 %v1509_v27, %s1388_s7 }
 0x3fd   :  { %653 = vrot.lane.b32.xlu0 %v1515_v28, %s1388_s7 }
 0x46c   :  { %v563_v6 = vpop.xlane.xlu0 %562 }
 0x46d   :  { %v564_v7 = vsub.f32 %v560_v2, %v563_v6  ;;  %v57_v6 = vld [vmem:[%s1639_s8 + $0x8] sm:$0xff] }
 0x46f   :  { %v565_v8 = vmul.f32 1.442695, %v564_v7  ;;  %v58_v7 = vld [vmem:[%s1639_s8 + $0x10] sm:$0xff] }
 0x470   :  { %v1345_v9 = vpop.permute.xlu0 %1344 }
 0x471   :  { %1372 = vpow2.f32 %v565_v8  ;;  %v1347_v10 = vunpack.i.h.bf16 %v1345_v9  ;;  %v1346_v11 = vunpack.i.l.bf16 %v1345_v9  ;;  %v1324_v8 = vpack.c.bf16 %v57_v6, %v56_v5  ;;  %v59_v9 = vld [vmem:[%s1639_s8 + $0x18] sm:$0xff] }
 0x473   :  { %v1307_v12 = vpack.c.bf16 %v1347_v10, %v1346_v11  ;;  %v1327_v10 = vpack.c.bf16 %v59_v9, %v58_v7 }
 0x474   :  { %v1350_v19 = vpop.permute.xlu0 %1349 }
 0x475   :  { %1308 = vmatpush3.bf16.msra.mxu0 %v1307_v12  ;;  %v1352_v21 = vunpack.i.h.bf16 %v1350_v19  ;;  %v1351_v22 = vunpack.i.l.bf16 %v1350_v19 }
 0x476   :  { %1309 = vmatprep.subr.bf16.mxu0 %v1384_v3 }
 0x477   :  { %v1310_v26 = vpack.c.bf16 %v1352_v21, %v1351_v22 }
 0x47b   :  { %v1373_v13 = vpop.eup %1372 }
 0x47c   :  { %v567_v14 = vsel %vm392_vm4, %v1373_v13, 0.0 }
 0x47d   :  { %568 = vadd.xlane.f32.xlu1 %v567_v14 }
 0x48e   :  { %1354 = vrot.lane.b32.xlu1 %v1551_v52, %s1388_s7 }
 0x492   :  { %1359 = vrot.lane.b32.xlu1 %v1509_v27, %s1389_s29  ;;  %v654_v27 = vpop.permute.xlu0 %653 }
 0x50a   :  { %v569_v15 = vpop.xlane.xlu1 %568 }
 0x50b   :  { %1374 = vrcp.f32 %v569_v15 }
 0x50e   :  { %v1355_v16 = vpop.permute.xlu1 %1354 }
 0x50f   :  { %v1357_v17 = vunpack.i.h.bf16 %v1355_v16  ;;  %v1356_v18 = vunpack.i.l.bf16 %v1355_v16 }
 0x511   :  { %v1314_v20 = vpack.c.bf16 %v1357_v17, %v1356_v18 }
 0x512   :  { %v1360_v42 = vpop.permute.xlu1 %1359 }
 0x513   :  { %1315 = vmatpush3.bf16.msra.mxu1 %v1314_v20  ;;  %v1362_v44 = vunpack.i.h.bf16 %v1360_v42  ;;  %v1361_v45 = vunpack.i.l.bf16 %v1360_v42 }
 0x514   :  { %1316 = vmatprep.subr.bf16.mxu1 %v1384_v3 }
 0x515   :  { %v1375_v23 = vpop.eup %1374  ;;  %v1317_v48 = vpack.c.bf16 %v1362_v44, %v1361_v45 }
 0x516   :  { %v571_v25 = vmul.f32 %v1375_v23, %v1373_v13 }
 0x518   :  { %1232 = vmatmul.mubr.msk.f32.vlgmr.msra.gmra.mrb[4].mxu0 %vm392_vm4, %v571_v25 }
 0x519   :  { %1312 = vmatpush3.bf16.xpose.msk.msra.mxu0 %vm1502_vm3, %v1310_v26  ;;  %1238 = vmatprep.mubr.msk.f32.mxu0 %vm1385_vm1, %v1386_v4 }
 0x51a   :  { %1320 = vmatprep.subr.bf16.mxu0 %v1384_v3 }
 0x520   :  { %1239 = vmatmul.mubr.msk.f32.vlgmr.msra.gmra.mrb[6].mxu0 %vm310_vm2, %v654_v27 }
 0x521   :  { %1259 = vmatprep.mubr.msk.f32.mxu0 %vm1385_vm1, %v1386_v4 }
 0x5eb   :  { %v649_v29 = vpop.f32.mrb[4].mxu0 }
 0x5ec   :  { %v1233_v30 = vpop.f32.mrb[5].mxu0 }
 0x5f3   :  { %v731_v31 = vpop.f32.mrb[6].mxu0 }
 0x5f4   :  { %v735_v32 = vmul.f32 0.35355338, %v731_v31  ;;  %v1240_v33 = vpop.f32.mrb[7].mxu0 }
 0x5f6   :  { %v736_v34 = vadd.f32 %v735_v32, %v1543_v36 }
 0x5f8   :  { %v737_v35 = vsel %vm392_vm4, %v736_v34, -inf }
 0x5f9   :  { %738 = vmax.xlane.f32.xlu0 %v737_v35 }
 0x686   :  { %v739_v37 = vpop.xlane.xlu0 %738 }
 0x687   :  { %v740_v38 = vsub.f32 %v736_v34, %v739_v37 }
 0x689   :  { %v741_v39 = vmul.f32 1.442695, %v740_v38 }
 0x68b   :  { %1376 = vpow2.f32 %v741_v39 }
 0x695   :  { %v1377_v40 = vpop.eup %1376 }
 0x696   :  { %v743_v41 = vsel %vm392_vm4, %v1377_v40, 0.0 }
 0x697   :  { %744 = vadd.xlane.f32.xlu1 %v743_v41 }
 0x6a8   :  { %827 = vrot.lane.b32.xlu1 %v1515_v28, %s1389_s29 }
 0x724   :  { %v745_v43 = vpop.xlane.xlu1 %744 }
 0x725   :  { %1378 = vrcp.f32 %v745_v43 }
 0x728   :  { %v828_v49 = vpop.permute.xlu1 %827 }
 0x72f   :  { %v1379_v46 = vpop.eup %1378 }
 0x730   :  { %v747_v47 = vmul.f32 %v1379_v46, %v1377_v40 }
 0x732   :  { %1246 = vmatmul.mubr.msk.f32.vlgmr.msra.gmra.mrb[8].mxu1 %vm392_vm4, %v747_v47 }
 0x733   :  { %1319 = vmatpush3.bf16.xpose.msk.msra.mxu1 %vm1502_vm3, %v1317_v48  ;;  %1252 = vmatprep.mubr.msk.f32.mxu1 %vm1385_vm1, %v1386_v4 }
 0x73a   :  { %1253 = vmatmul.mubr.msk.f32.vlgmr.msra.gmra.mrb[10].mxu1 %vm310_vm2, %v828_v49 }
 0x805   :  { %v823_v28 = vpop.f32.mrb[8].mxu1 }
 0x806   :  { %v1247_v50 = vpop.f32.mrb[9].mxu1 }
 0x80d   :  { %v905_v51 = vpop.f32.mrb[10].mxu1 }
 0x80e   :  { %v909_v53 = vmul.f32 0.35355338, %v905_v51  ;;  %v1254_v54 = vpop.f32.mrb[11].mxu1 }
 0x810   :  { %v910_v55 = vadd.f32 %v909_v53, %v1543_v36 }
 0x812   :  { %v911_v56 = vsel %vm392_vm4, %v910_v55, -inf }
 0x813   :  { %912 = vmax.xlane.f32.xlu0 %v911_v56 }
 0x829   :  { %1364 = vrot.lane.b32.xlu0 %v1551_v52, %s1389_s29 }
 0x82d   :  { %1002 = vrot.lane.b32.xlu0 %v649_v29, %s1390_s30 }
 0x831   :  { %1006 = vrot.lane.b32.xlu0 %v823_v28, %s1391_s12 }
 0x8a0   :  { %v913_v24 = vpop.xlane.xlu0 %912 }
 0x8a1   :  { %v914_v57 = vsub.f32 %v910_v55, %v913_v24 }
 0x8a3   :  { %v915_v58 = vmul.f32 1.442695, %v914_v57 }
 0x8a4   :  { %v1365_v59 = vpop.permute.xlu0 %1364 }
 0x8a5   :  { %1380 = vpow2.f32 %v915_v58  ;;  %v1367_v60 = vunpack.i.h.bf16 %v1365_v59  ;;  %v1366_v62 = vunpack.i.l.bf16 %v1365_v59 }
 0x8a7   :  { %v1321_v63 = vpack.c.bf16 %v1367_v60, %v1366_v62 }
 0x8a8   :  { %v1003_v12 = vpop.permute.xlu0 %1002 }
 0x8a9   :  { %1322 = vmatpush3.bf16.msra.mxu0 %v1321_v63  ;;  %v1013_v14 = vsel %vm310_vm2, %v1563_v61, %v1003_v12 }
 0x8aa   :  { %1323 = vmatprep.subr.bf16.mxu0 %v1384_v3 }
 0x8ac   :  { %v1007_v13 = vpop.permute.xlu0 %1006 }
 0x8ad   :  { %v1014_v15 = vsel %vm392_vm4, %v1013_v14, %v1007_v13 }
 0x8af   :  { %v1381_v36 = vpop.eup %1380 }
 0x8b0   :  { %v917_v0 = vsel %vm392_vm4, %v1381_v36, 0.0 }
 0x8b1   :  { %918 = vadd.xlane.f32.xlu1 %v917_v0 }
 0x93e   :  { %v919_v52 = vpop.xlane.xlu1 %918 }
 0x93f   :  { %1382 = vrcp.f32 %v919_v52 }
 0x949   :  { %v1383_v1 = vpop.eup %1382 }
 0x94a   :  { %v921_v2 = vmul.f32 %v1383_v1, %v1381_v36 }
 0x94c   :  { %1260 = vmatmul.mubr.msk.f32.vlgmr.msra.gmra.mrb[8].mxu0 %vm392_vm4, %v921_v2 }
 0x94d   :  { %1270 = vmatprep.mubr.msk.f32.mxu0 %vm1385_vm1, %v1386_v4  ;;  %1325 = vmatpush3.bf16.msra.mxu0 %v1324_v8 }
 0x94e   :  { %1326 = vmatprep.subr.bf16.mxu0 %v1384_v3  ;;  %v1125_v3 = vld [vmem:[%s1640_s9] ss:$0 sm:$0xff] }
 0x951   :  { %1328 = vmatpush3.bf16.msra.mxu0 %v1327_v10 }
 0xa1f   :  { %v997_v4 = vpop.f32.mrb[8].mxu0 }
 0xa20   :  { %1010 = vrot.lane.b32.xlu0 %v997_v4, %s1392_s19  ;;  %v1261_v11 = vpop.f32.mrb[9].mxu0 }
 0xa92   :  { %v1011_v16 = vpop.permute.xlu0 %1010 }
 0xa93   :  { %v1016_v17 = vsel %vm1015_vm5, %v1014_v15, %v1011_v16 }
 0xa94   :  { %1271 = vmatmul.mubr.msk.f32.vlgmr.msra.gmra.mrb[10].mxu0 %vm68_vm0, %v1016_v17 }
 0xb67   :  { %v1092_v18 = vpop.f32.mrb[10].mxu0 }
 0xb68   :  { %v1093_v19 = vadd.f32 %v1125_v3, %v1092_v18  ;;  %v1272_v20 = vpop.f32.mrb[11].mxu0 }
 0xb6a   :  { %1096 = vst.msk [vmem:[%s1641_s11] sm:$0xff] %vm68_vm0, %v1093_v19 }

// kernel: transformer_tf_attn_forward.36
= control target key start
LH: loop header
LB: loop body
LE: loop exit
PB: predicated region body
PF: predicated region fallthrough
CT: control target
= control target key end

     0   :  { %s537_s21 = smov 0   ;;  %s585_s0 = inlined_call_operand.vmem [shape: f32[2,16,4], index: 0, kind: input, shape index: {}]   ;;  %s586_s1 = inlined_call_operand.vmem [shape: f32[4,32], index: 1, kind: input, shape index: {}]   ;;  %s587_s2 = inlined_call_operand.vmem [shape: f32[1,32], index: 2, kind: input, shape index: {}]   ;;  %s588_s3 = inlined_call_operand.vmem [shape: f32[1,16,32], index: 3, kind: input, shape index: {}]   ;;  %s589_s4 = inlined_call_operand.vmem [shape: f32[1,32], index: 4, kind: input, shape index: {}]   ;;  %s590_s5 = inlined_call_operand.vmem [shape: f32[1,32], index: 5, kind: input, shape index: {}]   ;;  %s591_s6 = inlined_call_operand.vmem [shape: f32[2,16,32], index: 6, kind: output, shape index: {}]  }
   0x1 LB: > { %s455_s22 = sadd.s32 4294967295, %s500_s21   ;;  %p459_p0 = scmp.ge.s32.totalorder %s500_s21, 1  ;;  %s500_s21 = sphi %s537_s21, %s16_s21  }
   0x2   : > { %p212_p1 = scmp.lt.s32.totalorder %s500_s21, 3 }
   0x4   : > { %p213_p2 = pnand %p459_p0, %p212_p1 }
   0x5   : > { %v254_v0 = vld [vmem:[%s586_s1] sm:$0xf] (!%p213_p2)  ;;  %vm269_vm0 = vcmask (!%p213_p2), 1043456   ;;  %p242_p3 = scmp.lt.s32.totalorder (!%p213_p2), %s455_s22, 1  ;;  %vm262_vm1 = vcmask (!%p213_p2), 31744   ;;  %vm354_vm2 = vcmask (!%p213_p2), 261120  }
   0x6   : > { %216 = sbr.rel (%p213_p2) target bundleno = 553 (0x229), region = 44  ;;  %477 = vmatprep.subr.msk.mxu0 (!%p213_p2), %vm269_vm0, %v254_v0  ;;  %v464_v3 = vld [vmem:[%s587_s2] ss:$0 sm:$0xff] (!%p213_p2)  ;;  %v349_v9 = vld [vmem:[%s588_s3 + $0x8] sm:$0xff] (!%p213_p2) }
   0x7   : > { %478 = vmatpush3.msk.msra.mxu0 (!%p213_p2), %vm269_vm0, %v254_v0  ;;  %v348_v6 = vld [vmem:[%s588_s3] sm:$0xff] (!%p213_p2) }
   0x8   : > { %v468_v31 = vld [vmem:[%s589_s4] ss:$0 sm:$0xff] (!%p213_p2) }
   0x9   : > { %v469_v33 = vld [vmem:[%s590_s5] ss:$0 sm:$0xff] (!%p213_p2) }
   0xd   : > { %s593_s22 = smov (!%p242_p3, %s455_s22), 1 }
   0xe   : > { %s472_s25 = sshll.u32 %s593_s22, 4 }
   0xf   : > { %s246_s28 = scalar_lea.vmem %s585_s0, %s472_s25  ;;  %s251_s17 = scalar_lea.vmem %s591_s6, %s472_s25 }
  0x10   : > { %v252_v1 = vld [vmem:[%s246_s28] sm:$0xff]  ;;  %v253_v2 = vld [vmem:[%s246_s28 + $0x8] sm:$0xff] }
  0x11   : > { %479 = vmatprep.mubr.msk.f32.mxu0 %vm262_vm1, %v252_v1 }
  0x12   : > { %480 = vmatmul.mubr.msk.f32.vlgmr.msra.gmra.mrb[0].mxu0 %vm262_vm1, %v253_v2 }
  0xe5   : > { %v481_v4 = vpop.f32.mrb[0].mxu0 }
  0xe6   : > { %v339_v5 = vpop.f32.mrb[1].mxu0  ;;  %v345_v7 = vadd.f32 %v481_v4, %v464_v3 }
  0xe7   : > { %v340_v8 = vadd.f32 %v464_v3, %v339_v5 }
  0xe8   : > { %v351_v12 = vadd.f32 %v349_v9, %v345_v7 }
  0xe9   : > { %v350_v10 = vadd.f32 %v348_v6, %v340_v8 }
  0xea   : > { %v358_v13 = vsel %vm354_vm2, %v351_v12, 0.0 }
  0xeb   : > { %v355_v11 = vsel %vm354_vm2, %v350_v10, 0.0 }
  0xec   : > { %356 = vadd.xlane.f32.xlu0 %v355_v11 }
  0xf0   : > { %359 = vadd.xlane.f32.xlu0 %v358_v13 }
 0x179   : > { %v357_v14 = vpop.xlane.xlu0 %356 }
 0x17a   : > { %v362_v15 = vmul.f32 0.03125, %v357_v14 }
 0x17c   : > { %v364_v16 = vsub.f32 %v350_v10, %v362_v15 }
 0x17d   : > { %v360_v17 = vpop.xlane.xlu0 %359 }
 0x17e   : > { %v363_v18 = vmul.f32 0.03125, %v360_v17  ;;  %v366_v19 = vmul.f32 %v364_v16, %v364_v16 }
 0x180   : > { %v365_v20 = vsub.f32 %v351_v12, %v363_v18  ;;  %v368_v21 = vsel %vm354_vm2, %v366_v19, 0.0 }
 0x181   : > { %369 = vadd.xlane.f32.xlu1 %v368_v21 }
 0x182   : > { %v367_v22 = vmul.f32 %v365_v20, %v365_v20 }
 0x184   : > { %v371_v23 = vsel %vm354_vm2, %v367_v22, 0.0 }
 0x185   : > { %372 = vadd.xlane.f32.xlu1 %v371_v23 }
 0x20e   : > { %v370_v24 = vpop.xlane.xlu1 %369 }
 0x20f   : > { %v374_v25 = vmul.f32 0.03125, %v370_v24 }
 0x211   : > { %v376_v26 = vadd.f32 1e-05, %v374_v25 }
 0x212   : > { %v373_v27 = vpop.xlane.xlu1 %372 }
 0x213   : > { %490 = vrsqrt.f32 %v376_v26  ;;  %v375_v28 = vmul.f32 0.03125, %v373_v27 }
 0x215   : > { %v377_v29 = vadd.f32 1e-05, %v375_v28 }
 0x217   : > { %492 = vrsqrt.f32 %v377_v29 }
 0x21d   : > { %v491_v30 = vpop.eup %490 }
 0x21e   : > { %v380_v32 = vmul.f32 %v491_v30, %v364_v16 }
 0x220   : > { %v388_v34 = vmul.f32 %v468_v31, %v380_v32 }
 0x221   : > { %v493_v35 = vpop.eup %492 }
 0x222   : > { %v396_v36 = vadd.f32 %v469_v33, %v388_v34  ;;  %v381_v37 = vmul.f32 %v493_v35, %v365_v20 }
 0x224   : > { %398 = vst.msk [vmem:[%s251_s17] sm:$0xff] %vm354_vm2, %v396_v36  ;;  %v389_v38 = vmul.f32 %v468_v31, %v381_v37 }
 0x226   : > { %v397_v39 = vadd.f32 %v469_v33, %v389_v38 }
 0x228   : > { %399 = vst.msk [vmem:[%s251_s17 + $0x8] sm:$0xff] %vm354_vm2, %v397_v39 }
 0x229 PF: > { %s16_s21 = sadd.s32 1, %s500_s21  }
 0x22a   : > { %p13_p4 = scmp.ge.s32.totalorder %s16_s21, 4  }
 0x22c   :  { %15 = sbr.rel (!%p13_p4) target bundleno = 1 (0x1), region = 74 }

// kernel: transformer_tf_attn_forward.54
= control target key start
LH: loop header
LB: loop body
LE: loop exit
PB: predicated region body
PF: predicated region fallthrough
CT: control target
= control target key end

     0   :  { %vm39_vm0 = vcmask 261120   ;;  %s496_s1 = inlined_call_operand.vmem [shape: f32[32,32], index: 1, kind: input, shape index: {}]   ;;  %s497_s0 = inlined_call_operand.vmem [shape: f32[16,32], index: 0, kind: input, shape index: {}]   ;;  %s498_s3 = inlined_call_operand.vmem [shape: f32[32,32], index: 3, kind: input, shape index: {}]   ;;  %s499_s2 = inlined_call_operand.vmem [shape: f32[1,32], index: 2, kind: input, shape index: {}]   ;;  %s500_s4 = inlined_call_operand.vmem [shape: f32[1,32], index: 4, kind: input, shape index: {}]   ;;  %s501_s5 = inlined_call_operand.vmem [shape: f32[1,32], index: 5, kind: input, shape index: {}]   ;;  %s502_s6 = inlined_call_operand.vmem [shape: f32[1,32], index: 6, kind: input, shape index: {}]   ;;  %s503_s7 = inlined_call_operand.vmem [shape: f32[16,32], index: 7, kind: output, shape index: {}]  }
   0x1   :  { %v28_v0 = vld [vmem:[%s496_s1] sm:$0xff]  ;;  %v29_v1 = vld [vmem:[%s496_s1 + $0x8] sm:$0xff]  ;;  %v30_v2 = vld [vmem:[%s496_s1 + $0x10] sm:$0xff] }
   0x2   :  { %v362_v3 = vpack.c.bf16 %v29_v1, %v28_v0  ;;  %v31_v4 = vld [vmem:[%s496_s1 + $0x18] sm:$0xff]  ;;  %v445_v5 = vld [vmem:[%s497_s0] sm:$0xff]  ;;  %v452_v7 = vld [vmem:[%s497_s0 + $0x8] sm:$0xff] }
   0x3   :  { %v366_v6 = vpack.c.bf16 %v31_v4, %v30_v2  ;;  %348 = vmatprep.mubr.msk.f32.mxu0 %vm39_vm0, %v445_v5  ;;  %v175_v8 = vld [vmem:[%s498_s3] sm:$0xff]  ;;  %v176_v9 = vld [vmem:[%s498_s3 + $0x8] sm:$0xff]  ;;  %v177_v11 = vld [vmem:[%s498_s3 + $0x10] sm:$0xff] }
   0x4   :  { %363 = vmatprep.subr.bf16.mxu0 %v362_v3  ;;  %v370_v10 = vpack.c.bf16 %v176_v9, %v175_v8  ;;  %v178_v12 = vld [vmem:[%s498_s3 + $0x18] sm:$0xff]  ;;  %v320_v14 = vld [vmem:[%s499_s2] ss:$0 sm:$0xff] }
   0x5   :  { %365 = vmatpush3.bf16.msra.mxu0 %v362_v3  ;;  %v374_v13 = vpack.c.bf16 %v178_v12, %v177_v11 }
   0x6   :  { %367 = vmatprep.subr.bf16.mxu0 %v366_v6  ;;  %371 = vmatprep.subr.bf16.mxu1 %v370_v10 }
   0x7   :  { %373 = vmatpush3.bf16.msra.mxu1 %v370_v10 }
   0x8   :  { %375 = vmatprep.subr.bf16.mxu1 %v374_v13 }
   0x9   :  { %369 = vmatpush3.bf16.msra.mxu0 %v366_v6  ;;  %v323_v6 = vld [vmem:[%s500_s4] ss:$0 sm:$0xff] }
   0xb   :  { %377 = vmatpush3.bf16.msra.mxu1 %v374_v13 }
   0xc   :  { %349 = vmatmul.mubr.msk.f32.vlgmr.msra.gmra.mrb[0].mxu0 %vm39_vm0, %v452_v7 }
  0xdf   :  { %v350_v15 = vpop.f32.mrb[0].mxu0 }
  0xe0   :  { %v118_v16 = vadd.f32 %v350_v15, %v320_v14  ;;  %v112_v17 = vpop.f32.mrb[1].mxu0 }
  0xe1   :  { %v113_v18 = vadd.f32 %v320_v14, %v112_v17 }
  0xe2   :  { %v122_v19 = vmul.f32 0.70710677, %v118_v16  ;;  %v170_v2 = vmul.f32 0.5, %v118_v16 }
  0xe3   :  { %v121_v20 = vmul.f32 0.70710677, %v113_v18  ;;  %v169_v0 = vmul.f32 0.5, %v113_v18 }
  0xe4   :  { %v124_v21 = vand.u32 2147483647, %v122_v19  ;;  %vm164_vm1 = vcmp.ge.f32.partialorder %v122_v19, 0.0 }
  0xe5   :  { %v123_v22 = vand.u32 2147483647, %v121_v20  ;;  %vm163_vm2 = vcmp.ge.f32.partialorder %v121_v20, 0.0 }
  0xe6   :  { %v126_v23 = vmul.f32 0.3275911, %v124_v21  ;;  %v152_v27 = vsub.f32 0.0, %v124_v21 }
  0xe7   :  { %v125_v24 = vmul.f32 0.3275911, %v123_v22  ;;  %v151_v28 = vsub.f32 0.0, %v123_v22 }
  0xe8   :  { %v128_v25 = vadd.f32 1.0, %v126_v23  ;;  %v154_v30 = vmul.f32 %v152_v27, %v124_v21 }
  0xe9   :  { %v127_v26 = vadd.f32 1.0, %v125_v24  ;;  %v153_v33 = vmul.f32 %v151_v28, %v123_v22 }
  0xea   :  { %378 = vrcp.f32 %v128_v25  ;;  %v157_v36 = vmul.f32 1.442695, %v154_v30 }
  0xeb   :  { %380 = vrcp.f32 %v127_v26  ;;  %v155_v39 = vmul.f32 1.442695, %v153_v33  ;;  %v327_v33 = vld [vmem:[%s502_s6] ss:$0 sm:$0xff] }
  0xec   :  { %382 = vpow2.f32 %v157_v36 }
  0xed   :  { %384 = vpow2.f32 %v155_v39 }
  0xf4   :  { %v379_v29 = vpop.eup %378 }
  0xf5   :  { %v381_v31 = vpop.eup %380  ;;  %v134_v32 = vmul.f32 1.0614054, %v379_v29 }
  0xf6   :  { %v133_v34 = vmul.f32 1.0614054, %v381_v31  ;;  %v383_v52 = vpop.eup %382 }
  0xf7   :  { %v136_v35 = vadd.f32 -1.4531521, %v134_v32  ;;  %v385_v54 = vpop.eup %384 }
  0xf8   :  { %v135_v37 = vadd.f32 -1.4531521, %v133_v34 }
  0xf9   :  { %v138_v38 = vmul.f32 %v379_v29, %v136_v35 }
  0xfa   :  { %v137_v40 = vmul.f32 %v381_v31, %v135_v37 }
  0xfb   :  { %v140_v41 = vadd.f32 1.4214138, %v138_v38 }
  0xfc   :  { %v139_v42 = vadd.f32 1.4214138, %v137_v40 }
  0xfd   :  { %v142_v43 = vmul.f32 %v379_v29, %v140_v41 }
  0xfe   :  { %v141_v44 = vmul.f32 %v381_v31, %v139_v42 }
  0xff   :  { %v144_v45 = vadd.f32 -0.28449672, %v142_v43 }
 0x100   :  { %v143_v46 = vadd.f32 -0.28449672, %v141_v44 }
 0x101   :  { %v146_v47 = vmul.f32 %v379_v29, %v144_v45 }
 0x102   :  { %v145_v48 = vmul.f32 %v381_v31, %v143_v46 }
 0x103   :  { %v148_v49 = vadd.f32 0.2548296, %v146_v47 }
 0x104   :  { %v147_v50 = vadd.f32 0.2548296, %v145_v48 }
 0x105   :  { %v150_v51 = vmul.f32 %v379_v29, %v148_v49 }
 0x106   :  { %v149_v53 = vmul.f32 %v381_v31, %v147_v50  ;;  %v326_v31 = vld [vmem:[%s501_s5] ss:$0 sm:$0xff] }
 0x107   :  { %v160_v55 = vmul.f32 %v383_v52, %v150_v51 }
 0x108   :  { %v159_v56 = vmul.f32 %v385_v54, %v149_v53 }
 0x109   :  { %v162_v57 = vsub.f32 1.0, %v160_v55 }
 0x10a   :  { %v161_v58 = vsub.f32 1.0, %v159_v56 }
 0x10b   :  { %v166_v59 = vsub.f32 0.0, %v162_v57 }
 0x10c   :  { %v165_v60 = vsub.f32 0.0, %v161_v58 }
 0x10d   :  { %v168_v61 = vsel %vm164_vm1, %v162_v57, %v166_v59 }
 0x10e   :  { %v172_v62 = vadd.f32 1.0, %v168_v61  ;;  %v167_v63 = vsel %vm163_vm2, %v161_v58, %v165_v60 }
 0x10f   :  { %v171_v1 = vadd.f32 1.0, %v167_v63 }
 0x110   :  { %v174_v4 = vmul.f32 %v172_v62, %v170_v2 }
 0x111   :  { %v173_v3 = vmul.f32 %v171_v1, %v169_v0 }
 0x113   :  { %359 = vmatprep.mubr.msk.f32.mxu1 %vm39_vm0, %v173_v3 }
 0x114   :  { %360 = vmatmul.mubr.msk.f32.vlgmr.msra.gmra.mrb[0].mxu1 %vm39_vm0, %v174_v4 }
 0x1e7   :  { %v361_v8 = vpop.f32.mrb[0].mxu1 }
 0x1e8   :  { %v258_v9 = vpop.f32.mrb[1].mxu1  ;;  %v264_v10 = vadd.f32 %v361_v8, %v323_v6 }
 0x1e9   :  { %v259_v11 = vadd.f32 %v323_v6, %v258_v9 }
 0x1ea   :  { %v268_v14 = vadd.f32 %v264_v10, %v452_v7 }
 0x1eb   :  { %v267_v12 = vadd.f32 %v259_v11, %v445_v5 }
 0x1ec   :  { %v274_v15 = vsel %vm39_vm0, %v268_v14, 0.0 }
 0x1ed   :  { %v271_v13 = vsel %vm39_vm0, %v267_v12, 0.0 }
 0x1ee   :  { %272 = vadd.xlane.f32.xlu0 %v271_v13 }
 0x1f2   :  { %275 = vadd.xlane.f32.xlu0 %v274_v15 }
 0x27b   :  { %v273_v16 = vpop.xlane.xlu0 %272 }
 0x27c   :  { %v278_v17 = vmul.f32 0.03125, %v273_v16 }
 0x27e   :  { %v280_v18 = vsub.f32 %v267_v12, %v278_v17 }
 0x27f   :  { %v276_v19 = vpop.xlane.xlu0 %275 }
 0x280   :  { %v279_v20 = vmul.f32 0.03125, %v276_v19  ;;  %v282_v21 = vmul.f32 %v280_v18, %v280_v18 }
 0x282   :  { %v281_v22 = vsub.f32 %v268_v14, %v279_v20  ;;  %v284_v23 = vsel %vm39_vm0, %v282_v21, 0.0 }
 0x283   :  { %285 = vadd.xlane.f32.xlu1 %v284_v23 }
 0x284   :  { %v283_v24 = vmul.f32 %v281_v22, %v281_v22 }
 0x286   :  { %v287_v5 = vsel %vm39_vm0, %v283_v24, 0.0 }
 0x287   :  { %288 = vadd.xlane.f32.xlu1 %v287_v5 }
 0x310   :  { %v286_v25 = vpop.xlane.xlu1 %285 }
 0x311   :  { %v290_v7 = vmul.f32 0.03125, %v286_v25 }
 0x313   :  { %v292_v26 = vadd.f32 1e-05, %v290_v7 }
 0x314   :  { %v289_v27 = vpop.xlane.xlu1 %288 }
 0x315   :  { %386 = vrsqrt.f32 %v292_v26  ;;  %v291_v28 = vmul.f32 0.03125, %v289_v27 }
 0x317   :  { %v293_v29 = vadd.f32 1e-05, %v291_v28 }
 0x319   :  { %388 = vrsqrt.f32 %v293_v29 }
 0x31f   :  { %v387_v30 = vpop.eup %386 }
 0x320   :  { %v296_v32 = vmul.f32 %v387_v30, %v280_v18 }
 0x322   :  { %v304_v34 = vmul.f32 %v326_v31, %v296_v32 }
 0x323   :  { %v389_v35 = vpop.eup %388 }
 0x324   :  { %v312_v36 = vadd.f32 %v327_v33, %v304_v34  ;;  %v297_v37 = vmul.f32 %v389_v35, %v281_v22 }
 0x326   :  { %314 = vst.msk [vmem:[%s503_s7] sm:$0xff] %vm39_vm0, %v312_v36  ;;  %v305_v38 = vmul.f32 %v326_v31, %v297_v37 }
 0x328   :  { %v313_v39 = vadd.f32 %v327_v33, %v305_v38 }
 0x32a   :  { %315 = vst.msk [vmem:[%s503_s7 + $0x8] sm:$0xff] %vm39_vm0, %v313_v39 }

// kernel: transformer_tf_attn_forward.53
= control target key start
LH: loop header
LB: loop body
LE: loop exit
PB: predicated region body
PF: predicated region fallthrough
CT: control target
= control target key end

     0   :  { %vm78_vm0 = vcmask 261120   ;;  %vm354_vm1 = vcmask 64512   ;;  %s1866_s29 = smov 8   ;;  %s1867_s30 = smov 16   ;;  %vm1239_vm3 = vcmask 130048   ;;  %vm1242_vm4 = vcmask 195584   ;;  %s2223_s4 = inlined_call_operand.vmem [shape: f32[32,32], index: 4, kind: input, shape index: {}]   ;;  %s2224_s1 = inlined_call_operand.vmem [shape: f32[32,32], index: 1, kind: input, shape index: {}]   ;;  %s2225_s2 = inlined_call_operand.vmem [shape: f32[32,32], index: 2, kind: input, shape index: {}]   ;;  %s2226_s0 = inlined_call_operand.vmem [shape: f32[16,32], index: 0, kind: input, shape index: {}]   ;;  %s2227_s6 = inlined_call_operand.vmem [shape: f32[32,32], index: 6, kind: input, shape index: {}]   ;;  %s2228_s5 = inlined_call_operand.vmem [shape: f32[1,32], index: 5, kind: input, shape index: {}]   ;;  %s2229_s3 = inlined_call_operand.vmem [shape: f32[1,32], index: 3, kind: input, shape index: {}]   ;;  %s2230_s10 = inlined_call_operand.vmem [shape: f32[16,32], index: 10, kind: input, shape index: {}]   ;;  %s2231_s7 = inlined_call_operand.vmem [shape: f32[1,32], index: 7, kind: input, shape index: {}]   ;;  %s2232_s8 = inlined_call_operand.vmem [shape: f32[32,32], index: 8, kind: input, shape index: {}]   ;;  %s2233_s9 = inlined_call_operand.vmem [shape: f32[1,32], index: 9, kind: input, shape index: {}]   ;;  %s2234_s11 = inlined_call_operand.vmem [shape: f32[1,32], index: 11, kind: input, shape index: {}]   ;;  %s2235_s12 = inlined_call_operand.vmem [shape: f32[1,32], index: 12, kind: input, shape index: {}]   ;;  %s2236_s13 = inlined_call_operand.vmem [shape: f32[16,32], index: 13, kind: output, shape index: {}]  }
   0x1   :  { %v55_v0 = vld [vmem:[%s2223_s4] sm:$0xff]  ;;  %v56_v1 = vld [vmem:[%s2223_s4 + $0x8] sm:$0xff]  ;;  %v57_v2 = vld [vmem:[%s2223_s4 + $0x10] sm:$0xff]  ;;  %s1868_s21 = smov 24  }
   0x2   :  { %v1657_v3 = vpack.c.bf16 %v56_v1, %v55_v0  ;;  %v58_v4 = vld [vmem:[%s2223_s4 + $0x18] sm:$0xff]  ;;  %v46_v5 = vld [vmem:[%s2224_s1] sm:$0xff]  ;;  %v51_v8 = vld [vmem:[%s2225_s2 + $0x8] sm:$0xff] }
   0x3   :  { %v1661_v6 = vpack.c.bf16 %v58_v4, %v57_v2  ;;  %1530 = vmatprep.mubr.msk.f32.mxu1 %vm78_vm0, %v46_v5  ;;  %v50_v7 = vld [vmem:[%s2225_s2] sm:$0xff]  ;;  %v52_v9 = vld [vmem:[%s2225_s2 + $0x10] sm:$0xff]  ;;  %v53_v10 = vld [vmem:[%s2225_s2 + $0x18] sm:$0xff]  ;;  %s1865_s2 = smov 104  }
   0x4   :  { %1658 = vmatprep.subr.bf16.mxu1 %v1657_v3  ;;  %v1649_v11 = vpack.c.bf16 %v51_v8, %v50_v7  ;;  %v1653_v12 = vpack.c.bf16 %v53_v10, %v52_v9  ;;  %v1970_v13 = vld [vmem:[%s2226_s0] sm:$0xff]  ;;  %v47_v14 = vld [vmem:[%s2224_s1 + $0x8] sm:$0xff]  ;;  %v48_v15 = vld [vmem:[%s2224_s1 + $0x10] sm:$0xff] }
   0x5   :  { %1660 = vmatpush3.bf16.msra.mxu1 %v1657_v3  ;;  %1519 = vmatprep.mubr.msk.f32.mxu0 %vm78_vm0, %v1970_v13  ;;  %v1984_v16 = vld [vmem:[%s2226_s0 + $0x8] sm:$0xff]  ;;  %v49_v17 = vld [vmem:[%s2224_s1 + $0x18] sm:$0xff]  ;;  %v60_v18 = vld [vmem:[%s2227_s6] sm:$0xff] }
   0x6   :  { %1662 = vmatprep.subr.bf16.mxu1 %v1661_v6  ;;  %1650 = vmatprep.subr.bf16.mxu0 %v1649_v11  ;;  %v61_v19 = vld [vmem:[%s2227_s6 + $0x8] sm:$0xff]  ;;  %v62_v20 = vld [vmem:[%s2227_s6 + $0x10] sm:$0xff]  ;;  %v63_v22 = vld [vmem:[%s2227_s6 + $0x18] sm:$0xff] }
   0x7   :  { %1652 = vmatpush3.bf16.msra.mxu0 %v1649_v11  ;;  %v1665_v21 = vpack.c.bf16 %v61_v19, %v60_v18  ;;  %v1669_v23 = vpack.c.bf16 %v63_v22, %v62_v20  ;;  %v1388_v24 = vld [vmem:[%s2228_s5] ss:$0 sm:$0xff]  ;;  %vm2017_vm2 = vmpackc.low %vm354_vm1, %vm354_vm1  ;;  %v2049_v48 = vld [vmem:[%s2230_s10 + $0x8] sm:$0xff] }
   0x8   :  { %1654 = vmatprep.subr.bf16.mxu0 %v1653_v12  ;;  %v1385_v29 = vld [vmem:[%s2229_s3] ss:$0 sm:$0xff] }
   0x9   :  { %1664 = vmatpush3.bf16.msra.mxu1 %v1661_v6  ;;  %v2044_v45 = vld [vmem:[%s2230_s10] sm:$0xff]  ;;  %s1864_s10 = smov 112  }
   0xa   :  { %v1393_v54 = vld [vmem:[%s2231_s7] ss:$0 sm:$0xff]  ;;  %s1863_s7 = smov 120  }
   0xb   :  { %1656 = vmatpush3.bf16.msra.mxu0 %v1653_v12 }
   0xc   :  { %1531 = vmatmul.mubr.msk.f32.vlgmr.msra.gmra.mrb[0].mxu1 %vm78_vm0, %v47_v14  ;;  %1666 = vmatprep.subr.bf16.mxu0 %v1665_v21 }
   0xd   :  { %1533 = vmatprep.mubr.msk.f32.mxu1 %vm78_vm0, %v48_v15 }
   0xe   :  { %1520 = vmatmul.mubr.msk.f32.vlgmr.msra.gmra.mrb[0].mxu0 %vm78_vm0, %v1984_v16 }
   0xf   :  { %1544 = vmatprep.mubr.msk.f32.mxu0 %vm78_vm0, %v46_v5  ;;  %1668 = vmatpush3.bf16.msra.mxu0 %v1665_v21 }
  0x10   :  { %1534 = vmatmul.mubr.msk.f32.gmra.mrb[2].mxu1 %vm78_vm0, %v49_v17  ;;  %1670 = vmatprep.subr.bf16.mxu0 %v1669_v23 }
  0x13   :  { %1672 = vmatpush3.bf16.msra.mxu0 %v1669_v23 }
  0x16   :  { %1545 = vmatmul.mubr.msk.f32.vlgmr.msra.gmra.mrb[2].mxu0 %vm78_vm0, %v47_v14 }
  0x17   :  { %1547 = vmatprep.mubr.msk.f32.mxu0 %vm78_vm0, %v48_v15 }
  0x1a   :  { %1548 = vmatmul.mubr.msk.f32.gmra.mrb[4].mxu0 %vm78_vm0, %v49_v17 }
  0xdf   :  { %v1532_v25 = vpop.f32.mrb[0].mxu1 }
  0xe0   :  { %v250_v26 = vadd.f32 %v1532_v25, %v1388_v24  ;;  %v244_v27 = vpop.f32.mrb[1].mxu1 }
  0xe1   :  { %v245_v28 = vadd.f32 %v1388_v24, %v244_v27  ;;  %v1521_v31 = vpop.f32.mrb[0].mxu0 }
  0xe2   :  { %v151_v34 = vpop.f32.mrb[1].mxu0  ;;  %v2037_v42 = vadd.f32 %v1521_v31, %v1385_v29 }
  0xe3   :  { %v1673_v32 = vpack.c.bf16 %v250_v26, %v245_v28  ;;  %v1535_v33 = vpop.f32.mrb[2].mxu1  ;;  %v2021_v35 = vpack.i.bf16 %v250_v26, %v245_v28  ;;  %v2023_v38 = vadd.f32 %v1385_v29, %v151_v34 }
  0xe4   :  { %v260_v36 = vadd.f32 %v1535_v33, %v1388_v24  ;;  %v254_v37 = vpop.f32.mrb[3].mxu1 }
  0xe5   :  { %1675 = vmatprep.subr.msk.bf16.mxu1 %vm2017_vm2, %v1673_v32  ;;  %v255_v39 = vadd.f32 %v1388_v24, %v254_v37  ;;  %1558 = vmatprep.mubr.msk.f32.mxu1 %vm354_vm1, %v2023_v38 }
  0xe6   :  { %1678 = vmatpush3.bf16.xpose.msk.msra.mxu1 %vm2017_vm2, %v1673_v32 }
  0xe7   :  { %v1679_v40 = vpack.c.bf16 %v260_v36, %v255_v39  ;;  %v2031_v41 = vpack.i.bf16 %v260_v36, %v255_v39 }
  0xe9   :  { %1681 = vmatprep.subr.msk.bf16.mxu1 %vm2017_vm2, %v1679_v40  ;;  %v1546_v53 = vpop.f32.mrb[2].mxu0 }
  0xea   :  { %v335_v55 = vpop.f32.mrb[3].mxu0  ;;  %v2058_v56 = vadd.f32 %v1546_v53, %v1393_v54 }
  0xeb   :  { %v2060_v57 = vadd.f32 %v1393_v54, %v335_v55 }
  0xed   :  { %v1549_v58 = vpop.f32.mrb[4].mxu0  ;;  %v1685_v59 = vpack.c.bf16 %v2058_v56, %v2060_v57 }
  0xee   :  { %1684 = vmatpush3.bf16.xpose.msk.msra.mxu1 %vm2017_vm2, %v1679_v40  ;;  %v345_v60 = vpop.f32.mrb[5].mxu0  ;;  %v2064_v61 = vadd.f32 %v1549_v58, %v1393_v54  ;;  %v2116_v58 = vpack.i.bf16 %v2058_v56, %v2060_v57 }
  0xef   :  { %v2066_v62 = vadd.f32 %v1393_v54, %v345_v60  ;;  %1686 = vmatprep.subr.bf16.mxu0 %v1685_v59 }
  0xf0   :  { %1688 = vmatpush3.bf16.msra.mxu0 %v1685_v59 }
  0xf1   :  { %v1689_v63 = vpack.c.bf16 %v2064_v61, %v2066_v62 }
  0xf3   :  { %1690 = vmatprep.subr.bf16.mxu0 %v1689_v63 }
  0xf4   :  { %1692 = vmatpush3.bf16.msra.mxu0 %v1689_v63 }
  0xf5   :  { %1559 = vmatmul.mubr.msk.f32.vlgmr.msra.gmra.mrb[4].mxu1 %vm354_vm1, %v2037_v42 }
 0x1c8   :  { %v1560_v43 = vpop.f32.mrb[4].mxu1 }
 0x1c9   :  { %v439_v44 = vpop.f32.mrb[5].mxu1  ;;  %v449_v46 = vmul.f32 0.35355338, %v1560_v43  ;;  %v2102_v43 = vpack.i.bf16 %v2064_v61, %v2066_v62 }
 0x1ca   :  { %v448_v47 = vmul.f32 0.35355338, %v439_v44 }
 0x1cb   :  { %v451_v51 = vadd.f32 %v449_v46, %v2049_v48 }
 0x1cc   :  { %v450_v49 = vadd.f32 %v448_v47, %v2044_v45 }
 0x1cd   :  { %v455_v52 = vsel %vm78_vm0, %v451_v51, -inf }
 0x1ce   :  { %v452_v50 = vsel %vm78_vm0, %v450_v49, -inf }
 0x1cf   :  { %453 = vmax.xlane.f32.xlu0 %v452_v50 }
 0x1d3   :  { %456 = vmax.xlane.f32.xlu0 %v455_v52 }
 0x1e9   :  { %1768 = vrot.lane.b32.xlu0 %v2021_v35, %s1863_s7 }
 0x25c   :  { %v454_v0 = vpop.xlane.xlu0 %453 }
 0x25d   :  { %v458_v1 = vsub.f32 %v450_v49, %v454_v0 }
 0x25f   :  { %v460_v4 = vmul.f32 1.442695, %v458_v1 }
 0x260   :  { %v457_v2 = vpop.xlane.xlu0 %456 }
 0x261   :  { %v459_v3 = vsub.f32 %v451_v51, %v457_v2 }
 0x263   :  { %v462_v5 = vmul.f32 1.442695, %v459_v3 }
 0x264   :  { %v1769_v6 = vpop.permute.xlu0 %1768 }
 0x265   :  { %1827 = vpow2.f32 %v462_v5  ;;  %v1771_v7 = vunpack.i.h.bf16 %v1769_v6  ;;  %v1770_v8 = vunpack.i.l.bf16 %v1769_v6 }
 0x266   :  { %1829 = vpow2.f32 %v460_v4 }
 0x267   :  { %v1693_v9 = vpack.c.bf16 %v1771_v7, %v1770_v8 }
 0x269   :  { %1695 = vmatprep.subr.msk.bf16.mxu0 %vm2017_vm2, %v1693_v9 }
 0x26f   :  { %v1828_v10 = vpop.eup %1827 }
 0x270   :  { %v467_v11 = vsel %vm78_vm0, %v1828_v10, 0.0  ;;  %v1830_v12 = vpop.eup %1829 }
 0x271   :  { %468 = vadd.xlane.f32.xlu1 %v467_v11  ;;  %v464_v14 = vsel %vm78_vm0, %v1830_v12, 0.0 }
 0x275   :  { %465 = vadd.xlane.f32.xlu1 %v464_v14 }
 0x286   :  { %1773 = vrot.lane.b32.xlu1 %v2031_v41, %s1863_s7 }
 0x28a   :  { %555 = vrot.lane.b32.xlu1 %v2023_v38, %s1863_s7 }
 0x28e   :  { %557 = vrot.lane.b32.xlu1 %v2037_v42, %s1863_s7 }
 0x2fe   :  { %v469_v15 = vpop.xlane.xlu1 %468 }
 0x2ff   :  { %1831 = vrcp.f32 %v469_v15 }
 0x302   :  { %v466_v17 = vpop.xlane.xlu1 %465 }
 0x303   :  { %1833 = vrcp.f32 %v466_v17 }
 0x306   :  { %v1774_v18 = vpop.permute.xlu1 %1773 }
 0x307   :  { %v1776_v21 = vunpack.i.h.bf16 %v1774_v18  ;;  %v1775_v22 = vunpack.i.l.bf16 %v1774_v18 }
 0x309   :  { %v1832_v19 = vpop.eup %1831  ;;  %v1699_v25 = vpack.c.bf16 %v1776_v21, %v1775_v22 }
 0x30a   :  { %v473_v24 = vmul.f32 %v1832_v19, %v1828_v10  ;;  %v556_v26 = vpop.permute.xlu1 %555 }
 0x30d   :  { %v1834_v20 = vpop.eup %1833 }
 0x30e   :  { %v471_v23 = vmul.f32 %v1834_v20, %v1830_v12  ;;  %v558_v27 = vpop.permute.xlu1 %557 }
 0x310   :  { %1569 = vmatprep.mubr.msk.f32.mxu0 %vm78_vm0, %v471_v23 }
 0x311   :  { %1570 = vmatmul.mubr.msk.f32.vlgmr.msra.gmra.mrb[6].mxu0 %vm78_vm0, %v473_v24 }
 0x312   :  { %1698 = vmatpush3.bf16.xpose.msk.msra.mxu0 %vm2017_vm2, %v1693_v9  ;;  %1580 = vmatprep.mubr.msk.f32.mxu0 %vm354_vm1, %v556_v26 }
 0x313   :  { %1701 = vmatprep.subr.msk.bf16.mxu0 %vm2017_vm2, %v1699_v25 }
 0x31a   :  { %1704 = vmatpush3.bf16.xpose.msk.msra.mxu0 %vm2017_vm2, %v1699_v25 }
 0x321   :  { %1581 = vmatmul.mubr.msk.f32.vlgmr.msra.gmra.mrb[8].mxu0 %vm354_vm1, %v558_v27 }
 0x3e4   :  { %v2092_v28 = vpop.f32.mrb[6].mxu0 }
 0x3e5   :  { %v2094_v29 = vpop.f32.mrb[7].mxu0 }
 0x3f4   :  { %v1582_v31 = vpop.f32.mrb[8].mxu0 }
 0x3f5   :  { %v655_v32 = vmul.f32 0.35355338, %v1582_v31  ;;  %v645_v33 = vpop.f32.mrb[9].mxu0 }
 0x3f6   :  { %v654_v34 = vmul.f32 0.35355338, %v645_v33 }
 0x3f7   :  { %v657_v36 = vadd.f32 %v655_v32, %v2049_v48 }
 0x3f8   :  { %v656_v37 = vadd.f32 %v654_v34, %v2044_v45 }
 0x3f9   :  { %v661_v39 = vsel %vm78_vm0, %v657_v36, -inf }
 0x3fa   :  { %662 = vmax.xlane.f32.xlu1 %v661_v39  ;;  %v658_v40 = vsel %vm78_vm0, %v656_v37, -inf }
 0x3fb   :  { %659 = vmax.xlane.f32.xlu0 %v658_v40 }
 0x40b   :  { %1783 = vrot.lane.b32.xlu1 %v2102_v43, %s1863_s7 }
 0x40f   :  { %1788 = vrot.lane.b32.xlu1 %v2021_v35, %s1864_s10 }
 0x413   :  { %1793 = vrot.lane.b32.xlu1 %v2031_v41, %s1864_s10 }
 0x417   :  { %779 = vrot.lane.b32.xlu1 %v2037_v42, %s1864_s10 }
 0x487   :  { %v663_v44 = vpop.xlane.xlu1 %662 }
 0x488   :  { %v665_v46 = vsub.f32 %v657_v36, %v663_v44  ;;  %v660_v47 = vpop.xlane.xlu0 %659 }
 0x489   :  { %v664_v49 = vsub.f32 %v656_v37, %v660_v47 }
 0x48a   :  { %v668_v50 = vmul.f32 1.442695, %v665_v46 }
 0x48b   :  { %v666_v51 = vmul.f32 1.442695, %v664_v49  ;;  %v1784_v60 = vpop.permute.xlu1 %1783 }
 0x48c   :  { %1835 = vpow2.f32 %v668_v50  ;;  %v1786_v63 = vunpack.i.h.bf16 %v1784_v60  ;;  %v1785_v0 = vunpack.i.l.bf16 %v1784_v60 }
 0x48d   :  { %1837 = vpow2.f32 %v666_v51 }
 0x48e   :  { %v1709_v56 = vpack.c.bf16 %v1786_v63, %v1785_v0 }
 0x48f   :  { %v1789_v3 = vpop.permute.xlu1 %1788 }
 0x490   :  { %v1791_v57 = vunpack.i.h.bf16 %v1789_v3  ;;  %v1790_v5 = vunpack.i.l.bf16 %v1789_v3 }
 0x492   :  { %v1713_v9 = vpack.c.bf16 %v1791_v57, %v1790_v5 }
 0x493   :  { %v1794_v10 = vpop.permute.xlu1 %1793 }
 0x494   :  { %v1796_v14 = vunpack.i.h.bf16 %v1794_v10  ;;  %v1795_v15 = vunpack.i.l.bf16 %v1794_v10 }
 0x496   :  { %v1836_v52 = vpop.eup %1835  ;;  %v1719_v17 = vpack.c.bf16 %v1796_v14, %v1795_v15 }
 0x497   :  { %v673_v53 = vsel %vm78_vm0, %v1836_v52, 0.0  ;;  %v1838_v54 = vpop.eup %1837  ;;  %v780_v18 = vpop.permute.xlu1 %779 }
 0x498   :  { %674 = vadd.xlane.f32.xlu0 %v673_v53  ;;  %v670_v55 = vsel %vm78_vm0, %v1838_v54, 0.0 }
 0x49c   :  { %671 = vadd.xlane.f32.xlu0 %v670_v55 }
 0x4b2   :  { %1778 = vrot.lane.b32.xlu0 %v2116_v58, %s1863_s7 }
 0x4b6   :  { %777 = vrot.lane.b32.xlu0 %v2023_v38, %s1864_s10 }
 0x525   :  { %v675_v59 = vpop.xlane.xlu0 %674 }
 0x529   :  { %v672_v61 = vpop.xlane.xlu0 %671 }
 0x52a   :  { %1839 = vrcp.f32 %v672_v61 }
 0x52b   :  { %1841 = vrcp.f32 %v675_v59 }
 0x52d   :  { %v1779_v62 = vpop.permute.xlu0 %1778 }
 0x52e   :  { %v1781_v1 = vunpack.i.h.bf16 %v1779_v62  ;;  %v1780_v2 = vunpack.i.l.bf16 %v1779_v62 }
 0x530   :  { %v1705_v4 = vpack.c.bf16 %v1781_v1, %v1780_v2 }
 0x531   :  { %v778_v12 = vpop.permute.xlu0 %777 }
 0x532   :  { %1706 = vmatprep.subr.bf16.mxu1 %v1705_v4 }
 0x533   :  { %1708 = vmatpush3.bf16.msra.mxu1 %v1705_v4 }
 0x534   :  { %v1840_v6 = vpop.eup %1839  ;;  %1710 = vmatprep.subr.bf16.mxu1 %v1709_v56 }
 0x535   :  { %v1842_v7 = vpop.eup %1841  ;;  %v677_v8 = vmul.f32 %v1840_v6, %v1838_v54 }
 0x536   :  { %v679_v11 = vmul.f32 %v1842_v7, %v1836_v52 }
 0x537   :  { %1712 = vmatpush3.bf16.msra.mxu1 %v1709_v56  ;;  %1591 = vmatprep.mubr.msk.f32.mxu1 %vm78_vm0, %v677_v8 }
 0x538   :  { %1715 = vmatprep.subr.msk.bf16.mxu1 %vm2017_vm2, %v1713_v9 }
 0x53a   :  { %1592 = vmatmul.mubr.msk.f32.vlgmr.msra.gmra.mrb[6].mxu1 %vm78_vm0, %v679_v11 }
 0x53b   :  { %1602 = vmatprep.mubr.msk.f32.mxu1 %vm354_vm1, %v778_v12 }
 0x540   :  { %1718 = vmatpush3.bf16.xpose.msk.msra.mxu1 %vm2017_vm2, %v1713_v9 }
 0x541   :  { %1721 = vmatprep.subr.msk.bf16.mxu1 %vm2017_vm2, %v1719_v17 }
 0x548   :  { %1724 = vmatpush3.bf16.xpose.msk.msra.mxu1 %vm2017_vm2, %v1719_v17 }
 0x54f   :  { %1603 = vmatmul.mubr.msk.f32.vlgmr.msra.gmra.mrb[8].mxu1 %vm354_vm1, %v780_v18 }
 0x60d   :  { %v2134_v19 = vpop.f32.mrb[6].mxu1 }
 0x60e   :  { %v2136_v20 = vpop.f32.mrb[7].mxu1 }
 0x622   :  { %v1604_v21 = vpop.f32.mrb[8].mxu1 }
 0x623   :  { %v877_v22 = vmul.f32 0.35355338, %v1604_v21  ;;  %v867_v23 = vpop.f32.mrb[9].mxu1 }
 0x624   :  { %v876_v24 = vmul.f32 0.35355338, %v867_v23 }
 0x625   :  { %v879_v25 = vadd.f32 %v877_v22, %v2049_v48 }
 0x626   :  { %v878_v26 = vadd.f32 %v876_v24, %v2044_v45 }
 0x627   :  { %v883_v27 = vsel %vm78_vm0, %v879_v25, -inf }
 0x628   :  { %884 = vmax.xlane.f32.xlu1 %v883_v27  ;;  %v880_v31 = vsel %vm78_vm0, %v878_v26, -inf }
 0x629   :  { %881 = vmax.xlane.f32.xlu0 %v880_v31 }
 0x639   :  { %1803 = vrot.lane.b32.xlu1 %v2102_v43, %s1864_s10 }
 0x63d   :  { %1808 = vrot.lane.b32.xlu1 %v2021_v35, %s1865_s2 }
 0x641   :  { %1813 = vrot.lane.b32.xlu1 %v2031_v41, %s1865_s2 }
 0x645   :  { %997 = vrot.lane.b32.xlu1 %v2037_v42, %s1865_s2 }
 0x6b5   :  { %v885_v32 = vpop.xlane.xlu1 %884 }
 0x6b6   :  { %v887_v33 = vsub.f32 %v879_v25, %v885_v32  ;;  %v882_v34 = vpop.xlane.xlu0 %881 }
 0x6b7   :  { %v886_v36 = vsub.f32 %v878_v26, %v882_v34 }
 0x6b8   :  { %v890_v37 = vmul.f32 1.442695, %v887_v33 }
 0x6b9   :  { %v888_v39 = vmul.f32 1.442695, %v886_v36  ;;  %v1804_v42 = vpop.permute.xlu1 %1803 }
 0x6ba   :  { %1843 = vpow2.f32 %v890_v37  ;;  %v1806_v50 = vunpack.i.h.bf16 %v1804_v42  ;;  %v1805_v51 = vunpack.i.l.bf16 %v1804_v42 }
 0x6bb   :  { %1845 = vpow2.f32 %v888_v39 }
 0x6bc   :  { %v1729_v59 = vpack.c.bf16 %v1806_v50, %v1805_v51 }
 0x6bd   :  { %v1809_v54 = vpop.permute.xlu1 %1808 }
 0x6be   :  { %v1811_v60 = vunpack.i.h.bf16 %v1809_v54  ;;  %v1810_v61 = vunpack.i.l.bf16 %v1809_v54 }
 0x6c0   :  { %v1733_v0 = vpack.c.bf16 %v1811_v60, %v1810_v61 }
 0x6c1   :  { %v1814_v1 = vpop.permute.xlu1 %1813 }
 0x6c2   :  { %v1816_v4 = vunpack.i.h.bf16 %v1814_v1  ;;  %v1815_v56 = vunpack.i.l.bf16 %v1814_v1 }
 0x6c4   :  { %v1844_v40 = vpop.eup %1843  ;;  %v1739_v57 = vpack.c.bf16 %v1816_v4, %v1815_v56 }
 0x6c5   :  { %v895_v44 = vsel %vm78_vm0, %v1844_v40, 0.0  ;;  %v1846_v46 = vpop.eup %1845  ;;  %v998_v5 = vpop.permute.xlu1 %997 }
 0x6c6   :  { %896 = vadd.xlane.f32.xlu0 %v895_v44  ;;  %v892_v35 = vsel %vm78_vm0, %v1846_v46, 0.0 }
 0x6ca   :  { %893 = vadd.xlane.f32.xlu0 %v892_v35  ;;  %v66_v35 = vld [vmem:[%s2232_s8 + $0x8] sm:$0xff] }
 0x6e0   :  { %1798 = vrot.lane.b32.xlu0 %v2116_v58, %s1864_s10 }
 0x6e4   :  { %995 = vrot.lane.b32.xlu0 %v2023_v38, %s1865_s2 }
 0x753   :  { %v897_v41 = vpop.xlane.xlu0 %896 }
 0x757   :  { %v894_v47 = vpop.xlane.xlu0 %893 }
 0x758   :  { %1847 = vrcp.f32 %v894_v47  ;;  %v68_v47 = vld [vmem:[%s2232_s8 + $0x18] sm:$0xff] }
 0x759   :  { %1849 = vrcp.f32 %v897_v41  ;;  %v67_v41 = vld [vmem:[%s2232_s8 + $0x10] sm:$0xff] }
 0x75b   :  { %v1799_v49 = vpop.permute.xlu0 %1798 }
 0x75c   :  { %v1801_v52 = vunpack.i.h.bf16 %v1799_v49  ;;  %v1800_v53 = vunpack.i.l.bf16 %v1799_v49  ;;  %v1757_v49 = vpack.c.bf16 %v68_v47, %v67_v41 }
 0x75e   :  { %v1725_v55 = vpack.c.bf16 %v1801_v52, %v1800_v53 }
 0x75f   :  { %v996_v3 = vpop.permute.xlu0 %995 }
 0x760   :  { %1726 = vmatprep.subr.bf16.mxu0 %v1725_v55 }
 0x761   :  { %1728 = vmatpush3.bf16.msra.mxu0 %v1725_v55 }
 0x762   :  { %v1848_v62 = vpop.eup %1847  ;;  %1730 = vmatprep.subr.bf16.mxu0 %v1729_v59 }
 0x763   :  { %v1850_v38 = vpop.eup %1849  ;;  %v899_v63 = vmul.f32 %v1848_v62, %v1846_v46  ;;  %v65_v46 = vld [vmem:[%s2232_s8] sm:$0xff] }
 0x764   :  { %v901_v2 = vmul.f32 %v1850_v38, %v1844_v40  ;;  %v1753_v42 = vpack.c.bf16 %v66_v35, %v65_v46 }
 0x765   :  { %1732 = vmatpush3.bf16.msra.mxu0 %v1729_v59  ;;  %1613 = vmatprep.mubr.msk.f32.mxu0 %vm78_vm0, %v899_v63 }
 0x766   :  { %1735 = vmatprep.subr.msk.bf16.mxu0 %vm2017_vm2, %v1733_v0 }
 0x768   :  { %1614 = vmatmul.mubr.msk.f32.vlgmr.msra.gmra.mrb[10].mxu0 %vm78_vm0, %v901_v2  ;;  %v1430_v2 = vld [vmem:[%s2233_s9] ss:$0 sm:$0xff] }
 0x769   :  { %1624 = vmatprep.mubr.msk.f32.mxu0 %vm354_vm1, %v996_v3 }
 0x76e   :  { %1738 = vmatpush3.bf16.xpose.msk.msra.mxu0 %vm2017_vm2, %v1733_v0 }
 0x76f   :  { %1741 = vmatprep.subr.msk.bf16.mxu0 %vm2017_vm2, %v1739_v57 }
 0x776   :  { %1744 = vmatpush3.bf16.xpose.msk.msra.mxu0 %vm2017_vm2, %v1739_v57 }
 0x77d   :  { %1625 = vmatmul.mubr.msk.f32.vlgmr.msra.gmra.mrb[12].mxu0 %vm354_vm1, %v998_v5 }
 0x83b   :  { %v1615_v6 = vpop.f32.mrb[10].mxu0 }
 0x83c   :  { %v986_v7 = vpop.f32.mrb[11].mxu0 }
 0x850   :  { %v1626_v8 = vpop.f32.mrb[12].mxu0 }
 0x851   :  { %v1095_v9 = vmul.f32 0.35355338, %v1626_v8  ;;  %v1085_v10 = vpop.f32.mrb[13].mxu0 }
 0x852   :  { %v1094_v11 = vmul.f32 0.35355338, %v1085_v10 }
 0x853   :  { %v1097_v12 = vadd.f32 %v1095_v9, %v2049_v48 }
 0x854   :  { %v1096_v14 = vadd.f32 %v1094_v11, %v2044_v45 }
 0x855   :  { %v1101_v15 = vsel %vm78_vm0, %v1097_v12, -inf }
 0x856   :  { %1102 = vmax.xlane.f32.xlu1 %v1101_v15  ;;  %v1098_v17 = vsel %vm78_vm0, %v1096_v14, -inf }
 0x857   :  { %1099 = vmax.xlane.f32.xlu0 %v1098_v17 }
 0x867   :  { %1823 = vrot.lane.b32.xlu1 %v2102_v43, %s1865_s2 }
 0x86b   :  { %1215 = vrot.lane.b32.xlu1 %v2136_v20, %s1866_s29 }
 0x86f   :  { %1217 = vrot.lane.b32.xlu1 %v2134_v19, %s1866_s29 }
 0x873   :  { %1225 = vrot.lane.b32.xlu1 %v1615_v6, %s1867_s30 }
 0x8e3   :  { %v1103_v30 = vpop.xlane.xlu1 %1102 }
 0x8e4   :  { %v1105_v48 = vsub.f32 %v1097_v12, %v1103_v30  ;;  %v1100_v18 = vpop.xlane.xlu0 %1099 }
 0x8e5   :  { %v1104_v45 = vsub.f32 %v1096_v14, %v1100_v18 }
 0x8e6   :  { %v1108_v21 = vmul.f32 1.442695, %v1105_v48 }
 0x8e7   :  { %v1106_v22 = vmul.f32 1.442695, %v1104_v45  ;;  %v1824_v26 = vpop.permute.xlu1 %1823 }
 0x8e8   :  { %1851 = vpow2.f32 %v1108_v21  ;;  %v1826_v31 = vunpack.i.h.bf16 %v1824_v26  ;;  %v1825_v32 = vunpack.i.l.bf16 %v1824_v26 }
 0x8e9   :  { %1853 = vpow2.f32 %v1106_v22 }
 0x8ea   :  { %v1749_v37 = vpack.c.bf16 %v1826_v31, %v1825_v32 }
 0x8eb   :  { %v1216_v52 = vpop.permute.xlu1 %1215 }
 0x8ec   :  { %v1237_v59 = vsel %vm354_vm1, %v2094_v29, %v1216_v52 }
 0x8ef   :  { %v1218_v53 = vpop.permute.xlu1 %1217 }
 0x8f0   :  { %v1238_v61 = vsel %vm354_vm1, %v2092_v28, %v1218_v53 }
 0x8f2   :  { %v1852_v23 = vpop.eup %1851 }
 0x8f3   :  { %v1113_v24 = vsel %vm78_vm0, %v1852_v23, 0.0  ;;  %v1854_v25 = vpop.eup %1853  ;;  %v1226_v54 = vpop.permute.xlu1 %1225 }
 0x8f4   :  { %1114 = vadd.xlane.f32.xlu0 %v1113_v24  ;;  %v1110_v43 = vsel %vm78_vm0, %v1854_v25, 0.0  ;;  %v1241_v63 = vsel %vm1239_vm3, %v1238_v61, %v1226_v54 }
 0x8f8   :  { %1111 = vadd.xlane.f32.xlu0 %v1110_v43 }
 0x90e   :  { %1818 = vrot.lane.b32.xlu0 %v2116_v58, %s1865_s2 }
 0x912   :  { %1223 = vrot.lane.b32.xlu0 %v986_v7, %s1867_s30 }
 0x981   :  { %v1115_v19 = vpop.xlane.xlu0 %1114 }
 0x985   :  { %v1112_v20 = vpop.xlane.xlu0 %1111 }
 0x986   :  { %1855 = vrcp.f32 %v1112_v20 }
 0x987   :  { %1857 = vrcp.f32 %v1115_v19 }
 0x989   :  { %v1819_v27 = vpop.permute.xlu0 %1818 }
 0x98a   :  { %v1821_v33 = vunpack.i.h.bf16 %v1819_v27  ;;  %v1820_v34 = vunpack.i.l.bf16 %v1819_v27 }
 0x98c   :  { %v1745_v36 = vpack.c.bf16 %v1821_v33, %v1820_v34 }
 0x98d   :  { %v1224_v55 = vpop.permute.xlu0 %1223 }
 0x98e   :  { %1746 = vmatprep.subr.bf16.mxu1 %v1745_v36  ;;  %v1240_v62 = vsel %vm1239_vm3, %v1237_v59, %v1224_v55 }
 0x98f   :  { %1748 = vmatpush3.bf16.msra.mxu1 %v1745_v36 }
 0x990   :  { %v1856_v39 = vpop.eup %1855  ;;  %1750 = vmatprep.subr.bf16.mxu1 %v1749_v37 }
 0x991   :  { %v1858_v40 = vpop.eup %1857  ;;  %v1117_v44 = vmul.f32 %v1856_v39, %v1854_v25  ;;  %v1434_v25 = vld [vmem:[%s2235_s12] ss:$0 sm:$0xff] }
 0x992   :  { %v1119_v58 = vmul.f32 %v1858_v40, %v1852_v23  ;;  %v1433_v23 = vld [vmem:[%s2234_s11] ss:$0 sm:$0xff] }
 0x993   :  { %1752 = vmatpush3.bf16.msra.mxu1 %v1749_v37  ;;  %1635 = vmatprep.mubr.msk.f32.mxu1 %vm78_vm0, %v1117_v44 }
 0x994   :  { %1754 = vmatprep.subr.bf16.mxu1 %v1753_v42 }
 0x996   :  { %1636 = vmatmul.mubr.msk.f32.vlgmr.msra.gmra.mrb[10].mxu1 %vm78_vm0, %v1119_v58 }
 0x997   :  { %1756 = vmatpush3.bf16.msra.mxu1 %v1753_v42 }
 0x998   :  { %1758 = vmatprep.subr.bf16.mxu1 %v1757_v49 }
 0x99b   :  { %1760 = vmatpush3.bf16.msra.mxu1 %v1757_v49 }
 0xa69   :  { %v1637_v50 = vpop.f32.mrb[10].mxu1 }
 0xa6a   :  { %1233 = vrot.lane.b32.xlu1 %v1637_v50, %s1868_s21  ;;  %v1204_v51 = vpop.f32.mrb[11].mxu1 }
 0xa6b   :  { %1231 = vrot.lane.b32.xlu0 %v1204_v51, %s1868_s21 }
 0xadc   :  { %v1234_v60 = vpop.permute.xlu1 %1233 }
 0xadd   :  { %v1232_v38 = vpop.permute.xlu0 %1231  ;;  %v1244_v1 = vsel %vm1242_vm4, %v1241_v63, %v1234_v60 }
 0xade   :  { %v1243_v0 = vsel %vm1242_vm4, %v1240_v62, %v1232_v38 }
 0xadf   :  { %1646 = vmatprep.mubr.msk.f32.mxu1 %vm78_vm0, %v1243_v0 }
 0xae0   :  { %1647 = vmatmul.mubr.msk.f32.vlgmr.msra.gmra.mrb[12].mxu1 %vm78_vm0, %v1244_v1 }
 0xbb3   :  { %v1648_v3 = vpop.f32.mrb[12].mxu1 }
 0xbb4   :  { %v1329_v4 = vadd.f32 %v1648_v3, %v1430_v2  ;;  %v1323_v29 = vpop.f32.mrb[13].mxu1 }
 0xbb5   :  { %v1324_v56 = vadd.f32 %v1430_v2, %v1323_v29 }
 0xbb6   :  { %v1333_v57 = vadd.f32 %v1329_v4, %v1984_v16 }
 0xbb7   :  { %v1332_v28 = vadd.f32 %v1324_v56, %v1970_v13 }
 0xbb8   :  { %v1339_v5 = vsel %vm78_vm0, %v1333_v57, 0.0 }
 0xbb9   :  { %1340 = vadd.xlane.f32.xlu1 %v1339_v5  ;;  %v1336_v6 = vsel %vm78_vm0, %v1332_v28, 0.0 }
 0xbba   :  { %1337 = vadd.xlane.f32.xlu0 %v1336_v6 }
 0xc46   :  { %v1341_v7 = vpop.xlane.xlu1 %1340 }
 0xc47   :  { %v1344_v8 = vmul.f32 0.03125, %v1341_v7  ;;  %v1338_v9 = vpop.xlane.xlu0 %1337 }
 0xc48   :  { %v1343_v10 = vmul.f32 0.03125, %v1338_v9 }
 0xc49   :  { %v1346_v11 = vsub.f32 %v1333_v57, %v1344_v8 }
 0xc4a   :  { %v1345_v12 = vsub.f32 %v1332_v28, %v1343_v10 }
 0xc4b   :  { %v1348_v17 = vmul.f32 %v1346_v11, %v1346_v11 }
 0xc4c   :  { %v1347_v14 = vmul.f32 %v1345_v12, %v1345_v12 }
 0xc4d   :  { %v1352_v16 = vsel %vm78_vm0, %v1348_v17, 0.0 }
 0xc4e   :  { %v1349_v15 = vsel %vm78_vm0, %v1347_v14, 0.0 }
 0xc4f   :  { %1350 = vadd.xlane.f32.xlu0 %v1349_v15 }
 0xc53   :  { %1353 = vadd.xlane.f32.xlu0 %v1352_v16 }
 0xcdc   :  { %v1351_v13 = vpop.xlane.xlu0 %1350 }
 0xcdd   :  { %v1355_v30 = vmul.f32 0.03125, %v1351_v13 }
 0xcdf   :  { %v1357_v48 = vadd.f32 1e-05, %v1355_v30 }
 0xce0   :  { %v1354_v18 = vpop.xlane.xlu0 %1353 }
 0xce1   :  { %1859 = vrsqrt.f32 %v1357_v48  ;;  %v1356_v45 = vmul.f32 0.03125, %v1354_v18 }
 0xce3   :  { %v1358_v21 = vadd.f32 1e-05, %v1356_v45 }
 0xce5   :  { %1861 = vrsqrt.f32 %v1358_v21 }
 0xceb   :  { %v1860_v22 = vpop.eup %1859 }
 0xcec   :  { %v1361_v24 = vmul.f32 %v1860_v22, %v1345_v12 }
 0xcee   :  { %v1369_v43 = vmul.f32 %v1433_v23, %v1361_v24 }
 0xcef   :  { %v1862_v19 = vpop.eup %1861 }
 0xcf0   :  { %v1377_v20 = vadd.f32 %v1434_v25, %v1369_v43  ;;  %v1362_v26 = vmul.f32 %v1862_v19, %v1346_v11 }
 0xcf2   :  { %1379 = vst.msk [vmem:[%s2236_s13] sm:$0xff] %vm78_vm0, %v1377_v20  ;;  %v1370_v27 = vmul.f32 %v1433_v23, %v1362_v26 }
 0xcf4   :  { %v1378_v31 = vadd.f32 %v1434_v25, %v1370_v27 }
 0xcf6   :  { %1380 = vst.msk [vmem:[%s2236_s13 + $0x8] sm:$0xff] %vm78_vm0, %v1378_v31 }

// kernel: transformer_tf_attn_forward.38
= control target key start
LH: loop header
LB: loop body
LE: loop exit
PB: predicated region body
PF: predicated region fallthrough
CT: control target
= control target key end

     0   :  { %vm41_vm0 = vcmask 261120   ;;  %vm262_vm4 = vcmask 523264   ;;  %s739_s1 = inlined_call_operand.vmem [shape: f32[32,64], index: 1, kind: input, shape index: {}]   ;;  %s740_s0 = inlined_call_operand.vmem [shape: f32[32,32], index: 0, kind: input, shape index: {}]   ;;  %s741_s3 = inlined_call_operand.vmem [shape: f32[64,32], index: 3, kind: input, shape index: {}]   ;;  %s742_s2 = inlined_call_operand.vmem [shape: f32[1,64], index: 2, kind: input, shape index: {}]   ;;  %s743_s4 = inlined_call_operand.vmem [shape: f32[1,32], index: 4, kind: input, shape index: {}]   ;;  %s744_s5 = inlined_call_operand.vmem [shape: f32[1,32], index: 5, kind: input, shape index: {}]   ;;  %s745_s6 = inlined_call_operand.vmem [shape: f32[1,32], index: 6, kind: input, shape index: {}]   ;;  %s746_s7 = inlined_call_operand.vmem [shape: f32[32,32], index: 7, kind: output, shape index: {}]  }
   0x1   :  { %v30_v0 = vld [vmem:[%s739_s1] sm:$0xff]  ;;  %v31_v1 = vld [vmem:[%s739_s1 + $0x8] sm:$0xff]  ;;  %v32_v2 = vld [vmem:[%s739_s1 + $0x10] sm:$0xff] }
   0x2   :  { %v515_v3 = vpack.c.bf16 %v31_v1, %v30_v0  ;;  %v33_v4 = vld [vmem:[%s739_s1 + $0x18] sm:$0xff]  ;;  %v618_v5 = vld [vmem:[%s740_s0] sm:$0xff]  ;;  %v625_v7 = vld [vmem:[%s740_s0 + $0x8] sm:$0xff] }
   0x3   :  { %v519_v6 = vpack.c.bf16 %v33_v4, %v32_v2  ;;  %487 = vmatprep.mubr.msk.f32.mxu0 %vm41_vm0, %v618_v5  ;;  %v630_v8 = vld [vmem:[%s740_s0 + $0x10] sm:$0xff]  ;;  %v639_v9 = vld [vmem:[%s740_s0 + $0x18] sm:$0xff]  ;;  %v247_v10 = vld [vmem:[%s741_s3] sm:$0xff] }
   0x4   :  { %516 = vmatprep.subr.bf16.mxu0 %v515_v3  ;;  %v248_v11 = vld [vmem:[%s741_s3 + $0x8] sm:$0xff]  ;;  %v249_v13 = vld [vmem:[%s741_s3 + $0x10] sm:$0xff]  ;;  %v250_v14 = vld [vmem:[%s741_s3 + $0x18] sm:$0xff] }
   0x5   :  { %518 = vmatpush3.bf16.msra.mxu0 %v515_v3  ;;  %v523_v12 = vpack.c.bf16 %v248_v11, %v247_v10  ;;  %v527_v15 = vpack.c.bf16 %v250_v14, %v249_v13  ;;  %v251_v16 = vld [vmem:[%s741_s3 + $0x20] sm:$0xff]  ;;  %v252_v17 = vld [vmem:[%s741_s3 + $0x28] sm:$0xff]  ;;  %v253_v19 = vld [vmem:[%s741_s3 + $0x30] sm:$0xff] }
   0x6   :  { %520 = vmatprep.subr.bf16.mxu0 %v519_v6  ;;  %v531_v18 = vpack.c.bf16 %v252_v17, %v251_v16  ;;  %v254_v20 = vld [vmem:[%s741_s3 + $0x38] sm:$0xff]  ;;  %v447_v22 = vld [vmem:[%s742_s2] ss:$0 sm:$0xff] }
   0x7   :  { %524 = vmatprep.subr.bf16.mxu1 %v523_v12  ;;  %v535_v21 = vpack.c.bf16 %v254_v20, %v253_v19 }
   0x8   :  { %526 = vmatpush3.bf16.msra.mxu1 %v523_v12 }
   0x9   :  { %522 = vmatpush3.bf16.msra.mxu0 %v519_v6  ;;  %528 = vmatprep.subr.bf16.mxu1 %v527_v15 }
   0xc   :  { %488 = vmatmul.mubr.msk.f32.vlgmr.msra.gmra.mrb[0].mxu0 %vm41_vm0, %v625_v7  ;;  %530 = vmatpush3.bf16.msra.mxu1 %v527_v15 }
   0xd   :  { %490 = vmatprep.mubr.msk.f32.mxu0 %vm41_vm0, %v630_v8  ;;  %532 = vmatprep.subr.bf16.mxu1 %v531_v18 }
  0x10   :  { %491 = vmatmul.mubr.msk.f32.gmra.mrb[2].mxu0 %vm41_vm0, %v639_v9  ;;  %534 = vmatpush3.bf16.msra.mxu1 %v531_v18 }
  0x11   :  { %536 = vmatprep.subr.bf16.mxu1 %v535_v21 }
  0x14   :  { %538 = vmatpush3.bf16.msra.mxu1 %v535_v21 }
  0xdf   :  { %v489_v23 = vpop.f32.mrb[0].mxu0 }
  0xe0   :  { %v670_v24 = vadd.f32 %v489_v23, %v447_v22  ;;  %v120_v25 = vpop.f32.mrb[1].mxu0 }
  0xe1   :  { %v672_v26 = vadd.f32 %v447_v22, %v120_v25 }
  0xe2   :  { %v675_v27 = vmul.f32 0.70710677, %v670_v24 }
  0xe3   :  { %v678_v28 = vmul.f32 0.70710677, %v672_v26  ;;  %v492_v29 = vpop.f32.mrb[2].mxu0 }
  0xe4   :  { %v144_v30 = vand.u32 2147483647, %v675_v27  ;;  %v681_v31 = vadd.f32 %v492_v29, %v447_v22  ;;  %v130_v32 = vpop.f32.mrb[3].mxu0  ;;  %vm224_vm1 = vcmp.ge.f32.partialorder %v675_v27, 0.0 }
  0xe5   :  { %v143_v33 = vand.u32 2147483647, %v678_v28  ;;  %v684_v34 = vadd.f32 %v447_v22, %v130_v32  ;;  %vm223_vm2 = vcmp.ge.f32.partialorder %v678_v28, 0.0 }
  0xe6   :  { %v148_v35 = vmul.f32 0.3275911, %v144_v30  ;;  %v687_v36 = vmul.f32 0.70710677, %v681_v31  ;;  %v200_v47 = vsub.f32 0.0, %v144_v30 }
  0xe7   :  { %v147_v37 = vmul.f32 0.3275911, %v143_v33  ;;  %v690_v38 = vmul.f32 0.70710677, %v684_v34  ;;  %v199_v48 = vsub.f32 0.0, %v143_v33 }
  0xe8   :  { %v152_v39 = vadd.f32 1.0, %v148_v35  ;;  %v146_v40 = vand.u32 2147483647, %v687_v36  ;;  %v204_v50 = vmul.f32 %v200_v47, %v144_v30  ;;  %vm226_vm3 = vcmp.ge.f32.partialorder %v687_v36, 0.0  ;;  %v452_v36 = vld [vmem:[%s743_s4] ss:$0 sm:$0xff] }
  0xe9   :  { %v151_v41 = vadd.f32 1.0, %v147_v37  ;;  %v145_v42 = vand.u32 2147483647, %v690_v38  ;;  %v203_v54 = vmul.f32 %v199_v48, %v143_v33  ;;  %vm225_vm5 = vcmp.ge.f32.partialorder %v690_v38, 0.0 }
  0xea   :  { %539 = vrcp.f32 %v152_v39  ;;  %v150_v43 = vmul.f32 0.3275911, %v146_v40  ;;  %v202_v51 = vsub.f32 0.0, %v146_v40  ;;  %v209_v59 = vmul.f32 1.442695, %v204_v50 }
  0xeb   :  { %541 = vrcp.f32 %v151_v41  ;;  %v149_v44 = vmul.f32 0.3275911, %v145_v42  ;;  %v201_v55 = vsub.f32 0.0, %v145_v42  ;;  %v207_v0 = vmul.f32 1.442695, %v203_v54 }
  0xec   :  { %v154_v45 = vadd.f32 1.0, %v150_v43  ;;  %v206_v60 = vmul.f32 %v202_v51, %v146_v40 }
  0xed   :  { %v153_v46 = vadd.f32 1.0, %v149_v44  ;;  %v205_v2 = vmul.f32 %v201_v55, %v145_v42 }
  0xee   :  { %543 = vrcp.f32 %v154_v45  ;;  %v213_v11 = vmul.f32 1.442695, %v206_v60 }
  0xef   :  { %545 = vrcp.f32 %v153_v46  ;;  %v211_v16 = vmul.f32 1.442695, %v205_v2  ;;  %v235_v2 = vmul.f32 0.5, %v672_v26  ;;  %v238_v26 = vmul.f32 0.5, %v681_v31 }
  0xf0   :  { %547 = vpow2.f32 %v209_v59 }
  0xf1   :  { %549 = vpow2.f32 %v207_v0 }
  0xf2   :  { %551 = vpow2.f32 %v213_v11 }
  0xf3   :  { %553 = vpow2.f32 %v211_v16 }
  0xf4   :  { %v540_v49 = vpop.eup %539 }
  0xf5   :  { %v542_v52 = vpop.eup %541  ;;  %v164_v53 = vmul.f32 1.0614054, %v540_v49 }
  0xf6   :  { %v163_v56 = vmul.f32 1.0614054, %v542_v52 }
  0xf7   :  { %v168_v57 = vadd.f32 -1.4531521, %v164_v53 }
  0xf8   :  { %v544_v58 = vpop.eup %543  ;;  %v167_v61 = vadd.f32 -1.4531521, %v163_v56 }
  0xf9   :  { %v546_v62 = vpop.eup %545  ;;  %v172_v63 = vmul.f32 %v540_v49, %v168_v57  ;;  %v166_v1 = vmul.f32 1.0614054, %v544_v58 }
  0xfa   :  { %v165_v3 = vmul.f32 1.0614054, %v546_v62  ;;  %v171_v4 = vmul.f32 %v542_v52, %v167_v61  ;;  %v548_v41 = vpop.eup %547 }
  0xfb   :  { %v176_v6 = vadd.f32 1.4214138, %v172_v63  ;;  %v170_v10 = vadd.f32 -1.4531521, %v166_v1  ;;  %v550_v44 = vpop.eup %549 }
  0xfc   :  { %v169_v12 = vadd.f32 -1.4531521, %v165_v3  ;;  %v175_v13 = vadd.f32 1.4214138, %v171_v4  ;;  %v552_v53 = vpop.eup %551 }
  0xfd   :  { %v180_v14 = vmul.f32 %v540_v49, %v176_v6  ;;  %v174_v15 = vmul.f32 %v544_v58, %v170_v10  ;;  %v554_v56 = vpop.eup %553 }
  0xfe   :  { %v173_v17 = vmul.f32 %v546_v62, %v169_v12  ;;  %v179_v18 = vmul.f32 %v542_v52, %v175_v13  ;;  %v237_v12 = vmul.f32 0.5, %v684_v34 }
  0xff   :  { %v184_v19 = vadd.f32 -0.28449672, %v180_v14  ;;  %v178_v20 = vadd.f32 1.4214138, %v174_v15 }
 0x100   :  { %v177_v21 = vadd.f32 1.4214138, %v173_v17  ;;  %v183_v22 = vadd.f32 -0.28449672, %v179_v18 }
 0x101   :  { %v188_v23 = vmul.f32 %v540_v49, %v184_v19  ;;  %v182_v25 = vmul.f32 %v544_v58, %v178_v20 }
 0x102   :  { %v181_v29 = vmul.f32 %v546_v62, %v177_v21  ;;  %v187_v30 = vmul.f32 %v542_v52, %v183_v22 }
 0x103   :  { %v192_v32 = vadd.f32 0.2548296, %v188_v23  ;;  %v186_v33 = vadd.f32 -0.28449672, %v182_v25 }
 0x104   :  { %v185_v35 = vadd.f32 -0.28449672, %v181_v29  ;;  %v191_v37 = vadd.f32 0.2548296, %v187_v30 }
 0x105   :  { %v196_v39 = vmul.f32 %v540_v49, %v192_v32  ;;  %v190_v40 = vmul.f32 %v544_v58, %v186_v33 }
 0x106   :  { %v189_v42 = vmul.f32 %v546_v62, %v185_v35  ;;  %v195_v43 = vmul.f32 %v542_v52, %v191_v37 }
 0x107   :  { %v216_v45 = vmul.f32 %v548_v41, %v196_v39  ;;  %v194_v46 = vadd.f32 0.2548296, %v190_v40 }
 0x108   :  { %v193_v47 = vadd.f32 0.2548296, %v189_v42  ;;  %v215_v48 = vmul.f32 %v550_v44, %v195_v43 }
 0x109   :  { %v220_v50 = vsub.f32 1.0, %v216_v45  ;;  %v198_v51 = vmul.f32 %v544_v58, %v194_v46 }
 0x10a   :  { %v197_v54 = vmul.f32 %v546_v62, %v193_v47  ;;  %v219_v55 = vsub.f32 1.0, %v215_v48  ;;  %v236_v62 = vmul.f32 0.5, %v670_v24 }
 0x10b   :  { %v228_v57 = vsub.f32 0.0, %v220_v50  ;;  %v218_v59 = vmul.f32 %v552_v53, %v198_v51 }
 0x10c   :  { %v217_v49 = vmul.f32 %v554_v56, %v197_v54  ;;  %v227_v60 = vsub.f32 0.0, %v219_v55 }
 0x10d   :  { %v232_v61 = vsel %vm224_vm1, %v220_v50, %v228_v57  ;;  %v222_v52 = vsub.f32 1.0, %v218_v59 }
 0x10e   :  { %v240_v63 = vadd.f32 1.0, %v232_v61  ;;  %v221_v0 = vsub.f32 1.0, %v217_v49  ;;  %v231_v1 = vsel %vm223_vm2, %v219_v55, %v227_v60 }
 0x10f   :  { %v230_v58 = vsub.f32 0.0, %v222_v52  ;;  %v239_v3 = vadd.f32 1.0, %v231_v1 }
 0x110   :  { %v229_v4 = vsub.f32 0.0, %v221_v0  ;;  %v244_v10 = vmul.f32 %v240_v63, %v236_v62  ;;  %v458_v62 = vld [vmem:[%s745_s6] ss:$0 sm:$0xff] }
 0x111   :  { %v234_v27 = vsel %vm226_vm3, %v222_v52, %v230_v58  ;;  %v243_v6 = vmul.f32 %v239_v3, %v235_v2  ;;  %v457_v58 = vld [vmem:[%s744_s5] ss:$0 sm:$0xff] }
 0x112   :  { %v242_v28 = vadd.f32 1.0, %v234_v27  ;;  %v233_v11 = vsel %vm225_vm5, %v221_v0, %v229_v4 }
 0x113   :  { %v241_v13 = vadd.f32 1.0, %v233_v11  ;;  %509 = vmatprep.mubr.msk.f32.mxu1 %vm262_vm4, %v243_v6 }
 0x114   :  { %510 = vmatmul.mubr.msk.f32.vlgmr.msra.gmra.mrb[0].mxu1 %vm262_vm4, %v244_v10  ;;  %v246_v24 = vmul.f32 %v242_v28, %v238_v26 }
 0x115   :  { %v245_v14 = vmul.f32 %v241_v13, %v237_v12 }
 0x117   :  { %512 = vmatprep.mubr.msk.f32.mxu1 %vm262_vm4, %v245_v14 }
 0x118   :  { %513 = vmatmul.mubr.msk.f32.gmra.mrb[2].mxu1 %vm262_vm4, %v246_v24 }
 0x1e7   :  { %v511_v38 = vpop.f32.mrb[0].mxu1 }
 0x1e8   :  { %v341_v15 = vpop.f32.mrb[1].mxu1  ;;  %v347_v16 = vadd.f32 %v511_v38, %v452_v36 }
 0x1e9   :  { %v342_v17 = vadd.f32 %v452_v36, %v341_v15 }
 0x1ea   :  { %v361_v22 = vadd.f32 %v347_v16, %v625_v7 }
 0x1eb   :  { %v514_v18 = vpop.f32.mrb[2].mxu1  ;;  %v360_v34 = vadd.f32 %v342_v17, %v618_v5 }
 0x1ec   :  { %v351_v19 = vpop.f32.mrb[3].mxu1  ;;  %v357_v20 = vadd.f32 %v514_v18, %v452_v36  ;;  %v369_v29 = vsel %vm41_vm0, %v361_v22, 0.0 }
 0x1ed   :  { %v352_v21 = vadd.f32 %v452_v36, %v351_v19  ;;  %v366_v31 = vsel %vm41_vm0, %v360_v34, 0.0 }
 0x1ee   :  { %367 = vadd.xlane.f32.xlu0 %v366_v31  ;;  %v363_v30 = vadd.f32 %v357_v20, %v639_v9 }
 0x1ef   :  { %v362_v23 = vadd.f32 %v352_v21, %v630_v8 }
 0x1f0   :  { %v375_v5 = vsel %vm41_vm0, %v363_v30, 0.0 }
 0x1f1   :  { %v372_v25 = vsel %vm41_vm0, %v362_v23, 0.0 }
 0x1f2   :  { %373 = vadd.xlane.f32.xlu1 %v372_v25  ;;  %370 = vadd.xlane.f32.xlu0 %v369_v29 }
 0x1f6   :  { %376 = vadd.xlane.f32.xlu1 %v375_v5 }
 0x27b   :  { %v368_v32 = vpop.xlane.xlu0 %367 }
 0x27c   :  { %v379_v33 = vmul.f32 0.03125, %v368_v32 }
 0x27e   :  { %v383_v35 = vsub.f32 %v360_v34, %v379_v33 }
 0x27f   :  { %v374_v37 = vpop.xlane.xlu1 %373  ;;  %v371_v39 = vpop.xlane.xlu0 %370 }
 0x280   :  { %v381_v7 = vmul.f32 0.03125, %v374_v37  ;;  %v380_v40 = vmul.f32 0.03125, %v371_v39  ;;  %v387_v41 = vmul.f32 %v383_v35, %v383_v35 }
 0x282   :  { %v385_v8 = vsub.f32 %v362_v23, %v381_v7  ;;  %v384_v42 = vsub.f32 %v361_v22, %v380_v40  ;;  %v391_v43 = vsel %vm41_vm0, %v387_v41, 0.0 }
 0x283   :  { %v377_v44 = vpop.xlane.xlu1 %376  ;;  %392 = vadd.xlane.f32.xlu0 %v391_v43 }
 0x284   :  { %v382_v9 = vmul.f32 0.03125, %v377_v44  ;;  %v389_v45 = vmul.f32 %v385_v8, %v385_v8  ;;  %v388_v46 = vmul.f32 %v384_v42, %v384_v42 }
 0x286   :  { %v386_v47 = vsub.f32 %v363_v30, %v382_v9  ;;  %v397_v48 = vsel %vm41_vm0, %v389_v45, 0.0  ;;  %v394_v50 = vsel %vm41_vm0, %v388_v46, 0.0 }
 0x287   :  { %398 = vadd.xlane.f32.xlu0 %v397_v48  ;;  %395 = vadd.xlane.f32.xlu1 %v394_v50 }
 0x288   :  { %v390_v51 = vmul.f32 %v386_v47, %v386_v47 }
 0x28a   :  { %v400_v53 = vsel %vm41_vm0, %v390_v51, 0.0 }
 0x28b   :  { %401 = vadd.xlane.f32.xlu1 %v400_v53 }
 0x310   :  { %v393_v54 = vpop.xlane.xlu0 %392 }
 0x311   :  { %v403_v55 = vmul.f32 0.03125, %v393_v54 }
 0x313   :  { %v407_v56 = vadd.f32 1e-05, %v403_v55 }
 0x314   :  { %v396_v57 = vpop.xlane.xlu1 %395  ;;  %v399_v59 = vpop.xlane.xlu0 %398 }
 0x315   :  { %555 = vrsqrt.f32 %v407_v56  ;;  %v404_v49 = vmul.f32 0.03125, %v396_v57  ;;  %v405_v60 = vmul.f32 0.03125, %v399_v59 }
 0x317   :  { %v408_v61 = vadd.f32 1e-05, %v404_v49  ;;  %v409_v52 = vadd.f32 1e-05, %v405_v60 }
 0x318   :  { %v402_v63 = vpop.xlane.xlu1 %401 }
 0x319   :  { %557 = vrsqrt.f32 %v408_v61  ;;  %v406_v0 = vmul.f32 0.03125, %v402_v63 }
 0x31a   :  { %559 = vrsqrt.f32 %v409_v52 }
 0x31b   :  { %v410_v1 = vadd.f32 1e-05, %v406_v0 }
 0x31d   :  { %561 = vrsqrt.f32 %v410_v1 }
 0x31f   :  { %v556_v2 = vpop.eup %555 }
 0x320   :  { %v415_v3 = vmul.f32 %v556_v2, %v383_v35 }
 0x322   :  { %v425_v4 = vmul.f32 %v457_v58, %v415_v3 }
 0x323   :  { %v558_v27 = vpop.eup %557 }
 0x324   :  { %v560_v6 = vpop.eup %559  ;;  %v435_v10 = vadd.f32 %v458_v62, %v425_v4  ;;  %v416_v28 = vmul.f32 %v558_v27, %v384_v42 }
 0x325   :  { %v417_v11 = vmul.f32 %v560_v6, %v385_v8 }
 0x326   :  { %439 = vst.msk [vmem:[%s746_s7] sm:$0xff] %vm41_vm0, %v435_v10  ;;  %v426_v12 = vmul.f32 %v457_v58, %v416_v28 }
 0x327   :  { %v562_v13 = vpop.eup %561  ;;  %v427_v26 = vmul.f32 %v457_v58, %v417_v11 }
 0x328   :  { %v436_v14 = vadd.f32 %v458_v62, %v426_v12  ;;  %v418_v24 = vmul.f32 %v562_v13, %v386_v47 }
 0x329   :  { %v437_v36 = vadd.f32 %v458_v62, %v427_v26 }
 0x32a   :  { %440 = vst.msk [vmem:[%s746_s7 + $0x8] sm:$0xff] %vm41_vm0, %v436_v14  ;;  %v428_v38 = vmul.f32 %v457_v58, %v418_v24 }
 0x32b   :  { %441 = vst.msk [vmem:[%s746_s7 + $0x10] sm:$0xff] %vm41_vm0, %v437_v36 }
 0x32c   :  { %v438_v15 = vadd.f32 %v458_v62, %v428_v38 }
 0x32e   :  { %442 = vst.msk [vmem:[%s746_s7 + $0x18] sm:$0xff] %vm41_vm0, %v438_v15 }

// kernel: transformer_tf_attn_forward.37
= control target key start
LH: loop header
LB: loop body
LE: loop exit
PB: predicated region body
PF: predicated region fallthrough
CT: control target
= control target key end

     0   :  { %vm82_vm0 = vcmask 261120   ;;  %vm374_vm1 = vcmask 64512   ;;  %s2311_s19 = smov 120   ;;  %s2313_s20 = smov 104   ;;  %vm1523_vm3 = vcmask 130048   ;;  %vm1528_vm4 = vcmask 195584   ;;  %s2771_s4 = inlined_call_operand.vmem [shape: f32[32,32], index: 4, kind: input, shape index: {}]   ;;  %s2772_s1 = inlined_call_operand.vmem [shape: f32[32,32], index: 1, kind: input, shape index: {}, may-alias: {0,1}]   ;;  %s2773_s2 = inlined_call_operand.vmem [shape: f32[32,32], index: 2, kind: input, shape index: {}]   ;;  %s2774_s0 = inlined_call_operand.vmem [shape: f32[32,32], index: 0, kind: input, shape index: {}, may-alias: {0,1}]   ;;  %s2775_s5 = inlined_call_operand.vmem [shape: f32[1,32], index: 5, kind: input, shape index: {}]   ;;  %s2776_s3 = inlined_call_operand.vmem [shape: f32[1,32], index: 3, kind: input, shape index: {}]   ;;  %s2777_s6 = inlined_call_operand.vmem [shape: f32[32,32], index: 6, kind: input, shape index: {}]   ;;  %s2778_s10 = inlined_call_operand.vmem [shape: f32[32,32], index: 10, kind: input, shape index: {}]   ;;  %s2779_s7 = inlined_call_operand.vmem [shape: f32[1,32], index: 7, kind: input, shape index: {}]   ;;  %s2780_s8 = inlined_call_operand.vmem [shape: f32[32,32], index: 8, kind: input, shape index: {}]   ;;  %s2781_s9 = inlined_call_operand.vmem [shape: f32[1,32], index: 9, kind: input, shape index: {}]   ;;  %s2782_s11 = inlined_call_operand.vmem [shape: f32[1,32], index: 11, kind: input, shape index: {}]   ;;  %s2783_s12 = inlined_call_operand.vmem [shape: f32[1,32], index: 12, kind: input, shape index: {}]   ;;  %s2784_s13 = inlined_call_operand.vmem [shape: f32[32,32], index: 13, kind: output, shape index: {}]  }
   0x1   :  { %v57_v0 = vld [vmem:[%s2771_s4] sm:$0xff]  ;;  %v58_v1 = vld [vmem:[%s2771_s4 + $0x8] sm:$0xff]  ;;  %v59_v2 = vld [vmem:[%s2771_s4 + $0x10] sm:$0xff]  ;;  %s2314_s21 = smov 8   ;;  %s2316_s27 = smov 24  }
   0x2   :  { %v2065_v3 = vpack.c.bf16 %v58_v1, %v57_v0  ;;  %v60_v4 = vld [vmem:[%s2771_s4 + $0x18] sm:$0xff]  ;;  %v48_v5 = vld [vmem:[%s2772_s1] sm:$0xff]  ;;  %v53_v8 = vld [vmem:[%s2773_s2 + $0x8] sm:$0xff] }
   0x3   :  { %v2069_v6 = vpack.c.bf16 %v60_v4, %v59_v2  ;;  %1911 = vmatprep.mubr.msk.f32.mxu1 %vm82_vm0, %v48_v5  ;;  %v52_v7 = vld [vmem:[%s2773_s2] sm:$0xff]  ;;  %v54_v9 = vld [vmem:[%s2773_s2 + $0x10] sm:$0xff]  ;;  %v55_v10 = vld [vmem:[%s2773_s2 + $0x18] sm:$0xff] }
   0x4   :  { %2066 = vmatprep.subr.bf16.mxu1 %v2065_v3  ;;  %v2057_v11 = vpack.c.bf16 %v53_v8, %v52_v7  ;;  %v2061_v12 = vpack.c.bf16 %v55_v10, %v54_v9  ;;  %v44_v13 = vld [vmem:[%s2774_s0] sm:$0xff]  ;;  %v49_v14 = vld [vmem:[%s2772_s1 + $0x8] sm:$0xff]  ;;  %v50_v15 = vld [vmem:[%s2772_s1 + $0x10] sm:$0xff] }
   0x5   :  { %2068 = vmatpush3.bf16.msra.mxu1 %v2065_v3  ;;  %1897 = vmatprep.mubr.msk.f32.mxu0 %vm82_vm0, %v44_v13  ;;  %v45_v16 = vld [vmem:[%s2774_s0 + $0x8] sm:$0xff]  ;;  %v51_v17 = vld [vmem:[%s2772_s1 + $0x18] sm:$0xff]  ;;  %v46_v18 = vld [vmem:[%s2774_s0 + $0x10] sm:$0xff]  ;;  %s2315_s1 = smov 16  }
   0x6   :  { %2070 = vmatprep.subr.bf16.mxu1 %v2069_v6  ;;  %2058 = vmatprep.subr.bf16.mxu0 %v2057_v11  ;;  %v47_v19 = vld [vmem:[%s2774_s0 + $0x18] sm:$0xff]  ;;  %v1728_v20 = vld [vmem:[%s2775_s5] ss:$0 sm:$0xff]  ;;  %vm2452_vm2 = vmpackc.low %vm374_vm1, %vm374_vm1 }
   0x7   :  { %2060 = vmatpush3.bf16.msra.mxu0 %v2057_v11  ;;  %v1723_v25 = vld [vmem:[%s2776_s3] ss:$0 sm:$0xff]  ;;  %v63_v44 = vld [vmem:[%s2777_s6 + $0x8] sm:$0xff]  ;;  %v64_v45 = vld [vmem:[%s2777_s6 + $0x10] sm:$0xff] }
   0x8   :  { %2062 = vmatprep.subr.bf16.mxu0 %v2061_v12  ;;  %v62_v43 = vld [vmem:[%s2777_s6] sm:$0xff]  ;;  %v65_v47 = vld [vmem:[%s2777_s6 + $0x18] sm:$0xff]  ;;  %v2507_v54 = vld [vmem:[%s2778_s10 + $0x8] sm:$0xff] }
   0x9   :  { %2072 = vmatpush3.bf16.msra.mxu1 %v2069_v6  ;;  %v2073_v46 = vpack.c.bf16 %v63_v44, %v62_v43  ;;  %v2077_v48 = vpack.c.bf16 %v65_v47, %v64_v45  ;;  %v2502_v51 = vld [vmem:[%s2778_s10] sm:$0xff]  ;;  %v2513_v58 = vld [vmem:[%s2778_s10 + $0x10] sm:$0xff]  ;;  %v2520_v63 = vld [vmem:[%s2778_s10 + $0x18] sm:$0xff] }
   0xb   :  { %2064 = vmatpush3.bf16.msra.mxu0 %v2061_v12 }
   0xc   :  { %1912 = vmatmul.mubr.msk.f32.vlgmr.msra.gmra.mrb[0].mxu1 %vm82_vm0, %v49_v14  ;;  %2074 = vmatprep.subr.bf16.mxu0 %v2073_v46 }
   0xd   :  { %1914 = vmatprep.mubr.msk.f32.mxu1 %vm82_vm0, %v50_v15 }
   0xe   :  { %1898 = vmatmul.mubr.msk.f32.vlgmr.msra.gmra.mrb[0].mxu0 %vm82_vm0, %v45_v16 }
   0xf   :  { %1900 = vmatprep.mubr.msk.f32.mxu0 %vm82_vm0, %v46_v18  ;;  %2076 = vmatpush3.bf16.msra.mxu0 %v2073_v46 }
  0x10   :  { %1915 = vmatmul.mubr.msk.f32.gmra.mrb[2].mxu1 %vm82_vm0, %v51_v17  ;;  %2078 = vmatprep.subr.bf16.mxu0 %v2077_v48 }
  0x12   :  { %1901 = vmatmul.mubr.msk.f32.gmra.mrb[2].mxu0 %vm82_vm0, %v47_v19 }
  0x13   :  { %1925 = vmatprep.mubr.msk.f32.mxu0 %vm82_vm0, %v48_v5  ;;  %2080 = vmatpush3.bf16.msra.mxu0 %v2077_v48 }
  0x16   :  { %1926 = vmatmul.mubr.msk.f32.vlgmr.msra.gmra.mrb[4].mxu0 %vm82_vm0, %v49_v14 }
  0x17   :  { %1928 = vmatprep.mubr.msk.f32.mxu0 %vm82_vm0, %v50_v15 }
  0x1a   :  { %1929 = vmatmul.mubr.msk.f32.gmra.mrb[6].mxu0 %vm82_vm0, %v51_v17 }
  0xdf   :  { %v1913_v21 = vpop.f32.mrb[0].mxu1 }
  0xe0   :  { %v270_v22 = vadd.f32 %v1913_v21, %v1728_v20  ;;  %v264_v23 = vpop.f32.mrb[1].mxu1 }
  0xe1   :  { %v265_v24 = vadd.f32 %v1728_v20, %v264_v23  ;;  %v1899_v27 = vpop.f32.mrb[0].mxu0 }
  0xe2   :  { %v161_v30 = vpop.f32.mrb[1].mxu0  ;;  %v2474_v41 = vadd.f32 %v1899_v27, %v1723_v25 }
  0xe3   :  { %v2081_v28 = vpack.c.bf16 %v270_v22, %v265_v24  ;;  %v1916_v29 = vpop.f32.mrb[2].mxu1  ;;  %v2456_v31 = vpack.i.bf16 %v270_v22, %v265_v24  ;;  %v2458_v34 = vadd.f32 %v1723_v25, %v161_v30 }
  0xe4   :  { %v280_v32 = vadd.f32 %v1916_v29, %v1728_v20  ;;  %v274_v33 = vpop.f32.mrb[3].mxu1  ;;  %v1733_v29 = vld [vmem:[%s2779_s7] ss:$0 sm:$0xff]  ;;  %s2312_s7 = smov 112  }
  0xe5   :  { %2083 = vmatprep.subr.msk.bf16.mxu1 %vm2452_vm2, %v2081_v28  ;;  %v275_v35 = vadd.f32 %v1728_v20, %v274_v33  ;;  %1939 = vmatprep.mubr.msk.f32.mxu1 %vm374_vm1, %v2458_v34  ;;  %v1902_v36 = vpop.f32.mrb[2].mxu0 }
  0xe6   :  { %2086 = vmatpush3.bf16.xpose.msk.msra.mxu1 %vm2452_vm2, %v2081_v28  ;;  %v171_v38 = vpop.f32.mrb[3].mxu0  ;;  %v2476_v42 = vadd.f32 %v1902_v36, %v1723_v25 }
  0xe7   :  { %v2087_v37 = vpack.c.bf16 %v280_v32, %v275_v35  ;;  %v2466_v39 = vpack.i.bf16 %v280_v32, %v275_v35  ;;  %v2472_v40 = vadd.f32 %v1723_v25, %v171_v38 }
  0xe9   :  { %2089 = vmatprep.subr.msk.bf16.mxu1 %vm2452_vm2, %v2087_v37  ;;  %v1927_v5 = vpop.f32.mrb[4].mxu0 }
  0xea   :  { %v355_v6 = vpop.f32.mrb[5].mxu0  ;;  %v361_v30 = vadd.f32 %v1927_v5, %v1733_v29 }
  0xeb   :  { %v356_v32 = vadd.f32 %v1733_v29, %v355_v6 }
  0xed   :  { %v1930_v7 = vpop.f32.mrb[6].mxu0  ;;  %v2093_v36 = vpack.c.bf16 %v361_v30, %v356_v32  ;;  %v2534_v38 = vpack.i.bf16 %v361_v30, %v356_v32 }
  0xee   :  { %2092 = vmatpush3.bf16.xpose.msk.msra.mxu1 %vm2452_vm2, %v2087_v37  ;;  %v371_v33 = vadd.f32 %v1930_v7, %v1733_v29  ;;  %v365_v35 = vpop.f32.mrb[7].mxu0 }
  0xef   :  { %v366_v37 = vadd.f32 %v1733_v29, %v365_v35  ;;  %2094 = vmatprep.subr.bf16.mxu0 %v2093_v36 }
  0xf0   :  { %2096 = vmatpush3.bf16.msra.mxu0 %v2093_v36 }
  0xf1   :  { %v2097_v43 = vpack.c.bf16 %v371_v33, %v366_v37  ;;  %v2536_v44 = vpack.i.bf16 %v371_v33, %v366_v37 }
  0xf3   :  { %2098 = vmatprep.subr.bf16.mxu0 %v2097_v43 }
  0xf4   :  { %2100 = vmatpush3.bf16.msra.mxu0 %v2097_v43 }
  0xf5   :  { %1940 = vmatmul.mubr.msk.f32.vlgmr.msra.gmra.mrb[4].mxu1 %vm374_vm1, %v2474_v41 }
  0xf6   :  { %1942 = vmatprep.mubr.msk.f32.mxu1 %vm374_vm1, %v2472_v40 }
  0xf9   :  { %1943 = vmatmul.mubr.msk.f32.gmra.mrb[6].mxu1 %vm374_vm1, %v2476_v42 }
 0x1c8   :  { %v1941_v49 = vpop.f32.mrb[4].mxu1 }
 0x1c9   :  { %v465_v50 = vpop.f32.mrb[5].mxu1  ;;  %v485_v52 = vmul.f32 0.35355338, %v1941_v49 }
 0x1ca   :  { %v484_v53 = vmul.f32 0.35355338, %v465_v50 }
 0x1cb   :  { %v489_v62 = vadd.f32 %v485_v52, %v2507_v54 }
 0x1cc   :  { %v1944_v55 = vpop.f32.mrb[6].mxu1  ;;  %v488_v56 = vadd.f32 %v484_v53, %v2502_v51 }
 0x1cd   :  { %v475_v57 = vpop.f32.mrb[7].mxu1  ;;  %v487_v59 = vmul.f32 0.35355338, %v1944_v55  ;;  %v495_v1 = vsel %vm82_vm0, %v489_v62, -inf }
 0x1ce   :  { %v486_v60 = vmul.f32 0.35355338, %v475_v57  ;;  %v492_v61 = vsel %vm82_vm0, %v488_v56, -inf }
 0x1cf   :  { %493 = vmax.xlane.f32.xlu0 %v492_v61  ;;  %v491_v3 = vadd.f32 %v487_v59, %v2520_v63 }
 0x1d0   :  { %v490_v0 = vadd.f32 %v486_v60, %v2513_v58 }
 0x1d1   :  { %v501_v4 = vsel %vm82_vm0, %v491_v3, -inf }
 0x1d2   :  { %v498_v2 = vsel %vm82_vm0, %v490_v0, -inf }
 0x1d3   :  { %496 = vmax.xlane.f32.xlu0 %v495_v1  ;;  %499 = vmax.xlane.f32.xlu1 %v498_v2 }
 0x1d7   :  { %502 = vmax.xlane.f32.xlu1 %v501_v4 }
 0x25c   :  { %v494_v8 = vpop.xlane.xlu0 %493 }
 0x25d   :  { %v504_v9 = vsub.f32 %v488_v56, %v494_v8 }
 0x25f   :  { %v508_v10 = vmul.f32 1.442695, %v504_v9 }
 0x260   :  { %v497_v11 = vpop.xlane.xlu0 %496  ;;  %v500_v12 = vpop.xlane.xlu1 %499 }
 0x261   :  { %2235 = vpow2.f32 %v508_v10  ;;  %v505_v13 = vsub.f32 %v489_v62, %v497_v11  ;;  %v506_v14 = vsub.f32 %v490_v0, %v500_v12 }
 0x263   :  { %v510_v15 = vmul.f32 1.442695, %v505_v13  ;;  %v512_v16 = vmul.f32 1.442695, %v506_v14 }
 0x264   :  { %v503_v17 = vpop.xlane.xlu1 %502 }
 0x265   :  { %2237 = vpow2.f32 %v510_v15  ;;  %v507_v18 = vsub.f32 %v491_v3, %v503_v17 }
 0x266   :  { %2239 = vpow2.f32 %v512_v16 }
 0x267   :  { %v514_v19 = vmul.f32 1.442695, %v507_v18 }
 0x269   :  { %2241 = vpow2.f32 %v514_v19 }
 0x26b   :  { %v2236_v20 = vpop.eup %2235 }
 0x26c   :  { %v516_v21 = vsel %vm82_vm0, %v2236_v20, 0.0 }
 0x26d   :  { %517 = vadd.xlane.f32.xlu0 %v516_v21 }
 0x26f   :  { %v2238_v22 = vpop.eup %2237 }
 0x270   :  { %v2240_v23 = vpop.eup %2239  ;;  %v519_v24 = vsel %vm82_vm0, %v2238_v22, 0.0 }
 0x271   :  { %520 = vadd.xlane.f32.xlu1 %v519_v24  ;;  %v522_v25 = vsel %vm82_vm0, %v2240_v23, 0.0 }
 0x272   :  { %523 = vadd.xlane.f32.xlu0 %v522_v25 }
 0x273   :  { %v2242_v27 = vpop.eup %2241 }
 0x274   :  { %v525_v28 = vsel %vm82_vm0, %v2242_v27, 0.0 }
 0x275   :  { %526 = vadd.xlane.f32.xlu1 %v525_v28 }
 0x286   :  { %2181 = vrot.lane.b32.xlu1 %v2466_v39, %s2311_s19 }
 0x288   :  { %2176 = vrot.lane.b32.xlu0 %v2456_v31, %s2311_s19 }
 0x28a   :  { %633 = vrot.lane.b32.xlu1 %v2458_v34, %s2311_s19 }
 0x28c   :  { %637 = vrot.lane.b32.xlu0 %v2472_v40, %s2311_s19 }
 0x28e   :  { %635 = vrot.lane.b32.xlu1 %v2474_v41, %s2311_s19 }
 0x292   :  { %639 = vrot.lane.b32.xlu1 %v2476_v42, %s2311_s19 }
 0x2fa   :  { %v518_v45 = vpop.xlane.xlu0 %517 }
 0x2fb   :  { %2243 = vrcp.f32 %v518_v45 }
 0x2fe   :  { %v521_v46 = vpop.xlane.xlu1 %520 }
 0x2ff   :  { %v524_v47 = vpop.xlane.xlu0 %523  ;;  %2245 = vrcp.f32 %v521_v46 }
 0x300   :  { %2247 = vrcp.f32 %v524_v47 }
 0x302   :  { %v527_v48 = vpop.xlane.xlu1 %526 }
 0x303   :  { %v2177_v49 = vpop.permute.xlu0 %2176  ;;  %2249 = vrcp.f32 %v527_v48 }
 0x304   :  { %v2179_v50 = vunpack.i.h.bf16 %v2177_v49  ;;  %v2178_v52 = vunpack.i.l.bf16 %v2177_v49 }
 0x305   :  { %v2244_v53 = vpop.eup %2243 }
 0x306   :  { %v2101_v55 = vpack.c.bf16 %v2179_v50, %v2178_v52  ;;  %v2182_v56 = vpop.permute.xlu1 %2181  ;;  %v529_v57 = vmul.f32 %v2244_v53, %v2236_v20 }
 0x307   :  { %v2184_v59 = vunpack.i.h.bf16 %v2182_v56  ;;  %v2183_v60 = vunpack.i.l.bf16 %v2182_v56  ;;  %v638_v7 = vpop.permute.xlu0 %637 }
 0x308   :  { %2103 = vmatprep.subr.msk.bf16.mxu0 %vm2452_vm2, %v2101_v55  ;;  %1953 = vmatprep.mubr.msk.f32.mxu0 %vm82_vm0, %v529_v57 }
 0x309   :  { %v2246_v61 = vpop.eup %2245  ;;  %v2107_v2 = vpack.c.bf16 %v2184_v59, %v2183_v60 }
 0x30a   :  { %v2248_v62 = vpop.eup %2247  ;;  %v531_v0 = vmul.f32 %v2246_v61, %v2238_v22  ;;  %v634_v5 = vpop.permute.xlu1 %633 }
 0x30b   :  { %v533_v1 = vmul.f32 %v2248_v62, %v2240_v23 }
 0x30c   :  { %1954 = vmatmul.mubr.msk.f32.vlgmr.msra.gmra.mrb[8].mxu0 %vm82_vm0, %v531_v0 }
 0x30d   :  { %v2250_v3 = vpop.eup %2249  ;;  %2106 = vmatpush3.bf16.xpose.msk.msra.mxu0 %vm2452_vm2, %v2101_v55  ;;  %1956 = vmatprep.mubr.msk.f32.mxu0 %vm82_vm0, %v533_v1 }
 0x30e   :  { %2109 = vmatprep.subr.msk.bf16.mxu0 %vm2452_vm2, %v2107_v2  ;;  %v535_v4 = vmul.f32 %v2250_v3, %v2242_v27  ;;  %v636_v6 = vpop.permute.xlu1 %635 }
 0x310   :  { %1957 = vmatmul.mubr.msk.f32.gmra.mrb[10].mxu0 %vm82_vm0, %v535_v4 }
 0x311   :  { %1967 = vmatprep.mubr.msk.f32.mxu0 %vm374_vm1, %v634_v5 }
 0x312   :  { %v640_v8 = vpop.permute.xlu1 %639 }
 0x315   :  { %2112 = vmatpush3.bf16.xpose.msk.msra.mxu0 %vm2452_vm2, %v2107_v2 }
 0x31c   :  { %1968 = vmatmul.mubr.msk.f32.vlgmr.msra.gmra.mrb[12].mxu0 %vm374_vm1, %v636_v6 }
 0x31d   :  { %1970 = vmatprep.mubr.msk.f32.mxu0 %vm374_vm1, %v638_v7 }
 0x320   :  { %1971 = vmatmul.mubr.msk.f32.gmra.mrb[14].mxu0 %vm374_vm1, %v640_v8 }
 0x3df   :  { %v2566_v9 = vpop.f32.mrb[8].mxu0 }
 0x3e0   :  { %v2568_v10 = vpop.f32.mrb[9].mxu0 }
 0x3e3   :  { %v2570_v11 = vpop.f32.mrb[10].mxu0 }
 0x3e4   :  { %v2572_v12 = vpop.f32.mrb[11].mxu0 }
 0x3ef   :  { %v1969_v13 = vpop.f32.mrb[12].mxu0 }
 0x3f0   :  { %v751_v14 = vmul.f32 0.35355338, %v1969_v13  ;;  %v731_v15 = vpop.f32.mrb[13].mxu0 }
 0x3f1   :  { %v750_v16 = vmul.f32 0.35355338, %v731_v15 }
 0x3f2   :  { %v755_v17 = vadd.f32 %v751_v14, %v2507_v54 }
 0x3f3   :  { %v1972_v18 = vpop.f32.mrb[14].mxu0  ;;  %v754_v19 = vadd.f32 %v750_v16, %v2502_v51 }
 0x3f4   :  { %v741_v20 = vpop.f32.mrb[15].mxu0  ;;  %v761_v21 = vsel %vm82_vm0, %v755_v17, -inf  ;;  %v753_v22 = vmul.f32 0.35355338, %v1972_v18 }
 0x3f5   :  { %v752_v23 = vmul.f32 0.35355338, %v741_v20  ;;  %762 = vmax.xlane.f32.xlu1 %v761_v21  ;;  %v758_v24 = vsel %vm82_vm0, %v754_v19, -inf }
 0x3f6   :  { %759 = vmax.xlane.f32.xlu0 %v758_v24  ;;  %v757_v28 = vadd.f32 %v753_v22, %v2520_v63 }
 0x3f7   :  { %v756_v25 = vadd.f32 %v752_v23, %v2513_v58 }
 0x3f8   :  { %v767_v29 = vsel %vm82_vm0, %v757_v28, -inf }
 0x3f9   :  { %v764_v27 = vsel %vm82_vm0, %v756_v25, -inf }
 0x3fa   :  { %765 = vmax.xlane.f32.xlu0 %v764_v27 }
 0x3fe   :  { %768 = vmax.xlane.f32.xlu0 %v767_v29 }
 0x482   :  { %v763_v30 = vpop.xlane.xlu1 %762 }
 0x483   :  { %v771_v32 = vsub.f32 %v755_v17, %v763_v30  ;;  %v760_v33 = vpop.xlane.xlu0 %759 }
 0x484   :  { %v770_v35 = vsub.f32 %v754_v19, %v760_v33 }
 0x485   :  { %v776_v36 = vmul.f32 1.442695, %v771_v32 }
 0x486   :  { %v774_v37 = vmul.f32 1.442695, %v770_v35 }
 0x487   :  { %2251 = vpow2.f32 %v776_v36  ;;  %v766_v48 = vpop.xlane.xlu0 %765 }
 0x488   :  { %2253 = vpow2.f32 %v774_v37  ;;  %v772_v49 = vsub.f32 %v756_v25, %v766_v48 }
 0x48a   :  { %v778_v50 = vmul.f32 1.442695, %v772_v49 }
 0x48b   :  { %v769_v52 = vpop.xlane.xlu0 %768 }
 0x48c   :  { %v773_v53 = vsub.f32 %v757_v28, %v769_v52  ;;  %2255 = vpow2.f32 %v778_v50 }
 0x48e   :  { %v780_v55 = vmul.f32 1.442695, %v773_v53 }
 0x490   :  { %2257 = vpow2.f32 %v780_v55 }
 0x491   :  { %v2252_v43 = vpop.eup %2251 }
 0x492   :  { %v2254_v45 = vpop.eup %2253  ;;  %v785_v46 = vsel %vm82_vm0, %v2252_v43, 0.0 }
 0x493   :  { %786 = vadd.xlane.f32.xlu1 %v785_v46  ;;  %v782_v47 = vsel %vm82_vm0, %v2254_v45, 0.0 }
 0x494   :  { %783 = vadd.xlane.f32.xlu0 %v782_v47 }
 0x496   :  { %v2256_v56 = vpop.eup %2255 }
 0x497   :  { %v788_v57 = vsel %vm82_vm0, %v2256_v56, 0.0 }
 0x49a   :  { %v2258_v59 = vpop.eup %2257 }
 0x49b   :  { %v791_v60 = vsel %vm82_vm0, %v2258_v59, 0.0 }
 0x4a4   :  { %2191 = vrot.lane.b32.xlu1 %v2536_v44, %s2311_s19 }
 0x4a8   :  { %2196 = vrot.lane.b32.xlu1 %v2456_v31, %s2312_s7 }
 0x4aa   :  { %2186 = vrot.lane.b32.xlu0 %v2534_v38, %s2311_s19 }
 0x4ac   :  { %2201 = vrot.lane.b32.xlu1 %v2466_v39, %s2312_s7 }
 0x4c9   :  { %789 = vadd.xlane.f32.xlu0 %v788_v57 }
 0x4d0   :  { %792 = vadd.xlane.f32.xlu1 %v791_v60 }
 0x4df   :  { %915 = vrot.lane.b32.xlu0 %v2458_v34, %s2312_s7 }
 0x4e1   :  { %917 = vrot.lane.b32.xlu1 %v2474_v41, %s2312_s7 }
 0x4e3   :  { %919 = vrot.lane.b32.xlu0 %v2472_v40, %s2312_s7 }
 0x4e5   :  { %921 = vrot.lane.b32.xlu1 %v2476_v42, %s2312_s7 }
 0x520   :  { %v787_v61 = vpop.xlane.xlu1 %786 }
 0x521   :  { %v784_v62 = vpop.xlane.xlu0 %783 }
 0x522   :  { %2259 = vrcp.f32 %v784_v62 }
 0x523   :  { %2261 = vrcp.f32 %v787_v61 }
 0x524   :  { %v2192_v0 = vpop.permute.xlu1 %2191 }
 0x525   :  { %v2187_v1 = vpop.permute.xlu0 %2186  ;;  %v2194_v2 = vunpack.i.h.bf16 %v2192_v0  ;;  %v2193_v3 = vunpack.i.l.bf16 %v2192_v0 }
 0x526   :  { %v2189_v4 = vunpack.i.h.bf16 %v2187_v1  ;;  %v2188_v5 = vunpack.i.l.bf16 %v2187_v1 }
 0x527   :  { %v2117_v8 = vpack.c.bf16 %v2194_v2, %v2193_v3 }
 0x528   :  { %v2113_v6 = vpack.c.bf16 %v2189_v4, %v2188_v5  ;;  %v2197_v7 = vpop.permute.xlu1 %2196 }
 0x529   :  { %v2199_v13 = vunpack.i.h.bf16 %v2197_v7  ;;  %v2198_v14 = vunpack.i.l.bf16 %v2197_v7 }
 0x52a   :  { %2114 = vmatprep.subr.bf16.mxu1 %v2113_v6 }
 0x52b   :  { %2116 = vmatpush3.bf16.msra.mxu1 %v2113_v6  ;;  %v2121_v18 = vpack.c.bf16 %v2199_v13, %v2198_v14 }
 0x52c   :  { %v2260_v15 = vpop.eup %2259  ;;  %2118 = vmatprep.subr.bf16.mxu1 %v2117_v8  ;;  %v2202_v20 = vpop.permute.xlu1 %2201 }
 0x52d   :  { %v2262_v16 = vpop.eup %2261  ;;  %v795_v17 = vmul.f32 %v2260_v15, %v2254_v45  ;;  %v2204_v21 = vunpack.i.h.bf16 %v2202_v20  ;;  %v2203_v22 = vunpack.i.l.bf16 %v2202_v20 }
 0x52e   :  { %v797_v19 = vmul.f32 %v2262_v16, %v2252_v43 }
 0x52f   :  { %2120 = vmatpush3.bf16.msra.mxu1 %v2117_v8  ;;  %1981 = vmatprep.mubr.msk.f32.mxu1 %vm82_vm0, %v795_v17  ;;  %v2127_v23 = vpack.c.bf16 %v2204_v21, %v2203_v22 }
 0x530   :  { %2123 = vmatprep.subr.msk.bf16.mxu1 %vm2452_vm2, %v2121_v18 }
 0x532   :  { %1982 = vmatmul.mubr.msk.f32.vlgmr.msra.gmra.mrb[8].mxu1 %vm82_vm0, %v797_v19 }
 0x538   :  { %2126 = vmatpush3.bf16.xpose.msk.msra.mxu1 %vm2452_vm2, %v2121_v18 }
 0x539   :  { %2129 = vmatprep.subr.msk.bf16.mxu1 %vm2452_vm2, %v2127_v23 }
 0x540   :  { %2132 = vmatpush3.bf16.xpose.msk.msra.mxu1 %vm2452_vm2, %v2127_v23 }
 0x556   :  { %v790_v24 = vpop.xlane.xlu0 %789 }
 0x557   :  { %2263 = vrcp.f32 %v790_v24 }
 0x55a   :  { %v916_v30 = vpop.permute.xlu0 %915 }
 0x55d   :  { %v793_v25 = vpop.xlane.xlu1 %792 }
 0x55e   :  { %2265 = vrcp.f32 %v793_v25  ;;  %v920_v35 = vpop.permute.xlu0 %919 }
 0x561   :  { %v2264_v27 = vpop.eup %2263  ;;  %v918_v33 = vpop.permute.xlu1 %917 }
 0x562   :  { %v799_v28 = vmul.f32 %v2264_v27, %v2256_v56 }
 0x564   :  { %1984 = vmatprep.mubr.msk.f32.mxu1 %vm82_vm0, %v799_v28 }
 0x565   :  { %v922_v36 = vpop.permute.xlu1 %921 }
 0x568   :  { %v2266_v29 = vpop.eup %2265 }
 0x569   :  { %v801_v32 = vmul.f32 %v2266_v29, %v2258_v59 }
 0x56b   :  { %1985 = vmatmul.mubr.msk.f32.gmra.mrb[10].mxu1 %vm82_vm0, %v801_v32 }
 0x56c   :  { %1995 = vmatprep.mubr.msk.f32.mxu1 %vm374_vm1, %v916_v30 }
 0x56f   :  { %1996 = vmatmul.mubr.msk.f32.vlgmr.msra.gmra.mrb[12].mxu1 %vm374_vm1, %v918_v33 }
 0x570   :  { %1998 = vmatprep.mubr.msk.f32.mxu1 %vm374_vm1, %v920_v35 }
 0x573   :  { %1999 = vmatmul.mubr.msk.f32.gmra.mrb[14].mxu1 %vm374_vm1, %v922_v36 }
 0x605   :  { %v2618_v37 = vpop.f32.mrb[8].mxu1 }
 0x606   :  { %v2620_v43 = vpop.f32.mrb[9].mxu1 }
 0x63e   :  { %v2622_v45 = vpop.f32.mrb[10].mxu1 }
 0x63f   :  { %v2624_v46 = vpop.f32.mrb[11].mxu1 }
 0x642   :  { %v1997_v47 = vpop.f32.mrb[12].mxu1 }
 0x643   :  { %v1033_v48 = vmul.f32 0.35355338, %v1997_v47  ;;  %v1013_v49 = vpop.f32.mrb[13].mxu1 }
 0x644   :  { %v1032_v50 = vmul.f32 0.35355338, %v1013_v49 }
 0x645   :  { %v1037_v52 = vadd.f32 %v1033_v48, %v2507_v54 }
 0x646   :  { %v2000_v53 = vpop.f32.mrb[14].mxu1  ;;  %v1036_v55 = vadd.f32 %v1032_v50, %v2502_v51 }
 0x647   :  { %v1023_v56 = vpop.f32.mrb[15].mxu1  ;;  %v1043_v57 = vsel %vm82_vm0, %v1037_v52, -inf  ;;  %v1035_v59 = vmul.f32 0.35355338, %v2000_v53 }
 0x648   :  { %v1034_v60 = vmul.f32 0.35355338, %v1023_v56  ;;  %1044 = vmax.xlane.f32.xlu1 %v1043_v57  ;;  %v1040_v61 = vsel %vm82_vm0, %v1036_v55, -inf }
 0x649   :  { %1041 = vmax.xlane.f32.xlu0 %v1040_v61  ;;  %v1039_v1 = vadd.f32 %v1035_v59, %v2520_v63 }
 0x64a   :  { %v1038_v62 = vadd.f32 %v1034_v60, %v2513_v58 }
 0x64b   :  { %v1049_v2 = vsel %vm82_vm0, %v1039_v1, -inf }
 0x64c   :  { %v1046_v0 = vsel %vm82_vm0, %v1038_v62, -inf }
 0x64d   :  { %1047 = vmax.xlane.f32.xlu0 %v1046_v0 }
 0x651   :  { %1050 = vmax.xlane.f32.xlu0 %v1049_v2 }
 0x6d5   :  { %v1045_v3 = vpop.xlane.xlu1 %1044 }
 0x6d6   :  { %v1053_v4 = vsub.f32 %v1037_v52, %v1045_v3  ;;  %v1042_v5 = vpop.xlane.xlu0 %1041 }
 0x6d7   :  { %v1052_v6 = vsub.f32 %v1036_v55, %v1042_v5 }
 0x6d8   :  { %v1058_v7 = vmul.f32 1.442695, %v1053_v4 }
 0x6d9   :  { %v1056_v8 = vmul.f32 1.442695, %v1052_v6 }
 0x6da   :  { %2267 = vpow2.f32 %v1058_v7  ;;  %v1048_v17 = vpop.xlane.xlu0 %1047 }
 0x6db   :  { %2269 = vpow2.f32 %v1056_v8  ;;  %v1054_v18 = vsub.f32 %v1038_v62, %v1048_v17 }
 0x6dd   :  { %v1060_v19 = vmul.f32 1.442695, %v1054_v18 }
 0x6de   :  { %v1051_v20 = vpop.xlane.xlu0 %1050 }
 0x6df   :  { %v1055_v21 = vsub.f32 %v1039_v1, %v1051_v20  ;;  %2271 = vpow2.f32 %v1060_v19 }
 0x6e1   :  { %v1062_v22 = vmul.f32 1.442695, %v1055_v21 }
 0x6e3   :  { %2273 = vpow2.f32 %v1062_v22 }
 0x6e4   :  { %v2268_v13 = vpop.eup %2267 }
 0x6e5   :  { %v2270_v14 = vpop.eup %2269  ;;  %v1067_v15 = vsel %vm82_vm0, %v2268_v13, 0.0 }
 0x6e6   :  { %1068 = vadd.xlane.f32.xlu1 %v1067_v15  ;;  %v1064_v16 = vsel %vm82_vm0, %v2270_v14, 0.0 }
 0x6e7   :  { %1065 = vadd.xlane.f32.xlu0 %v1064_v16 }
 0x6e9   :  { %v2272_v23 = vpop.eup %2271 }
 0x6ea   :  { %v1070_v24 = vsel %vm82_vm0, %v2272_v23, 0.0 }
 0x6ed   :  { %v2274_v25 = vpop.eup %2273 }
 0x6f7   :  { %2211 = vrot.lane.b32.xlu1 %v2536_v44, %s2312_s7 }
 0x6fb   :  { %2216 = vrot.lane.b32.xlu1 %v2456_v31, %s2313_s20  ;;  %v1073_v31 = vsel %vm82_vm0, %v2274_v25, 0.0 }
 0x6fd   :  { %2206 = vrot.lane.b32.xlu0 %v2534_v38, %s2312_s7 }
 0x6ff   :  { %2221 = vrot.lane.b32.xlu1 %v2466_v39, %s2313_s20 }
 0x71c   :  { %1071 = vadd.xlane.f32.xlu0 %v1070_v24 }
 0x723   :  { %1074 = vadd.xlane.f32.xlu1 %v1073_v31 }
 0x732   :  { %1193 = vrot.lane.b32.xlu0 %v2458_v34, %s2313_s20 }
 0x734   :  { %1195 = vrot.lane.b32.xlu1 %v2474_v41, %s2313_s20 }
 0x736   :  { %1197 = vrot.lane.b32.xlu0 %v2472_v40, %s2313_s20 }
 0x738   :  { %1199 = vrot.lane.b32.xlu1 %v2476_v42, %s2313_s20 }
 0x773   :  { %v1069_v39 = vpop.xlane.xlu1 %1068 }
 0x774   :  { %v1066_v27 = vpop.xlane.xlu0 %1065 }
 0x775   :  { %2275 = vrcp.f32 %v1066_v27 }
 0x776   :  { %2277 = vrcp.f32 %v1069_v39 }
 0x777   :  { %v2212_v28 = vpop.permute.xlu1 %2211 }
 0x778   :  { %v2207_v29 = vpop.permute.xlu0 %2206  ;;  %v2214_v30 = vunpack.i.h.bf16 %v2212_v28  ;;  %v2213_v32 = vunpack.i.l.bf16 %v2212_v28 }
 0x779   :  { %v2209_v33 = vunpack.i.h.bf16 %v2207_v29  ;;  %v2208_v35 = vunpack.i.l.bf16 %v2207_v29 }
 0x77a   :  { %v2137_v47 = vpack.c.bf16 %v2214_v30, %v2213_v32 }
 0x77b   :  { %v2133_v34 = vpack.c.bf16 %v2209_v33, %v2208_v35  ;;  %v2217_v36 = vpop.permute.xlu1 %2216 }
 0x77c   :  { %v2219_v41 = vunpack.i.h.bf16 %v2217_v36  ;;  %v2218_v48 = vunpack.i.l.bf16 %v2217_v36 }
 0x77d   :  { %2134 = vmatprep.subr.bf16.mxu0 %v2133_v34 }
 0x77e   :  { %2136 = vmatpush3.bf16.msra.mxu0 %v2133_v34  ;;  %v2141_v50 = vpack.c.bf16 %v2219_v41, %v2218_v48 }
 0x77f   :  { %v2276_v40 = vpop.eup %2275  ;;  %2138 = vmatprep.subr.bf16.mxu0 %v2137_v47  ;;  %v2222_v53 = vpop.permute.xlu1 %2221 }
 0x780   :  { %v2278_v42 = vpop.eup %2277  ;;  %v1077_v49 = vmul.f32 %v2276_v40, %v2270_v14  ;;  %v2224_v55 = vunpack.i.h.bf16 %v2222_v53  ;;  %v2223_v56 = vunpack.i.l.bf16 %v2222_v53 }
 0x781   :  { %v1079_v52 = vmul.f32 %v2278_v42, %v2268_v13 }
 0x782   :  { %2140 = vmatpush3.bf16.msra.mxu0 %v2137_v47  ;;  %2009 = vmatprep.mubr.msk.f32.mxu0 %vm82_vm0, %v1077_v49  ;;  %v2147_v57 = vpack.c.bf16 %v2224_v55, %v2223_v56 }
 0x783   :  { %2143 = vmatprep.subr.msk.bf16.mxu0 %vm2452_vm2, %v2141_v50 }
 0x785   :  { %2010 = vmatmul.mubr.msk.f32.vlgmr.msra.gmra.mrb[16].mxu0 %vm82_vm0, %v1079_v52 }
 0x78b   :  { %2146 = vmatpush3.bf16.xpose.msk.msra.mxu0 %vm2452_vm2, %v2141_v50 }
 0x78c   :  { %2149 = vmatprep.subr.msk.bf16.mxu0 %vm2452_vm2, %v2147_v57 }
 0x793   :  { %2152 = vmatpush3.bf16.xpose.msk.msra.mxu0 %vm2452_vm2, %v2147_v57 }
 0x7a9   :  { %v1072_v59 = vpop.xlane.xlu0 %1071 }
 0x7aa   :  { %2279 = vrcp.f32 %v1072_v59 }
 0x7ad   :  { %v1194_v1 = vpop.permute.xlu0 %1193 }
 0x7b0   :  { %v1075_v60 = vpop.xlane.xlu1 %1074 }
 0x7b1   :  { %2281 = vrcp.f32 %v1075_v60  ;;  %v1198_v4 = vpop.permute.xlu0 %1197 }
 0x7b4   :  { %v2280_v61 = vpop.eup %2279  ;;  %v1196_v3 = vpop.permute.xlu1 %1195 }
 0x7b5   :  { %v1081_v62 = vmul.f32 %v2280_v61, %v2272_v23 }
 0x7b7   :  { %2012 = vmatprep.mubr.msk.f32.mxu0 %vm82_vm0, %v1081_v62 }
 0x7b8   :  { %v1200_v26 = vpop.permute.xlu1 %1199 }
 0x7bb   :  { %v2282_v0 = vpop.eup %2281 }
 0x7bc   :  { %v1083_v2 = vmul.f32 %v2282_v0, %v2274_v25 }
 0x7be   :  { %2013 = vmatmul.mubr.msk.f32.gmra.mrb[18].mxu0 %vm82_vm0, %v1083_v2 }
 0x7bf   :  { %2023 = vmatprep.mubr.msk.f32.mxu0 %vm374_vm1, %v1194_v1 }
 0x7c2   :  { %2024 = vmatmul.mubr.msk.f32.vlgmr.msra.gmra.mrb[20].mxu0 %vm374_vm1, %v1196_v3 }
 0x7c3   :  { %2026 = vmatprep.mubr.msk.f32.mxu0 %vm374_vm1, %v1198_v4 }
 0x7c6   :  { %2027 = vmatmul.mubr.msk.f32.gmra.mrb[22].mxu0 %vm374_vm1, %v1200_v26 }
 0x858   :  { %v2011_v5 = vpop.f32.mrb[16].mxu0 }
 0x859   :  { %v1174_v6 = vpop.f32.mrb[17].mxu0 }
 0x891   :  { %v2014_v7 = vpop.f32.mrb[18].mxu0 }
 0x892   :  { %v1184_v8 = vpop.f32.mrb[19].mxu0 }
 0x895   :  { %v2025_v13 = vpop.f32.mrb[20].mxu0 }
 0x896   :  { %v1311_v14 = vmul.f32 0.35355338, %v2025_v13  ;;  %v1291_v15 = vpop.f32.mrb[21].mxu0  ;;  %v70_v13 = vld [vmem:[%s2780_s8 + $0x18] sm:$0xff] }
 0x897   :  { %v1310_v16 = vmul.f32 0.35355338, %v1291_v15 }
 0x898   :  { %v1315_v17 = vadd.f32 %v1311_v14, %v2507_v54 }
 0x899   :  { %v2028_v18 = vpop.f32.mrb[22].mxu0  ;;  %v1314_v19 = vadd.f32 %v1310_v16, %v2502_v51 }
 0x89a   :  { %v1301_v20 = vpop.f32.mrb[23].mxu0  ;;  %v1321_v21 = vsel %vm82_vm0, %v1315_v17, -inf  ;;  %v1313_v22 = vmul.f32 0.35355338, %v2028_v18 }
 0x89b   :  { %v1312_v23 = vmul.f32 0.35355338, %v1301_v20  ;;  %1322 = vmax.xlane.f32.xlu1 %v1321_v21  ;;  %v1318_v24 = vsel %vm82_vm0, %v1314_v19, -inf }
 0x89c   :  { %1319 = vmax.xlane.f32.xlu0 %v1318_v24  ;;  %v1317_v39 = vadd.f32 %v1313_v22, %v2520_v63 }
 0x89d   :  { %v1316_v25 = vadd.f32 %v1312_v23, %v2513_v58 }
 0x89e   :  { %v1327_v54 = vsel %vm82_vm0, %v1317_v39, -inf }
 0x89f   :  { %v1324_v31 = vsel %vm82_vm0, %v1316_v25, -inf }
 0x8a0   :  { %1325 = vmax.xlane.f32.xlu0 %v1324_v31 }
 0x8a4   :  { %1328 = vmax.xlane.f32.xlu0 %v1327_v54 }
 0x928   :  { %v1323_v51 = vpop.xlane.xlu1 %1322 }
 0x929   :  { %v1331_v27 = vsub.f32 %v1315_v17, %v1323_v51  ;;  %v1320_v28 = vpop.xlane.xlu0 %1319 }
 0x92a   :  { %v1330_v29 = vsub.f32 %v1314_v19, %v1320_v28 }
 0x92b   :  { %v1336_v30 = vmul.f32 1.442695, %v1331_v27 }
 0x92c   :  { %v1334_v32 = vmul.f32 1.442695, %v1330_v29 }
 0x92d   :  { %2283 = vpow2.f32 %v1336_v30  ;;  %v1326_v33 = vpop.xlane.xlu0 %1325 }
 0x92e   :  { %2285 = vpow2.f32 %v1334_v32  ;;  %v1332_v35 = vsub.f32 %v1316_v25, %v1326_v33 }
 0x930   :  { %v1338_v34 = vmul.f32 1.442695, %v1332_v35 }
 0x931   :  { %v1329_v58 = vpop.xlane.xlu0 %1328 }
 0x932   :  { %2287 = vpow2.f32 %v1338_v34  ;;  %v1333_v36 = vsub.f32 %v1317_v39, %v1329_v58 }
 0x934   :  { %v1340_v47 = vmul.f32 1.442695, %v1333_v36 }
 0x936   :  { %2289 = vpow2.f32 %v1340_v47 }
 0x937   :  { %v2284_v63 = vpop.eup %2283 }
 0x938   :  { %v2286_v41 = vpop.eup %2285  ;;  %v1345_v48 = vsel %vm82_vm0, %v2284_v63, 0.0 }
 0x939   :  { %1346 = vadd.xlane.f32.xlu1 %v1345_v48  ;;  %v1342_v40 = vsel %vm82_vm0, %v2286_v41, 0.0 }
 0x93a   :  { %1343 = vadd.xlane.f32.xlu0 %v1342_v40 }
 0x93c   :  { %v2288_v42 = vpop.eup %2287 }
 0x93d   :  { %v1348_v49 = vsel %vm82_vm0, %v2288_v42, 0.0 }
 0x93e   :  { %1349 = vadd.xlane.f32.xlu0 %v1348_v49 }
 0x940   :  { %v2290_v50 = vpop.eup %2289 }
 0x941   :  { %v1351_v52 = vsel %vm82_vm0, %v2290_v50, 0.0 }
 0x942   :  { %1352 = vadd.xlane.f32.xlu1 %v1351_v52 }
 0x953   :  { %2231 = vrot.lane.b32.xlu1 %v2536_v44, %s2313_s20 }
 0x954   :  { %2226 = vrot.lane.b32.xlu0 %v2534_v38, %s2313_s20 }
 0x957   :  { %1475 = vrot.lane.b32.xlu1 %v2620_v43, %s2314_s21 }
 0x958   :  { %1491 = vrot.lane.b32.xlu0 %v1174_v6, %s2315_s1  ;;  %v68_v6 = vld [vmem:[%s2780_s8 + $0x8] sm:$0xff] }
 0x95b   :  { %1477 = vrot.lane.b32.xlu1 %v2618_v37, %s2314_s21 }
 0x95c   :  { %1479 = vrot.lane.b32.xlu0 %v2624_v46, %s2314_s21 }
 0x95f   :  { %1493 = vrot.lane.b32.xlu1 %v2011_v5, %s2315_s1  ;;  %v67_v5 = vld [vmem:[%s2780_s8] sm:$0xff] }
 0x960   :  { %1495 = vrot.lane.b32.xlu0 %v1184_v8, %s2315_s1  ;;  %v2161_v8 = vpack.c.bf16 %v68_v6, %v67_v5 }
 0x963   :  { %1481 = vrot.lane.b32.xlu1 %v2622_v45, %s2314_s21 }
 0x967   :  { %1497 = vrot.lane.b32.xlu1 %v2014_v7, %s2315_s1  ;;  %v69_v7 = vld [vmem:[%s2780_s8 + $0x10] sm:$0xff] }
 0x968   :  { %v2165_v14 = vpack.c.bf16 %v70_v13, %v69_v7 }
 0x9c6   :  { %v1347_v44 = vpop.xlane.xlu1 %1346 }
 0x9c7   :  { %v1344_v53 = vpop.xlane.xlu0 %1343 }
 0x9c8   :  { %2291 = vrcp.f32 %v1344_v53 }
 0x9c9   :  { %2293 = vrcp.f32 %v1347_v44 }
 0x9cb   :  { %v1350_v55 = vpop.xlane.xlu0 %1349 }
 0x9cc   :  { %2295 = vrcp.f32 %v1350_v55 }
 0x9cf   :  { %v1353_v38 = vpop.xlane.xlu1 %1352  ;;  %v2227_v56 = vpop.permute.xlu0 %2226 }
 0x9d0   :  { %v2229_v43 = vunpack.i.h.bf16 %v2227_v56  ;;  %v2228_v57 = vunpack.i.l.bf16 %v2227_v56  ;;  %2297 = vrcp.f32 %v1353_v38 }
 0x9d2   :  { %v2292_v59 = vpop.eup %2291  ;;  %v2153_v37 = vpack.c.bf16 %v2229_v43, %v2228_v57  ;;  %v2309_v43 = vld [vmem:[%s2774_s0 + $0x10] sm:$0xff] }
 0x9d3   :  { %v2232_v60 = vpop.permute.xlu1 %2231  ;;  %v1355_v46 = vmul.f32 %v2292_v59, %v2286_v41  ;;  %v2294_v0 = vpop.eup %2293 }
 0x9d4   :  { %v2234_v61 = vunpack.i.h.bf16 %v2232_v60  ;;  %v2233_v62 = vunpack.i.l.bf16 %v2232_v60  ;;  %2154 = vmatprep.subr.bf16.mxu1 %v2153_v37  ;;  %v1357_v2 = vmul.f32 %v2294_v0, %v2284_v63  ;;  %v1492_v22 = vpop.permute.xlu0 %1491 }
 0x9d5   :  { %2156 = vmatpush3.bf16.msra.mxu1 %v2153_v37  ;;  %2037 = vmatprep.mubr.msk.f32.mxu1 %vm82_vm0, %v1355_v46  ;;  %v2310_v37 = vld [vmem:[%s2774_s0 + $0x18] sm:$0xff] }
 0x9d6   :  { %v2157_v45 = vpack.c.bf16 %v2234_v61, %v2233_v62  ;;  %v2296_v1 = vpop.eup %2295 }
 0x9d7   :  { %v1359_v4 = vmul.f32 %v2296_v1, %v2288_v42  ;;  %v1476_v19 = vpop.permute.xlu1 %1475 }
 0x9d8   :  { %2158 = vmatprep.subr.bf16.mxu1 %v2157_v45  ;;  %v1480_v24 = vpop.permute.xlu0 %1479  ;;  %v1519_v39 = vsel %vm374_vm1, %v2568_v10, %v1476_v19 }
 0x9d9   :  { %2160 = vmatpush3.bf16.msra.mxu1 %v2157_v45  ;;  %v1524_v27 = vsel %vm1523_vm3, %v1519_v39, %v1492_v22  ;;  %v1521_v10 = vsel %vm374_vm1, %v2572_v12, %v1480_v24  ;;  %v1786_v12 = vld [vmem:[%s2781_s9] ss:$0 sm:$0xff] }
 0x9da   :  { %v2298_v3 = vpop.eup %2297  ;;  %2162 = vmatprep.subr.bf16.mxu1 %v2161_v8 }
 0x9db   :  { %v1361_v26 = vmul.f32 %v2298_v3, %v2290_v50  ;;  %v1478_v20 = vpop.permute.xlu1 %1477  ;;  %v2308_v50 = vld [vmem:[%s2774_s0] sm:$0xff] }
 0x9dc   :  { %2038 = vmatmul.mubr.msk.f32.vlgmr.msra.gmra.mrb[16].mxu1 %vm82_vm0, %v1357_v2  ;;  %v1496_v31 = vpop.permute.xlu0 %1495  ;;  %v1520_v51 = vsel %vm374_vm1, %v2566_v9, %v1478_v20 }
 0x9dd   :  { %2040 = vmatprep.mubr.msk.f32.mxu1 %vm82_vm0, %v1359_v4  ;;  %2164 = vmatpush3.bf16.msra.mxu1 %v2161_v8  ;;  %v1526_v35 = vsel %vm1523_vm3, %v1521_v10, %v1496_v31 }
 0x9de   :  { %2166 = vmatprep.subr.bf16.mxu1 %v2165_v14 }
 0x9df   :  { %v1494_v21 = vpop.permute.xlu1 %1493 }
 0x9e0   :  { %2041 = vmatmul.mubr.msk.f32.gmra.mrb[18].mxu1 %vm82_vm0, %v1361_v26  ;;  %v1525_v29 = vsel %vm1523_vm3, %v1520_v51, %v1494_v21 }
 0x9e1   :  { %2168 = vmatpush3.bf16.msra.mxu1 %v2165_v14 }
 0x9e3   :  { %v1482_v23 = vpop.permute.xlu1 %1481 }
 0x9e4   :  { %v1522_v9 = vsel %vm374_vm1, %v2570_v11, %v1482_v23  ;;  %v2307_v11 = vld [vmem:[%s2774_s0 + $0x8] sm:$0xff] }
 0x9e7   :  { %v1498_v25 = vpop.permute.xlu1 %1497 }
 0x9e8   :  { %v1527_v58 = vsel %vm1523_vm3, %v1522_v9, %v1498_v25 }
 0xaaf   :  { %v2039_v15 = vpop.f32.mrb[16].mxu1 }
 0xab0   :  { %1509 = vrot.lane.b32.xlu1 %v2039_v15, %s2316_s27  ;;  %v1452_v16 = vpop.f32.mrb[17].mxu1 }
 0xab1   :  { %1507 = vrot.lane.b32.xlu0 %v1452_v16, %s2316_s27 }
 0xab3   :  { %v2042_v17 = vpop.f32.mrb[18].mxu1 }
 0xab4   :  { %1513 = vrot.lane.b32.xlu1 %v2042_v17, %s2316_s27  ;;  %v1462_v18 = vpop.f32.mrb[19].mxu1 }
 0xab5   :  { %1511 = vrot.lane.b32.xlu0 %v1462_v18, %s2316_s27 }
 0xb22   :  { %v1510_v54 = vpop.permute.xlu1 %1509 }
 0xb23   :  { %v1508_v28 = vpop.permute.xlu0 %1507  ;;  %v1530_v32 = vsel %vm1528_vm4, %v1525_v29, %v1510_v54 }
 0xb24   :  { %v1529_v30 = vsel %vm1528_vm4, %v1524_v27, %v1508_v28 }
 0xb25   :  { %2051 = vmatprep.mubr.msk.f32.mxu1 %vm82_vm0, %v1529_v30  ;;  %v1791_v30 = vld [vmem:[%s2782_s11] ss:$0 sm:$0xff] }
 0xb26   :  { %2052 = vmatmul.mubr.msk.f32.vlgmr.msra.gmra.mrb[20].mxu1 %vm82_vm0, %v1530_v32  ;;  %v1514_v33 = vpop.permute.xlu1 %1513 }
 0xb27   :  { %v1512_v34 = vpop.permute.xlu0 %1511  ;;  %v1532_v47 = vsel %vm1528_vm4, %v1527_v58, %v1514_v33  ;;  %v1792_v33 = vld [vmem:[%s2783_s12] ss:$0 sm:$0xff] }
 0xb28   :  { %v1531_v36 = vsel %vm1528_vm4, %v1526_v35, %v1512_v34 }
 0xb29   :  { %2054 = vmatprep.mubr.msk.f32.mxu1 %vm82_vm0, %v1531_v36 }
 0xb2a   :  { %2055 = vmatmul.mubr.msk.f32.gmra.mrb[22].mxu1 %vm82_vm0, %v1532_v47 }
 0xbf9   :  { %v2053_v63 = vpop.f32.mrb[20].mxu1 }
 0xbfa   :  { %v1623_v41 = vadd.f32 %v2053_v63, %v1786_v12  ;;  %v1617_v48 = vpop.f32.mrb[21].mxu1 }
 0xbfb   :  { %v1618_v40 = vadd.f32 %v1786_v12, %v1617_v48 }
 0xbfc   :  { %v1637_v42 = vadd.f32 %v2307_v11, %v1623_v41 }
 0xbfd   :  { %v2056_v49 = vpop.f32.mrb[22].mxu1  ;;  %v1636_v52 = vadd.f32 %v2308_v50, %v1618_v40 }
 0xbfe   :  { %v1627_v53 = vpop.f32.mrb[23].mxu1  ;;  %v1645_v44 = vsel %vm82_vm0, %v1637_v42, 0.0  ;;  %v1633_v55 = vadd.f32 %v2056_v49, %v1786_v12 }
 0xbff   :  { %v1628_v38 = vadd.f32 %v1786_v12, %v1627_v53  ;;  %1646 = vadd.xlane.f32.xlu1 %v1645_v44  ;;  %v1642_v56 = vsel %vm82_vm0, %v1636_v52, 0.0 }
 0xc00   :  { %1643 = vadd.xlane.f32.xlu0 %v1642_v56  ;;  %v1639_v60 = vadd.f32 %v2310_v37, %v1633_v55 }
 0xc01   :  { %v1638_v57 = vadd.f32 %v2309_v43, %v1628_v38 }
 0xc02   :  { %v1651_v46 = vsel %vm82_vm0, %v1639_v60, 0.0 }
 0xc03   :  { %v1648_v59 = vsel %vm82_vm0, %v1638_v57, 0.0 }
 0xc04   :  { %1649 = vadd.xlane.f32.xlu0 %v1648_v59 }
 0xc08   :  { %1652 = vadd.xlane.f32.xlu0 %v1651_v46 }
 0xc8c   :  { %v1647_v61 = vpop.xlane.xlu1 %1646 }
 0xc8d   :  { %v1656_v62 = vmul.f32 0.03125, %v1647_v61  ;;  %v1644_v45 = vpop.xlane.xlu0 %1643 }
 0xc8e   :  { %v1655_v0 = vmul.f32 0.03125, %v1644_v45 }
 0xc8f   :  { %v1660_v1 = vsub.f32 %v1637_v42, %v1656_v62 }
 0xc90   :  { %v1659_v2 = vsub.f32 %v1636_v52, %v1655_v0 }
 0xc91   :  { %v1650_v3 = vpop.xlane.xlu0 %1649  ;;  %v1664_v4 = vmul.f32 %v1660_v1, %v1660_v1 }
 0xc92   :  { %v1657_v26 = vmul.f32 0.03125, %v1650_v3  ;;  %v1663_v5 = vmul.f32 %v1659_v2, %v1659_v2 }
 0xc93   :  { %v1670_v6 = vsel %vm82_vm0, %v1664_v4, 0.0 }
 0xc94   :  { %v1661_v7 = vsub.f32 %v1638_v57, %v1657_v26  ;;  %1671 = vadd.xlane.f32.xlu1 %v1670_v6  ;;  %v1667_v8 = vsel %vm82_vm0, %v1663_v5, 0.0 }
 0xc95   :  { %1668 = vadd.xlane.f32.xlu0 %v1667_v8  ;;  %v1653_v13 = vpop.xlane.xlu0 %1652 }
 0xc96   :  { %v1658_v14 = vmul.f32 0.03125, %v1653_v13  ;;  %v1665_v15 = vmul.f32 %v1661_v7, %v1661_v7 }
 0xc98   :  { %v1662_v16 = vsub.f32 %v1639_v60, %v1658_v14  ;;  %v1673_v17 = vsel %vm82_vm0, %v1665_v15, 0.0 }
 0xc99   :  { %1674 = vadd.xlane.f32.xlu0 %v1673_v17 }
 0xc9a   :  { %v1666_v18 = vmul.f32 %v1662_v16, %v1662_v16 }
 0xc9c   :  { %v1676_v19 = vsel %vm82_vm0, %v1666_v18, 0.0 }
 0xc9d   :  { %1677 = vadd.xlane.f32.xlu1 %v1676_v19 }
 0xd21   :  { %v1672_v20 = vpop.xlane.xlu1 %1671 }
 0xd22   :  { %v1680_v21 = vmul.f32 0.03125, %v1672_v20  ;;  %v1669_v22 = vpop.xlane.xlu0 %1668 }
 0xd23   :  { %v1679_v23 = vmul.f32 0.03125, %v1669_v22 }
 0xd24   :  { %v1684_v24 = vadd.f32 1e-05, %v1680_v21 }
 0xd25   :  { %v1683_v25 = vadd.f32 1e-05, %v1679_v23 }
 0xd26   :  { %2299 = vrsqrt.f32 %v1684_v24  ;;  %v1675_v31 = vpop.xlane.xlu0 %1674 }
 0xd27   :  { %2301 = vrsqrt.f32 %v1683_v25  ;;  %v1681_v39 = vmul.f32 0.03125, %v1675_v31 }
 0xd29   :  { %v1685_v54 = vadd.f32 1e-05, %v1681_v39 }
 0xd2a   :  { %v1678_v51 = vpop.xlane.xlu1 %1677 }
 0xd2b   :  { %2303 = vrsqrt.f32 %v1685_v54  ;;  %v1682_v27 = vmul.f32 0.03125, %v1678_v51 }
 0xd2d   :  { %v1686_v28 = vadd.f32 1e-05, %v1682_v27 }
 0xd2f   :  { %2305 = vrsqrt.f32 %v1686_v28 }
 0xd30   :  { %v2300_v29 = vpop.eup %2299 }
 0xd31   :  { %v2302_v32 = vpop.eup %2301  ;;  %v1692_v10 = vmul.f32 %v2300_v29, %v1660_v1 }
 0xd32   :  { %v1691_v35 = vmul.f32 %v2302_v32, %v1659_v2 }
 0xd33   :  { %v1702_v9 = vmul.f32 %v1791_v30, %v1692_v10 }
 0xd34   :  { %v1701_v34 = vmul.f32 %v1791_v30, %v1691_v35 }
 0xd35   :  { %v2304_v58 = vpop.eup %2303  ;;  %v1712_v36 = vadd.f32 %v1792_v33, %v1702_v9 }
 0xd36   :  { %v1711_v47 = vadd.f32 %v1792_v33, %v1701_v34  ;;  %v1693_v12 = vmul.f32 %v2304_v58, %v1661_v7 }
 0xd37   :  { %1716 = vst.msk [vmem:[%s2784_s13 + $0x8] sm:$0xff] %vm82_vm0, %v1712_v36 }
 0xd38   :  { %1715 = vst.msk [vmem:[%s2784_s13] sm:$0xff] %vm82_vm0, %v1711_v47  ;;  %v1703_v63 = vmul.f32 %v1791_v30, %v1693_v12 }
 0xd39   :  { %v2306_v41 = vpop.eup %2305 }
 0xd3a   :  { %v1713_v48 = vadd.f32 %v1792_v33, %v1703_v63  ;;  %v1694_v40 = vmul.f32 %v2306_v41, %v1662_v16 }
 0xd3c   :  { %1717 = vst.msk [vmem:[%s2784_s13 + $0x10] sm:$0xff] %vm82_vm0, %v1713_v48  ;;  %v1704_v11 = vmul.f32 %v1791_v30, %v1694_v40 }
 0xd3e   :  { %v1714_v42 = vadd.f32 %v1792_v33, %v1704_v11 }
 0xd40   :  { %1718 = vst.msk [vmem:[%s2784_s13 + $0x18] sm:$0xff] %vm82_vm0, %v1714_v42 }

// kernel: transformer_tf_attn_forward.39
= control target key start
LH: loop header
LB: loop body
LE: loop exit
PB: predicated region body
PF: predicated region fallthrough
CT: control target
= control target key end

     0   :  { %vm72_vm0 = vcmask 261120   ;;  %vm348_vm1 = vcmask 64512   ;;  %s1806_s17 = smov 104   ;;  %s1807_s18 = smov 8   ;;  %vm1233_vm3 = vcmask 130048   ;;  %vm1236_vm4 = vcmask 195584   ;;  %s2136_s4 = inlined_call_operand.vmem [shape: f32[32,32], index: 4, kind: input, shape index: {}]   ;;  %s2137_s1 = inlined_call_operand.vmem [shape: f32[32,32], index: 1, kind: input, shape index: {}]   ;;  %s2138_s2 = inlined_call_operand.vmem [shape: f32[32,32], index: 2, kind: input, shape index: {}]   ;;  %s2139_s0 = inlined_call_operand.vmem [shape: f32[16,32], index: 0, kind: input, shape index: {}]   ;;  %s2140_s6 = inlined_call_operand.vmem [shape: f32[32,32], index: 6, kind: input, shape index: {}]   ;;  %s2141_s5 = inlined_call_operand.vmem [shape: f32[1,32], index: 5, kind: input, shape index: {}]   ;;  %s2142_s3 = inlined_call_operand.vmem [shape: f32[1,32], index: 3, kind: input, shape index: {}]   ;;  %s2143_s10 = inlined_call_operand.vmem [shape: f32[16,32], index: 10, kind: input, shape index: {}]   ;;  %s2144_s7 = inlined_call_operand.vmem [shape: f32[1,32], index: 7, kind: input, shape index: {}]   ;;  %s2145_s8 = inlined_call_operand.vmem [shape: f32[32,32], index: 8, kind: input, shape index: {}]   ;;  %s2146_s9 = inlined_call_operand.vmem [shape: f32[1,32], index: 9, kind: input, shape index: {}]   ;;  %s2147_s11 = inlined_call_operand.vmem [shape: f32[16,32], index: 11, kind: output, shape index: {}]  }
   0x1   :  { %v49_v0 = vld [vmem:[%s2136_s4] sm:$0xff]  ;;  %v50_v1 = vld [vmem:[%s2136_s4 + $0x8] sm:$0xff]  ;;  %v51_v2 = vld [vmem:[%s2136_s4 + $0x10] sm:$0xff]  ;;  %s1808_s19 = smov 16   ;;  %s1809_s27 = smov 24  }
   0x2   :  { %v1602_v3 = vpack.c.bf16 %v50_v1, %v49_v0  ;;  %v52_v4 = vld [vmem:[%s2136_s4 + $0x18] sm:$0xff]  ;;  %v40_v5 = vld [vmem:[%s2137_s1] sm:$0xff]  ;;  %v45_v8 = vld [vmem:[%s2138_s2 + $0x8] sm:$0xff] }
   0x3   :  { %v1606_v6 = vpack.c.bf16 %v52_v4, %v51_v2  ;;  %1475 = vmatprep.mubr.msk.f32.mxu1 %vm72_vm0, %v40_v5  ;;  %v44_v7 = vld [vmem:[%s2138_s2] sm:$0xff]  ;;  %v46_v9 = vld [vmem:[%s2138_s2 + $0x10] sm:$0xff]  ;;  %v47_v10 = vld [vmem:[%s2138_s2 + $0x18] sm:$0xff] }
   0x4   :  { %1603 = vmatprep.subr.bf16.mxu1 %v1602_v3  ;;  %v1594_v11 = vpack.c.bf16 %v45_v8, %v44_v7  ;;  %v1598_v12 = vpack.c.bf16 %v47_v10, %v46_v9  ;;  %v38_v13 = vld [vmem:[%s2139_s0] sm:$0xff]  ;;  %v41_v14 = vld [vmem:[%s2137_s1 + $0x8] sm:$0xff]  ;;  %v42_v15 = vld [vmem:[%s2137_s1 + $0x10] sm:$0xff] }
   0x5   :  { %1605 = vmatpush3.bf16.msra.mxu1 %v1602_v3  ;;  %1464 = vmatprep.mubr.msk.f32.mxu0 %vm72_vm0, %v38_v13  ;;  %v39_v16 = vld [vmem:[%s2139_s0 + $0x8] sm:$0xff]  ;;  %v43_v17 = vld [vmem:[%s2137_s1 + $0x18] sm:$0xff]  ;;  %v54_v18 = vld [vmem:[%s2140_s6] sm:$0xff] }
   0x6   :  { %1607 = vmatprep.subr.bf16.mxu1 %v1606_v6  ;;  %1595 = vmatprep.subr.bf16.mxu0 %v1594_v11  ;;  %v55_v19 = vld [vmem:[%s2140_s6 + $0x8] sm:$0xff]  ;;  %v56_v20 = vld [vmem:[%s2140_s6 + $0x10] sm:$0xff]  ;;  %v57_v22 = vld [vmem:[%s2140_s6 + $0x18] sm:$0xff] }
   0x7   :  { %1597 = vmatpush3.bf16.msra.mxu0 %v1594_v11  ;;  %v1610_v21 = vpack.c.bf16 %v55_v19, %v54_v18  ;;  %v1614_v23 = vpack.c.bf16 %v57_v22, %v56_v20  ;;  %v1335_v24 = vld [vmem:[%s2141_s5] ss:$0 sm:$0xff]  ;;  %vm1942_vm2 = vmpackc.low %vm348_vm1, %vm348_vm1  ;;  %v1974_v48 = vld [vmem:[%s2143_s10 + $0x8] sm:$0xff] }
   0x8   :  { %1599 = vmatprep.subr.bf16.mxu0 %v1598_v12  ;;  %v1332_v29 = vld [vmem:[%s2142_s3] ss:$0 sm:$0xff] }
   0x9   :  { %1609 = vmatpush3.bf16.msra.mxu1 %v1606_v6  ;;  %v1969_v45 = vld [vmem:[%s2143_s10] sm:$0xff]  ;;  %s1805_s10 = smov 112  }
   0xa   :  { %v1340_v54 = vld [vmem:[%s2144_s7] ss:$0 sm:$0xff]  ;;  %s1804_s7 = smov 120  }
   0xb   :  { %1601 = vmatpush3.bf16.msra.mxu0 %v1598_v12 }
   0xc   :  { %1476 = vmatmul.mubr.msk.f32.vlgmr.msra.gmra.mrb[0].mxu1 %vm72_vm0, %v41_v14  ;;  %1611 = vmatprep.subr.bf16.mxu0 %v1610_v21 }
   0xd   :  { %1478 = vmatprep.mubr.msk.f32.mxu1 %vm72_vm0, %v42_v15 }
   0xe   :  { %1465 = vmatmul.mubr.msk.f32.vlgmr.msra.gmra.mrb[0].mxu0 %vm72_vm0, %v39_v16 }
   0xf   :  { %1489 = vmatprep.mubr.msk.f32.mxu0 %vm72_vm0, %v40_v5  ;;  %1613 = vmatpush3.bf16.msra.mxu0 %v1610_v21 }
  0x10   :  { %1479 = vmatmul.mubr.msk.f32.gmra.mrb[2].mxu1 %vm72_vm0, %v43_v17  ;;  %1615 = vmatprep.subr.bf16.mxu0 %v1614_v23 }
  0x13   :  { %1617 = vmatpush3.bf16.msra.mxu0 %v1614_v23 }
  0x16   :  { %1490 = vmatmul.mubr.msk.f32.vlgmr.msra.gmra.mrb[2].mxu0 %vm72_vm0, %v41_v14 }
  0x17   :  { %1492 = vmatprep.mubr.msk.f32.mxu0 %vm72_vm0, %v42_v15 }
  0x1a   :  { %1493 = vmatmul.mubr.msk.f32.gmra.mrb[4].mxu0 %vm72_vm0, %v43_v17 }
  0xdf   :  { %v1477_v25 = vpop.f32.mrb[0].mxu1 }
  0xe0   :  { %v244_v26 = vadd.f32 %v1477_v25, %v1335_v24  ;;  %v238_v27 = vpop.f32.mrb[1].mxu1 }
  0xe1   :  { %v239_v28 = vadd.f32 %v1335_v24, %v238_v27  ;;  %v1466_v31 = vpop.f32.mrb[0].mxu0 }
  0xe2   :  { %v145_v34 = vpop.f32.mrb[1].mxu0  ;;  %v1962_v42 = vadd.f32 %v1466_v31, %v1332_v29 }
  0xe3   :  { %v1618_v32 = vpack.c.bf16 %v244_v26, %v239_v28  ;;  %v1480_v33 = vpop.f32.mrb[2].mxu1  ;;  %v1946_v35 = vpack.i.bf16 %v244_v26, %v239_v28  ;;  %v1948_v38 = vadd.f32 %v1332_v29, %v145_v34 }
  0xe4   :  { %v254_v36 = vadd.f32 %v1480_v33, %v1335_v24  ;;  %v248_v37 = vpop.f32.mrb[3].mxu1 }
  0xe5   :  { %1620 = vmatprep.subr.msk.bf16.mxu1 %vm1942_vm2, %v1618_v32  ;;  %v249_v39 = vadd.f32 %v1335_v24, %v248_v37  ;;  %1503 = vmatprep.mubr.msk.f32.mxu1 %vm348_vm1, %v1948_v38 }
  0xe6   :  { %1623 = vmatpush3.bf16.xpose.msk.msra.mxu1 %vm1942_vm2, %v1618_v32 }
  0xe7   :  { %v1624_v40 = vpack.c.bf16 %v254_v36, %v249_v39  ;;  %v1956_v41 = vpack.i.bf16 %v254_v36, %v249_v39 }
  0xe9   :  { %1626 = vmatprep.subr.msk.bf16.mxu1 %vm1942_vm2, %v1624_v40  ;;  %v1491_v53 = vpop.f32.mrb[2].mxu0 }
  0xea   :  { %v329_v55 = vpop.f32.mrb[3].mxu0  ;;  %v1983_v56 = vadd.f32 %v1491_v53, %v1340_v54 }
  0xeb   :  { %v1985_v57 = vadd.f32 %v1340_v54, %v329_v55 }
  0xed   :  { %v1494_v58 = vpop.f32.mrb[4].mxu0  ;;  %v1630_v59 = vpack.c.bf16 %v1983_v56, %v1985_v57 }
  0xee   :  { %1629 = vmatpush3.bf16.xpose.msk.msra.mxu1 %vm1942_vm2, %v1624_v40  ;;  %v339_v60 = vpop.f32.mrb[5].mxu0  ;;  %v1989_v61 = vadd.f32 %v1494_v58, %v1340_v54 }
  0xef   :  { %v1991_v62 = vadd.f32 %v1340_v54, %v339_v60  ;;  %1631 = vmatprep.subr.bf16.mxu0 %v1630_v59  ;;  %v2041_v54 = vpack.i.bf16 %v1983_v56, %v1985_v57 }
  0xf0   :  { %1633 = vmatpush3.bf16.msra.mxu0 %v1630_v59 }
  0xf1   :  { %v1634_v63 = vpack.c.bf16 %v1989_v61, %v1991_v62  ;;  %v2027_v39 = vpack.i.bf16 %v1989_v61, %v1991_v62 }
  0xf3   :  { %1635 = vmatprep.subr.bf16.mxu0 %v1634_v63 }
  0xf4   :  { %1637 = vmatpush3.bf16.msra.mxu0 %v1634_v63 }
  0xf5   :  { %1504 = vmatmul.mubr.msk.f32.vlgmr.msra.gmra.mrb[4].mxu1 %vm348_vm1, %v1962_v42 }
 0x1c8   :  { %v1505_v43 = vpop.f32.mrb[4].mxu1 }
 0x1c9   :  { %v433_v44 = vpop.f32.mrb[5].mxu1  ;;  %v443_v46 = vmul.f32 0.35355338, %v1505_v43 }
 0x1ca   :  { %v442_v47 = vmul.f32 0.35355338, %v433_v44 }
 0x1cb   :  { %v445_v51 = vadd.f32 %v443_v46, %v1974_v48 }
 0x1cc   :  { %v444_v49 = vadd.f32 %v442_v47, %v1969_v45 }
 0x1cd   :  { %v449_v52 = vsel %vm72_vm0, %v445_v51, -inf }
 0x1ce   :  { %v446_v50 = vsel %vm72_vm0, %v444_v49, -inf }
 0x1cf   :  { %447 = vmax.xlane.f32.xlu0 %v446_v50 }
 0x1d3   :  { %450 = vmax.xlane.f32.xlu0 %v449_v52 }
 0x1e9   :  { %1713 = vrot.lane.b32.xlu0 %v1946_v35, %s1804_s7 }
 0x25c   :  { %v448_v0 = vpop.xlane.xlu0 %447 }
 0x25d   :  { %v452_v1 = vsub.f32 %v444_v49, %v448_v0 }
 0x25f   :  { %v454_v4 = vmul.f32 1.442695, %v452_v1 }
 0x260   :  { %v451_v2 = vpop.xlane.xlu0 %450 }
 0x261   :  { %v453_v3 = vsub.f32 %v445_v51, %v451_v2 }
 0x263   :  { %v456_v5 = vmul.f32 1.442695, %v453_v3 }
 0x264   :  { %v1714_v6 = vpop.permute.xlu0 %1713 }
 0x265   :  { %1772 = vpow2.f32 %v456_v5  ;;  %v1716_v7 = vunpack.i.h.bf16 %v1714_v6  ;;  %v1715_v8 = vunpack.i.l.bf16 %v1714_v6 }
 0x266   :  { %1774 = vpow2.f32 %v454_v4 }
 0x267   :  { %v1638_v9 = vpack.c.bf16 %v1716_v7, %v1715_v8 }
 0x269   :  { %1640 = vmatprep.subr.msk.bf16.mxu0 %vm1942_vm2, %v1638_v9 }
 0x26f   :  { %v1773_v10 = vpop.eup %1772 }
 0x270   :  { %v461_v11 = vsel %vm72_vm0, %v1773_v10, 0.0  ;;  %v1775_v12 = vpop.eup %1774 }
 0x271   :  { %462 = vadd.xlane.f32.xlu1 %v461_v11  ;;  %v458_v13 = vsel %vm72_vm0, %v1775_v12, 0.0 }
 0x275   :  { %459 = vadd.xlane.f32.xlu1 %v458_v13 }
 0x286   :  { %1718 = vrot.lane.b32.xlu1 %v1956_v41, %s1804_s7 }
 0x28a   :  { %549 = vrot.lane.b32.xlu1 %v1948_v38, %s1804_s7 }
 0x28e   :  { %551 = vrot.lane.b32.xlu1 %v1962_v42, %s1804_s7 }
 0x2fe   :  { %v463_v14 = vpop.xlane.xlu1 %462 }
 0x2ff   :  { %1776 = vrcp.f32 %v463_v14 }
 0x302   :  { %v460_v15 = vpop.xlane.xlu1 %459 }
 0x303   :  { %1778 = vrcp.f32 %v460_v15 }
 0x306   :  { %v1719_v16 = vpop.permute.xlu1 %1718 }
 0x307   :  { %v1721_v19 = vunpack.i.h.bf16 %v1719_v16  ;;  %v1720_v20 = vunpack.i.l.bf16 %v1719_v16 }
 0x309   :  { %v1777_v17 = vpop.eup %1776  ;;  %v1644_v23 = vpack.c.bf16 %v1721_v19, %v1720_v20 }
 0x30a   :  { %v467_v22 = vmul.f32 %v1777_v17, %v1773_v10  ;;  %v550_v24 = vpop.permute.xlu1 %549 }
 0x30d   :  { %v1779_v18 = vpop.eup %1778 }
 0x30e   :  { %v465_v21 = vmul.f32 %v1779_v18, %v1775_v12  ;;  %v552_v25 = vpop.permute.xlu1 %551 }
 0x310   :  { %1514 = vmatprep.mubr.msk.f32.mxu0 %vm72_vm0, %v465_v21 }
 0x311   :  { %1515 = vmatmul.mubr.msk.f32.vlgmr.msra.gmra.mrb[6].mxu0 %vm72_vm0, %v467_v22 }
 0x312   :  { %1643 = vmatpush3.bf16.xpose.msk.msra.mxu0 %vm1942_vm2, %v1638_v9  ;;  %1525 = vmatprep.mubr.msk.f32.mxu0 %vm348_vm1, %v550_v24 }
 0x313   :  { %1646 = vmatprep.subr.msk.bf16.mxu0 %vm1942_vm2, %v1644_v23 }
 0x31a   :  { %1649 = vmatpush3.bf16.xpose.msk.msra.mxu0 %vm1942_vm2, %v1644_v23 }
 0x321   :  { %1526 = vmatmul.mubr.msk.f32.vlgmr.msra.gmra.mrb[8].mxu0 %vm348_vm1, %v552_v25 }
 0x3e4   :  { %v2017_v26 = vpop.f32.mrb[6].mxu0 }
 0x3e5   :  { %v2019_v27 = vpop.f32.mrb[7].mxu0 }
 0x3f4   :  { %v1527_v28 = vpop.f32.mrb[8].mxu0 }
 0x3f5   :  { %v649_v29 = vmul.f32 0.35355338, %v1527_v28  ;;  %v639_v31 = vpop.f32.mrb[9].mxu0 }
 0x3f6   :  { %v648_v32 = vmul.f32 0.35355338, %v639_v31 }
 0x3f7   :  { %v651_v33 = vadd.f32 %v649_v29, %v1974_v48 }
 0x3f8   :  { %v650_v34 = vadd.f32 %v648_v32, %v1969_v45 }
 0x3f9   :  { %v655_v36 = vsel %vm72_vm0, %v651_v33, -inf }
 0x3fa   :  { %656 = vmax.xlane.f32.xlu1 %v655_v36  ;;  %v652_v37 = vsel %vm72_vm0, %v650_v34, -inf }
 0x3fb   :  { %653 = vmax.xlane.f32.xlu0 %v652_v37 }
 0x40b   :  { %1728 = vrot.lane.b32.xlu1 %v2027_v39, %s1804_s7 }
 0x40f   :  { %1733 = vrot.lane.b32.xlu1 %v1946_v35, %s1805_s10 }
 0x413   :  { %1738 = vrot.lane.b32.xlu1 %v1956_v41, %s1805_s10 }
 0x417   :  { %773 = vrot.lane.b32.xlu1 %v1962_v42, %s1805_s10 }
 0x487   :  { %v657_v40 = vpop.xlane.xlu1 %656 }
 0x488   :  { %v659_v43 = vsub.f32 %v651_v33, %v657_v40  ;;  %v654_v44 = vpop.xlane.xlu0 %653 }
 0x489   :  { %v658_v46 = vsub.f32 %v650_v34, %v654_v44 }
 0x48a   :  { %v662_v47 = vmul.f32 1.442695, %v659_v43 }
 0x48b   :  { %v660_v49 = vmul.f32 1.442695, %v658_v46  ;;  %v1729_v58 = vpop.permute.xlu1 %1728 }
 0x48c   :  { %1780 = vpow2.f32 %v662_v47  ;;  %v1731_v61 = vunpack.i.h.bf16 %v1729_v58  ;;  %v1730_v62 = vunpack.i.l.bf16 %v1729_v58 }
 0x48d   :  { %1782 = vpow2.f32 %v660_v49 }
 0x48e   :  { %v1654_v56 = vpack.c.bf16 %v1731_v61, %v1730_v62 }
 0x48f   :  { %v1734_v1 = vpop.permute.xlu1 %1733 }
 0x490   :  { %v1736_v57 = vunpack.i.h.bf16 %v1734_v1  ;;  %v1735_v3 = vunpack.i.l.bf16 %v1734_v1 }
 0x492   :  { %v1658_v7 = vpack.c.bf16 %v1736_v57, %v1735_v3 }
 0x493   :  { %v1739_v8 = vpop.permute.xlu1 %1738 }
 0x494   :  { %v1741_v11 = vunpack.i.h.bf16 %v1739_v8  ;;  %v1740_v12 = vunpack.i.l.bf16 %v1739_v8 }
 0x496   :  { %v1781_v50 = vpop.eup %1780  ;;  %v1664_v13 = vpack.c.bf16 %v1741_v11, %v1740_v12 }
 0x497   :  { %v667_v51 = vsel %vm72_vm0, %v1781_v50, 0.0  ;;  %v1783_v52 = vpop.eup %1782  ;;  %v774_v14 = vpop.permute.xlu1 %773 }
 0x498   :  { %668 = vadd.xlane.f32.xlu0 %v667_v51  ;;  %v664_v53 = vsel %vm72_vm0, %v1783_v52, 0.0 }
 0x49c   :  { %665 = vadd.xlane.f32.xlu0 %v664_v53 }
 0x4b2   :  { %1723 = vrot.lane.b32.xlu0 %v2041_v54, %s1804_s7 }
 0x4b6   :  { %771 = vrot.lane.b32.xlu0 %v1948_v38, %s1805_s10 }
 0x525   :  { %v669_v55 = vpop.xlane.xlu0 %668 }
 0x529   :  { %v666_v59 = vpop.xlane.xlu0 %665 }
 0x52a   :  { %1784 = vrcp.f32 %v666_v59 }
 0x52b   :  { %1786 = vrcp.f32 %v669_v55 }
 0x52d   :  { %v1724_v60 = vpop.permute.xlu0 %1723 }
 0x52e   :  { %v1726_v63 = vunpack.i.h.bf16 %v1724_v60  ;;  %v1725_v0 = vunpack.i.l.bf16 %v1724_v60 }
 0x530   :  { %v1650_v2 = vpack.c.bf16 %v1726_v63, %v1725_v0 }
 0x531   :  { %v772_v10 = vpop.permute.xlu0 %771 }
 0x532   :  { %1651 = vmatprep.subr.bf16.mxu1 %v1650_v2 }
 0x533   :  { %1653 = vmatpush3.bf16.msra.mxu1 %v1650_v2 }
 0x534   :  { %v1785_v4 = vpop.eup %1784  ;;  %1655 = vmatprep.subr.bf16.mxu1 %v1654_v56 }
 0x535   :  { %v1787_v5 = vpop.eup %1786  ;;  %v671_v6 = vmul.f32 %v1785_v4, %v1783_v52 }
 0x536   :  { %v673_v9 = vmul.f32 %v1787_v5, %v1781_v50 }
 0x537   :  { %1657 = vmatpush3.bf16.msra.mxu1 %v1654_v56  ;;  %1536 = vmatprep.mubr.msk.f32.mxu1 %vm72_vm0, %v671_v6 }
 0x538   :  { %1660 = vmatprep.subr.msk.bf16.mxu1 %vm1942_vm2, %v1658_v7 }
 0x53a   :  { %1537 = vmatmul.mubr.msk.f32.vlgmr.msra.gmra.mrb[6].mxu1 %vm72_vm0, %v673_v9 }
 0x53b   :  { %1547 = vmatprep.mubr.msk.f32.mxu1 %vm348_vm1, %v772_v10 }
 0x540   :  { %1663 = vmatpush3.bf16.xpose.msk.msra.mxu1 %vm1942_vm2, %v1658_v7 }
 0x541   :  { %1666 = vmatprep.subr.msk.bf16.mxu1 %vm1942_vm2, %v1664_v13 }
 0x548   :  { %1669 = vmatpush3.bf16.xpose.msk.msra.mxu1 %vm1942_vm2, %v1664_v13 }
 0x54f   :  { %1548 = vmatmul.mubr.msk.f32.vlgmr.msra.gmra.mrb[8].mxu1 %vm348_vm1, %v774_v14 }
 0x60d   :  { %v2059_v15 = vpop.f32.mrb[6].mxu1 }
 0x60e   :  { %v2061_v16 = vpop.f32.mrb[7].mxu1 }
 0x622   :  { %v1549_v17 = vpop.f32.mrb[8].mxu1 }
 0x623   :  { %v871_v18 = vmul.f32 0.35355338, %v1549_v17  ;;  %v861_v19 = vpop.f32.mrb[9].mxu1 }
 0x624   :  { %v870_v20 = vmul.f32 0.35355338, %v861_v19 }
 0x625   :  { %v873_v21 = vadd.f32 %v871_v18, %v1974_v48 }
 0x626   :  { %v872_v22 = vadd.f32 %v870_v20, %v1969_v45 }
 0x627   :  { %v877_v23 = vsel %vm72_vm0, %v873_v21, -inf }
 0x628   :  { %878 = vmax.xlane.f32.xlu1 %v877_v23  ;;  %v874_v24 = vsel %vm72_vm0, %v872_v22, -inf }
 0x629   :  { %875 = vmax.xlane.f32.xlu0 %v874_v24 }
 0x639   :  { %1748 = vrot.lane.b32.xlu1 %v2027_v39, %s1805_s10 }
 0x63d   :  { %1753 = vrot.lane.b32.xlu1 %v1946_v35, %s1806_s17 }
 0x641   :  { %1758 = vrot.lane.b32.xlu1 %v1956_v41, %s1806_s17 }
 0x645   :  { %991 = vrot.lane.b32.xlu1 %v1962_v42, %s1806_s17 }
 0x6b5   :  { %v879_v25 = vpop.xlane.xlu1 %878 }
 0x6b6   :  { %v881_v28 = vsub.f32 %v873_v21, %v879_v25  ;;  %v876_v29 = vpop.xlane.xlu0 %875 }
 0x6b7   :  { %v880_v31 = vsub.f32 %v872_v22, %v876_v29 }
 0x6b8   :  { %v884_v32 = vmul.f32 1.442695, %v881_v28 }
 0x6b9   :  { %v882_v33 = vmul.f32 1.442695, %v880_v31  ;;  %v1749_v42 = vpop.permute.xlu1 %1748 }
 0x6ba   :  { %1788 = vpow2.f32 %v884_v32  ;;  %v1751_v44 = vunpack.i.h.bf16 %v1749_v42  ;;  %v1750_v46 = vunpack.i.l.bf16 %v1749_v42 }
 0x6bb   :  { %1790 = vpow2.f32 %v882_v33 }
 0x6bc   :  { %v1674_v52 = vpack.c.bf16 %v1751_v44, %v1750_v46 }
 0x6bd   :  { %v1754_v50 = vpop.permute.xlu1 %1753 }
 0x6be   :  { %v1756_v53 = vunpack.i.h.bf16 %v1754_v50  ;;  %v1755_v55 = vunpack.i.l.bf16 %v1754_v50 }
 0x6c0   :  { %v1678_v60 = vpack.c.bf16 %v1756_v53, %v1755_v55 }
 0x6c1   :  { %v1759_v61 = vpop.permute.xlu1 %1758 }
 0x6c2   :  { %v1761_v0 = vunpack.i.h.bf16 %v1759_v61  ;;  %v1760_v1 = vunpack.i.l.bf16 %v1759_v61 }
 0x6c4   :  { %v1789_v34 = vpop.eup %1788  ;;  %v1684_v2 = vpack.c.bf16 %v1761_v0, %v1760_v1 }
 0x6c5   :  { %v889_v36 = vsel %vm72_vm0, %v1789_v34, 0.0  ;;  %v1791_v37 = vpop.eup %1790  ;;  %v992_v56 = vpop.permute.xlu1 %991 }
 0x6c6   :  { %890 = vadd.xlane.f32.xlu0 %v889_v36  ;;  %v886_v35 = vsel %vm72_vm0, %v1791_v37, 0.0  ;;  %v60_v36 = vld [vmem:[%s2145_s8 + $0x8] sm:$0xff] }
 0x6ca   :  { %887 = vadd.xlane.f32.xlu0 %v886_v35 }
 0x6e0   :  { %1743 = vrot.lane.b32.xlu0 %v2041_v54, %s1805_s10 }
 0x6e4   :  { %989 = vrot.lane.b32.xlu0 %v1948_v38, %s1806_s17 }
 0x753   :  { %v891_v41 = vpop.xlane.xlu0 %890 }
 0x757   :  { %v888_v40 = vpop.xlane.xlu0 %887 }
 0x758   :  { %1792 = vrcp.f32 %v888_v40 }
 0x759   :  { %1794 = vrcp.f32 %v891_v41  ;;  %v62_v41 = vld [vmem:[%s2145_s8 + $0x18] sm:$0xff] }
 0x75b   :  { %v1744_v43 = vpop.permute.xlu0 %1743 }
 0x75c   :  { %v1746_v47 = vunpack.i.h.bf16 %v1744_v43  ;;  %v1745_v49 = vunpack.i.l.bf16 %v1744_v43 }
 0x75e   :  { %v1670_v51 = vpack.c.bf16 %v1746_v47, %v1745_v49 }
 0x75f   :  { %v990_v63 = vpop.permute.xlu0 %989 }
 0x760   :  { %1671 = vmatprep.subr.bf16.mxu0 %v1670_v51 }
 0x761   :  { %1673 = vmatpush3.bf16.msra.mxu0 %v1670_v51 }
 0x762   :  { %v1793_v58 = vpop.eup %1792  ;;  %1675 = vmatprep.subr.bf16.mxu0 %v1674_v52 }
 0x763   :  { %v1795_v38 = vpop.eup %1794  ;;  %v893_v59 = vmul.f32 %v1793_v58, %v1791_v37  ;;  %v61_v37 = vld [vmem:[%s2145_s8 + $0x10] sm:$0xff] }
 0x764   :  { %v895_v62 = vmul.f32 %v1795_v38, %v1789_v34  ;;  %v59_v34 = vld [vmem:[%s2145_s8] sm:$0xff]  ;;  %v1702_v42 = vpack.c.bf16 %v62_v41, %v61_v37 }
 0x765   :  { %1677 = vmatpush3.bf16.msra.mxu0 %v1674_v52  ;;  %1558 = vmatprep.mubr.msk.f32.mxu0 %vm72_vm0, %v893_v59  ;;  %v1698_v35 = vpack.c.bf16 %v60_v36, %v59_v34 }
 0x766   :  { %1680 = vmatprep.subr.msk.bf16.mxu0 %vm1942_vm2, %v1678_v60 }
 0x768   :  { %1559 = vmatmul.mubr.msk.f32.vlgmr.msra.gmra.mrb[10].mxu0 %vm72_vm0, %v895_v62 }
 0x769   :  { %1569 = vmatprep.mubr.msk.f32.mxu0 %vm348_vm1, %v990_v63 }
 0x76e   :  { %1683 = vmatpush3.bf16.xpose.msk.msra.mxu0 %vm1942_vm2, %v1678_v60  ;;  %v1377_v60 = vld [vmem:[%s2146_s9] ss:$0 sm:$0xff] }
 0x76f   :  { %1686 = vmatprep.subr.msk.bf16.mxu0 %vm1942_vm2, %v1684_v2 }
 0x776   :  { %1689 = vmatpush3.bf16.xpose.msk.msra.mxu0 %vm1942_vm2, %v1684_v2 }
 0x77d   :  { %1570 = vmatmul.mubr.msk.f32.vlgmr.msra.gmra.mrb[12].mxu0 %vm348_vm1, %v992_v56 }
 0x83b   :  { %v1560_v57 = vpop.f32.mrb[10].mxu0 }
 0x83c   :  { %v980_v3 = vpop.f32.mrb[11].mxu0 }
 0x850   :  { %v1571_v4 = vpop.f32.mrb[12].mxu0 }
 0x851   :  { %v1089_v5 = vmul.f32 0.35355338, %v1571_v4  ;;  %v1079_v6 = vpop.f32.mrb[13].mxu0 }
 0x852   :  { %v1088_v7 = vmul.f32 0.35355338, %v1079_v6 }
 0x853   :  { %v1091_v8 = vadd.f32 %v1089_v5, %v1974_v48 }
 0x854   :  { %v1090_v9 = vadd.f32 %v1088_v7, %v1969_v45 }
 0x855   :  { %v1095_v10 = vsel %vm72_vm0, %v1091_v8, -inf }
 0x856   :  { %1096 = vmax.xlane.f32.xlu1 %v1095_v10  ;;  %v1092_v11 = vsel %vm72_vm0, %v1090_v9, -inf }
 0x857   :  { %1093 = vmax.xlane.f32.xlu0 %v1092_v11 }
 0x867   :  { %1768 = vrot.lane.b32.xlu1 %v2027_v39, %s1806_s17 }
 0x86b   :  { %1209 = vrot.lane.b32.xlu1 %v2061_v16, %s1807_s18 }
 0x86f   :  { %1211 = vrot.lane.b32.xlu1 %v2059_v15, %s1807_s18 }
 0x873   :  { %1219 = vrot.lane.b32.xlu1 %v1560_v57, %s1808_s19 }
 0x8e3   :  { %v1097_v30 = vpop.xlane.xlu1 %1096 }
 0x8e4   :  { %v1099_v48 = vsub.f32 %v1091_v8, %v1097_v30  ;;  %v1094_v12 = vpop.xlane.xlu0 %1093 }
 0x8e5   :  { %v1098_v45 = vsub.f32 %v1090_v9, %v1094_v12 }
 0x8e6   :  { %v1102_v13 = vmul.f32 1.442695, %v1099_v48 }
 0x8e7   :  { %v1100_v14 = vmul.f32 1.442695, %v1098_v45  ;;  %v1769_v20 = vpop.permute.xlu1 %1768 }
 0x8e8   :  { %1796 = vpow2.f32 %v1102_v13  ;;  %v1771_v22 = vunpack.i.h.bf16 %v1769_v20  ;;  %v1770_v23 = vunpack.i.l.bf16 %v1769_v20 }
 0x8e9   :  { %1798 = vpow2.f32 %v1100_v14 }
 0x8ea   :  { %v1694_v29 = vpack.c.bf16 %v1771_v22, %v1770_v23 }
 0x8eb   :  { %v1210_v44 = vpop.permute.xlu1 %1209 }
 0x8ec   :  { %v1231_v50 = vsel %vm348_vm1, %v2019_v27, %v1210_v44 }
 0x8ef   :  { %v1212_v46 = vpop.permute.xlu1 %1211 }
 0x8f0   :  { %v1232_v52 = vsel %vm348_vm1, %v2017_v26, %v1212_v46 }
 0x8f2   :  { %v1797_v17 = vpop.eup %1796 }
 0x8f3   :  { %v1107_v18 = vsel %vm72_vm0, %v1797_v17, 0.0  ;;  %v1799_v19 = vpop.eup %1798  ;;  %v1220_v47 = vpop.permute.xlu1 %1219 }
 0x8f4   :  { %1108 = vadd.xlane.f32.xlu0 %v1107_v18  ;;  %v1104_v39 = vsel %vm72_vm0, %v1799_v19, 0.0  ;;  %v1235_v58 = vsel %vm1233_vm3, %v1232_v52, %v1220_v47 }
 0x8f8   :  { %1105 = vadd.xlane.f32.xlu0 %v1104_v39 }
 0x90e   :  { %1763 = vrot.lane.b32.xlu0 %v2041_v54, %s1806_s17 }
 0x912   :  { %1217 = vrot.lane.b32.xlu0 %v980_v3, %s1808_s19 }
 0x981   :  { %v1109_v15 = vpop.xlane.xlu0 %1108 }
 0x985   :  { %v1106_v16 = vpop.xlane.xlu0 %1105 }
 0x986   :  { %1800 = vrcp.f32 %v1106_v16 }
 0x987   :  { %1802 = vrcp.f32 %v1109_v15 }
 0x989   :  { %v1764_v21 = vpop.permute.xlu0 %1763 }
 0x98a   :  { %v1766_v24 = vunpack.i.h.bf16 %v1764_v21  ;;  %v1765_v25 = vunpack.i.l.bf16 %v1764_v21 }
 0x98c   :  { %v1690_v28 = vpack.c.bf16 %v1766_v24, %v1765_v25 }
 0x98d   :  { %v1218_v49 = vpop.permute.xlu0 %1217 }
 0x98e   :  { %1691 = vmatprep.subr.bf16.mxu1 %v1690_v28  ;;  %v1234_v53 = vsel %vm1233_vm3, %v1231_v50, %v1218_v49 }
 0x98f   :  { %1693 = vmatpush3.bf16.msra.mxu1 %v1690_v28 }
 0x990   :  { %v1801_v31 = vpop.eup %1800  ;;  %1695 = vmatprep.subr.bf16.mxu1 %v1694_v29 }
 0x991   :  { %v1803_v32 = vpop.eup %1802  ;;  %v1111_v33 = vmul.f32 %v1801_v31, %v1799_v19 }
 0x992   :  { %v1113_v54 = vmul.f32 %v1803_v32, %v1797_v17 }
 0x993   :  { %1697 = vmatpush3.bf16.msra.mxu1 %v1694_v29  ;;  %1580 = vmatprep.mubr.msk.f32.mxu1 %vm72_vm0, %v1111_v33 }
 0x994   :  { %1699 = vmatprep.subr.bf16.mxu1 %v1698_v35 }
 0x996   :  { %1581 = vmatmul.mubr.msk.f32.vlgmr.msra.gmra.mrb[10].mxu1 %vm72_vm0, %v1113_v54 }
 0x997   :  { %1701 = vmatpush3.bf16.msra.mxu1 %v1698_v35 }
 0x998   :  { %1703 = vmatprep.subr.bf16.mxu1 %v1702_v42 }
 0x99b   :  { %1705 = vmatpush3.bf16.msra.mxu1 %v1702_v42 }
 0xa69   :  { %v1582_v40 = vpop.f32.mrb[10].mxu1 }
 0xa6a   :  { %1227 = vrot.lane.b32.xlu1 %v1582_v40, %s1809_s27  ;;  %v1198_v43 = vpop.f32.mrb[11].mxu1 }
 0xa6b   :  { %1225 = vrot.lane.b32.xlu0 %v1198_v43, %s1809_s27 }
 0xadc   :  { %v1228_v51 = vpop.permute.xlu1 %1227 }
 0xadd   :  { %v1226_v55 = vpop.permute.xlu0 %1225  ;;  %v1238_v59 = vsel %vm1236_vm4, %v1235_v58, %v1228_v51 }
 0xade   :  { %v1237_v38 = vsel %vm1236_vm4, %v1234_v53, %v1226_v55 }
 0xadf   :  { %1591 = vmatprep.mubr.msk.f32.mxu1 %vm72_vm0, %v1237_v38 }
 0xae0   :  { %1592 = vmatmul.mubr.msk.f32.vlgmr.msra.gmra.mrb[12].mxu1 %vm72_vm0, %v1238_v59 }
 0xbb3   :  { %v1593_v61 = vpop.f32.mrb[12].mxu1 }
 0xbb4   :  { %v1323_v62 = vadd.f32 %v1593_v61, %v1377_v60  ;;  %v1317_v27 = vpop.f32.mrb[13].mxu1 }
 0xbb5   :  { %v1318_v63 = vadd.f32 %v1377_v60, %v1317_v27 }
 0xbb6   :  { %1327 = vst.msk [vmem:[%s2147_s11 + $0x8] sm:$0xff] %vm72_vm0, %v1323_v62 }
 0xbb7   :  { %1326 = vst.msk [vmem:[%s2147_s11] sm:$0xff] %vm72_vm0, %v1318_v63 }

// kernel: transformer_tf_attn_forward.42
= control target key start
LH: loop header
LB: loop body
LE: loop exit
PB: predicated region body
PF: predicated region fallthrough
CT: control target
= control target key end

     0   :  { %vm24_vm0 = vcmask 523264   ;;  %vm164_vm1 = vcmask 261120   ;;  %s306_s0 = inlined_call_operand.vmem [shape: f32[16,64], index: 0, kind: input, shape index: {}]   ;;  %s307_s3 = inlined_call_operand.vmem [shape: f32[64,32], index: 3, kind: input, shape index: {}]   ;;  %s308_s1 = inlined_call_operand.vmem [shape: f32[1,64], index: 1, kind: input, shape index: {}]   ;;  %s309_s2 = inlined_call_operand.vmem [shape: f32[1,64], index: 2, kind: input, shape index: {}]   ;;  %s310_s4 = inlined_call_operand.vmem [shape: f32[1,32], index: 4, kind: input, shape index: {}]   ;;  %s311_s5 = inlined_call_operand.vmem [shape: f32[16,32], index: 5, kind: output, shape index: {}]  }
   0x1   :  { %v20_v0 = vld [vmem:[%s306_s0] sm:$0xff]  ;;  %v21_v1 = vld [vmem:[%s306_s0 + $0x8] sm:$0xff]  ;;  %v70_v17 = vld [vmem:[%s307_s3 + $0x10] sm:$0xff] }
   0x2   :  { %v25_v2 = vsel %vm24_vm0, %v20_v0, 0.0  ;;  %v28_v3 = vsel %vm24_vm0, %v21_v1, 0.0  ;;  %v68_v14 = vld [vmem:[%s307_s3] sm:$0xff]  ;;  %v69_v15 = vld [vmem:[%s307_s3 + $0x8] sm:$0xff]  ;;  %v71_v18 = vld [vmem:[%s307_s3 + $0x18] sm:$0xff] }
   0x3   :  { %26 = vadd.xlane.f32.xlu0 %v25_v2  ;;  %v205_v16 = vpack.c.bf16 %v69_v15, %v68_v14  ;;  %v72_v19 = vld [vmem:[%s307_s3 + $0x20] sm:$0xff]  ;;  %v209_v20 = vpack.c.bf16 %v71_v18, %v70_v17  ;;  %v73_v21 = vld [vmem:[%s307_s3 + $0x28] sm:$0xff]  ;;  %v74_v23 = vld [vmem:[%s307_s3 + $0x30] sm:$0xff] }
   0x4   :  { %v213_v22 = vpack.c.bf16 %v73_v21, %v72_v19  ;;  %v75_v24 = vld [vmem:[%s307_s3 + $0x38] sm:$0xff]  ;;  %v171_v33 = vld [vmem:[%s308_s1] ss:$0 sm:$0xff] }
   0x5   :  { %206 = vmatprep.subr.bf16.mxu0 %v205_v16  ;;  %v217_v25 = vpack.c.bf16 %v75_v24, %v74_v23  ;;  %v172_v35 = vld [vmem:[%s309_s2] ss:$0 sm:$0xff] }
   0x6   :  { %208 = vmatpush3.bf16.msra.mxu0 %v205_v16  ;;  %v173_v42 = vld [vmem:[%s310_s4] ss:$0 sm:$0xff] }
   0x7   :  { %29 = vadd.xlane.f32.xlu0 %v28_v3  ;;  %210 = vmatprep.subr.bf16.mxu0 %v209_v20 }
   0xa   :  { %212 = vmatpush3.bf16.msra.mxu0 %v209_v20 }
   0xb   :  { %214 = vmatprep.subr.bf16.mxu0 %v213_v22 }
   0xe   :  { %216 = vmatpush3.bf16.msra.mxu0 %v213_v22 }
   0xf   :  { %218 = vmatprep.subr.bf16.mxu0 %v217_v25 }
  0x12   :  { %220 = vmatpush3.bf16.msra.mxu0 %v217_v25 }
  0x90   :  { %v27_v4 = vpop.xlane.xlu0 %26 }
  0x91   :  { %v32_v5 = vmul.f32 0.015625, %v27_v4 }
  0x93   :  { %v34_v6 = vsub.f32 %v20_v0, %v32_v5 }
  0x94   :  { %v30_v7 = vpop.xlane.xlu0 %29 }
  0x95   :  { %v33_v8 = vmul.f32 0.015625, %v30_v7  ;;  %v36_v9 = vmul.f32 %v34_v6, %v34_v6 }
  0x97   :  { %v35_v10 = vsub.f32 %v21_v1, %v33_v8  ;;  %v38_v11 = vsel %vm24_vm0, %v36_v9, 0.0 }
  0x98   :  { %39 = vadd.xlane.f32.xlu1 %v38_v11 }
  0x99   :  { %v37_v12 = vmul.f32 %v35_v10, %v35_v10 }
  0x9b   :  { %v41_v13 = vsel %vm24_vm0, %v37_v12, 0.0 }
  0x9c   :  { %42 = vadd.xlane.f32.xlu1 %v41_v13 }
 0x125   :  { %v40_v26 = vpop.xlane.xlu1 %39 }
 0x126   :  { %v44_v27 = vmul.f32 0.015625, %v40_v26 }
 0x128   :  { %v46_v28 = vadd.f32 1e-05, %v44_v27 }
 0x129   :  { %v43_v29 = vpop.xlane.xlu1 %42 }
 0x12a   :  { %221 = vrsqrt.f32 %v46_v28  ;;  %v45_v30 = vmul.f32 0.015625, %v43_v29 }
 0x12c   :  { %v47_v31 = vadd.f32 1e-05, %v45_v30 }
 0x12e   :  { %223 = vrsqrt.f32 %v47_v31 }
 0x134   :  { %v222_v32 = vpop.eup %221 }
 0x135   :  { %v50_v34 = vmul.f32 %v222_v32, %v34_v6 }
 0x137   :  { %v58_v36 = vmul.f32 %v171_v33, %v50_v34 }
 0x138   :  { %v224_v37 = vpop.eup %223 }
 0x139   :  { %v51_v38 = vmul.f32 %v224_v37, %v35_v10  ;;  %v66_v39 = vadd.f32 %v172_v35, %v58_v36 }
 0x13b   :  { %v59_v40 = vmul.f32 %v171_v33, %v51_v38  ;;  %202 = vmatprep.mubr.msk.f32.mxu0 %vm24_vm0, %v66_v39 }
 0x13d   :  { %v67_v41 = vadd.f32 %v172_v35, %v59_v40 }
 0x13f   :  { %203 = vmatmul.mubr.msk.f32.vlgmr.msra.gmra.mrb[0].mxu0 %vm24_vm0, %v67_v41 }
 0x212   :  { %v204_v43 = vpop.f32.mrb[0].mxu0 }
 0x213   :  { %v161_v44 = vadd.f32 %v204_v43, %v173_v42  ;;  %v155_v45 = vpop.f32.mrb[1].mxu0 }
 0x214   :  { %v156_v46 = vadd.f32 %v173_v42, %v155_v45 }
 0x215   :  { %166 = vst.msk [vmem:[%s311_s5 + $0x8] sm:$0xff] %vm164_vm1, %v161_v44 }
 0x216   :  { %165 = vst.msk [vmem:[%s311_s5] sm:$0xff] %vm164_vm1, %v156_v46 }

// kernel: transformer_tf_attn_forward.71
= control target key start
LH: loop header
LB: loop body
LE: loop exit
PB: predicated region body
PF: predicated region fallthrough
CT: control target
= control target key end

     0   :  { %vm27_vm0 = vcmask 261120   ;;  %vm109_vm1 = vcmask 31744   ;;  %s191_s1 = inlined_call_operand.vmem [shape: f32[32,4], index: 1, kind: input, shape index: {}]   ;;  %s192_s0 = inlined_call_operand.vmem [shape: f32[16,32], index: 0, kind: input, shape index: {}]   ;;  %s193_s2 = inlined_call_operand.vmem [shape: f32[1,4], index: 2, kind: input, shape index: {}]   ;;  %s194_s3 = inlined_call_operand.vmem [shape: f32[16,4], index: 3, kind: output, shape index: {}]  }
   0x1   :  { %v16_v0 = vld [vmem:[%s191_s1] sm:$0xff]  ;;  %v17_v1 = vld [vmem:[%s191_s1 + $0x8] sm:$0xff]  ;;  %v18_v2 = vld [vmem:[%s191_s1 + $0x10] sm:$0xff] }
   0x2   :  { %v136_v3 = vpack.c.bf16 %v17_v1, %v16_v0  ;;  %v19_v4 = vld [vmem:[%s191_s1 + $0x18] sm:$0xff]  ;;  %v14_v5 = vld [vmem:[%s192_s0] sm:$0xff]  ;;  %v15_v7 = vld [vmem:[%s192_s0 + $0x8] sm:$0xff] }
   0x3   :  { %v140_v6 = vpack.c.bf16 %v19_v4, %v18_v2  ;;  %133 = vmatprep.mubr.msk.f32.mxu0 %vm27_vm0, %v14_v5  ;;  %v116_v8 = vld [vmem:[%s193_s2] ss:$0 sm:$0xff] }
   0x4   :  { %137 = vmatprep.subr.bf16.mxu0 %v136_v3 }
   0x5   :  { %139 = vmatpush3.bf16.msra.mxu0 %v136_v3 }
   0x6   :  { %141 = vmatprep.subr.bf16.mxu0 %v140_v6 }
   0x9   :  { %143 = vmatpush3.bf16.msra.mxu0 %v140_v6 }
   0xc   :  { %134 = vmatmul.mubr.msk.f32.vlgmr.msra.gmra.mrb[0].mxu0 %vm27_vm0, %v15_v7 }
  0xdf   :  { %v135_v9 = vpop.f32.mrb[0].mxu0 }
  0xe0   :  { %v106_v10 = vadd.f32 %v135_v9, %v116_v8  ;;  %v100_v11 = vpop.f32.mrb[1].mxu0 }
  0xe1   :  { %v101_v12 = vadd.f32 %v116_v8, %v100_v11 }
  0xe2   :  { %111 = vst.msk [vmem:[%s194_s3 + $0x8] sm:$0xff] %vm109_vm1, %v106_v10 }
  0xe3   :  { %110 = vst.msk [vmem:[%s194_s3] sm:$0xff] %vm109_vm1, %v101_v12 }

// kernel: transformer_tf_attn_forward.40
= control target key start
LH: loop header
LB: loop body
LE: loop exit
PB: predicated region body
PF: predicated region fallthrough
CT: control target
= control target key end

     0   :  { %vm80_vm0 = vcmask 261120   ;;  %vm346_vm1 = vcmask 64512   ;;  %s2090_s20 = smov 120   ;;  %vm458_vm3 = vcmask 130048   ;;  %s2094_s23 = smov 16   ;;  %vm1450_vm4 = vcmask 195584   ;;  %s2590_s2 = inlined_call_operand.vmem [shape: f32[32,32], index: 2, kind: input, shape index: {}]   ;;  %s2591_s4 = inlined_call_operand.vmem [shape: f32[32,32], index: 4, kind: input, shape index: {}]   ;;  %s2592_s0 = inlined_call_operand.vmem [shape: f32[32,32], index: 0, kind: input, shape index: {}]   ;;  %s2593_s1 = inlined_call_operand.vmem [shape: f32[16,32], index: 1, kind: input, shape index: {}]   ;;  %s2594_s3 = inlined_call_operand.vmem [shape: f32[1,32], index: 3, kind: input, shape index: {}]   ;;  %s2595_s5 = inlined_call_operand.vmem [shape: f32[1,32], index: 5, kind: input, shape index: {}]   ;;  %s2596_s6 = inlined_call_operand.vmem [shape: f32[32,32], index: 6, kind: input, shape index: {}]   ;;  %s2597_s10 = inlined_call_operand.vmem [shape: f32[32,16], index: 10, kind: input, shape index: {}]   ;;  %s2598_s7 = inlined_call_operand.vmem [shape: f32[1,32], index: 7, kind: input, shape index: {}]   ;;  %s2599_s8 = inlined_call_operand.vmem [shape: f32[32,32], index: 8, kind: input, shape index: {}]   ;;  %s2600_s9 = inlined_call_operand.vmem [shape: f32[1,32], index: 9, kind: input, shape index: {}]   ;;  %s2601_s11 = inlined_call_operand.vmem [shape: f32[1,32], index: 11, kind: input, shape index: {}]   ;;  %s2602_s12 = inlined_call_operand.vmem [shape: f32[1,32], index: 12, kind: input, shape index: {}]   ;;  %s2603_s13 = inlined_call_operand.vmem [shape: f32[32,32], index: 13, kind: output, shape index: {}]  }
   0x1   :  { %v50_v0 = vld [vmem:[%s2590_s2] sm:$0xff]  ;;  %v51_v1 = vld [vmem:[%s2590_s2 + $0x8] sm:$0xff]  ;;  %v52_v5 = vld [vmem:[%s2590_s2 + $0x10] sm:$0xff]  ;;  %s2095_s24 = smov 24  }
   0x2   :  { %v55_v2 = vld [vmem:[%s2591_s4] sm:$0xff]  ;;  %v1909_v3 = vpack.c.bf16 %v51_v1, %v50_v0  ;;  %v56_v4 = vld [vmem:[%s2591_s4 + $0x8] sm:$0xff]  ;;  %v53_v6 = vld [vmem:[%s2590_s2 + $0x18] sm:$0xff] }
   0x3   :  { %v1917_v7 = vpack.c.bf16 %v56_v4, %v55_v2  ;;  %v1913_v8 = vpack.c.bf16 %v53_v6, %v52_v5  ;;  %v57_v9 = vld [vmem:[%s2591_s4 + $0x10] sm:$0xff]  ;;  %v58_v10 = vld [vmem:[%s2591_s4 + $0x18] sm:$0xff]  ;;  %v44_v11 = vld [vmem:[%s2592_s0] sm:$0xff] }
   0x4   :  { %1910 = vmatprep.subr.bf16.mxu0 %v1909_v3  ;;  %v1921_v12 = vpack.c.bf16 %v58_v10, %v57_v9  ;;  %1787 = vmatprep.mubr.msk.f32.mxu0 %vm80_vm0, %v44_v11  ;;  %v48_v13 = vld [vmem:[%s2593_s1] sm:$0xff]  ;;  %v2201_v14 = vld [vmem:[%s2592_s0 + $0x8] sm:$0xff]  ;;  %v2211_v16 = vld [vmem:[%s2592_s0 + $0x10] sm:$0xff] }
   0x5   :  { %1918 = vmatprep.subr.bf16.mxu1 %v1917_v7  ;;  %1912 = vmatpush3.bf16.msra.mxu0 %v1909_v3  ;;  %v2206_v15 = vld [vmem:[%s2593_s1 + $0x8] sm:$0xff]  ;;  %v2222_v17 = vld [vmem:[%s2592_s0 + $0x18] sm:$0xff]  ;;  %v1645_v18 = vld [vmem:[%s2594_s3] ss:$0 sm:$0xff]  ;;  %s2091_s3 = smov 112  }
   0x6   :  { %1920 = vmatpush3.bf16.msra.mxu1 %v1917_v7  ;;  %1914 = vmatprep.subr.bf16.mxu0 %v1913_v8  ;;  %v1650_v19 = vld [vmem:[%s2595_s5] ss:$0 sm:$0xff]  ;;  %vm2236_vm2 = vmpackc.low %vm346_vm1, %vm346_vm1  ;;  %s2092_s5 = smov 104   ;;  %v61_v36 = vld [vmem:[%s2596_s6 + $0x8] sm:$0xff] }
   0x7   :  { %1922 = vmatprep.subr.bf16.mxu1 %v1921_v12  ;;  %1801 = vmatprep.mubr.msk.f32.mxu1 %vm80_vm0, %v48_v13  ;;  %v60_v35 = vld [vmem:[%s2596_s6] sm:$0xff]  ;;  %v62_v37 = vld [vmem:[%s2596_s6 + $0x10] sm:$0xff]  ;;  %v63_v39 = vld [vmem:[%s2596_s6 + $0x18] sm:$0xff] }
   0x8   :  { %v1925_v38 = vpack.c.bf16 %v61_v36, %v60_v35  ;;  %v1929_v40 = vpack.c.bf16 %v63_v39, %v62_v37  ;;  %v2303_v2 = vld [vmem:[%s2597_s10 + $0x8] sm:$0xff]  ;;  %v2308_v5 = vld [vmem:[%s2597_s10] sm:$0xff]  ;;  %v2319_v10 = vld [vmem:[%s2597_s10 + $0x18] sm:$0xff] }
   0x9   :  { %1916 = vmatpush3.bf16.msra.mxu0 %v1913_v8 }
   0xa   :  { %1924 = vmatpush3.bf16.msra.mxu1 %v1921_v12  ;;  %1926 = vmatprep.subr.bf16.mxu0 %v1925_v38 }
   0xc   :  { %1788 = vmatmul.mubr.msk.f32.vlgmr.msra.gmra.mrb[0].mxu0 %vm80_vm0, %v2201_v14 }
   0xd   :  { %1802 = vmatmul.mubr.msk.f32.vlgmr.msra.gmra.mrb[0].mxu1 %vm80_vm0, %v2206_v15  ;;  %1790 = vmatprep.mubr.msk.f32.mxu0 %vm80_vm0, %v2211_v16 }
   0xe   :  { %1928 = vmatpush3.bf16.msra.mxu0 %v1925_v38 }
   0xf   :  { %1930 = vmatprep.subr.bf16.mxu0 %v1929_v40 }
  0x10   :  { %1791 = vmatmul.mubr.msk.f32.gmra.mrb[2].mxu0 %vm80_vm0, %v2222_v17 }
  0x11   :  { %1812 = vmatprep.mubr.msk.f32.mxu0 %vm80_vm0, %v48_v13 }
  0x12   :  { %1932 = vmatpush3.bf16.msra.mxu0 %v1929_v40 }
  0x15   :  { %1813 = vmatmul.mubr.msk.f32.vlgmr.msra.gmra.mrb[4].mxu0 %vm80_vm0, %v2206_v15  ;;  %v2326_v15 = vld [vmem:[%s2597_s10 + $0x10] sm:$0xff] }
  0xdf   :  { %v1789_v20 = vpop.f32.mrb[0].mxu0 }
  0xe0   :  { %v165_v21 = vadd.f32 %v1789_v20, %v1645_v18  ;;  %v1803_v22 = vpop.f32.mrb[0].mxu1  ;;  %v159_v23 = vpop.f32.mrb[1].mxu0 }
  0xe1   :  { %v262_v24 = vadd.f32 %v1803_v22, %v1650_v19  ;;  %v256_v25 = vpop.f32.mrb[1].mxu1  ;;  %v160_v26 = vadd.f32 %v1645_v18, %v159_v23 }
  0xe2   :  { %v257_v27 = vadd.f32 %v1650_v19, %v256_v25  ;;  %602 = vrot.lane.b32.xlu1 %v165_v21, %s2090_s20 }
  0xe3   :  { %v1792_v29 = vpop.f32.mrb[2].mxu0  ;;  %1819 = vmatprep.mubr.msk.f32.mxu1 %vm346_vm1, %v160_v26 }
  0xe4   :  { %v1987_v30 = vpack.i.bf16 %v262_v24, %v257_v27  ;;  %v1933_v31 = vpack.c.bf16 %v262_v24, %v257_v27  ;;  %v169_v32 = vpop.f32.mrb[3].mxu0  ;;  %v175_v33 = vadd.f32 %v1792_v29, %v1645_v18 }
  0xe5   :  { %v170_v34 = vadd.f32 %v1645_v18, %v169_v32 }
  0xe6   :  { %1988 = vrot.lane.b32.xlu0 %v1987_v30, %s2090_s20  ;;  %1935 = vmatprep.subr.msk.bf16.mxu1 %vm2236_vm2, %v1933_v31 }
  0xe7   :  { %1938 = vmatpush3.bf16.xpose.msk.msra.mxu1 %vm2236_vm2, %v1933_v31  ;;  %600 = vrot.lane.b32.xlu1 %v160_v26, %s2090_s20 }
  0xea   :  { %1993 = vrot.lane.b32.xlu0 %v1987_v30, %s2091_s3 }
  0xeb   :  { %606 = vrot.lane.b32.xlu1 %v175_v33, %s2090_s20 }
  0xee   :  { %604 = vrot.lane.b32.xlu0 %v170_v34, %s2090_s20  ;;  %1820 = vmatmul.mubr.msk.f32.vlgmr.msra.gmra.mrb[2].mxu1 %vm346_vm1, %v165_v21 }
  0xef   :  { %866 = vrot.lane.b32.xlu1 %v160_v26, %s2091_s3  ;;  %1822 = vmatprep.mubr.msk.f32.mxu1 %vm346_vm1, %v170_v34 }
  0xf2   :  { %1998 = vrot.lane.b32.xlu0 %v1987_v30, %s2092_s5  ;;  %1823 = vmatmul.mubr.msk.f32.gmra.mrb[4].mxu1 %vm346_vm1, %v175_v33 }
  0xf3   :  { %870 = vrot.lane.b32.xlu1 %v170_v34, %s2091_s3 }
  0xf6   :  { %868 = vrot.lane.b32.xlu0 %v165_v21, %s2091_s3 }
  0xf7   :  { %1130 = vrot.lane.b32.xlu1 %v160_v26, %s2092_s5 }
  0xfa   :  { %872 = vrot.lane.b32.xlu0 %v175_v33, %s2091_s3 }
  0xfb   :  { %1134 = vrot.lane.b32.xlu1 %v170_v34, %s2092_s5 }
  0xfe   :  { %1132 = vrot.lane.b32.xlu0 %v165_v21, %s2092_s5 }
 0x102   :  { %1136 = vrot.lane.b32.xlu0 %v175_v33, %s2092_s5 }
 0x154   :  { %v603_v41 = vpop.permute.xlu1 %602 }
 0x158   :  { %v1989_v42 = vpop.permute.xlu0 %1988 }
 0x159   :  { %v1991_v43 = vunpack.i.h.bf16 %v1989_v42  ;;  %v1990_v44 = vunpack.i.l.bf16 %v1989_v42  ;;  %v601_v45 = vpop.permute.xlu1 %600 }
 0x15a   :  { %1839 = vmatprep.mubr.msk.f32.mxu1 %vm346_vm1, %v601_v45 }
 0x15b   :  { %v1943_v46 = vpack.c.bf16 %v1991_v43, %v1990_v44 }
 0x15c   :  { %v1994_v47 = vpop.permute.xlu0 %1993 }
 0x15d   :  { %v1996_v48 = vunpack.i.h.bf16 %v1994_v47  ;;  %v1995_v49 = vunpack.i.l.bf16 %v1994_v47  ;;  %1945 = vmatprep.subr.msk.bf16.mxu1 %vm2236_vm2, %v1943_v46  ;;  %v607_v50 = vpop.permute.xlu1 %606 }
 0x15e   :  { %1948 = vmatpush3.bf16.xpose.msk.msra.mxu1 %vm2236_vm2, %v1943_v46 }
 0x15f   :  { %v1953_v51 = vpack.c.bf16 %v1996_v48, %v1995_v49 }
 0x160   :  { %v605_v52 = vpop.permute.xlu0 %604 }
 0x161   :  { %1955 = vmatprep.subr.msk.bf16.mxu1 %vm2236_vm2, %v1953_v51  ;;  %v867_v53 = vpop.permute.xlu1 %866 }
 0x164   :  { %v1999_v54 = vpop.permute.xlu0 %1998 }
 0x165   :  { %v2001_v55 = vunpack.i.h.bf16 %v1999_v54  ;;  %v2000_v56 = vunpack.i.l.bf16 %v1999_v54  ;;  %1840 = vmatmul.mubr.msk.f32.vlgmr.msra.gmra.mrb[6].mxu1 %vm346_vm1, %v603_v41  ;;  %v871_v59 = vpop.permute.xlu1 %870 }
 0x166   :  { %1842 = vmatprep.mubr.msk.f32.mxu1 %vm346_vm1, %v605_v52  ;;  %1958 = vmatpush3.bf16.xpose.msk.msra.mxu1 %vm2236_vm2, %v1953_v51 }
 0x167   :  { %v1963_v57 = vpack.c.bf16 %v2001_v55, %v2000_v56 }
 0x168   :  { %v869_v58 = vpop.permute.xlu0 %868 }
 0x169   :  { %1843 = vmatmul.mubr.msk.f32.gmra.mrb[8].mxu1 %vm346_vm1, %v607_v50  ;;  %1965 = vmatprep.subr.msk.bf16.mxu1 %vm2236_vm2, %v1963_v57  ;;  %v1131_v61 = vpop.permute.xlu1 %1130 }
 0x16a   :  { %1859 = vmatprep.mubr.msk.f32.mxu1 %vm346_vm1, %v867_v53 }
 0x16c   :  { %v873_v60 = vpop.permute.xlu0 %872 }
 0x16d   :  { %1860 = vmatmul.mubr.msk.f32.vlgmr.msra.gmra.mrb[10].mxu1 %vm346_vm1, %v869_v58  ;;  %v1135_v63 = vpop.permute.xlu1 %1134 }
 0x16e   :  { %1862 = vmatprep.mubr.msk.f32.mxu1 %vm346_vm1, %v871_v59  ;;  %1968 = vmatpush3.bf16.xpose.msk.msra.mxu1 %vm2236_vm2, %v1963_v57 }
 0x170   :  { %v1133_v62 = vpop.permute.xlu0 %1132 }
 0x171   :  { %1863 = vmatmul.mubr.msk.f32.gmra.mrb[12].mxu1 %vm346_vm1, %v873_v60 }
 0x172   :  { %1879 = vmatprep.mubr.msk.f32.mxu1 %vm346_vm1, %v1131_v61 }
 0x174   :  { %v1137_v0 = vpop.permute.xlu0 %1136 }
 0x175   :  { %1880 = vmatmul.mubr.msk.f32.vlgmr.msra.gmra.mrb[14].mxu1 %vm346_vm1, %v1133_v62 }
 0x176   :  { %1882 = vmatprep.mubr.msk.f32.mxu1 %vm346_vm1, %v1135_v63 }
 0x179   :  { %1883 = vmatmul.mubr.msk.f32.gmra.mrb[16].mxu1 %vm346_vm1, %v1137_v0 }
 0x1c1   :  { %v1821_v1 = vpop.f32.mrb[2].mxu1 }
 0x1c2   :  { %v451_v3 = vmul.f32 0.35355338, %v1821_v1  ;;  %v431_v4 = vpop.f32.mrb[3].mxu1 }
 0x1c3   :  { %v450_v6 = vmul.f32 0.35355338, %v431_v4 }
 0x1c4   :  { %v2311_v7 = vadd.f32 %v451_v3, %v2303_v2 }
 0x1c5   :  { %v1824_v8 = vpop.f32.mrb[4].mxu1  ;;  %v2314_v9 = vadd.f32 %v450_v6, %v2308_v5 }
 0x1c6   :  { %v453_v11 = vmul.f32 0.35355338, %v1824_v8  ;;  %v441_v12 = vpop.f32.mrb[5].mxu1  ;;  %v462_v13 = vsel %vm458_vm3, %v2311_v7, -inf }
 0x1c7   :  { %v452_v18 = vmul.f32 0.35355338, %v441_v12  ;;  %463 = vmax.xlane.f32.xlu0 %v462_v13  ;;  %v459_v19 = vsel %vm458_vm3, %v2314_v9, -inf }
 0x1c8   :  { %460 = vmax.xlane.f32.xlu1 %v459_v19  ;;  %v2331_v20 = vadd.f32 %v453_v11, %v2319_v10 }
 0x1c9   :  { %v2334_v21 = vadd.f32 %v452_v18, %v2326_v15 }
 0x1ca   :  { %v468_v22 = vsel %vm458_vm3, %v2331_v20, -inf }
 0x1cb   :  { %v465_v23 = vsel %vm458_vm3, %v2334_v21, -inf }
 0x1cc   :  { %469 = vmax.xlane.f32.xlu1 %v468_v22  ;;  %466 = vmax.xlane.f32.xlu0 %v465_v23 }
 0x238   :  { %v1841_v24 = vpop.f32.mrb[6].mxu1 }
 0x239   :  { %v710_v25 = vmul.f32 0.35355338, %v1841_v24  ;;  %v690_v26 = vpop.f32.mrb[7].mxu1 }
 0x23a   :  { %v709_v27 = vmul.f32 0.35355338, %v690_v26 }
 0x23b   :  { %v2341_v28 = vadd.f32 %v710_v25, %v2303_v2 }
 0x23c   :  { %v1844_v29 = vpop.f32.mrb[8].mxu1  ;;  %v2344_v30 = vadd.f32 %v709_v27, %v2308_v5 }
 0x23d   :  { %v712_v31 = vmul.f32 0.35355338, %v1844_v29  ;;  %v700_v32 = vpop.f32.mrb[9].mxu1  ;;  %v720_v33 = vsel %vm458_vm3, %v2341_v28, -inf }
 0x23e   :  { %v711_v34 = vmul.f32 0.35355338, %v700_v32  ;;  %721 = vmax.xlane.f32.xlu1 %v720_v33  ;;  %v717_v35 = vsel %vm458_vm3, %v2344_v30, -inf  ;;  %v1814_v33 = vpop.f32.mrb[4].mxu0 }
 0x23f   :  { %718 = vmax.xlane.f32.xlu0 %v717_v35  ;;  %v2351_v36 = vadd.f32 %v712_v31, %v2319_v10  ;;  %v337_v35 = vpop.f32.mrb[5].mxu0 }
 0x240   :  { %v1861_v37 = vpop.f32.mrb[10].mxu1  ;;  %v2354_v38 = vadd.f32 %v711_v34, %v2326_v15  ;;  %v1653_v34 = vld [vmem:[%s2598_s7] ss:$0 sm:$0xff] }
 0x241   :  { %v976_v39 = vmul.f32 0.35355338, %v1861_v37  ;;  %v956_v40 = vpop.f32.mrb[11].mxu1  ;;  %v726_v41 = vsel %vm458_vm3, %v2351_v36, -inf  ;;  %v343_v37 = vadd.f32 %v1814_v33, %v1653_v34 }
 0x242   :  { %v975_v42 = vmul.f32 0.35355338, %v956_v40  ;;  %727 = vmax.xlane.f32.xlu1 %v726_v41  ;;  %v723_v43 = vsel %vm458_vm3, %v2354_v38, -inf }
 0x243   :  { %724 = vmax.xlane.f32.xlu0 %v723_v43  ;;  %v2361_v44 = vadd.f32 %v976_v39, %v2303_v2  ;;  %v338_v39 = vadd.f32 %v1653_v34, %v337_v35 }
 0x244   :  { %v1864_v45 = vpop.f32.mrb[12].mxu1  ;;  %v2364_v46 = vadd.f32 %v975_v42, %v2308_v5 }
 0x245   :  { %v978_v47 = vmul.f32 0.35355338, %v1864_v45  ;;  %v966_v48 = vpop.f32.mrb[13].mxu1  ;;  %v986_v49 = vsel %vm458_vm3, %v2361_v44, -inf  ;;  %v1939_v40 = vpack.c.bf16 %v343_v37, %v338_v39  ;;  %v2423_v41 = vpack.i.bf16 %v343_v37, %v338_v39 }
 0x246   :  { %v977_v50 = vmul.f32 0.35355338, %v966_v48  ;;  %987 = vmax.xlane.f32.xlu1 %v986_v49  ;;  %v983_v51 = vsel %vm458_vm3, %v2364_v46, -inf }
 0x247   :  { %984 = vmax.xlane.f32.xlu0 %v983_v51  ;;  %v2371_v52 = vadd.f32 %v978_v47, %v2319_v10  ;;  %1940 = vmatprep.subr.bf16.mxu0 %v1939_v40 }
 0x248   :  { %v1881_v53 = vpop.f32.mrb[14].mxu1  ;;  %v2374_v54 = vadd.f32 %v977_v50, %v2326_v15  ;;  %1942 = vmatpush3.bf16.msra.mxu0 %v1939_v40 }
 0x249   :  { %v1240_v55 = vmul.f32 0.35355338, %v1881_v53  ;;  %v1220_v56 = vpop.f32.mrb[15].mxu1  ;;  %v992_v57 = vsel %vm458_vm3, %v2371_v52, -inf }
 0x24a   :  { %v1239_v58 = vmul.f32 0.35355338, %v1220_v56  ;;  %993 = vmax.xlane.f32.xlu1 %v992_v57  ;;  %v989_v59 = vsel %vm458_vm3, %v2374_v54, -inf }
 0x24b   :  { %990 = vmax.xlane.f32.xlu0 %v989_v59  ;;  %v2381_v60 = vadd.f32 %v1240_v55, %v2303_v2 }
 0x24c   :  { %v1884_v61 = vpop.f32.mrb[16].mxu1  ;;  %v2384_v62 = vadd.f32 %v1239_v58, %v2308_v5 }
 0x24d   :  { %v1242_v63 = vmul.f32 0.35355338, %v1884_v61  ;;  %v1230_v0 = vpop.f32.mrb[17].mxu1  ;;  %v1250_v1 = vsel %vm458_vm3, %v2381_v60, -inf }
 0x24e   :  { %v1241_v3 = vmul.f32 0.35355338, %v1230_v0  ;;  %1251 = vmax.xlane.f32.xlu1 %v1250_v1  ;;  %v1247_v4 = vsel %vm458_vm3, %v2384_v62, -inf }
 0x24f   :  { %1248 = vmax.xlane.f32.xlu0 %v1247_v4  ;;  %v2391_v6 = vadd.f32 %v1242_v63, %v2319_v10 }
 0x250   :  { %v2394_v2 = vadd.f32 %v1241_v3, %v2326_v15 }
 0x251   :  { %v1256_v5 = vsel %vm458_vm3, %v2391_v6, -inf }
 0x252   :  { %1257 = vmax.xlane.f32.xlu1 %v1256_v5  ;;  %v1253_v8 = vsel %vm458_vm3, %v2394_v2, -inf }
 0x253   :  { %1254 = vmax.xlane.f32.xlu0 %v1253_v8 }
 0x254   :  { %v464_v11 = vpop.xlane.xlu0 %463 }
 0x255   :  { %v472_v12 = vsub.f32 %v2311_v7, %v464_v11  ;;  %v461_v13 = vpop.xlane.xlu1 %460 }
 0x256   :  { %v471_v18 = vsub.f32 %v2314_v9, %v461_v13 }
 0x257   :  { %v477_v19 = vmul.f32 1.442695, %v472_v12 }
 0x258   :  { %v475_v10 = vmul.f32 1.442695, %v471_v18 }
 0x259   :  { %2017 = vpow2.f32 %v477_v19  ;;  %v470_v22 = vpop.xlane.xlu1 %469  ;;  %v467_v15 = vpop.xlane.xlu0 %466 }
 0x25a   :  { %2019 = vpow2.f32 %v475_v10  ;;  %v474_v23 = vsub.f32 %v2331_v20, %v470_v22  ;;  %v473_v24 = vsub.f32 %v2334_v21, %v467_v15 }
 0x25c   :  { %v481_v25 = vmul.f32 1.442695, %v474_v23  ;;  %v479_v26 = vmul.f32 1.442695, %v473_v24 }
 0x25e   :  { %2021 = vpow2.f32 %v481_v25 }
 0x25f   :  { %2023 = vpow2.f32 %v479_v26 }
 0x263   :  { %v2404_v27 = vpop.eup %2017 }
 0x264   :  { %v2406_v7 = vpop.eup %2019  ;;  %v486_v9 = vsel %vm458_vm3, %v2404_v27, 0.0 }
 0x265   :  { %487 = vadd.xlane.f32.xlu1 %v486_v9  ;;  %v483_v29 = vsel %vm458_vm3, %v2406_v7, 0.0 }
 0x266   :  { %484 = vadd.xlane.f32.xlu0 %v483_v29 }
 0x268   :  { %v2412_v31 = vpop.eup %2021 }
 0x269   :  { %v2414_v20 = vpop.eup %2023  ;;  %v492_v21 = vsel %vm458_vm3, %v2412_v31, 0.0 }
 0x26a   :  { %493 = vadd.xlane.f32.xlu1 %v492_v21  ;;  %v489_v32 = vsel %vm458_vm3, %v2414_v20, 0.0 }
 0x26b   :  { %490 = vadd.xlane.f32.xlu0 %v489_v32 }
 0x2cb   :  { %v722_v42 = vpop.xlane.xlu1 %721 }
 0x2cc   :  { %v730_v43 = vsub.f32 %v2341_v28, %v722_v42  ;;  %v719_v45 = vpop.xlane.xlu0 %718 }
 0x2cd   :  { %v729_v47 = vsub.f32 %v2344_v30, %v719_v45 }
 0x2ce   :  { %v735_v48 = vmul.f32 1.442695, %v730_v43 }
 0x2cf   :  { %v733_v49 = vmul.f32 1.442695, %v729_v47  ;;  %v728_v50 = vpop.xlane.xlu1 %727 }
 0x2d0   :  { %2025 = vpow2.f32 %v735_v48  ;;  %v732_v51 = vsub.f32 %v2351_v36, %v728_v50  ;;  %v725_v53 = vpop.xlane.xlu0 %724 }
 0x2d1   :  { %2027 = vpow2.f32 %v733_v49  ;;  %v731_v55 = vsub.f32 %v2354_v38, %v725_v53 }
 0x2d2   :  { %v739_v56 = vmul.f32 1.442695, %v732_v51 }
 0x2d3   :  { %v737_v57 = vmul.f32 1.442695, %v731_v55  ;;  %v988_v58 = vpop.xlane.xlu1 %987 }
 0x2d4   :  { %2029 = vpow2.f32 %v739_v56  ;;  %v996_v59 = vsub.f32 %v2361_v44, %v988_v58  ;;  %v985_v28 = vpop.xlane.xlu0 %984 }
 0x2d5   :  { %2031 = vpow2.f32 %v737_v57  ;;  %v995_v30 = vsub.f32 %v2364_v46, %v985_v28 }
 0x2d6   :  { %v1001_v61 = vmul.f32 1.442695, %v996_v59 }
 0x2d7   :  { %v999_v63 = vmul.f32 1.442695, %v995_v30  ;;  %v994_v0 = vpop.xlane.xlu1 %993 }
 0x2d8   :  { %2033 = vpow2.f32 %v1001_v61  ;;  %v998_v36 = vsub.f32 %v2371_v52, %v994_v0  ;;  %v991_v1 = vpop.xlane.xlu0 %990 }
 0x2d9   :  { %2035 = vpow2.f32 %v999_v63  ;;  %v997_v38 = vsub.f32 %v2374_v54, %v991_v1 }
 0x2da   :  { %v2433_v3 = vpop.eup %2025  ;;  %v1005_v4 = vmul.f32 1.442695, %v998_v36 }
 0x2db   :  { %v2435_v5 = vpop.eup %2027  ;;  %v1003_v44 = vmul.f32 1.442695, %v997_v38  ;;  %v1252_v8 = vpop.xlane.xlu1 %1251  ;;  %v744_v46 = vsel %vm458_vm3, %v2433_v3, 0.0 }
 0x2dc   :  { %2037 = vpow2.f32 %v1005_v4  ;;  %v1260_v11 = vsub.f32 %v2381_v60, %v1252_v8  ;;  %745 = vadd.xlane.f32.xlu1 %v744_v46  ;;  %v1249_v12 = vpop.xlane.xlu0 %1248  ;;  %v741_v52 = vsel %vm458_vm3, %v2435_v5, 0.0 }
 0x2dd   :  { %2039 = vpow2.f32 %v1003_v44  ;;  %v1259_v54 = vsub.f32 %v2384_v62, %v1249_v12  ;;  %742 = vadd.xlane.f32.xlu0 %v741_v52 }
 0x2de   :  { %v2443_v13 = vpop.eup %2029  ;;  %v1265_v18 = vmul.f32 1.442695, %v1260_v11 }
 0x2df   :  { %v2445_v19 = vpop.eup %2031  ;;  %v1263_v10 = vmul.f32 1.442695, %v1259_v54  ;;  %v1258_v22 = vpop.xlane.xlu1 %1257  ;;  %v750_v15 = vsel %vm458_vm3, %v2443_v13, 0.0 }
 0x2e0   :  { %2041 = vpow2.f32 %v1265_v18  ;;  %v1262_v60 = vsub.f32 %v2391_v6, %v1258_v22  ;;  %751 = vadd.xlane.f32.xlu1 %v750_v15  ;;  %v1255_v23 = vpop.xlane.xlu0 %1254  ;;  %v747_v24 = vsel %vm458_vm3, %v2445_v19, 0.0 }
 0x2e1   :  { %2043 = vpow2.f32 %v1263_v10  ;;  %v1261_v62 = vsub.f32 %v2394_v2, %v1255_v23  ;;  %748 = vadd.xlane.f32.xlu0 %v747_v24 }
 0x2e2   :  { %v2453_v25 = vpop.eup %2033  ;;  %v1269_v26 = vmul.f32 1.442695, %v1262_v60 }
 0x2e3   :  { %v2455_v9 = vpop.eup %2035  ;;  %v1267_v29 = vmul.f32 1.442695, %v1261_v62  ;;  %v1010_v21 = vsel %vm458_vm3, %v2453_v25, 0.0 }
 0x2e4   :  { %2045 = vpow2.f32 %v1269_v26  ;;  %1011 = vadd.xlane.f32.xlu1 %v1010_v21  ;;  %v1007_v6 = vsel %vm458_vm3, %v2455_v9, 0.0 }
 0x2e5   :  { %2047 = vpow2.f32 %v1267_v29  ;;  %1008 = vadd.xlane.f32.xlu0 %v1007_v6 }
 0x2e6   :  { %v2461_v32 = vpop.eup %2037 }
 0x2e7   :  { %v2463_v2 = vpop.eup %2039  ;;  %v1016_v33 = vsel %vm458_vm3, %v2461_v32, 0.0 }
 0x2e8   :  { %1017 = vadd.xlane.f32.xlu1 %v1016_v33  ;;  %v1013_v34 = vsel %vm458_vm3, %v2463_v2, 0.0 }
 0x2e9   :  { %1014 = vadd.xlane.f32.xlu0 %v1013_v34 }
 0x2ea   :  { %v2469_v35 = vpop.eup %2041 }
 0x2eb   :  { %v2471_v37 = vpop.eup %2043  ;;  %v1274_v39 = vsel %vm458_vm3, %v2469_v35, 0.0 }
 0x2ec   :  { %1275 = vadd.xlane.f32.xlu1 %v1274_v39  ;;  %v1271_v40 = vsel %vm458_vm3, %v2471_v37, 0.0 }
 0x2ed   :  { %1272 = vadd.xlane.f32.xlu0 %v1271_v40 }
 0x2ee   :  { %v2477_v42 = vpop.eup %2045 }
 0x2ef   :  { %v2479_v43 = vpop.eup %2047  ;;  %v1280_v45 = vsel %vm458_vm3, %v2477_v42, 0.0 }
 0x2f0   :  { %1281 = vadd.xlane.f32.xlu1 %v1280_v45  ;;  %v1277_v47 = vsel %vm458_vm3, %v2479_v43, 0.0 }
 0x2f1   :  { %1278 = vadd.xlane.f32.xlu0 %v1277_v47 }
 0x2f2   :  { %v488_v48 = vpop.xlane.xlu1 %487 }
 0x2f3   :  { %2049 = vrcp.f32 %v488_v48  ;;  %v485_v49 = vpop.xlane.xlu0 %484 }
 0x2f4   :  { %2051 = vrcp.f32 %v485_v49 }
 0x2f7   :  { %v494_v50 = vpop.xlane.xlu1 %493 }
 0x2f8   :  { %2053 = vrcp.f32 %v494_v50  ;;  %v491_v51 = vpop.xlane.xlu0 %490 }
 0x2f9   :  { %2055 = vrcp.f32 %v491_v51 }
 0x2fd   :  { %v2050_v53 = vpop.eup %2049 }
 0x2fe   :  { %v2052_v55 = vpop.eup %2051  ;;  %v498_v57 = vmul.f32 %v2050_v53, %v2404_v27 }
 0x2ff   :  { %v496_v56 = vmul.f32 %v2052_v55, %v2406_v7 }
 0x301   :  { %1829 = vmatprep.mubr.msk.f32.mxu0 %vm458_vm3, %v496_v56  ;;  %2008 = vrot.lane.b32.xlu1 %v2423_v41, %s2091_s3  ;;  %v65_v56 = vld [vmem:[%s2599_s8] sm:$0xff] }
 0x302   :  { %v2054_v58 = vpop.eup %2053  ;;  %1830 = vmatmul.mubr.msk.f32.vlgmr.msra.gmra.mrb[6].mxu0 %vm458_vm3, %v498_v57 }
 0x303   :  { %v2056_v59 = vpop.eup %2055  ;;  %v502_v28 = vmul.f32 %v2054_v58, %v2412_v31  ;;  %v67_v58 = vld [vmem:[%s2599_s8 + $0x10] sm:$0xff] }
 0x304   :  { %v500_v30 = vmul.f32 %v2056_v59, %v2414_v20  ;;  %v68_v59 = vld [vmem:[%s2599_s8 + $0x18] sm:$0xff] }
 0x305   :  { %2013 = vrot.lane.b32.xlu1 %v2423_v41, %s2092_s5 }
 0x306   :  { %1832 = vmatprep.mubr.msk.f32.mxu0 %vm458_vm3, %v500_v30 }
 0x307   :  { %1833 = vmatmul.mubr.msk.f32.gmra.mrb[8].mxu0 %vm458_vm3, %v502_v28  ;;  %2003 = vrot.lane.b32.xlu0 %v2423_v41, %s2090_s20  ;;  %s2093_s20 = smov 8   ;;  %v1977_v28 = vpack.c.bf16 %v68_v59, %v67_v58 }
 0x369   :  { %v746_v27 = vpop.xlane.xlu1 %745 }
 0x36a   :  { %v743_v7 = vpop.xlane.xlu0 %742 }
 0x36b   :  { %2057 = vrcp.f32 %v743_v7 }
 0x36c   :  { %2059 = vrcp.f32 %v746_v27 }
 0x36d   :  { %v752_v61 = vpop.xlane.xlu1 %751 }
 0x36e   :  { %v749_v63 = vpop.xlane.xlu0 %748 }
 0x36f   :  { %2061 = vrcp.f32 %v749_v63 }
 0x370   :  { %2063 = vrcp.f32 %v752_v61 }
 0x371   :  { %v1012_v0 = vpop.xlane.xlu1 %1011 }
 0x372   :  { %v1009_v36 = vpop.xlane.xlu0 %1008 }
 0x373   :  { %2065 = vrcp.f32 %v1009_v36 }
 0x374   :  { %2067 = vrcp.f32 %v1012_v0 }
 0x375   :  { %v2058_v31 = vpop.eup %2057  ;;  %v1018_v1 = vpop.xlane.xlu1 %1017 }
 0x376   :  { %v1015_v20 = vpop.xlane.xlu0 %1014  ;;  %v754_v38 = vmul.f32 %v2058_v31, %v2435_v5  ;;  %v2060_v22 = vpop.eup %2059 }
 0x377   :  { %2069 = vrcp.f32 %v1015_v20  ;;  %v756_v62 = vmul.f32 %v2060_v22, %v2433_v3 }
 0x378   :  { %1849 = vmatprep.mubr.msk.f32.mxu0 %vm458_vm3, %v754_v38  ;;  %2071 = vrcp.f32 %v1018_v1 }
 0x379   :  { %v1276_v4 = vpop.xlane.xlu1 %1275  ;;  %v2062_v15 = vpop.eup %2061 }
 0x37a   :  { %v1273_v44 = vpop.xlane.xlu0 %1272  ;;  %v2064_v26 = vpop.eup %2063  ;;  %v758_v29 = vmul.f32 %v2062_v15, %v2445_v19 }
 0x37b   :  { %2073 = vrcp.f32 %v1273_v44  ;;  %v760_v33 = vmul.f32 %v2064_v26, %v2443_v13 }
 0x37c   :  { %2075 = vrcp.f32 %v1276_v4 }
 0x37d   :  { %v1282_v8 = vpop.xlane.xlu1 %1281  ;;  %v2066_v21 = vpop.eup %2065 }
 0x37e   :  { %v1279_v41 = vpop.xlane.xlu0 %1278  ;;  %v2068_v34 = vpop.eup %2067  ;;  %v1020_v3 = vmul.f32 %v2066_v21, %v2455_v9 }
 0x37f   :  { %2077 = vrcp.f32 %v1279_v41  ;;  %v1022_v19 = vmul.f32 %v2068_v34, %v2453_v25  ;;  %v1696_v34 = vld [vmem:[%s2600_s9] ss:$0 sm:$0xff] }
 0x380   :  { %2079 = vrcp.f32 %v1282_v8 }
 0x381   :  { %v2009_v46 = vpop.permute.xlu1 %2008  ;;  %v2070_v39 = vpop.eup %2069 }
 0x382   :  { %v2004_v11 = vpop.permute.xlu0 %2003  ;;  %v2011_v12 = vunpack.i.h.bf16 %v2009_v46  ;;  %v2010_v52 = vunpack.i.l.bf16 %v2009_v46  ;;  %v2072_v40 = vpop.eup %2071  ;;  %v1024_v45 = vmul.f32 %v2070_v39, %v2463_v2 }
 0x383   :  { %v2006_v54 = vunpack.i.h.bf16 %v2004_v11  ;;  %v2005_v18 = vunpack.i.l.bf16 %v2004_v11  ;;  %v1026_v13 = vmul.f32 %v2072_v40, %v2461_v32 }
 0x384   :  { %v1959_v60 = vpack.c.bf16 %v2011_v12, %v2010_v52 }
 0x385   :  { %v1949_v10 = vpack.c.bf16 %v2006_v54, %v2005_v18  ;;  %v2014_v5 = vpop.permute.xlu1 %2013  ;;  %v2074_v47 = vpop.eup %2073 }
 0x386   :  { %v2016_v23 = vunpack.i.h.bf16 %v2014_v5  ;;  %v2015_v24 = vunpack.i.l.bf16 %v2014_v5  ;;  %v2076_v9 = vpop.eup %2075  ;;  %v1284_v48 = vmul.f32 %v2074_v47, %v2471_v37 }
 0x387   :  { %1950 = vmatprep.subr.bf16.mxu0 %v1949_v10  ;;  %v1286_v25 = vmul.f32 %v2076_v9, %v2469_v35  ;;  %v66_v35 = vld [vmem:[%s2599_s8 + $0x8] sm:$0xff] }
 0x388   :  { %1952 = vmatpush3.bf16.msra.mxu0 %v1949_v10  ;;  %v1969_v6 = vpack.c.bf16 %v2016_v23, %v2015_v24 }
 0x389   :  { %1960 = vmatprep.subr.bf16.mxu0 %v1959_v60  ;;  %v2078_v49 = vpop.eup %2077 }
 0x38a   :  { %v2080_v50 = vpop.eup %2079  ;;  %v1288_v2 = vmul.f32 %v2078_v49, %v2479_v43  ;;  %v1973_v43 = vpack.c.bf16 %v66_v35, %v65_v56 }
 0x38b   :  { %1850 = vmatmul.mubr.msk.f32.vlgmr.msra.gmra.mrb[10].mxu0 %vm458_vm3, %v756_v62  ;;  %v1290_v51 = vmul.f32 %v2080_v50, %v2477_v42 }
 0x38c   :  { %1852 = vmatprep.mubr.msk.f32.mxu0 %vm458_vm3, %v758_v29  ;;  %1962 = vmatpush3.bf16.msra.mxu0 %v1959_v60 }
 0x38d   :  { %1970 = vmatprep.subr.bf16.mxu0 %v1969_v6  ;;  %1974 = vmatprep.subr.bf16.mxu1 %v1973_v43 }
 0x38e   :  { %1976 = vmatpush3.bf16.msra.mxu1 %v1973_v43 }
 0x38f   :  { %1853 = vmatmul.mubr.msk.f32.gmra.mrb[12].mxu0 %vm458_vm3, %v760_v33  ;;  %1978 = vmatprep.subr.bf16.mxu1 %v1977_v28 }
 0x390   :  { %1869 = vmatprep.mubr.msk.f32.mxu0 %vm458_vm3, %v1020_v3 }
 0x392   :  { %1980 = vmatpush3.bf16.msra.mxu1 %v1977_v28 }
 0x393   :  { %1870 = vmatmul.mubr.msk.f32.vlgmr.msra.gmra.mrb[14].mxu0 %vm458_vm3, %v1022_v19 }
 0x394   :  { %1972 = vmatpush3.bf16.msra.mxu0 %v1969_v6  ;;  %1872 = vmatprep.mubr.msk.f32.mxu0 %vm458_vm3, %v1024_v45 }
 0x397   :  { %1873 = vmatmul.mubr.msk.f32.gmra.mrb[16].mxu0 %vm458_vm3, %v1026_v13  ;;  %v2089_v13 = vld [vmem:[%s2592_s0] sm:$0xff] }
 0x398   :  { %1889 = vmatprep.mubr.msk.f32.mxu0 %vm458_vm3, %v1284_v48 }
 0x39b   :  { %1890 = vmatmul.mubr.msk.f32.vlgmr.msra.gmra.mrb[18].mxu0 %vm458_vm3, %v1286_v25 }
 0x39c   :  { %1892 = vmatprep.mubr.msk.f32.mxu0 %vm458_vm3, %v1288_v2 }
 0x39f   :  { %1893 = vmatmul.mubr.msk.f32.gmra.mrb[20].mxu0 %vm458_vm3, %v1290_v51 }
 0x3d5   :  { %v1831_v32 = vpop.f32.mrb[6].mxu0 }
 0x3d6   :  { %v581_v37 = vpop.f32.mrb[7].mxu0 }
 0x3da   :  { %v1834_v53 = vpop.f32.mrb[8].mxu0 }
 0x3db   :  { %v591_v55 = vpop.f32.mrb[9].mxu0 }
 0x45e   :  { %v1851_v57 = vpop.f32.mrb[10].mxu0 }
 0x45f   :  { %1400 = vrot.lane.b32.xlu1 %v1851_v57, %s2093_s20  ;;  %v847_v42 = vpop.f32.mrb[11].mxu0 }
 0x460   :  { %1398 = vrot.lane.b32.xlu0 %v847_v42, %s2093_s20 }
 0x462   :  { %v1854_v30 = vpop.f32.mrb[12].mxu0 }
 0x463   :  { %1404 = vrot.lane.b32.xlu1 %v1854_v30, %s2093_s20  ;;  %v857_v27 = vpop.f32.mrb[13].mxu0 }
 0x464   :  { %1402 = vrot.lane.b32.xlu0 %v857_v27, %s2093_s20 }
 0x466   :  { %v1871_v7 = vpop.f32.mrb[14].mxu0 }
 0x467   :  { %1416 = vrot.lane.b32.xlu1 %v1871_v7, %s2094_s23  ;;  %v1111_v61 = vpop.f32.mrb[15].mxu0 }
 0x468   :  { %1414 = vrot.lane.b32.xlu0 %v1111_v61, %s2094_s23 }
 0x46a   :  { %v1874_v63 = vpop.f32.mrb[16].mxu0 }
 0x46b   :  { %1420 = vrot.lane.b32.xlu1 %v1874_v63, %s2094_s23  ;;  %v1121_v0 = vpop.f32.mrb[17].mxu0 }
 0x46c   :  { %1418 = vrot.lane.b32.xlu0 %v1121_v0, %s2094_s23 }
 0x46e   :  { %v1891_v36 = vpop.f32.mrb[18].mxu0 }
 0x46f   :  { %1432 = vrot.lane.b32.xlu1 %v1891_v36, %s2095_s24  ;;  %v1375_v31 = vpop.f32.mrb[19].mxu0 }
 0x470   :  { %1430 = vrot.lane.b32.xlu0 %v1375_v31, %s2095_s24 }
 0x472   :  { %v1894_v1 = vpop.f32.mrb[20].mxu0 }
 0x473   :  { %1436 = vrot.lane.b32.xlu1 %v1894_v1, %s2095_s24  ;;  %v1385_v20 = vpop.f32.mrb[21].mxu0 }
 0x474   :  { %1434 = vrot.lane.b32.xlu0 %v1385_v20, %s2095_s24 }
 0x4d1   :  { %v1401_v38 = vpop.permute.xlu1 %1400 }
 0x4d2   :  { %v1399_v4 = vpop.permute.xlu0 %1398  ;;  %v1443_v18 = vsel %vm346_vm1, %v1831_v32, %v1401_v38 }
 0x4d3   :  { %v1442_v52 = vsel %vm346_vm1, %v581_v37, %v1399_v4 }
 0x4d5   :  { %v1405_v44 = vpop.permute.xlu1 %1404 }
 0x4d6   :  { %v1403_v8 = vpop.permute.xlu0 %1402  ;;  %v1445_v62 = vsel %vm346_vm1, %v1834_v53, %v1405_v44 }
 0x4d7   :  { %v1444_v23 = vsel %vm346_vm1, %v591_v55, %v1403_v8 }
 0x4d9   :  { %v1417_v41 = vpop.permute.xlu1 %1416 }
 0x4da   :  { %v1415_v46 = vpop.permute.xlu0 %1414  ;;  %v1447_v22 = vsel %vm458_vm3, %v1443_v18, %v1417_v41 }
 0x4db   :  { %v1446_v10 = vsel %vm458_vm3, %v1442_v52, %v1415_v46 }
 0x4dd   :  { %v1421_v11 = vpop.permute.xlu1 %1420 }
 0x4de   :  { %v1419_v12 = vpop.permute.xlu0 %1418  ;;  %v1449_v21 = vsel %vm458_vm3, %v1445_v62, %v1421_v11 }
 0x4df   :  { %v1448_v26 = vsel %vm458_vm3, %v1444_v23, %v1419_v12 }
 0x4e1   :  { %v1433_v54 = vpop.permute.xlu1 %1432 }
 0x4e2   :  { %v1431_v5 = vpop.permute.xlu0 %1430  ;;  %v1452_v60 = vsel %vm1450_vm4, %v1447_v22, %v1433_v54 }
 0x4e3   :  { %v1451_v15 = vsel %vm1450_vm4, %v1446_v10, %v1431_v5  ;;  %v1701_v10 = vld [vmem:[%s2601_s11] ss:$0 sm:$0xff] }
 0x4e4   :  { %1903 = vmatprep.mubr.msk.f32.mxu1 %vm80_vm0, %v1451_v15  ;;  %v1702_v15 = vld [vmem:[%s2602_s12] ss:$0 sm:$0xff] }
 0x4e5   :  { %1904 = vmatmul.mubr.msk.f32.vlgmr.msra.gmra.mrb[18].mxu1 %vm80_vm0, %v1452_v60  ;;  %v1437_v24 = vpop.permute.xlu1 %1436 }
 0x4e6   :  { %v1435_v29 = vpop.permute.xlu0 %1434  ;;  %v1454_v33 = vsel %vm1450_vm4, %v1449_v21, %v1437_v24 }
 0x4e7   :  { %v1453_v6 = vsel %vm1450_vm4, %v1448_v26, %v1435_v29 }
 0x4e8   :  { %1906 = vmatprep.mubr.msk.f32.mxu1 %vm80_vm0, %v1453_v6 }
 0x4e9   :  { %1907 = vmatmul.mubr.msk.f32.gmra.mrb[20].mxu1 %vm80_vm0, %v1454_v33 }
 0x5b8   :  { %v1905_v3 = vpop.f32.mrb[18].mxu1 }
 0x5b9   :  { %v1545_v39 = vadd.f32 %v1905_v3, %v1696_v34  ;;  %v1539_v19 = vpop.f32.mrb[19].mxu1 }
 0x5ba   :  { %v1540_v40 = vadd.f32 %v1696_v34, %v1539_v19 }
 0x5bb   :  { %v1559_v45 = vadd.f32 %v1545_v39, %v2201_v14 }
 0x5bc   :  { %v1908_v47 = vpop.f32.mrb[20].mxu1  ;;  %v1558_v9 = vadd.f32 %v2089_v13, %v1540_v40 }
 0x5bd   :  { %v1549_v48 = vpop.f32.mrb[21].mxu1  ;;  %v1567_v49 = vsel %vm80_vm0, %v1559_v45, 0.0  ;;  %v1555_v25 = vadd.f32 %v1908_v47, %v1696_v34 }
 0x5be   :  { %v1550_v50 = vadd.f32 %v1696_v34, %v1549_v48  ;;  %1568 = vadd.xlane.f32.xlu1 %v1567_v49  ;;  %v1564_v2 = vsel %vm80_vm0, %v1558_v9, 0.0 }
 0x5bf   :  { %1565 = vadd.xlane.f32.xlu0 %v1564_v2  ;;  %v1561_v14 = vadd.f32 %v1555_v25, %v2222_v17 }
 0x5c0   :  { %v1560_v51 = vadd.f32 %v1550_v50, %v2211_v16 }
 0x5c1   :  { %v1573_v37 = vsel %vm80_vm0, %v1561_v14, 0.0 }
 0x5c2   :  { %v1570_v32 = vsel %vm80_vm0, %v1560_v51, 0.0 }
 0x5c3   :  { %1571 = vadd.xlane.f32.xlu0 %v1570_v32 }
 0x5c7   :  { %1574 = vadd.xlane.f32.xlu0 %v1573_v37 }
 0x64b   :  { %v1569_v53 = vpop.xlane.xlu1 %1568 }
 0x64c   :  { %v1578_v55 = vmul.f32 0.03125, %v1569_v53  ;;  %v1566_v56 = vpop.xlane.xlu0 %1565 }
 0x64d   :  { %v1577_v35 = vmul.f32 0.03125, %v1566_v56 }
 0x64e   :  { %v1582_v43 = vsub.f32 %v1559_v45, %v1578_v55 }
 0x64f   :  { %v1581_v57 = vsub.f32 %v1558_v9, %v1577_v35 }
 0x650   :  { %v1572_v42 = vpop.xlane.xlu0 %1571  ;;  %v1586_v58 = vmul.f32 %v1582_v43, %v1582_v43 }
 0x651   :  { %v1579_v59 = vmul.f32 0.03125, %v1572_v42  ;;  %v1585_v28 = vmul.f32 %v1581_v57, %v1581_v57 }
 0x652   :  { %v1592_v16 = vsel %vm80_vm0, %v1586_v58, 0.0 }
 0x653   :  { %v1583_v30 = vsub.f32 %v1560_v51, %v1579_v59  ;;  %1593 = vadd.xlane.f32.xlu0 %v1592_v16  ;;  %v1589_v17 = vsel %vm80_vm0, %v1585_v28, 0.0 }
 0x654   :  { %1590 = vadd.xlane.f32.xlu1 %v1589_v17  ;;  %v1575_v27 = vpop.xlane.xlu0 %1574 }
 0x655   :  { %v1580_v7 = vmul.f32 0.03125, %v1575_v27  ;;  %v1587_v61 = vmul.f32 %v1583_v30, %v1583_v30 }
 0x657   :  { %v1584_v63 = vsub.f32 %v1561_v14, %v1580_v7  ;;  %v1595_v0 = vsel %vm80_vm0, %v1587_v61, 0.0 }
 0x658   :  { %1596 = vadd.xlane.f32.xlu1 %v1595_v0 }
 0x659   :  { %v1588_v36 = vmul.f32 %v1584_v63, %v1584_v63 }
 0x65b   :  { %v1598_v31 = vsel %vm80_vm0, %v1588_v36, 0.0 }
 0x65c   :  { %1599 = vadd.xlane.f32.xlu0 %v1598_v31 }
 0x6e0   :  { %v1594_v1 = vpop.xlane.xlu0 %1593 }
 0x6e1   :  { %v1602_v20 = vmul.f32 0.03125, %v1594_v1  ;;  %v1591_v38 = vpop.xlane.xlu1 %1590 }
 0x6e2   :  { %v1601_v4 = vmul.f32 0.03125, %v1591_v38 }
 0x6e3   :  { %v1606_v44 = vadd.f32 1e-05, %v1602_v20 }
 0x6e4   :  { %v1605_v8 = vadd.f32 1e-05, %v1601_v4 }
 0x6e5   :  { %2081 = vrsqrt.f32 %v1606_v44  ;;  %v1597_v41 = vpop.xlane.xlu1 %1596 }
 0x6e6   :  { %2083 = vrsqrt.f32 %v1605_v8  ;;  %v1603_v46 = vmul.f32 0.03125, %v1597_v41 }
 0x6e8   :  { %v1607_v11 = vadd.f32 1e-05, %v1603_v46 }
 0x6e9   :  { %v1600_v12 = vpop.xlane.xlu0 %1599 }
 0x6ea   :  { %2085 = vrsqrt.f32 %v1607_v11  ;;  %v1604_v52 = vmul.f32 0.03125, %v1600_v12 }
 0x6ec   :  { %v1608_v54 = vadd.f32 1e-05, %v1604_v52 }
 0x6ee   :  { %2087 = vrsqrt.f32 %v1608_v54 }
 0x6ef   :  { %v2082_v18 = vpop.eup %2081 }
 0x6f0   :  { %v2084_v5 = vpop.eup %2083  ;;  %v1614_v22 = vmul.f32 %v2082_v18, %v1582_v43 }
 0x6f1   :  { %v1613_v60 = vmul.f32 %v2084_v5, %v1581_v57 }
 0x6f2   :  { %v1624_v23 = vmul.f32 %v1701_v10, %v1614_v22 }
 0x6f3   :  { %v1623_v24 = vmul.f32 %v1701_v10, %v1613_v60 }
 0x6f4   :  { %v2086_v62 = vpop.eup %2085  ;;  %v1634_v26 = vadd.f32 %v1702_v15, %v1624_v23 }
 0x6f5   :  { %v1633_v29 = vadd.f32 %v1702_v15, %v1623_v24  ;;  %v1615_v21 = vmul.f32 %v2086_v62, %v1583_v30 }
 0x6f6   :  { %1638 = vst.msk [vmem:[%s2603_s13 + $0x8] sm:$0xff] %vm80_vm0, %v1634_v26 }
 0x6f7   :  { %1637 = vst.msk [vmem:[%s2603_s13] sm:$0xff] %vm80_vm0, %v1633_v29  ;;  %v1625_v6 = vmul.f32 %v1701_v10, %v1615_v21 }
 0x6f8   :  { %v2088_v33 = vpop.eup %2087 }
 0x6f9   :  { %v1635_v34 = vadd.f32 %v1702_v15, %v1625_v6  ;;  %v1616_v3 = vmul.f32 %v2088_v33, %v1584_v63 }
 0x6fb   :  { %1639 = vst.msk [vmem:[%s2603_s13 + $0x10] sm:$0xff] %vm80_vm0, %v1635_v34  ;;  %v1626_v39 = vmul.f32 %v1701_v10, %v1616_v3 }
 0x6fd   :  { %v1636_v19 = vadd.f32 %v1702_v15, %v1626_v39 }
 0x6ff   :  { %1640 = vst.msk [vmem:[%s2603_s13 + $0x18] sm:$0xff] %vm80_vm0, %v1636_v19 }

</bundles_post_ra>
